<compile_context>
chip_gen: v6e
topology: v6e:2x2x1
jax: 0.10.0
libtpu: 0.0.40
codegen_flags: <defaults>
</compile_context>

<pallas_src>
import functools
import math

import jax
import jax.numpy as jnp
from jax.experimental import pallas as pl
from jax.experimental.pallas import tpu as pltpu

_BF16 = jnp.bfloat16
_VMEM_LIMIT_BYTES = 48 * 1024 * 1024   # < v7x 64 MiB physical, > 32 MiB default
_CONV_TILE_BUDGET = 24 * 1024 * 1024   # working-set target per conv call
_POOL_TILE_BUDGET = 8 * 1024 * 1024
_MSE_TILE_BUDGET = 8 * 1024 * 1024


# -----------------------------------------------------------------------------
# Pallas kernels
# -----------------------------------------------------------------------------
def _conv3x3_kernel(x_ref, w_ref, b_ref, o_ref, *, wp, tile_h, relu):
    """3x3 conv on one flattened padded row tile (9-tap in-kernel accumulation).

    x_ref: (1, (tile_h+3)*wp, Cin) bf16  padded rows, flattened row-major
    w_ref: (9, Cin, Cout)          bf16  tap-major (dy, dx) weights (resident)
    b_ref: (1, Cout)               f32
    o_ref: (1, tile_h*wp, Cout)    bf16  cols W..W+1 of each row are garbage and
                                         are sliced off by the wrapper
    """
    mc = tile_h * wp
    cout = o_ref.shape[-1]
    # Load the tile once; do the tap shifts on an f32 copy (unaligned sublane
    # slices on unpacked f32 are the safest lowering path), cast each shifted
    # view back to bf16 so the MXU runs the fast bf16 path.
    xv = x_ref[0].astype(jnp.float32)                         # (Lt, Cin)
    acc = jnp.zeros((mc, cout), jnp.float32)
    for dy in range(3):
        for dx in range(3):
            off = dy * wp + dx                                # static shift
            xs = xv[off:off + mc, :].astype(_BF16)            # (mc, Cin)
            acc = acc + jnp.dot(xs, w_ref[dy * 3 + dx],
                                preferred_element_type=jnp.float32)
    acc = acc + b_ref[...]            # single bias broadcast per output tile
    if relu:
        acc = jnp.maximum(acc, 0.0)
    o_ref[0] = acc.astype(o_ref.dtype)


def _maxpool_kernel(x_ref, o_ref, *, c):
    # x_ref: (1, TPH, 2, Wo, 2*C) -- 2x2 windows folded into (row-pair, chan-pair)
    x = x_ref[0]
    hmax = jnp.maximum(x[:, 0], x[:, 1])                      # max over row pair
    o_ref[0] = jnp.maximum(hmax[:, :, :c], hmax[:, :, c:])    # max over col pair


def _mse_kernel(a_ref, b_ref, o_ref, acc_ref, *, inv_count):
    @pl.when(pl.program_id(0) == 0)
    def _():
        acc_ref[0] = jnp.float32(0.0)

    d = a_ref[...].astype(jnp.float32) - b_ref[...].astype(jnp.float32)
    acc_ref[0] = acc_ref[0] + jnp.sum(d * d)

    @pl.when(pl.program_id(0) == pl.num_programs(0) - 1)
    def _():
        o_ref[0, 0] = acc_ref[0] * inv_count


# -----------------------------------------------------------------------------
# Tile-size helpers (budgeted so one config fits v5e / v6e / v7x VMEM)
# -----------------------------------------------------------------------------
def _conv_tile_h(H, W, cin, cout):
    wp = W + 2
    for th in range(H, 0, -1):
        if H % th:
            continue
        in_b = 2 * (th + 3) * wp * cin * 2            # double-buffered bf16 in
        out_b = 2 * th * wp * cout * 2                # double-buffered bf16 out
        wgt = 9 * cin * cout * 2 + cout * 4
        tmp = th * wp * cout * 4 + (th + 3) * wp * cin * 4   # f32 acc + f32 copy
        if in_b + out_b + wgt + tmp <= _CONV_TILE_BUDGET:
            return th
    return 1


def _pool_tile_h(Ho, Wo, C):
    per_row = 2 * Wo * 2 * C * 2 * 2 + Wo * C * 2 * 2   # dbl-buffered in + out
    cap = max(1, _POOL_TILE_BUDGET // per_row)
    for th in range(min(Ho, cap), 0, -1):
        if Ho % th == 0:
            return th
    return 1


def _mse_row_tile(m, c):
    cap = max(8, _MSE_TILE_BUDGET // (8 * c))   # 2 arrays x dbl-buffer x bf16
    if m <= cap:
        return m
    best = 1
    for d in range(8, cap + 1, 8):
        if m % d == 0:
            best = d
    return best if best > 1 else m


# -----------------------------------------------------------------------------
# Wrappers around pallas_call
# -----------------------------------------------------------------------------
def conv3x3_same(x, w, b, relu):
    """3x3 conv, stride 1, padding 1.  x: (N,H,W,Cin) bf16, w: (3,3,Cin,Cout) f32."""
    N, H, W, Cin = x.shape
    Cout = w.shape[-1]
    wp = W + 2

    # Pad the contraction (channel) dim of the first layer to a multiple of 8.
    pad_c = (-Cin) % 8
    if pad_c:
        w = jnp.pad(w, ((0, 0), (0, 0), (0, pad_c), (0, 0)))
    cin = Cin + pad_c

    tile_h = _conv_tile_h(H, W, cin, Cout)
    ht = H // tile_h
    lt = (tile_h + 3) * wp
    mc = tile_h * wp

    # One spatial pad: 1 col each side, 1 top row, 2 bottom rows (conv halo +
    # read-guard for the garbage cols of the last output row of each tile).
    xp = jnp.pad(x, ((0, 0), (1, 2), (1, 1), (0, pad_c)))       # (N, H+3, wp, cin)
    if ht == 1:
        xt = xp
    else:
        # Duplicate the 3 halo rows per row-tile (small vs. the 9x im2col blow-up).
        xt = jnp.stack(
            [xp[:, i * tile_h:i * tile_h + tile_h + 3] for i in range(ht)],
            axis=1,
        ).reshape(N * ht, tile_h + 3, wp, cin)
    xt = xt.reshape(N * ht, lt, cin)

    wmat = w.reshape(9, cin, Cout).astype(_BF16)    # tap-major (dy, dx) weights
    bvec = b.reshape(1, Cout).astype(jnp.float32)

    flops = 2 * (N * ht) * mc * cin * Cout * 9
    bytes_accessed = (xt.size * 2 + wmat.size * 2 + bvec.size * 4
                      + N * ht * mc * Cout * 2)

    out = pl.pallas_call(
        functools.partial(_conv3x3_kernel, wp=wp, tile_h=tile_h, relu=relu),
        out_shape=jax.ShapeDtypeStruct((N * ht, mc, Cout), _BF16),
        grid_spec=pltpu.PrefetchScalarGridSpec(
            num_scalar_prefetch=0,
            grid=(N * ht,),                          # parallel row-tile axis
            in_specs=[
                pl.BlockSpec((1, lt, cin), lambda m: (m, 0, 0)),
                pl.BlockSpec((9, cin, Cout), lambda m: (0, 0, 0)),
                pl.BlockSpec((1, Cout), lambda m: (0, 0)),
            ],
            out_specs=pl.BlockSpec((1, mc, Cout), lambda m: (m, 0, 0)),
        ),
        compiler_params=pltpu.CompilerParams(
            dimension_semantics=("parallel",),
            vmem_limit_bytes=_VMEM_LIMIT_BYTES),
        cost_estimate=pl.CostEstimate(flops=flops, transcendentals=0,
                                      bytes_accessed=bytes_accessed),
    )(xt, wmat, bvec)

    # (N*ht, tile_h*wp, Cout) -> (N, H, W+2, Cout) -> drop the 2 garbage columns.
    # TODO(synk): carrying the padded-width layout between layers (and fusing the
    # pool into the conv epilogue) would remove this last per-layer copy pass.
    return out.reshape(N, H, wp, Cout)[:, :, :W, :]


def maxpool2x2(x):
    """2x2 max pool, stride 2 (floor mode).  x: (N,H,W,C) bf16."""
    N, H, W, C = x.shape
    assert H % 2 == 0 and W % 2 == 0, "maxpool2x2 expects even spatial dims"
    Ho, Wo = H // 2, W // 2
    xr = x.reshape(N, Ho, 2, Wo, 2 * C)               # free row-major reshape
    tph = _pool_tile_h(Ho, Wo, C)
    ht = Ho // tph
    return pl.pallas_call(
        functools.partial(_maxpool_kernel, c=C),
        out_shape=jax.ShapeDtypeStruct((N, Ho, Wo, C), x.dtype),
        grid_spec=pltpu.PrefetchScalarGridSpec(
            num_scalar_prefetch=0,
            grid=(N, ht),
            in_specs=[pl.BlockSpec((1, tph, 2, Wo, 2 * C),
                                   lambda n, h: (n, h, 0, 0, 0))],
            out_specs=pl.BlockSpec((1, tph, Wo, C), lambda n, h: (n, h, 0, 0)),
        ),
        compiler_params=pltpu.CompilerParams(
            dimension_semantics=("parallel", "parallel"),
            vmem_limit_bytes=_VMEM_LIMIT_BYTES),
    )(xr)


def mse_loss(a, b, reduction="mean"):
    """Streaming MSE between two equal-shaped feature tensors (f32 accumulation)."""
    C = a.shape[-1]
    a2 = a.reshape(-1, C)
    b2 = b.reshape(-1, C)
    M = a2.shape[0]
    if reduction == "mean":
        inv = 1.0 / float(M * C)
    elif reduction == "sum":
        inv = 1.0
    else:
        # TODO(synk): reduction='none' (per-element loss tensor) not implemented.
        raise NotImplementedError(reduction)
    tile_r = _mse_row_tile(M, C)
    nblk = M // tile_r
    out = pl.pallas_call(
        functools.partial(_mse_kernel, inv_count=inv),
        out_shape=jax.ShapeDtypeStruct((1, 1), jnp.float32),
        grid_spec=pltpu.PrefetchScalarGridSpec(
            num_scalar_prefetch=0,
            grid=(nblk,),
            in_specs=[pl.BlockSpec((tile_r, C), lambda i: (i, 0)),
                      pl.BlockSpec((tile_r, C), lambda i: (i, 0))],
            out_specs=pl.BlockSpec(memory_space=pltpu.MemorySpace.SMEM),
            scratch_shapes=[pltpu.SMEM((1,), jnp.float32)],
        ),
        compiler_params=pltpu.CompilerParams(
            dimension_semantics=("arbitrary",),      # sequential accumulation
            vmem_limit_bytes=_VMEM_LIMIT_BYTES),
        cost_estimate=pl.CostEstimate(flops=3 * M * C, transcendentals=0,
                                      bytes_accessed=4 * M * C + 4),
    )(a2, b2)
    # TODO(synk): v7x dual-TensorCore partial sums (parallel outer axis) not done.
    return out[0, 0]


# -----------------------------------------------------------------------------
# VGG16 features[:13]  (conv/relu x2, pool, conv/relu x2, pool, conv/relu, conv)
# -----------------------------------------------------------------------------
VGG16_CFG = [
    (3, 64, True), (64, 64, True), "pool",
    (64, 128, True), (128, 128, True), "pool",
    (128, 256, True), (256, 256, False),   # index 12 is the last conv, no ReLU
]


def init_vgg16_params(key):
    params = []
    for item in VGG16_CFG:
        if item == "pool":
            continue
        cin, cout, _ = item
        key, kw, kb = jax.random.split(key, 3)
        w = jax.random.normal(kw, (3, 3, cin, cout), jnp.float32) * (
            1.0 / math.sqrt(9.0 * cin))
        b = jax.random.normal(kb, (cout,), jnp.float32) * 0.01
        params.append((w, b))
    return params


def vgg16_features(x_nhwc, params):
    x = x_nhwc.astype(_BF16)      # bf16 inter-layer activations (f32 accumulation)
    pi = 0
    for item in VGG16_CFG:
        if item == "pool":
            x = maxpool2x2(x)
        else:
            _, _, relu = item
            w, b = params[pi]
            pi += 1
            x = conv3x3_same(x, w, b, relu)
    return x


# -----------------------------------------------------------------------------
# VGGLoss forward
# -----------------------------------------------------------------------------
def _reshape_into_rgb(x_nchw):
    # torch.cat(torch.chunk(x, C//3, dim=1), dim=0)
    B, C, H, W = x_nchw.shape
    k = C // 3
    return (x_nchw.reshape(B, k, 3, H, W)
            .transpose(1, 0, 2, 3, 4)
            .reshape(B * k, 3, H, W))


def vgg_loss(inp_nchw, tgt_nchw, params, reduction="mean"):
    inp = _reshape_into_rgb(inp_nchw)
    tgt = _reshape_into_rgb(tgt_nchw)
    sep = inp.shape[0]
    batch = jnp.concatenate([inp, tgt], axis=0)          # (2*sep, 3, H, W)
    batch = jnp.transpose(batch, (0, 2, 3, 1))           # NCHW -> NHWC
    feats = vgg16_features(batch, params)
    return mse_loss(feats[:sep], feats[sep:], reduction)


if __name__ == "__main__":
    key = jax.random.PRNGKey(0)
    kx, ky = jax.random.split(key)
    # small shapes: batch=2, channels=6 (multiple of 3), spatial=16
    x = jax.random.normal(kx, (2, 6, 16, 16), jnp.float32)
    y = jax.random.normal(ky, (2, 6, 16, 16), jnp.float32)

    params = init_vgg16_params(jax.random.PRNGKey(42))

    loss_fn = jax.jit(functools.partial(vgg_loss, reduction="mean"))
    loss = loss_fn(x, y, params)
    jax.block_until_ready(loss)
    assert loss.shape == () and bool(jnp.isfinite(loss))
    print("KERNEL_OK")
</pallas_src>

<mosaic_0001>
module attributes {stable_mosaic.version = 11 : i64} {
  func.func @_conv3x3_kernel(%arg0: i32, %arg1: memref<1x342x8xbf16, #tpu.memory_space<vmem>>, %arg2: memref<9x8x64xbf16, #tpu.memory_space<vmem>>, %arg3: memref<1x64xf32, #tpu.memory_space<vmem>>, %arg4: memref<1x288x64xbf16, #tpu.memory_space<vmem>>) attributes {dimension_semantics = [#tpu.dimension_semantics<parallel>], iteration_bounds = array<i64: 8>, scalar_prefetch = 0 : i64, scratch_operands = 0 : i64, tpu.core_type = #tpu.core_type<tc>, window_params = [{transform_indices = @transform_0, window_bounds = array<i64: 1, 342, 8>}, {pipeline_mode = #tpu.pipeline_mode<synchronous>, transform_indices = @transform_1, window_bounds = array<i64: 9, 8, 64>}, {pipeline_mode = #tpu.pipeline_mode<synchronous>, transform_indices = @transform_2, window_bounds = array<i64: 1, 64>}, {transform_indices = @transform_3, window_bounds = array<i64: 1, 288, 64>}]} {
    %c0 = arith.constant 0 : index
    %c0_0 = arith.constant 0 : index
    %c0_1 = arith.constant 0 : index
    %0 = vector.load %arg1[%c0, %c0_0, %c0_1] : memref<1x342x8xbf16, #tpu.memory_space<vmem>>, vector<1x342x8xbf16>
    %1 = vector.shape_cast %0 : vector<1x342x8xbf16> to vector<342x8xbf16>
    %2 = arith.extf %1 : vector<342x8xbf16> to vector<342x8xf32>
    %cst = arith.constant 0.000000e+00 : f32
    %3 = vector.broadcast %cst : f32 to vector<288x64xf32>
    %4 = vector.extract_strided_slice %2 {offsets = [0, 0], sizes = [288, 8], strides = [1, 1]} : vector<342x8xf32> to vector<288x8xf32>
    %5 = arith.truncf %4 : vector<288x8xf32> to vector<288x8xbf16>
    %c0_2 = arith.constant 0 : index
    %c0_3 = arith.constant 0 : index
    %c0_4 = arith.constant 0 : index
    %6 = vector.load %arg2[%c0_2, %c0_3, %c0_4] : memref<9x8x64xbf16, #tpu.memory_space<vmem>>, vector<1x8x64xbf16>
    %7 = vector.shape_cast %6 : vector<1x8x64xbf16> to vector<8x64xbf16>
    %cst_5 = arith.constant dense<0.000000e+00> : vector<288x64xf32>
    %8 = tpu.matmul %5, %7, %cst_5 {dimension_numbers = #tpu.dot_dimension_numbers<[1], [0], [0], [1], [0, 0, 1, 1], [], []>} : vector<288x8xbf16>, vector<8x64xbf16>, vector<288x64xf32> -> vector<288x64xf32>
    %9 = arith.addf %3, %8 : vector<288x64xf32>
    %10 = vector.extract_strided_slice %2 {offsets = [1, 0], sizes = [288, 8], strides = [1, 1]} : vector<342x8xf32> to vector<288x8xf32>
    %11 = arith.truncf %10 : vector<288x8xf32> to vector<288x8xbf16>
    %c1 = arith.constant 1 : index
    %c0_6 = arith.constant 0 : index
    %c0_7 = arith.constant 0 : index
    %12 = vector.load %arg2[%c1, %c0_6, %c0_7] : memref<9x8x64xbf16, #tpu.memory_space<vmem>>, vector<1x8x64xbf16>
    %13 = vector.shape_cast %12 : vector<1x8x64xbf16> to vector<8x64xbf16>
    %cst_8 = arith.constant dense<0.000000e+00> : vector<288x64xf32>
    %14 = tpu.matmul %11, %13, %cst_8 {dimension_numbers = #tpu.dot_dimension_numbers<[1], [0], [0], [1], [0, 0, 1, 1], [], []>} : vector<288x8xbf16>, vector<8x64xbf16>, vector<288x64xf32> -> vector<288x64xf32>
    %15 = arith.addf %9, %14 : vector<288x64xf32>
    %16 = vector.extract_strided_slice %2 {offsets = [2, 0], sizes = [288, 8], strides = [1, 1]} : vector<342x8xf32> to vector<288x8xf32>
    %17 = arith.truncf %16 : vector<288x8xf32> to vector<288x8xbf16>
    %c2 = arith.constant 2 : index
    %c0_9 = arith.constant 0 : index
    %c0_10 = arith.constant 0 : index
    %18 = vector.load %arg2[%c2, %c0_9, %c0_10] : memref<9x8x64xbf16, #tpu.memory_space<vmem>>, vector<1x8x64xbf16>
    %19 = vector.shape_cast %18 : vector<1x8x64xbf16> to vector<8x64xbf16>
    %cst_11 = arith.constant dense<0.000000e+00> : vector<288x64xf32>
    %20 = tpu.matmul %17, %19, %cst_11 {dimension_numbers = #tpu.dot_dimension_numbers<[1], [0], [0], [1], [0, 0, 1, 1], [], []>} : vector<288x8xbf16>, vector<8x64xbf16>, vector<288x64xf32> -> vector<288x64xf32>
    %21 = arith.addf %15, %20 : vector<288x64xf32>
    %22 = vector.extract_strided_slice %2 {offsets = [18, 0], sizes = [288, 8], strides = [1, 1]} : vector<342x8xf32> to vector<288x8xf32>
    %23 = arith.truncf %22 : vector<288x8xf32> to vector<288x8xbf16>
    %c3 = arith.constant 3 : index
    %c0_12 = arith.constant 0 : index
    %c0_13 = arith.constant 0 : index
    %24 = vector.load %arg2[%c3, %c0_12, %c0_13] : memref<9x8x64xbf16, #tpu.memory_space<vmem>>, vector<1x8x64xbf16>
    %25 = vector.shape_cast %24 : vector<1x8x64xbf16> to vector<8x64xbf16>
    %cst_14 = arith.constant dense<0.000000e+00> : vector<288x64xf32>
    %26 = tpu.matmul %23, %25, %cst_14 {dimension_numbers = #tpu.dot_dimension_numbers<[1], [0], [0], [1], [0, 0, 1, 1], [], []>} : vector<288x8xbf16>, vector<8x64xbf16>, vector<288x64xf32> -> vector<288x64xf32>
    %27 = arith.addf %21, %26 : vector<288x64xf32>
    %28 = vector.extract_strided_slice %2 {offsets = [19, 0], sizes = [288, 8], strides = [1, 1]} : vector<342x8xf32> to vector<288x8xf32>
    %29 = arith.truncf %28 : vector<288x8xf32> to vector<288x8xbf16>
    %c4 = arith.constant 4 : index
    %c0_15 = arith.constant 0 : index
    %c0_16 = arith.constant 0 : index
    %30 = vector.load %arg2[%c4, %c0_15, %c0_16] : memref<9x8x64xbf16, #tpu.memory_space<vmem>>, vector<1x8x64xbf16>
    %31 = vector.shape_cast %30 : vector<1x8x64xbf16> to vector<8x64xbf16>
    %cst_17 = arith.constant dense<0.000000e+00> : vector<288x64xf32>
    %32 = tpu.matmul %29, %31, %cst_17 {dimension_numbers = #tpu.dot_dimension_numbers<[1], [0], [0], [1], [0, 0, 1, 1], [], []>} : vector<288x8xbf16>, vector<8x64xbf16>, vector<288x64xf32> -> vector<288x64xf32>
    %33 = arith.addf %27, %32 : vector<288x64xf32>
    %34 = vector.extract_strided_slice %2 {offsets = [20, 0], sizes = [288, 8], strides = [1, 1]} : vector<342x8xf32> to vector<288x8xf32>
    %35 = arith.truncf %34 : vector<288x8xf32> to vector<288x8xbf16>
    %c5 = arith.constant 5 : index
    %c0_18 = arith.constant 0 : index
    %c0_19 = arith.constant 0 : index
    %36 = vector.load %arg2[%c5, %c0_18, %c0_19] : memref<9x8x64xbf16, #tpu.memory_space<vmem>>, vector<1x8x64xbf16>
    %37 = vector.shape_cast %36 : vector<1x8x64xbf16> to vector<8x64xbf16>
    %cst_20 = arith.constant dense<0.000000e+00> : vector<288x64xf32>
    %38 = tpu.matmul %35, %37, %cst_20 {dimension_numbers = #tpu.dot_dimension_numbers<[1], [0], [0], [1], [0, 0, 1, 1], [], []>} : vector<288x8xbf16>, vector<8x64xbf16>, vector<288x64xf32> -> vector<288x64xf32>
    %39 = arith.addf %33, %38 : vector<288x64xf32>
    %40 = vector.extract_strided_slice %2 {offsets = [36, 0], sizes = [288, 8], strides = [1, 1]} : vector<342x8xf32> to vector<288x8xf32>
    %41 = arith.truncf %40 : vector<288x8xf32> to vector<288x8xbf16>
    %c6 = arith.constant 6 : index
    %c0_21 = arith.constant 0 : index
    %c0_22 = arith.constant 0 : index
    %42 = vector.load %arg2[%c6, %c0_21, %c0_22] : memref<9x8x64xbf16, #tpu.memory_space<vmem>>, vector<1x8x64xbf16>
    %43 = vector.shape_cast %42 : vector<1x8x64xbf16> to vector<8x64xbf16>
    %cst_23 = arith.constant dense<0.000000e+00> : vector<288x64xf32>
    %44 = tpu.matmul %41, %43, %cst_23 {dimension_numbers = #tpu.dot_dimension_numbers<[1], [0], [0], [1], [0, 0, 1, 1], [], []>} : vector<288x8xbf16>, vector<8x64xbf16>, vector<288x64xf32> -> vector<288x64xf32>
    %45 = arith.addf %39, %44 : vector<288x64xf32>
    %46 = vector.extract_strided_slice %2 {offsets = [37, 0], sizes = [288, 8], strides = [1, 1]} : vector<342x8xf32> to vector<288x8xf32>
    %47 = arith.truncf %46 : vector<288x8xf32> to vector<288x8xbf16>
    %c7 = arith.constant 7 : index
    %c0_24 = arith.constant 0 : index
    %c0_25 = arith.constant 0 : index
    %48 = vector.load %arg2[%c7, %c0_24, %c0_25] : memref<9x8x64xbf16, #tpu.memory_space<vmem>>, vector<1x8x64xbf16>
    %49 = vector.shape_cast %48 : vector<1x8x64xbf16> to vector<8x64xbf16>
    %cst_26 = arith.constant dense<0.000000e+00> : vector<288x64xf32>
    %50 = tpu.matmul %47, %49, %cst_26 {dimension_numbers = #tpu.dot_dimension_numbers<[1], [0], [0], [1], [0, 0, 1, 1], [], []>} : vector<288x8xbf16>, vector<8x64xbf16>, vector<288x64xf32> -> vector<288x64xf32>
    %51 = arith.addf %45, %50 : vector<288x64xf32>
    %52 = vector.extract_strided_slice %2 {offsets = [38, 0], sizes = [288, 8], strides = [1, 1]} : vector<342x8xf32> to vector<288x8xf32>
    %53 = arith.truncf %52 : vector<288x8xf32> to vector<288x8xbf16>
    %c8 = arith.constant 8 : index
    %c0_27 = arith.constant 0 : index
    %c0_28 = arith.constant 0 : index
    %54 = vector.load %arg2[%c8, %c0_27, %c0_28] : memref<9x8x64xbf16, #tpu.memory_space<vmem>>, vector<1x8x64xbf16>
    %55 = vector.shape_cast %54 : vector<1x8x64xbf16> to vector<8x64xbf16>
    %cst_29 = arith.constant dense<0.000000e+00> : vector<288x64xf32>
    %56 = tpu.matmul %53, %55, %cst_29 {dimension_numbers = #tpu.dot_dimension_numbers<[1], [0], [0], [1], [0, 0, 1, 1], [], []>} : vector<288x8xbf16>, vector<8x64xbf16>, vector<288x64xf32> -> vector<288x64xf32>
    %57 = arith.addf %51, %56 : vector<288x64xf32>
    %c0_30 = arith.constant 0 : index
    %c0_31 = arith.constant 0 : index
    %58 = vector.load %arg3[%c0_30, %c0_31] : memref<1x64xf32, #tpu.memory_space<vmem>>, vector<1x64xf32>
    %59 = vector.broadcast %58 : vector<1x64xf32> to vector<288x64xf32>
    %60 = arith.addf %57, %59 : vector<288x64xf32>
    %cst_32 = arith.constant 0.000000e+00 : f32
    %61 = vector.broadcast %cst_32 : f32 to vector<288x64xf32>
    %62 = arith.maximumf %60, %61 : vector<288x64xf32>
    %63 = arith.truncf %62 : vector<288x64xf32> to vector<288x64xbf16>
    %c0_33 = arith.constant 0 : index
    %c0_34 = arith.constant 0 : index
    %c0_35 = arith.constant 0 : index
    %64 = vector.load %arg4[%c0_33, %c0_34, %c0_35] : memref<1x288x64xbf16, #tpu.memory_space<vmem>>, vector<1x288x64xbf16>
    %65 = vector.shape_cast %64 : vector<1x288x64xbf16> to vector<288x64xbf16>
    %66 = vector.shape_cast %63 : vector<288x64xbf16> to vector<1x288x64xbf16>
    tpu.vector_store %arg4[%c0_33, %c0_34, %c0_35], %66 {strides = array<i32>} : memref<1x288x64xbf16, #tpu.memory_space<vmem>>, vector<1x288x64xbf16>,
    return
  }
  func.func @transform_0(%arg0: i32) -> (i32, i32, i32) {
    %c0_i32 = arith.constant 0 : i32
    %c0_i32_0 = arith.constant 0 : i32
    %c0_i32_1 = arith.constant 0 : i32
    return %arg0, %c0_i32, %c0_i32_0 : i32, i32, i32
  }
  func.func @transform_1(%arg0: i32) -> (i32, i32, i32) {
    %c0_i32 = arith.constant 0 : i32
    %c0_i32_0 = arith.constant 0 : i32
    %c0_i32_1 = arith.constant 0 : i32
    %c0_i32_2 = arith.constant 0 : i32
    return %c0_i32, %c0_i32_0, %c0_i32_1 : i32, i32, i32
  }
  func.func @transform_2(%arg0: i32) -> (i32, i32) {
    %c0_i32 = arith.constant 0 : i32
    %c0_i32_0 = arith.constant 0 : i32
    %c0_i32_1 = arith.constant 0 : i32
    return %c0_i32, %c0_i32_0 : i32, i32
  }
  func.func @transform_3(%arg0: i32) -> (i32, i32, i32) {
    %c0_i32 = arith.constant 0 : i32
    %c0_i32_0 = arith.constant 0 : i32
    %c0_i32_1 = arith.constant 0 : i32
    return %arg0, %c0_i32, %c0_i32_0 : i32, i32, i32
  }
}

module attributes {stable_mosaic.version = 11 : i64} {
  func.func @_conv3x3_kernel(%arg0: i32, %arg1: memref<1x342x64xbf16, #tpu.memory_space<vmem>>, %arg2: memref<9x64x64xbf16, #tpu.memory_space<vmem>>, %arg3: memref<1x64xf32, #tpu.memory_space<vmem>>, %arg4: memref<1x288x64xbf16, #tpu.memory_space<vmem>>) attributes {dimension_semantics = [#tpu.dimension_semantics<parallel>], iteration_bounds = array<i64: 8>, scalar_prefetch = 0 : i64, scratch_operands = 0 : i64, tpu.core_type = #tpu.core_type<tc>, window_params = [{transform_indices = @transform_0, window_bounds = array<i64: 1, 342, 64>}, {pipeline_mode = #tpu.pipeline_mode<synchronous>, transform_indices = @transform_1, window_bounds = array<i64: 9, 64, 64>}, {pipeline_mode = #tpu.pipeline_mode<synchronous>, transform_indices = @transform_2, window_bounds = array<i64: 1, 64>}, {transform_indices = @transform_3, window_bounds = array<i64: 1, 288, 64>}]} {
    %c0 = arith.constant 0 : index
    %c0_0 = arith.constant 0 : index
    %c0_1 = arith.constant 0 : index
    %0 = vector.load %arg1[%c0, %c0_0, %c0_1] : memref<1x342x64xbf16, #tpu.memory_space<vmem>>, vector<1x342x64xbf16>
    %1 = vector.shape_cast %0 : vector<1x342x64xbf16> to vector<342x64xbf16>
    %2 = arith.extf %1 : vector<342x64xbf16> to vector<342x64xf32>
    %cst = arith.constant 0.000000e+00 : f32
    %3 = vector.broadcast %cst : f32 to vector<288x64xf32>
    %4 = vector.extract_strided_slice %2 {offsets = [0, 0], sizes = [288, 64], strides = [1, 1]} : vector<342x64xf32> to vector<288x64xf32>
    %5 = arith.truncf %4 : vector<288x64xf32> to vector<288x64xbf16>
    %c0_2 = arith.constant 0 : index
    %c0_3 = arith.constant 0 : index
    %c0_4 = arith.constant 0 : index
    %6 = vector.load %arg2[%c0_2, %c0_3, %c0_4] : memref<9x64x64xbf16, #tpu.memory_space<vmem>>, vector<1x64x64xbf16>
    %7 = vector.shape_cast %6 : vector<1x64x64xbf16> to vector<64x64xbf16>
    %cst_5 = arith.constant dense<0.000000e+00> : vector<288x64xf32>
    %8 = tpu.matmul %5, %7, %cst_5 {dimension_numbers = #tpu.dot_dimension_numbers<[1], [0], [0], [1], [0, 0, 1, 1], [], []>} : vector<288x64xbf16>, vector<64x64xbf16>, vector<288x64xf32> -> vector<288x64xf32>
    %9 = arith.addf %3, %8 : vector<288x64xf32>
    %10 = vector.extract_strided_slice %2 {offsets = [1, 0], sizes = [288, 64], strides = [1, 1]} : vector<342x64xf32> to vector<288x64xf32>
    %11 = arith.truncf %10 : vector<288x64xf32> to vector<288x64xbf16>
    %c1 = arith.constant 1 : index
    %c0_6 = arith.constant 0 : index
    %c0_7 = arith.constant 0 : index
    %12 = vector.load %arg2[%c1, %c0_6, %c0_7] : memref<9x64x64xbf16, #tpu.memory_space<vmem>>, vector<1x64x64xbf16>
    %13 = vector.shape_cast %12 : vector<1x64x64xbf16> to vector<64x64xbf16>
    %cst_8 = arith.constant dense<0.000000e+00> : vector<288x64xf32>
    %14 = tpu.matmul %11, %13, %cst_8 {dimension_numbers = #tpu.dot_dimension_numbers<[1], [0], [0], [1], [0, 0, 1, 1], [], []>} : vector<288x64xbf16>, vector<64x64xbf16>, vector<288x64xf32> -> vector<288x64xf32>
    %15 = arith.addf %9, %14 : vector<288x64xf32>
    %16 = vector.extract_strided_slice %2 {offsets = [2, 0], sizes = [288, 64], strides = [1, 1]} : vector<342x64xf32> to vector<288x64xf32>
    %17 = arith.truncf %16 : vector<288x64xf32> to vector<288x64xbf16>
    %c2 = arith.constant 2 : index
    %c0_9 = arith.constant 0 : index
    %c0_10 = arith.constant 0 : index
    %18 = vector.load %arg2[%c2, %c0_9, %c0_10] : memref<9x64x64xbf16, #tpu.memory_space<vmem>>, vector<1x64x64xbf16>
    %19 = vector.shape_cast %18 : vector<1x64x64xbf16> to vector<64x64xbf16>
    %cst_11 = arith.constant dense<0.000000e+00> : vector<288x64xf32>
    %20 = tpu.matmul %17, %19, %cst_11 {dimension_numbers = #tpu.dot_dimension_numbers<[1], [0], [0], [1], [0, 0, 1, 1], [], []>} : vector<288x64xbf16>, vector<64x64xbf16>, vector<288x64xf32> -> vector<288x64xf32>
    %21 = arith.addf %15, %20 : vector<288x64xf32>
    %22 = vector.extract_strided_slice %2 {offsets = [18, 0], sizes = [288, 64], strides = [1, 1]} : vector<342x64xf32> to vector<288x64xf32>
    %23 = arith.truncf %22 : vector<288x64xf32> to vector<288x64xbf16>
    %c3 = arith.constant 3 : index
    %c0_12 = arith.constant 0 : index
    %c0_13 = arith.constant 0 : index
    %24 = vector.load %arg2[%c3, %c0_12, %c0_13] : memref<9x64x64xbf16, #tpu.memory_space<vmem>>, vector<1x64x64xbf16>
    %25 = vector.shape_cast %24 : vector<1x64x64xbf16> to vector<64x64xbf16>
    %cst_14 = arith.constant dense<0.000000e+00> : vector<288x64xf32>
    %26 = tpu.matmul %23, %25, %cst_14 {dimension_numbers = #tpu.dot_dimension_numbers<[1], [0], [0], [1], [0, 0, 1, 1], [], []>} : vector<288x64xbf16>, vector<64x64xbf16>, vector<288x64xf32> -> vector<288x64xf32>
    %27 = arith.addf %21, %26 : vector<288x64xf32>
    %28 = vector.extract_strided_slice %2 {offsets = [19, 0], sizes = [288, 64], strides = [1, 1]} : vector<342x64xf32> to vector<288x64xf32>
    %29 = arith.truncf %28 : vector<288x64xf32> to vector<288x64xbf16>
    %c4 = arith.constant 4 : index
    %c0_15 = arith.constant 0 : index
    %c0_16 = arith.constant 0 : index
    %30 = vector.load %arg2[%c4, %c0_15, %c0_16] : memref<9x64x64xbf16, #tpu.memory_space<vmem>>, vector<1x64x64xbf16>
    %31 = vector.shape_cast %30 : vector<1x64x64xbf16> to vector<64x64xbf16>
    %cst_17 = arith.constant dense<0.000000e+00> : vector<288x64xf32>
    %32 = tpu.matmul %29, %31, %cst_17 {dimension_numbers = #tpu.dot_dimension_numbers<[1], [0], [0], [1], [0, 0, 1, 1], [], []>} : vector<288x64xbf16>, vector<64x64xbf16>, vector<288x64xf32> -> vector<288x64xf32>
    %33 = arith.addf %27, %32 : vector<288x64xf32>
    %34 = vector.extract_strided_slice %2 {offsets = [20, 0], sizes = [288, 64], strides = [1, 1]} : vector<342x64xf32> to vector<288x64xf32>
    %35 = arith.truncf %34 : vector<288x64xf32> to vector<288x64xbf16>
    %c5 = arith.constant 5 : index
    %c0_18 = arith.constant 0 : index
    %c0_19 = arith.constant 0 : index
    %36 = vector.load %arg2[%c5, %c0_18, %c0_19] : memref<9x64x64xbf16, #tpu.memory_space<vmem>>, vector<1x64x64xbf16>
    %37 = vector.shape_cast %36 : vector<1x64x64xbf16> to vector<64x64xbf16>
    %cst_20 = arith.constant dense<0.000000e+00> : vector<288x64xf32>
    %38 = tpu.matmul %35, %37, %cst_20 {dimension_numbers = #tpu.dot_dimension_numbers<[1], [0], [0], [1], [0, 0, 1, 1], [], []>} : vector<288x64xbf16>, vector<64x64xbf16>, vector<288x64xf32> -> vector<288x64xf32>
    %39 = arith.addf %33, %38 : vector<288x64xf32>
    %40 = vector.extract_strided_slice %2 {offsets = [36, 0], sizes = [288, 64], strides = [1, 1]} : vector<342x64xf32> to vector<288x64xf32>
    %41 = arith.truncf %40 : vector<288x64xf32> to vector<288x64xbf16>
    %c6 = arith.constant 6 : index
    %c0_21 = arith.constant 0 : index
    %c0_22 = arith.constant 0 : index
    %42 = vector.load %arg2[%c6, %c0_21, %c0_22] : memref<9x64x64xbf16, #tpu.memory_space<vmem>>, vector<1x64x64xbf16>
    %43 = vector.shape_cast %42 : vector<1x64x64xbf16> to vector<64x64xbf16>
    %cst_23 = arith.constant dense<0.000000e+00> : vector<288x64xf32>
    %44 = tpu.matmul %41, %43, %cst_23 {dimension_numbers = #tpu.dot_dimension_numbers<[1], [0], [0], [1], [0, 0, 1, 1], [], []>} : vector<288x64xbf16>, vector<64x64xbf16>, vector<288x64xf32> -> vector<288x64xf32>
    %45 = arith.addf %39, %44 : vector<288x64xf32>
    %46 = vector.extract_strided_slice %2 {offsets = [37, 0], sizes = [288, 64], strides = [1, 1]} : vector<342x64xf32> to vector<288x64xf32>
    %47 = arith.truncf %46 : vector<288x64xf32> to vector<288x64xbf16>
    %c7 = arith.constant 7 : index
    %c0_24 = arith.constant 0 : index
    %c0_25 = arith.constant 0 : index
    %48 = vector.load %arg2[%c7, %c0_24, %c0_25] : memref<9x64x64xbf16, #tpu.memory_space<vmem>>, vector<1x64x64xbf16>
    %49 = vector.shape_cast %48 : vector<1x64x64xbf16> to vector<64x64xbf16>
    %cst_26 = arith.constant dense<0.000000e+00> : vector<288x64xf32>
    %50 = tpu.matmul %47, %49, %cst_26 {dimension_numbers = #tpu.dot_dimension_numbers<[1], [0], [0], [1], [0, 0, 1, 1], [], []>} : vector<288x64xbf16>, vector<64x64xbf16>, vector<288x64xf32> -> vector<288x64xf32>
    %51 = arith.addf %45, %50 : vector<288x64xf32>
    %52 = vector.extract_strided_slice %2 {offsets = [38, 0], sizes = [288, 64], strides = [1, 1]} : vector<342x64xf32> to vector<288x64xf32>
    %53 = arith.truncf %52 : vector<288x64xf32> to vector<288x64xbf16>
    %c8 = arith.constant 8 : index
    %c0_27 = arith.constant 0 : index
    %c0_28 = arith.constant 0 : index
    %54 = vector.load %arg2[%c8, %c0_27, %c0_28] : memref<9x64x64xbf16, #tpu.memory_space<vmem>>, vector<1x64x64xbf16>
    %55 = vector.shape_cast %54 : vector<1x64x64xbf16> to vector<64x64xbf16>
    %cst_29 = arith.constant dense<0.000000e+00> : vector<288x64xf32>
    %56 = tpu.matmul %53, %55, %cst_29 {dimension_numbers = #tpu.dot_dimension_numbers<[1], [0], [0], [1], [0, 0, 1, 1], [], []>} : vector<288x64xbf16>, vector<64x64xbf16>, vector<288x64xf32> -> vector<288x64xf32>
    %57 = arith.addf %51, %56 : vector<288x64xf32>
    %c0_30 = arith.constant 0 : index
    %c0_31 = arith.constant 0 : index
    %58 = vector.load %arg3[%c0_30, %c0_31] : memref<1x64xf32, #tpu.memory_space<vmem>>, vector<1x64xf32>
    %59 = vector.broadcast %58 : vector<1x64xf32> to vector<288x64xf32>
    %60 = arith.addf %57, %59 : vector<288x64xf32>
    %cst_32 = arith.constant 0.000000e+00 : f32
    %61 = vector.broadcast %cst_32 : f32 to vector<288x64xf32>
    %62 = arith.maximumf %60, %61 : vector<288x64xf32>
    %63 = arith.truncf %62 : vector<288x64xf32> to vector<288x64xbf16>
    %c0_33 = arith.constant 0 : index
    %c0_34 = arith.constant 0 : index
    %c0_35 = arith.constant 0 : index
    %64 = vector.load %arg4[%c0_33, %c0_34, %c0_35] : memref<1x288x64xbf16, #tpu.memory_space<vmem>>, vector<1x288x64xbf16>
    %65 = vector.shape_cast %64 : vector<1x288x64xbf16> to vector<288x64xbf16>
    %66 = vector.shape_cast %63 : vector<288x64xbf16> to vector<1x288x64xbf16>
    tpu.vector_store %arg4[%c0_33, %c0_34, %c0_35], %66 {strides = array<i32>} : memref<1x288x64xbf16, #tpu.memory_space<vmem>>, vector<1x288x64xbf16>,
    return
  }
  func.func @transform_0(%arg0: i32) -> (i32, i32, i32) {
    %c0_i32 = arith.constant 0 : i32
    %c0_i32_0 = arith.constant 0 : i32
    %c0_i32_1 = arith.constant 0 : i32
    return %arg0, %c0_i32, %c0_i32_0 : i32, i32, i32
  }
  func.func @transform_1(%arg0: i32) -> (i32, i32, i32) {
    %c0_i32 = arith.constant 0 : i32
    %c0_i32_0 = arith.constant 0 : i32
    %c0_i32_1 = arith.constant 0 : i32
    %c0_i32_2 = arith.constant 0 : i32
    return %c0_i32, %c0_i32_0, %c0_i32_1 : i32, i32, i32
  }
  func.func @transform_2(%arg0: i32) -> (i32, i32) {
    %c0_i32 = arith.constant 0 : i32
    %c0_i32_0 = arith.constant 0 : i32
    %c0_i32_1 = arith.constant 0 : i32
    return %c0_i32, %c0_i32_0 : i32, i32
  }
  func.func @transform_3(%arg0: i32) -> (i32, i32, i32) {
    %c0_i32 = arith.constant 0 : i32
    %c0_i32_0 = arith.constant 0 : i32
    %c0_i32_1 = arith.constant 0 : i32
    return %arg0, %c0_i32, %c0_i32_0 : i32, i32, i32
  }
}

module attributes {stable_mosaic.version = 11 : i64} {
  func.func @_maxpool_kernel(%arg0: i32, %arg1: i32, %arg2: memref<1x8x2x8x128xbf16, #tpu.memory_space<vmem>>, %arg3: memref<1x8x8x64xbf16, #tpu.memory_space<vmem>>) attributes {dimension_semantics = [#tpu.dimension_semantics<parallel>, #tpu.dimension_semantics<parallel>], iteration_bounds = array<i64: 8, 1>, scalar_prefetch = 0 : i64, scratch_operands = 0 : i64, tpu.core_type = #tpu.core_type<tc>, window_params = [{transform_indices = @transform_0, window_bounds = array<i64: 1, 8, 2, 8, 128>}, {transform_indices = @transform_1, window_bounds = array<i64: 1, 8, 8, 64>}]} {
    %c0 = arith.constant 0 : index
    %c0_0 = arith.constant 0 : index
    %c0_1 = arith.constant 0 : index
    %c0_2 = arith.constant 0 : index
    %c0_3 = arith.constant 0 : index
    %0 = vector.load %arg2[%c0, %c0_0, %c0_1, %c0_2, %c0_3] : memref<1x8x2x8x128xbf16, #tpu.memory_space<vmem>>, vector<1x8x2x8x128xbf16>
    %1 = vector.shape_cast %0 : vector<1x8x2x8x128xbf16> to vector<8x2x8x128xbf16>
    %2 = vector.extract_strided_slice %1 {offsets = [0, 0, 0, 0], sizes = [8, 1, 8, 128], strides = [1, 1, 1, 1]} : vector<8x2x8x128xbf16> to vector<8x1x8x128xbf16>
    %3 = vector.shape_cast %2 : vector<8x1x8x128xbf16> to vector<8x8x128xbf16>
    %4 = vector.extract_strided_slice %1 {offsets = [0, 1, 0, 0], sizes = [8, 1, 8, 128], strides = [1, 1, 1, 1]} : vector<8x2x8x128xbf16> to vector<8x1x8x128xbf16>
    %5 = vector.shape_cast %4 : vector<8x1x8x128xbf16> to vector<8x8x128xbf16>
    %6 = arith.maximumf %3, %5 : vector<8x8x128xbf16>
    %7 = vector.extract_strided_slice %6 {offsets = [0, 0, 0], sizes = [8, 8, 64], strides = [1, 1, 1]} : vector<8x8x128xbf16> to vector<8x8x64xbf16>
    %8 = vector.extract_strided_slice %6 {offsets = [0, 0, 64], sizes = [8, 8, 64], strides = [1, 1, 1]} : vector<8x8x128xbf16> to vector<8x8x64xbf16>
    %9 = arith.maximumf %7, %8 : vector<8x8x64xbf16>
    %c0_4 = arith.constant 0 : index
    %c0_5 = arith.constant 0 : index
    %c0_6 = arith.constant 0 : index
    %c0_7 = arith.constant 0 : index
    %10 = vector.load %arg3[%c0_4, %c0_5, %c0_6, %c0_7] : memref<1x8x8x64xbf16, #tpu.memory_space<vmem>>, vector<1x8x8x64xbf16>
    %11 = vector.shape_cast %10 : vector<1x8x8x64xbf16> to vector<8x8x64xbf16>
    %12 = vector.shape_cast %9 : vector<8x8x64xbf16> to vector<1x8x8x64xbf16>
    tpu.vector_store %arg3[%c0_4, %c0_5, %c0_6, %c0_7], %12 {strides = array<i32>} : memref<1x8x8x64xbf16, #tpu.memory_space<vmem>>, vector<1x8x8x64xbf16>,
    return
  }
  func.func @transform_0(%arg0: i32, %arg1: i32) -> (i32, i32, i32, i32, i32) {
    %c0_i32 = arith.constant 0 : i32
    %c0_i32_0 = arith.constant 0 : i32
    %c0_i32_1 = arith.constant 0 : i32
    %c0_i32_2 = arith.constant 0 : i32
    return %arg0, %arg1, %c0_i32, %c0_i32_0, %c0_i32_1 : i32, i32, i32, i32, i32
  }
  func.func @transform_1(%arg0: i32, %arg1: i32) -> (i32, i32, i32, i32) {
    %c0_i32 = arith.constant 0 : i32
    %c0_i32_0 = arith.constant 0 : i32
    %c0_i32_1 = arith.constant 0 : i32
    return %arg0, %arg1, %c0_i32, %c0_i32_0 : i32, i32, i32, i32
  }
}

module attributes {stable_mosaic.version = 11 : i64} {
  func.func @_conv3x3_kernel(%arg0: i32, %arg1: memref<1x110x64xbf16, #tpu.memory_space<vmem>>, %arg2: memref<9x64x128xbf16, #tpu.memory_space<vmem>>, %arg3: memref<1x128xf32, #tpu.memory_space<vmem>>, %arg4: memref<1x80x128xbf16, #tpu.memory_space<vmem>>) attributes {dimension_semantics = [#tpu.dimension_semantics<parallel>], iteration_bounds = array<i64: 8>, scalar_prefetch = 0 : i64, scratch_operands = 0 : i64, tpu.core_type = #tpu.core_type<tc>, window_params = [{transform_indices = @transform_0, window_bounds = array<i64: 1, 110, 64>}, {pipeline_mode = #tpu.pipeline_mode<synchronous>, transform_indices = @transform_1, window_bounds = array<i64: 9, 64, 128>}, {pipeline_mode = #tpu.pipeline_mode<synchronous>, transform_indices = @transform_2, window_bounds = array<i64: 1, 128>}, {transform_indices = @transform_3, window_bounds = array<i64: 1, 80, 128>}]} {
    %c0 = arith.constant 0 : index
    %c0_0 = arith.constant 0 : index
    %c0_1 = arith.constant 0 : index
    %0 = vector.load %arg1[%c0, %c0_0, %c0_1] : memref<1x110x64xbf16, #tpu.memory_space<vmem>>, vector<1x110x64xbf16>
    %1 = vector.shape_cast %0 : vector<1x110x64xbf16> to vector<110x64xbf16>
    %2 = arith.extf %1 : vector<110x64xbf16> to vector<110x64xf32>
    %cst = arith.constant 0.000000e+00 : f32
    %3 = vector.broadcast %cst : f32 to vector<80x128xf32>
    %4 = vector.extract_strided_slice %2 {offsets = [0, 0], sizes = [80, 64], strides = [1, 1]} : vector<110x64xf32> to vector<80x64xf32>
    %5 = arith.truncf %4 : vector<80x64xf32> to vector<80x64xbf16>
    %c0_2 = arith.constant 0 : index
    %c0_3 = arith.constant 0 : index
    %c0_4 = arith.constant 0 : index
    %6 = vector.load %arg2[%c0_2, %c0_3, %c0_4] : memref<9x64x128xbf16, #tpu.memory_space<vmem>>, vector<1x64x128xbf16>
    %7 = vector.shape_cast %6 : vector<1x64x128xbf16> to vector<64x128xbf16>
    %cst_5 = arith.constant dense<0.000000e+00> : vector<80x128xf32>
    %8 = tpu.matmul %5, %7, %cst_5 {dimension_numbers = #tpu.dot_dimension_numbers<[1], [0], [0], [1], [0, 0, 1, 1], [], []>} : vector<80x64xbf16>, vector<64x128xbf16>, vector<80x128xf32> -> vector<80x128xf32>
    %9 = arith.addf %3, %8 : vector<80x128xf32>
    %10 = vector.extract_strided_slice %2 {offsets = [1, 0], sizes = [80, 64], strides = [1, 1]} : vector<110x64xf32> to vector<80x64xf32>
    %11 = arith.truncf %10 : vector<80x64xf32> to vector<80x64xbf16>
    %c1 = arith.constant 1 : index
    %c0_6 = arith.constant 0 : index
    %c0_7 = arith.constant 0 : index
    %12 = vector.load %arg2[%c1, %c0_6, %c0_7] : memref<9x64x128xbf16, #tpu.memory_space<vmem>>, vector<1x64x128xbf16>
    %13 = vector.shape_cast %12 : vector<1x64x128xbf16> to vector<64x128xbf16>
    %cst_8 = arith.constant dense<0.000000e+00> : vector<80x128xf32>
    %14 = tpu.matmul %11, %13, %cst_8 {dimension_numbers = #tpu.dot_dimension_numbers<[1], [0], [0], [1], [0, 0, 1, 1], [], []>} : vector<80x64xbf16>, vector<64x128xbf16>, vector<80x128xf32> -> vector<80x128xf32>
    %15 = arith.addf %9, %14 : vector<80x128xf32>
    %16 = vector.extract_strided_slice %2 {offsets = [2, 0], sizes = [80, 64], strides = [1, 1]} : vector<110x64xf32> to vector<80x64xf32>
    %17 = arith.truncf %16 : vector<80x64xf32> to vector<80x64xbf16>
    %c2 = arith.constant 2 : index
    %c0_9 = arith.constant 0 : index
    %c0_10 = arith.constant 0 : index
    %18 = vector.load %arg2[%c2, %c0_9, %c0_10] : memref<9x64x128xbf16, #tpu.memory_space<vmem>>, vector<1x64x128xbf16>
    %19 = vector.shape_cast %18 : vector<1x64x128xbf16> to vector<64x128xbf16>
    %cst_11 = arith.constant dense<0.000000e+00> : vector<80x128xf32>
    %20 = tpu.matmul %17, %19, %cst_11 {dimension_numbers = #tpu.dot_dimension_numbers<[1], [0], [0], [1], [0, 0, 1, 1], [], []>} : vector<80x64xbf16>, vector<64x128xbf16>, vector<80x128xf32> -> vector<80x128xf32>
    %21 = arith.addf %15, %20 : vector<80x128xf32>
    %22 = vector.extract_strided_slice %2 {offsets = [10, 0], sizes = [80, 64], strides = [1, 1]} : vector<110x64xf32> to vector<80x64xf32>
    %23 = arith.truncf %22 : vector<80x64xf32> to vector<80x64xbf16>
    %c3 = arith.constant 3 : index
    %c0_12 = arith.constant 0 : index
    %c0_13 = arith.constant 0 : index
    %24 = vector.load %arg2[%c3, %c0_12, %c0_13] : memref<9x64x128xbf16, #tpu.memory_space<vmem>>, vector<1x64x128xbf16>
    %25 = vector.shape_cast %24 : vector<1x64x128xbf16> to vector<64x128xbf16>
    %cst_14 = arith.constant dense<0.000000e+00> : vector<80x128xf32>
    %26 = tpu.matmul %23, %25, %cst_14 {dimension_numbers = #tpu.dot_dimension_numbers<[1], [0], [0], [1], [0, 0, 1, 1], [], []>} : vector<80x64xbf16>, vector<64x128xbf16>, vector<80x128xf32> -> vector<80x128xf32>
    %27 = arith.addf %21, %26 : vector<80x128xf32>
    %28 = vector.extract_strided_slice %2 {offsets = [11, 0], sizes = [80, 64], strides = [1, 1]} : vector<110x64xf32> to vector<80x64xf32>
    %29 = arith.truncf %28 : vector<80x64xf32> to vector<80x64xbf16>
    %c4 = arith.constant 4 : index
    %c0_15 = arith.constant 0 : index
    %c0_16 = arith.constant 0 : index
    %30 = vector.load %arg2[%c4, %c0_15, %c0_16] : memref<9x64x128xbf16, #tpu.memory_space<vmem>>, vector<1x64x128xbf16>
    %31 = vector.shape_cast %30 : vector<1x64x128xbf16> to vector<64x128xbf16>
    %cst_17 = arith.constant dense<0.000000e+00> : vector<80x128xf32>
    %32 = tpu.matmul %29, %31, %cst_17 {dimension_numbers = #tpu.dot_dimension_numbers<[1], [0], [0], [1], [0, 0, 1, 1], [], []>} : vector<80x64xbf16>, vector<64x128xbf16>, vector<80x128xf32> -> vector<80x128xf32>
    %33 = arith.addf %27, %32 : vector<80x128xf32>
    %34 = vector.extract_strided_slice %2 {offsets = [12, 0], sizes = [80, 64], strides = [1, 1]} : vector<110x64xf32> to vector<80x64xf32>
    %35 = arith.truncf %34 : vector<80x64xf32> to vector<80x64xbf16>
    %c5 = arith.constant 5 : index
    %c0_18 = arith.constant 0 : index
    %c0_19 = arith.constant 0 : index
    %36 = vector.load %arg2[%c5, %c0_18, %c0_19] : memref<9x64x128xbf16, #tpu.memory_space<vmem>>, vector<1x64x128xbf16>
    %37 = vector.shape_cast %36 : vector<1x64x128xbf16> to vector<64x128xbf16>
    %cst_20 = arith.constant dense<0.000000e+00> : vector<80x128xf32>
    %38 = tpu.matmul %35, %37, %cst_20 {dimension_numbers = #tpu.dot_dimension_numbers<[1], [0], [0], [1], [0, 0, 1, 1], [], []>} : vector<80x64xbf16>, vector<64x128xbf16>, vector<80x128xf32> -> vector<80x128xf32>
    %39 = arith.addf %33, %38 : vector<80x128xf32>
    %40 = vector.extract_strided_slice %2 {offsets = [20, 0], sizes = [80, 64], strides = [1, 1]} : vector<110x64xf32> to vector<80x64xf32>
    %41 = arith.truncf %40 : vector<80x64xf32> to vector<80x64xbf16>
    %c6 = arith.constant 6 : index
    %c0_21 = arith.constant 0 : index
    %c0_22 = arith.constant 0 : index
    %42 = vector.load %arg2[%c6, %c0_21, %c0_22] : memref<9x64x128xbf16, #tpu.memory_space<vmem>>, vector<1x64x128xbf16>
    %43 = vector.shape_cast %42 : vector<1x64x128xbf16> to vector<64x128xbf16>
    %cst_23 = arith.constant dense<0.000000e+00> : vector<80x128xf32>
    %44 = tpu.matmul %41, %43, %cst_23 {dimension_numbers = #tpu.dot_dimension_numbers<[1], [0], [0], [1], [0, 0, 1, 1], [], []>} : vector<80x64xbf16>, vector<64x128xbf16>, vector<80x128xf32> -> vector<80x128xf32>
    %45 = arith.addf %39, %44 : vector<80x128xf32>
    %46 = vector.extract_strided_slice %2 {offsets = [21, 0], sizes = [80, 64], strides = [1, 1]} : vector<110x64xf32> to vector<80x64xf32>
    %47 = arith.truncf %46 : vector<80x64xf32> to vector<80x64xbf16>
    %c7 = arith.constant 7 : index
    %c0_24 = arith.constant 0 : index
    %c0_25 = arith.constant 0 : index
    %48 = vector.load %arg2[%c7, %c0_24, %c0_25] : memref<9x64x128xbf16, #tpu.memory_space<vmem>>, vector<1x64x128xbf16>
    %49 = vector.shape_cast %48 : vector<1x64x128xbf16> to vector<64x128xbf16>
    %cst_26 = arith.constant dense<0.000000e+00> : vector<80x128xf32>
    %50 = tpu.matmul %47, %49, %cst_26 {dimension_numbers = #tpu.dot_dimension_numbers<[1], [0], [0], [1], [0, 0, 1, 1], [], []>} : vector<80x64xbf16>, vector<64x128xbf16>, vector<80x128xf32> -> vector<80x128xf32>
    %51 = arith.addf %45, %50 : vector<80x128xf32>
    %52 = vector.extract_strided_slice %2 {offsets = [22, 0], sizes = [80, 64], strides = [1, 1]} : vector<110x64xf32> to vector<80x64xf32>
    %53 = arith.truncf %52 : vector<80x64xf32> to vector<80x64xbf16>
    %c8 = arith.constant 8 : index
    %c0_27 = arith.constant 0 : index
    %c0_28 = arith.constant 0 : index
    %54 = vector.load %arg2[%c8, %c0_27, %c0_28] : memref<9x64x128xbf16, #tpu.memory_space<vmem>>, vector<1x64x128xbf16>
    %55 = vector.shape_cast %54 : vector<1x64x128xbf16> to vector<64x128xbf16>
    %cst_29 = arith.constant dense<0.000000e+00> : vector<80x128xf32>
    %56 = tpu.matmul %53, %55, %cst_29 {dimension_numbers = #tpu.dot_dimension_numbers<[1], [0], [0], [1], [0, 0, 1, 1], [], []>} : vector<80x64xbf16>, vector<64x128xbf16>, vector<80x128xf32> -> vector<80x128xf32>
    %57 = arith.addf %51, %56 : vector<80x128xf32>
    %c0_30 = arith.constant 0 : index
    %c0_31 = arith.constant 0 : index
    %58 = vector.load %arg3[%c0_30, %c0_31] : memref<1x128xf32, #tpu.memory_space<vmem>>, vector<1x128xf32>
    %59 = vector.broadcast %58 : vector<1x128xf32> to vector<80x128xf32>
    %60 = arith.addf %57, %59 : vector<80x128xf32>
    %cst_32 = arith.constant 0.000000e+00 : f32
    %61 = vector.broadcast %cst_32 : f32 to vector<80x128xf32>
    %62 = arith.maximumf %60, %61 : vector<80x128xf32>
    %63 = arith.truncf %62 : vector<80x128xf32> to vector<80x128xbf16>
    %c0_33 = arith.constant 0 : index
    %c0_34 = arith.constant 0 : index
    %c0_35 = arith.constant 0 : index
    %64 = vector.load %arg4[%c0_33, %c0_34, %c0_35] : memref<1x80x128xbf16, #tpu.memory_space<vmem>>, vector<1x80x128xbf16>
    %65 = vector.shape_cast %64 : vector<1x80x128xbf16> to vector<80x128xbf16>
    %66 = vector.shape_cast %63 : vector<80x128xbf16> to vector<1x80x128xbf16>
    tpu.vector_store %arg4[%c0_33, %c0_34, %c0_35], %66 {strides = array<i32>} : memref<1x80x128xbf16, #tpu.memory_space<vmem>>, vector<1x80x128xbf16>,
    return
  }
  func.func @transform_0(%arg0: i32) -> (i32, i32, i32) {
    %c0_i32 = arith.constant 0 : i32
    %c0_i32_0 = arith.constant 0 : i32
    %c0_i32_1 = arith.constant 0 : i32
    return %arg0, %c0_i32, %c0_i32_0 : i32, i32, i32
  }
  func.func @transform_1(%arg0: i32) -> (i32, i32, i32) {
    %c0_i32 = arith.constant 0 : i32
    %c0_i32_0 = arith.constant 0 : i32
    %c0_i32_1 = arith.constant 0 : i32
    %c0_i32_2 = arith.constant 0 : i32
    return %c0_i32, %c0_i32_0, %c0_i32_1 : i32, i32, i32
  }
  func.func @transform_2(%arg0: i32) -> (i32, i32) {
    %c0_i32 = arith.constant 0 : i32
    %c0_i32_0 = arith.constant 0 : i32
    %c0_i32_1 = arith.constant 0 : i32
    return %c0_i32, %c0_i32_0 : i32, i32
  }
  func.func @transform_3(%arg0: i32) -> (i32, i32, i32) {
    %c0_i32 = arith.constant 0 : i32
    %c0_i32_0 = arith.constant 0 : i32
    %c0_i32_1 = arith.constant 0 : i32
    return %arg0, %c0_i32, %c0_i32_0 : i32, i32, i32
  }
}

module attributes {stable_mosaic.version = 11 : i64} {
  func.func @_conv3x3_kernel(%arg0: i32, %arg1: memref<1x110x128xbf16, #tpu.memory_space<vmem>>, %arg2: memref<9x128x128xbf16, #tpu.memory_space<vmem>>, %arg3: memref<1x128xf32, #tpu.memory_space<vmem>>, %arg4: memref<1x80x128xbf16, #tpu.memory_space<vmem>>) attributes {dimension_semantics = [#tpu.dimension_semantics<parallel>], iteration_bounds = array<i64: 8>, scalar_prefetch = 0 : i64, scratch_operands = 0 : i64, tpu.core_type = #tpu.core_type<tc>, window_params = [{transform_indices = @transform_0, window_bounds = array<i64: 1, 110, 128>}, {pipeline_mode = #tpu.pipeline_mode<synchronous>, transform_indices = @transform_1, window_bounds = array<i64: 9, 128, 128>}, {pipeline_mode = #tpu.pipeline_mode<synchronous>, transform_indices = @transform_2, window_bounds = array<i64: 1, 128>}, {transform_indices = @transform_3, window_bounds = array<i64: 1, 80, 128>}]} {
    %c0 = arith.constant 0 : index
    %c0_0 = arith.constant 0 : index
    %c0_1 = arith.constant 0 : index
    %0 = vector.load %arg1[%c0, %c0_0, %c0_1] : memref<1x110x128xbf16, #tpu.memory_space<vmem>>, vector<1x110x128xbf16>
    %1 = vector.shape_cast %0 : vector<1x110x128xbf16> to vector<110x128xbf16>
    %2 = arith.extf %1 : vector<110x128xbf16> to vector<110x128xf32>
    %cst = arith.constant 0.000000e+00 : f32
    %3 = vector.broadcast %cst : f32 to vector<80x128xf32>
    %4 = vector.extract_strided_slice %2 {offsets = [0, 0], sizes = [80, 128], strides = [1, 1]} : vector<110x128xf32> to vector<80x128xf32>
    %5 = arith.truncf %4 : vector<80x128xf32> to vector<80x128xbf16>
    %c0_2 = arith.constant 0 : index
    %c0_3 = arith.constant 0 : index
    %c0_4 = arith.constant 0 : index
    %6 = vector.load %arg2[%c0_2, %c0_3, %c0_4] : memref<9x128x128xbf16, #tpu.memory_space<vmem>>, vector<1x128x128xbf16>
    %7 = vector.shape_cast %6 : vector<1x128x128xbf16> to vector<128x128xbf16>
    %cst_5 = arith.constant dense<0.000000e+00> : vector<80x128xf32>
    %8 = tpu.matmul %5, %7, %cst_5 {dimension_numbers = #tpu.dot_dimension_numbers<[1], [0], [0], [1], [0, 0, 1, 1], [], []>} : vector<80x128xbf16>, vector<128x128xbf16>, vector<80x128xf32> -> vector<80x128xf32>
    %9 = arith.addf %3, %8 : vector<80x128xf32>
    %10 = vector.extract_strided_slice %2 {offsets = [1, 0], sizes = [80, 128], strides = [1, 1]} : vector<110x128xf32> to vector<80x128xf32>
    %11 = arith.truncf %10 : vector<80x128xf32> to vector<80x128xbf16>
    %c1 = arith.constant 1 : index
    %c0_6 = arith.constant 0 : index
    %c0_7 = arith.constant 0 : index
    %12 = vector.load %arg2[%c1, %c0_6, %c0_7] : memref<9x128x128xbf16, #tpu.memory_space<vmem>>, vector<1x128x128xbf16>
    %13 = vector.shape_cast %12 : vector<1x128x128xbf16> to vector<128x128xbf16>
    %cst_8 = arith.constant dense<0.000000e+00> : vector<80x128xf32>
    %14 = tpu.matmul %11, %13, %cst_8 {dimension_numbers = #tpu.dot_dimension_numbers<[1], [0], [0], [1], [0, 0, 1, 1], [], []>} : vector<80x128xbf16>, vector<128x128xbf16>, vector<80x128xf32> -> vector<80x128xf32>
    %15 = arith.addf %9, %14 : vector<80x128xf32>
    %16 = vector.extract_strided_slice %2 {offsets = [2, 0], sizes = [80, 128], strides = [1, 1]} : vector<110x128xf32> to vector<80x128xf32>
    %17 = arith.truncf %16 : vector<80x128xf32> to vector<80x128xbf16>
    %c2 = arith.constant 2 : index
    %c0_9 = arith.constant 0 : index
    %c0_10 = arith.constant 0 : index
    %18 = vector.load %arg2[%c2, %c0_9, %c0_10] : memref<9x128x128xbf16, #tpu.memory_space<vmem>>, vector<1x128x128xbf16>
    %19 = vector.shape_cast %18 : vector<1x128x128xbf16> to vector<128x128xbf16>
    %cst_11 = arith.constant dense<0.000000e+00> : vector<80x128xf32>
    %20 = tpu.matmul %17, %19, %cst_11 {dimension_numbers = #tpu.dot_dimension_numbers<[1], [0], [0], [1], [0, 0, 1, 1], [], []>} : vector<80x128xbf16>, vector<128x128xbf16>, vector<80x128xf32> -> vector<80x128xf32>
    %21 = arith.addf %15, %20 : vector<80x128xf32>
    %22 = vector.extract_strided_slice %2 {offsets = [10, 0], sizes = [80, 128], strides = [1, 1]} : vector<110x128xf32> to vector<80x128xf32>
    %23 = arith.truncf %22 : vector<80x128xf32> to vector<80x128xbf16>
    %c3 = arith.constant 3 : index
    %c0_12 = arith.constant 0 : index
    %c0_13 = arith.constant 0 : index
    %24 = vector.load %arg2[%c3, %c0_12, %c0_13] : memref<9x128x128xbf16, #tpu.memory_space<vmem>>, vector<1x128x128xbf16>
    %25 = vector.shape_cast %24 : vector<1x128x128xbf16> to vector<128x128xbf16>
    %cst_14 = arith.constant dense<0.000000e+00> : vector<80x128xf32>
    %26 = tpu.matmul %23, %25, %cst_14 {dimension_numbers = #tpu.dot_dimension_numbers<[1], [0], [0], [1], [0, 0, 1, 1], [], []>} : vector<80x128xbf16>, vector<128x128xbf16>, vector<80x128xf32> -> vector<80x128xf32>
    %27 = arith.addf %21, %26 : vector<80x128xf32>
    %28 = vector.extract_strided_slice %2 {offsets = [11, 0], sizes = [80, 128], strides = [1, 1]} : vector<110x128xf32> to vector<80x128xf32>
    %29 = arith.truncf %28 : vector<80x128xf32> to vector<80x128xbf16>
    %c4 = arith.constant 4 : index
    %c0_15 = arith.constant 0 : index
    %c0_16 = arith.constant 0 : index
    %30 = vector.load %arg2[%c4, %c0_15, %c0_16] : memref<9x128x128xbf16, #tpu.memory_space<vmem>>, vector<1x128x128xbf16>
    %31 = vector.shape_cast %30 : vector<1x128x128xbf16> to vector<128x128xbf16>
    %cst_17 = arith.constant dense<0.000000e+00> : vector<80x128xf32>
    %32 = tpu.matmul %29, %31, %cst_17 {dimension_numbers = #tpu.dot_dimension_numbers<[1], [0], [0], [1], [0, 0, 1, 1], [], []>} : vector<80x128xbf16>, vector<128x128xbf16>, vector<80x128xf32> -> vector<80x128xf32>
    %33 = arith.addf %27, %32 : vector<80x128xf32>
    %34 = vector.extract_strided_slice %2 {offsets = [12, 0], sizes = [80, 128], strides = [1, 1]} : vector<110x128xf32> to vector<80x128xf32>
    %35 = arith.truncf %34 : vector<80x128xf32> to vector<80x128xbf16>
    %c5 = arith.constant 5 : index
    %c0_18 = arith.constant 0 : index
    %c0_19 = arith.constant 0 : index
    %36 = vector.load %arg2[%c5, %c0_18, %c0_19] : memref<9x128x128xbf16, #tpu.memory_space<vmem>>, vector<1x128x128xbf16>
    %37 = vector.shape_cast %36 : vector<1x128x128xbf16> to vector<128x128xbf16>
    %cst_20 = arith.constant dense<0.000000e+00> : vector<80x128xf32>
    %38 = tpu.matmul %35, %37, %cst_20 {dimension_numbers = #tpu.dot_dimension_numbers<[1], [0], [0], [1], [0, 0, 1, 1], [], []>} : vector<80x128xbf16>, vector<128x128xbf16>, vector<80x128xf32> -> vector<80x128xf32>
    %39 = arith.addf %33, %38 : vector<80x128xf32>
    %40 = vector.extract_strided_slice %2 {offsets = [20, 0], sizes = [80, 128], strides = [1, 1]} : vector<110x128xf32> to vector<80x128xf32>
    %41 = arith.truncf %40 : vector<80x128xf32> to vector<80x128xbf16>
    %c6 = arith.constant 6 : index
    %c0_21 = arith.constant 0 : index
    %c0_22 = arith.constant 0 : index
    %42 = vector.load %arg2[%c6, %c0_21, %c0_22] : memref<9x128x128xbf16, #tpu.memory_space<vmem>>, vector<1x128x128xbf16>
    %43 = vector.shape_cast %42 : vector<1x128x128xbf16> to vector<128x128xbf16>
    %cst_23 = arith.constant dense<0.000000e+00> : vector<80x128xf32>
    %44 = tpu.matmul %41, %43, %cst_23 {dimension_numbers = #tpu.dot_dimension_numbers<[1], [0], [0], [1], [0, 0, 1, 1], [], []>} : vector<80x128xbf16>, vector<128x128xbf16>, vector<80x128xf32> -> vector<80x128xf32>
    %45 = arith.addf %39, %44 : vector<80x128xf32>
    %46 = vector.extract_strided_slice %2 {offsets = [21, 0], sizes = [80, 128], strides = [1, 1]} : vector<110x128xf32> to vector<80x128xf32>
    %47 = arith.truncf %46 : vector<80x128xf32> to vector<80x128xbf16>
    %c7 = arith.constant 7 : index
    %c0_24 = arith.constant 0 : index
    %c0_25 = arith.constant 0 : index
    %48 = vector.load %arg2[%c7, %c0_24, %c0_25] : memref<9x128x128xbf16, #tpu.memory_space<vmem>>, vector<1x128x128xbf16>
    %49 = vector.shape_cast %48 : vector<1x128x128xbf16> to vector<128x128xbf16>
    %cst_26 = arith.constant dense<0.000000e+00> : vector<80x128xf32>
    %50 = tpu.matmul %47, %49, %cst_26 {dimension_numbers = #tpu.dot_dimension_numbers<[1], [0], [0], [1], [0, 0, 1, 1], [], []>} : vector<80x128xbf16>, vector<128x128xbf16>, vector<80x128xf32> -> vector<80x128xf32>
    %51 = arith.addf %45, %50 : vector<80x128xf32>
    %52 = vector.extract_strided_slice %2 {offsets = [22, 0], sizes = [80, 128], strides = [1, 1]} : vector<110x128xf32> to vector<80x128xf32>
    %53 = arith.truncf %52 : vector<80x128xf32> to vector<80x128xbf16>
    %c8 = arith.constant 8 : index
    %c0_27 = arith.constant 0 : index
    %c0_28 = arith.constant 0 : index
    %54 = vector.load %arg2[%c8, %c0_27, %c0_28] : memref<9x128x128xbf16, #tpu.memory_space<vmem>>, vector<1x128x128xbf16>
    %55 = vector.shape_cast %54 : vector<1x128x128xbf16> to vector<128x128xbf16>
    %cst_29 = arith.constant dense<0.000000e+00> : vector<80x128xf32>
    %56 = tpu.matmul %53, %55, %cst_29 {dimension_numbers = #tpu.dot_dimension_numbers<[1], [0], [0], [1], [0, 0, 1, 1], [], []>} : vector<80x128xbf16>, vector<128x128xbf16>, vector<80x128xf32> -> vector<80x128xf32>
    %57 = arith.addf %51, %56 : vector<80x128xf32>
    %c0_30 = arith.constant 0 : index
    %c0_31 = arith.constant 0 : index
    %58 = vector.load %arg3[%c0_30, %c0_31] : memref<1x128xf32, #tpu.memory_space<vmem>>, vector<1x128xf32>
    %59 = vector.broadcast %58 : vector<1x128xf32> to vector<80x128xf32>
    %60 = arith.addf %57, %59 : vector<80x128xf32>
    %cst_32 = arith.constant 0.000000e+00 : f32
    %61 = vector.broadcast %cst_32 : f32 to vector<80x128xf32>
    %62 = arith.maximumf %60, %61 : vector<80x128xf32>
    %63 = arith.truncf %62 : vector<80x128xf32> to vector<80x128xbf16>
    %c0_33 = arith.constant 0 : index
    %c0_34 = arith.constant 0 : index
    %c0_35 = arith.constant 0 : index
    %64 = vector.load %arg4[%c0_33, %c0_34, %c0_35] : memref<1x80x128xbf16, #tpu.memory_space<vmem>>, vector<1x80x128xbf16>
    %65 = vector.shape_cast %64 : vector<1x80x128xbf16> to vector<80x128xbf16>
    %66 = vector.shape_cast %63 : vector<80x128xbf16> to vector<1x80x128xbf16>
    tpu.vector_store %arg4[%c0_33, %c0_34, %c0_35], %66 {strides = array<i32>} : memref<1x80x128xbf16, #tpu.memory_space<vmem>>, vector<1x80x128xbf16>,
    return
  }
  func.func @transform_0(%arg0: i32) -> (i32, i32, i32) {
    %c0_i32 = arith.constant 0 : i32
    %c0_i32_0 = arith.constant 0 : i32
    %c0_i32_1 = arith.constant 0 : i32
    return %arg0, %c0_i32, %c0_i32_0 : i32, i32, i32
  }
  func.func @transform_1(%arg0: i32) -> (i32, i32, i32) {
    %c0_i32 = arith.constant 0 : i32
    %c0_i32_0 = arith.constant 0 : i32
    %c0_i32_1 = arith.constant 0 : i32
    %c0_i32_2 = arith.constant 0 : i32
    return %c0_i32, %c0_i32_0, %c0_i32_1 : i32, i32, i32
  }
  func.func @transform_2(%arg0: i32) -> (i32, i32) {
    %c0_i32 = arith.constant 0 : i32
    %c0_i32_0 = arith.constant 0 : i32
    %c0_i32_1 = arith.constant 0 : i32
    return %c0_i32, %c0_i32_0 : i32, i32
  }
  func.func @transform_3(%arg0: i32) -> (i32, i32, i32) {
    %c0_i32 = arith.constant 0 : i32
    %c0_i32_0 = arith.constant 0 : i32
    %c0_i32_1 = arith.constant 0 : i32
    return %arg0, %c0_i32, %c0_i32_0 : i32, i32, i32
  }
}

module attributes {stable_mosaic.version = 11 : i64} {
  func.func @_maxpool_kernel(%arg0: i32, %arg1: i32, %arg2: memref<1x4x2x4x256xbf16, #tpu.memory_space<vmem>>, %arg3: memref<1x4x4x128xbf16, #tpu.memory_space<vmem>>) attributes {dimension_semantics = [#tpu.dimension_semantics<parallel>, #tpu.dimension_semantics<parallel>], iteration_bounds = array<i64: 8, 1>, scalar_prefetch = 0 : i64, scratch_operands = 0 : i64, tpu.core_type = #tpu.core_type<tc>, window_params = [{transform_indices = @transform_0, window_bounds = array<i64: 1, 4, 2, 4, 256>}, {transform_indices = @transform_1, window_bounds = array<i64: 1, 4, 4, 128>}]} {
    %c0 = arith.constant 0 : index
    %c0_0 = arith.constant 0 : index
    %c0_1 = arith.constant 0 : index
    %c0_2 = arith.constant 0 : index
    %c0_3 = arith.constant 0 : index
    %0 = vector.load %arg2[%c0, %c0_0, %c0_1, %c0_2, %c0_3] : memref<1x4x2x4x256xbf16, #tpu.memory_space<vmem>>, vector<1x4x2x4x256xbf16>
    %1 = vector.shape_cast %0 : vector<1x4x2x4x256xbf16> to vector<4x2x4x256xbf16>
    %2 = vector.extract_strided_slice %1 {offsets = [0, 0, 0, 0], sizes = [4, 1, 4, 256], strides = [1, 1, 1, 1]} : vector<4x2x4x256xbf16> to vector<4x1x4x256xbf16>
    %3 = vector.shape_cast %2 : vector<4x1x4x256xbf16> to vector<4x4x256xbf16>
    %4 = vector.extract_strided_slice %1 {offsets = [0, 1, 0, 0], sizes = [4, 1, 4, 256], strides = [1, 1, 1, 1]} : vector<4x2x4x256xbf16> to vector<4x1x4x256xbf16>
    %5 = vector.shape_cast %4 : vector<4x1x4x256xbf16> to vector<4x4x256xbf16>
    %6 = arith.maximumf %3, %5 : vector<4x4x256xbf16>
    %7 = vector.extract_strided_slice %6 {offsets = [0, 0, 0], sizes = [4, 4, 128], strides = [1, 1, 1]} : vector<4x4x256xbf16> to vector<4x4x128xbf16>
    %8 = vector.extract_strided_slice %6 {offsets = [0, 0, 128], sizes = [4, 4, 128], strides = [1, 1, 1]} : vector<4x4x256xbf16> to vector<4x4x128xbf16>
    %9 = arith.maximumf %7, %8 : vector<4x4x128xbf16>
    %c0_4 = arith.constant 0 : index
    %c0_5 = arith.constant 0 : index
    %c0_6 = arith.constant 0 : index
    %c0_7 = arith.constant 0 : index
    %10 = vector.load %arg3[%c0_4, %c0_5, %c0_6, %c0_7] : memref<1x4x4x128xbf16, #tpu.memory_space<vmem>>, vector<1x4x4x128xbf16>
    %11 = vector.shape_cast %10 : vector<1x4x4x128xbf16> to vector<4x4x128xbf16>
    %12 = vector.shape_cast %9 : vector<4x4x128xbf16> to vector<1x4x4x128xbf16>
    tpu.vector_store %arg3[%c0_4, %c0_5, %c0_6, %c0_7], %12 {strides = array<i32>} : memref<1x4x4x128xbf16, #tpu.memory_space<vmem>>, vector<1x4x4x128xbf16>,
    return
  }
  func.func @transform_0(%arg0: i32, %arg1: i32) -> (i32, i32, i32, i32, i32) {
    %c0_i32 = arith.constant 0 : i32
    %c0_i32_0 = arith.constant 0 : i32
    %c0_i32_1 = arith.constant 0 : i32
    %c0_i32_2 = arith.constant 0 : i32
    return %arg0, %arg1, %c0_i32, %c0_i32_0, %c0_i32_1 : i32, i32, i32, i32, i32
  }
  func.func @transform_1(%arg0: i32, %arg1: i32) -> (i32, i32, i32, i32) {
    %c0_i32 = arith.constant 0 : i32
    %c0_i32_0 = arith.constant 0 : i32
    %c0_i32_1 = arith.constant 0 : i32
    return %arg0, %arg1, %c0_i32, %c0_i32_0 : i32, i32, i32, i32
  }
}

module attributes {stable_mosaic.version = 11 : i64} {
  func.func @_conv3x3_kernel(%arg0: i32, %arg1: memref<1x42x128xbf16, #tpu.memory_space<vmem>>, %arg2: memref<9x128x256xbf16, #tpu.memory_space<vmem>>, %arg3: memref<1x256xf32, #tpu.memory_space<vmem>>, %arg4: memref<1x24x256xbf16, #tpu.memory_space<vmem>>) attributes {dimension_semantics = [#tpu.dimension_semantics<parallel>], iteration_bounds = array<i64: 8>, scalar_prefetch = 0 : i64, scratch_operands = 0 : i64, tpu.core_type = #tpu.core_type<tc>, window_params = [{transform_indices = @transform_0, window_bounds = array<i64: 1, 42, 128>}, {pipeline_mode = #tpu.pipeline_mode<synchronous>, transform_indices = @transform_1, window_bounds = array<i64: 9, 128, 256>}, {pipeline_mode = #tpu.pipeline_mode<synchronous>, transform_indices = @transform_2, window_bounds = array<i64: 1, 256>}, {transform_indices = @transform_3, window_bounds = array<i64: 1, 24, 256>}]} {
    %c0 = arith.constant 0 : index
    %c0_0 = arith.constant 0 : index
    %c0_1 = arith.constant 0 : index
    %0 = vector.load %arg1[%c0, %c0_0, %c0_1] : memref<1x42x128xbf16, #tpu.memory_space<vmem>>, vector<1x42x128xbf16>
    %1 = vector.shape_cast %0 : vector<1x42x128xbf16> to vector<42x128xbf16>
    %2 = arith.extf %1 : vector<42x128xbf16> to vector<42x128xf32>
    %cst = arith.constant 0.000000e+00 : f32
    %3 = vector.broadcast %cst : f32 to vector<24x256xf32>
    %4 = vector.extract_strided_slice %2 {offsets = [0, 0], sizes = [24, 128], strides = [1, 1]} : vector<42x128xf32> to vector<24x128xf32>
    %5 = arith.truncf %4 : vector<24x128xf32> to vector<24x128xbf16>
    %c0_2 = arith.constant 0 : index
    %c0_3 = arith.constant 0 : index
    %c0_4 = arith.constant 0 : index
    %6 = vector.load %arg2[%c0_2, %c0_3, %c0_4] : memref<9x128x256xbf16, #tpu.memory_space<vmem>>, vector<1x128x256xbf16>
    %7 = vector.shape_cast %6 : vector<1x128x256xbf16> to vector<128x256xbf16>
    %cst_5 = arith.constant dense<0.000000e+00> : vector<24x256xf32>
    %8 = tpu.matmul %5, %7, %cst_5 {dimension_numbers = #tpu.dot_dimension_numbers<[1], [0], [0], [1], [0, 0, 1, 1], [], []>} : vector<24x128xbf16>, vector<128x256xbf16>, vector<24x256xf32> -> vector<24x256xf32>
    %9 = arith.addf %3, %8 : vector<24x256xf32>
    %10 = vector.extract_strided_slice %2 {offsets = [1, 0], sizes = [24, 128], strides = [1, 1]} : vector<42x128xf32> to vector<24x128xf32>
    %11 = arith.truncf %10 : vector<24x128xf32> to vector<24x128xbf16>
    %c1 = arith.constant 1 : index
    %c0_6 = arith.constant 0 : index
    %c0_7 = arith.constant 0 : index
    %12 = vector.load %arg2[%c1, %c0_6, %c0_7] : memref<9x128x256xbf16, #tpu.memory_space<vmem>>, vector<1x128x256xbf16>
    %13 = vector.shape_cast %12 : vector<1x128x256xbf16> to vector<128x256xbf16>
    %cst_8 = arith.constant dense<0.000000e+00> : vector<24x256xf32>
    %14 = tpu.matmul %11, %13, %cst_8 {dimension_numbers = #tpu.dot_dimension_numbers<[1], [0], [0], [1], [0, 0, 1, 1], [], []>} : vector<24x128xbf16>, vector<128x256xbf16>, vector<24x256xf32> -> vector<24x256xf32>
    %15 = arith.addf %9, %14 : vector<24x256xf32>
    %16 = vector.extract_strided_slice %2 {offsets = [2, 0], sizes = [24, 128], strides = [1, 1]} : vector<42x128xf32> to vector<24x128xf32>
    %17 = arith.truncf %16 : vector<24x128xf32> to vector<24x128xbf16>
    %c2 = arith.constant 2 : index
    %c0_9 = arith.constant 0 : index
    %c0_10 = arith.constant 0 : index
    %18 = vector.load %arg2[%c2, %c0_9, %c0_10] : memref<9x128x256xbf16, #tpu.memory_space<vmem>>, vector<1x128x256xbf16>
    %19 = vector.shape_cast %18 : vector<1x128x256xbf16> to vector<128x256xbf16>
    %cst_11 = arith.constant dense<0.000000e+00> : vector<24x256xf32>
    %20 = tpu.matmul %17, %19, %cst_11 {dimension_numbers = #tpu.dot_dimension_numbers<[1], [0], [0], [1], [0, 0, 1, 1], [], []>} : vector<24x128xbf16>, vector<128x256xbf16>, vector<24x256xf32> -> vector<24x256xf32>
    %21 = arith.addf %15, %20 : vector<24x256xf32>
    %22 = vector.extract_strided_slice %2 {offsets = [6, 0], sizes = [24, 128], strides = [1, 1]} : vector<42x128xf32> to vector<24x128xf32>
    %23 = arith.truncf %22 : vector<24x128xf32> to vector<24x128xbf16>
    %c3 = arith.constant 3 : index
    %c0_12 = arith.constant 0 : index
    %c0_13 = arith.constant 0 : index
    %24 = vector.load %arg2[%c3, %c0_12, %c0_13] : memref<9x128x256xbf16, #tpu.memory_space<vmem>>, vector<1x128x256xbf16>
    %25 = vector.shape_cast %24 : vector<1x128x256xbf16> to vector<128x256xbf16>
    %cst_14 = arith.constant dense<0.000000e+00> : vector<24x256xf32>
    %26 = tpu.matmul %23, %25, %cst_14 {dimension_numbers = #tpu.dot_dimension_numbers<[1], [0], [0], [1], [0, 0, 1, 1], [], []>} : vector<24x128xbf16>, vector<128x256xbf16>, vector<24x256xf32> -> vector<24x256xf32>
    %27 = arith.addf %21, %26 : vector<24x256xf32>
    %28 = vector.extract_strided_slice %2 {offsets = [7, 0], sizes = [24, 128], strides = [1, 1]} : vector<42x128xf32> to vector<24x128xf32>
    %29 = arith.truncf %28 : vector<24x128xf32> to vector<24x128xbf16>
    %c4 = arith.constant 4 : index
    %c0_15 = arith.constant 0 : index
    %c0_16 = arith.constant 0 : index
    %30 = vector.load %arg2[%c4, %c0_15, %c0_16] : memref<9x128x256xbf16, #tpu.memory_space<vmem>>, vector<1x128x256xbf16>
    %31 = vector.shape_cast %30 : vector<1x128x256xbf16> to vector<128x256xbf16>
    %cst_17 = arith.constant dense<0.000000e+00> : vector<24x256xf32>
    %32 = tpu.matmul %29, %31, %cst_17 {dimension_numbers = #tpu.dot_dimension_numbers<[1], [0], [0], [1], [0, 0, 1, 1], [], []>} : vector<24x128xbf16>, vector<128x256xbf16>, vector<24x256xf32> -> vector<24x256xf32>
    %33 = arith.addf %27, %32 : vector<24x256xf32>
    %34 = vector.extract_strided_slice %2 {offsets = [8, 0], sizes = [24, 128], strides = [1, 1]} : vector<42x128xf32> to vector<24x128xf32>
    %35 = arith.truncf %34 : vector<24x128xf32> to vector<24x128xbf16>
    %c5 = arith.constant 5 : index
    %c0_18 = arith.constant 0 : index
    %c0_19 = arith.constant 0 : index
    %36 = vector.load %arg2[%c5, %c0_18, %c0_19] : memref<9x128x256xbf16, #tpu.memory_space<vmem>>, vector<1x128x256xbf16>
    %37 = vector.shape_cast %36 : vector<1x128x256xbf16> to vector<128x256xbf16>
    %cst_20 = arith.constant dense<0.000000e+00> : vector<24x256xf32>
    %38 = tpu.matmul %35, %37, %cst_20 {dimension_numbers = #tpu.dot_dimension_numbers<[1], [0], [0], [1], [0, 0, 1, 1], [], []>} : vector<24x128xbf16>, vector<128x256xbf16>, vector<24x256xf32> -> vector<24x256xf32>
    %39 = arith.addf %33, %38 : vector<24x256xf32>
    %40 = vector.extract_strided_slice %2 {offsets = [12, 0], sizes = [24, 128], strides = [1, 1]} : vector<42x128xf32> to vector<24x128xf32>
    %41 = arith.truncf %40 : vector<24x128xf32> to vector<24x128xbf16>
    %c6 = arith.constant 6 : index
    %c0_21 = arith.constant 0 : index
    %c0_22 = arith.constant 0 : index
    %42 = vector.load %arg2[%c6, %c0_21, %c0_22] : memref<9x128x256xbf16, #tpu.memory_space<vmem>>, vector<1x128x256xbf16>
    %43 = vector.shape_cast %42 : vector<1x128x256xbf16> to vector<128x256xbf16>
    %cst_23 = arith.constant dense<0.000000e+00> : vector<24x256xf32>
    %44 = tpu.matmul %41, %43, %cst_23 {dimension_numbers = #tpu.dot_dimension_numbers<[1], [0], [0], [1], [0, 0, 1, 1], [], []>} : vector<24x128xbf16>, vector<128x256xbf16>, vector<24x256xf32> -> vector<24x256xf32>
    %45 = arith.addf %39, %44 : vector<24x256xf32>
    %46 = vector.extract_strided_slice %2 {offsets = [13, 0], sizes = [24, 128], strides = [1, 1]} : vector<42x128xf32> to vector<24x128xf32>
    %47 = arith.truncf %46 : vector<24x128xf32> to vector<24x128xbf16>
    %c7 = arith.constant 7 : index
    %c0_24 = arith.constant 0 : index
    %c0_25 = arith.constant 0 : index
    %48 = vector.load %arg2[%c7, %c0_24, %c0_25] : memref<9x128x256xbf16, #tpu.memory_space<vmem>>, vector<1x128x256xbf16>
    %49 = vector.shape_cast %48 : vector<1x128x256xbf16> to vector<128x256xbf16>
    %cst_26 = arith.constant dense<0.000000e+00> : vector<24x256xf32>
    %50 = tpu.matmul %47, %49, %cst_26 {dimension_numbers = #tpu.dot_dimension_numbers<[1], [0], [0], [1], [0, 0, 1, 1], [], []>} : vector<24x128xbf16>, vector<128x256xbf16>, vector<24x256xf32> -> vector<24x256xf32>
    %51 = arith.addf %45, %50 : vector<24x256xf32>
    %52 = vector.extract_strided_slice %2 {offsets = [14, 0], sizes = [24, 128], strides = [1, 1]} : vector<42x128xf32> to vector<24x128xf32>
    %53 = arith.truncf %52 : vector<24x128xf32> to vector<24x128xbf16>
    %c8 = arith.constant 8 : index
    %c0_27 = arith.constant 0 : index
    %c0_28 = arith.constant 0 : index
    %54 = vector.load %arg2[%c8, %c0_27, %c0_28] : memref<9x128x256xbf16, #tpu.memory_space<vmem>>, vector<1x128x256xbf16>
    %55 = vector.shape_cast %54 : vector<1x128x256xbf16> to vector<128x256xbf16>
    %cst_29 = arith.constant dense<0.000000e+00> : vector<24x256xf32>
    %56 = tpu.matmul %53, %55, %cst_29 {dimension_numbers = #tpu.dot_dimension_numbers<[1], [0], [0], [1], [0, 0, 1, 1], [], []>} : vector<24x128xbf16>, vector<128x256xbf16>, vector<24x256xf32> -> vector<24x256xf32>
    %57 = arith.addf %51, %56 : vector<24x256xf32>
    %c0_30 = arith.constant 0 : index
    %c0_31 = arith.constant 0 : index
    %58 = vector.load %arg3[%c0_30, %c0_31] : memref<1x256xf32, #tpu.memory_space<vmem>>, vector<1x256xf32>
    %59 = vector.broadcast %58 : vector<1x256xf32> to vector<24x256xf32>
    %60 = arith.addf %57, %59 : vector<24x256xf32>
    %cst_32 = arith.constant 0.000000e+00 : f32
    %61 = vector.broadcast %cst_32 : f32 to vector<24x256xf32>
    %62 = arith.maximumf %60, %61 : vector<24x256xf32>
    %63 = arith.truncf %62 : vector<24x256xf32> to vector<24x256xbf16>
    %c0_33 = arith.constant 0 : index
    %c0_34 = arith.constant 0 : index
    %c0_35 = arith.constant 0 : index
    %64 = vector.load %arg4[%c0_33, %c0_34, %c0_35] : memref<1x24x256xbf16, #tpu.memory_space<vmem>>, vector<1x24x256xbf16>
    %65 = vector.shape_cast %64 : vector<1x24x256xbf16> to vector<24x256xbf16>
    %66 = vector.shape_cast %63 : vector<24x256xbf16> to vector<1x24x256xbf16>
    tpu.vector_store %arg4[%c0_33, %c0_34, %c0_35], %66 {strides = array<i32>} : memref<1x24x256xbf16, #tpu.memory_space<vmem>>, vector<1x24x256xbf16>,
    return
  }
  func.func @transform_0(%arg0: i32) -> (i32, i32, i32) {
    %c0_i32 = arith.constant 0 : i32
    %c0_i32_0 = arith.constant 0 : i32
    %c0_i32_1 = arith.constant 0 : i32
    return %arg0, %c0_i32, %c0_i32_0 : i32, i32, i32
  }
  func.func @transform_1(%arg0: i32) -> (i32, i32, i32) {
    %c0_i32 = arith.constant 0 : i32
    %c0_i32_0 = arith.constant 0 : i32
    %c0_i32_1 = arith.constant 0 : i32
    %c0_i32_2 = arith.constant 0 : i32
    return %c0_i32, %c0_i32_0, %c0_i32_1 : i32, i32, i32
  }
  func.func @transform_2(%arg0: i32) -> (i32, i32) {
    %c0_i32 = arith.constant 0 : i32
    %c0_i32_0 = arith.constant 0 : i32
    %c0_i32_1 = arith.constant 0 : i32
    return %c0_i32, %c0_i32_0 : i32, i32
  }
  func.func @transform_3(%arg0: i32) -> (i32, i32, i32) {
    %c0_i32 = arith.constant 0 : i32
    %c0_i32_0 = arith.constant 0 : i32
    %c0_i32_1 = arith.constant 0 : i32
    return %arg0, %c0_i32, %c0_i32_0 : i32, i32, i32
  }
}

module attributes {stable_mosaic.version = 11 : i64} {
  func.func @_conv3x3_kernel(%arg0: i32, %arg1: memref<1x42x256xbf16, #tpu.memory_space<vmem>>, %arg2: memref<9x256x256xbf16, #tpu.memory_space<vmem>>, %arg3: memref<1x256xf32, #tpu.memory_space<vmem>>, %arg4: memref<1x24x256xbf16, #tpu.memory_space<vmem>>) attributes {dimension_semantics = [#tpu.dimension_semantics<parallel>], iteration_bounds = array<i64: 8>, scalar_prefetch = 0 : i64, scratch_operands = 0 : i64, tpu.core_type = #tpu.core_type<tc>, window_params = [{transform_indices = @transform_0, window_bounds = array<i64: 1, 42, 256>}, {pipeline_mode = #tpu.pipeline_mode<synchronous>, transform_indices = @transform_1, window_bounds = array<i64: 9, 256, 256>}, {pipeline_mode = #tpu.pipeline_mode<synchronous>, transform_indices = @transform_2, window_bounds = array<i64: 1, 256>}, {transform_indices = @transform_3, window_bounds = array<i64: 1, 24, 256>}]} {
    %c0 = arith.constant 0 : index
    %c0_0 = arith.constant 0 : index
    %c0_1 = arith.constant 0 : index
    %0 = vector.load %arg1[%c0, %c0_0, %c0_1] : memref<1x42x256xbf16, #tpu.memory_space<vmem>>, vector<1x42x256xbf16>
    %1 = vector.shape_cast %0 : vector<1x42x256xbf16> to vector<42x256xbf16>
    %2 = arith.extf %1 : vector<42x256xbf16> to vector<42x256xf32>
    %cst = arith.constant 0.000000e+00 : f32
    %3 = vector.broadcast %cst : f32 to vector<24x256xf32>
    %4 = vector.extract_strided_slice %2 {offsets = [0, 0], sizes = [24, 256], strides = [1, 1]} : vector<42x256xf32> to vector<24x256xf32>
    %5 = arith.truncf %4 : vector<24x256xf32> to vector<24x256xbf16>
    %c0_2 = arith.constant 0 : index
    %c0_3 = arith.constant 0 : index
    %c0_4 = arith.constant 0 : index
    %6 = vector.load %arg2[%c0_2, %c0_3, %c0_4] : memref<9x256x256xbf16, #tpu.memory_space<vmem>>, vector<1x256x256xbf16>
    %7 = vector.shape_cast %6 : vector<1x256x256xbf16> to vector<256x256xbf16>
    %cst_5 = arith.constant dense<0.000000e+00> : vector<24x256xf32>
    %8 = tpu.matmul %5, %7, %cst_5 {dimension_numbers = #tpu.dot_dimension_numbers<[1], [0], [0], [1], [0, 0, 1, 1], [], []>} : vector<24x256xbf16>, vector<256x256xbf16>, vector<24x256xf32> -> vector<24x256xf32>
    %9 = arith.addf %3, %8 : vector<24x256xf32>
    %10 = vector.extract_strided_slice %2 {offsets = [1, 0], sizes = [24, 256], strides = [1, 1]} : vector<42x256xf32> to vector<24x256xf32>
    %11 = arith.truncf %10 : vector<24x256xf32> to vector<24x256xbf16>
    %c1 = arith.constant 1 : index
    %c0_6 = arith.constant 0 : index
    %c0_7 = arith.constant 0 : index
    %12 = vector.load %arg2[%c1, %c0_6, %c0_7] : memref<9x256x256xbf16, #tpu.memory_space<vmem>>, vector<1x256x256xbf16>
    %13 = vector.shape_cast %12 : vector<1x256x256xbf16> to vector<256x256xbf16>
    %cst_8 = arith.constant dense<0.000000e+00> : vector<24x256xf32>
    %14 = tpu.matmul %11, %13, %cst_8 {dimension_numbers = #tpu.dot_dimension_numbers<[1], [0], [0], [1], [0, 0, 1, 1], [], []>} : vector<24x256xbf16>, vector<256x256xbf16>, vector<24x256xf32> -> vector<24x256xf32>
    %15 = arith.addf %9, %14 : vector<24x256xf32>
    %16 = vector.extract_strided_slice %2 {offsets = [2, 0], sizes = [24, 256], strides = [1, 1]} : vector<42x256xf32> to vector<24x256xf32>
    %17 = arith.truncf %16 : vector<24x256xf32> to vector<24x256xbf16>
    %c2 = arith.constant 2 : index
    %c0_9 = arith.constant 0 : index
    %c0_10 = arith.constant 0 : index
    %18 = vector.load %arg2[%c2, %c0_9, %c0_10] : memref<9x256x256xbf16, #tpu.memory_space<vmem>>, vector<1x256x256xbf16>
    %19 = vector.shape_cast %18 : vector<1x256x256xbf16> to vector<256x256xbf16>
    %cst_11 = arith.constant dense<0.000000e+00> : vector<24x256xf32>
    %20 = tpu.matmul %17, %19, %cst_11 {dimension_numbers = #tpu.dot_dimension_numbers<[1], [0], [0], [1], [0, 0, 1, 1], [], []>} : vector<24x256xbf16>, vector<256x256xbf16>, vector<24x256xf32> -> vector<24x256xf32>
    %21 = arith.addf %15, %20 : vector<24x256xf32>
    %22 = vector.extract_strided_slice %2 {offsets = [6, 0], sizes = [24, 256], strides = [1, 1]} : vector<42x256xf32> to vector<24x256xf32>
    %23 = arith.truncf %22 : vector<24x256xf32> to vector<24x256xbf16>
    %c3 = arith.constant 3 : index
    %c0_12 = arith.constant 0 : index
    %c0_13 = arith.constant 0 : index
    %24 = vector.load %arg2[%c3, %c0_12, %c0_13] : memref<9x256x256xbf16, #tpu.memory_space<vmem>>, vector<1x256x256xbf16>
    %25 = vector.shape_cast %24 : vector<1x256x256xbf16> to vector<256x256xbf16>
    %cst_14 = arith.constant dense<0.000000e+00> : vector<24x256xf32>
    %26 = tpu.matmul %23, %25, %cst_14 {dimension_numbers = #tpu.dot_dimension_numbers<[1], [0], [0], [1], [0, 0, 1, 1], [], []>} : vector<24x256xbf16>, vector<256x256xbf16>, vector<24x256xf32> -> vector<24x256xf32>
    %27 = arith.addf %21, %26 : vector<24x256xf32>
    %28 = vector.extract_strided_slice %2 {offsets = [7, 0], sizes = [24, 256], strides = [1, 1]} : vector<42x256xf32> to vector<24x256xf32>
    %29 = arith.truncf %28 : vector<24x256xf32> to vector<24x256xbf16>
    %c4 = arith.constant 4 : index
    %c0_15 = arith.constant 0 : index
    %c0_16 = arith.constant 0 : index
    %30 = vector.load %arg2[%c4, %c0_15, %c0_16] : memref<9x256x256xbf16, #tpu.memory_space<vmem>>, vector<1x256x256xbf16>
    %31 = vector.shape_cast %30 : vector<1x256x256xbf16> to vector<256x256xbf16>
    %cst_17 = arith.constant dense<0.000000e+00> : vector<24x256xf32>
    %32 = tpu.matmul %29, %31, %cst_17 {dimension_numbers = #tpu.dot_dimension_numbers<[1], [0], [0], [1], [0, 0, 1, 1], [], []>} : vector<24x256xbf16>, vector<256x256xbf16>, vector<24x256xf32> -> vector<24x256xf32>
    %33 = arith.addf %27, %32 : vector<24x256xf32>
    %34 = vector.extract_strided_slice %2 {offsets = [8, 0], sizes = [24, 256], strides = [1, 1]} : vector<42x256xf32> to vector<24x256xf32>
    %35 = arith.truncf %34 : vector<24x256xf32> to vector<24x256xbf16>
    %c5 = arith.constant 5 : index
    %c0_18 = arith.constant 0 : index
    %c0_19 = arith.constant 0 : index
    %36 = vector.load %arg2[%c5, %c0_18, %c0_19] : memref<9x256x256xbf16, #tpu.memory_space<vmem>>, vector<1x256x256xbf16>
    %37 = vector.shape_cast %36 : vector<1x256x256xbf16> to vector<256x256xbf16>
    %cst_20 = arith.constant dense<0.000000e+00> : vector<24x256xf32>
    %38 = tpu.matmul %35, %37, %cst_20 {dimension_numbers = #tpu.dot_dimension_numbers<[1], [0], [0], [1], [0, 0, 1, 1], [], []>} : vector<24x256xbf16>, vector<256x256xbf16>, vector<24x256xf32> -> vector<24x256xf32>
    %39 = arith.addf %33, %38 : vector<24x256xf32>
    %40 = vector.extract_strided_slice %2 {offsets = [12, 0], sizes = [24, 256], strides = [1, 1]} : vector<42x256xf32> to vector<24x256xf32>
    %41 = arith.truncf %40 : vector<24x256xf32> to vector<24x256xbf16>
    %c6 = arith.constant 6 : index
    %c0_21 = arith.constant 0 : index
    %c0_22 = arith.constant 0 : index
    %42 = vector.load %arg2[%c6, %c0_21, %c0_22] : memref<9x256x256xbf16, #tpu.memory_space<vmem>>, vector<1x256x256xbf16>
    %43 = vector.shape_cast %42 : vector<1x256x256xbf16> to vector<256x256xbf16>
    %cst_23 = arith.constant dense<0.000000e+00> : vector<24x256xf32>
    %44 = tpu.matmul %41, %43, %cst_23 {dimension_numbers = #tpu.dot_dimension_numbers<[1], [0], [0], [1], [0, 0, 1, 1], [], []>} : vector<24x256xbf16>, vector<256x256xbf16>, vector<24x256xf32> -> vector<24x256xf32>
    %45 = arith.addf %39, %44 : vector<24x256xf32>
    %46 = vector.extract_strided_slice %2 {offsets = [13, 0], sizes = [24, 256], strides = [1, 1]} : vector<42x256xf32> to vector<24x256xf32>
    %47 = arith.truncf %46 : vector<24x256xf32> to vector<24x256xbf16>
    %c7 = arith.constant 7 : index
    %c0_24 = arith.constant 0 : index
    %c0_25 = arith.constant 0 : index
    %48 = vector.load %arg2[%c7, %c0_24, %c0_25] : memref<9x256x256xbf16, #tpu.memory_space<vmem>>, vector<1x256x256xbf16>
    %49 = vector.shape_cast %48 : vector<1x256x256xbf16> to vector<256x256xbf16>
    %cst_26 = arith.constant dense<0.000000e+00> : vector<24x256xf32>
    %50 = tpu.matmul %47, %49, %cst_26 {dimension_numbers = #tpu.dot_dimension_numbers<[1], [0], [0], [1], [0, 0, 1, 1], [], []>} : vector<24x256xbf16>, vector<256x256xbf16>, vector<24x256xf32> -> vector<24x256xf32>
    %51 = arith.addf %45, %50 : vector<24x256xf32>
    %52 = vector.extract_strided_slice %2 {offsets = [14, 0], sizes = [24, 256], strides = [1, 1]} : vector<42x256xf32> to vector<24x256xf32>
    %53 = arith.truncf %52 : vector<24x256xf32> to vector<24x256xbf16>
    %c8 = arith.constant 8 : index
    %c0_27 = arith.constant 0 : index
    %c0_28 = arith.constant 0 : index
    %54 = vector.load %arg2[%c8, %c0_27, %c0_28] : memref<9x256x256xbf16, #tpu.memory_space<vmem>>, vector<1x256x256xbf16>
    %55 = vector.shape_cast %54 : vector<1x256x256xbf16> to vector<256x256xbf16>
    %cst_29 = arith.constant dense<0.000000e+00> : vector<24x256xf32>
    %56 = tpu.matmul %53, %55, %cst_29 {dimension_numbers = #tpu.dot_dimension_numbers<[1], [0], [0], [1], [0, 0, 1, 1], [], []>} : vector<24x256xbf16>, vector<256x256xbf16>, vector<24x256xf32> -> vector<24x256xf32>
    %57 = arith.addf %51, %56 : vector<24x256xf32>
    %c0_30 = arith.constant 0 : index
    %c0_31 = arith.constant 0 : index
    %58 = vector.load %arg3[%c0_30, %c0_31] : memref<1x256xf32, #tpu.memory_space<vmem>>, vector<1x256xf32>
    %59 = vector.broadcast %58 : vector<1x256xf32> to vector<24x256xf32>
    %60 = arith.addf %57, %59 : vector<24x256xf32>
    %61 = arith.truncf %60 : vector<24x256xf32> to vector<24x256xbf16>
    %c0_32 = arith.constant 0 : index
    %c0_33 = arith.constant 0 : index
    %c0_34 = arith.constant 0 : index
    %62 = vector.load %arg4[%c0_32, %c0_33, %c0_34] : memref<1x24x256xbf16, #tpu.memory_space<vmem>>, vector<1x24x256xbf16>
    %63 = vector.shape_cast %62 : vector<1x24x256xbf16> to vector<24x256xbf16>
    %64 = vector.shape_cast %61 : vector<24x256xbf16> to vector<1x24x256xbf16>
    tpu.vector_store %arg4[%c0_32, %c0_33, %c0_34], %64 {strides = array<i32>} : memref<1x24x256xbf16, #tpu.memory_space<vmem>>, vector<1x24x256xbf16>,
    return
  }
  func.func @transform_0(%arg0: i32) -> (i32, i32, i32) {
    %c0_i32 = arith.constant 0 : i32
    %c0_i32_0 = arith.constant 0 : i32
    %c0_i32_1 = arith.constant 0 : i32
    return %arg0, %c0_i32, %c0_i32_0 : i32, i32, i32
  }
  func.func @transform_1(%arg0: i32) -> (i32, i32, i32) {
    %c0_i32 = arith.constant 0 : i32
    %c0_i32_0 = arith.constant 0 : i32
    %c0_i32_1 = arith.constant 0 : i32
    %c0_i32_2 = arith.constant 0 : i32
    return %c0_i32, %c0_i32_0, %c0_i32_1 : i32, i32, i32
  }
  func.func @transform_2(%arg0: i32) -> (i32, i32) {
    %c0_i32 = arith.constant 0 : i32
    %c0_i32_0 = arith.constant 0 : i32
    %c0_i32_1 = arith.constant 0 : i32
    return %c0_i32, %c0_i32_0 : i32, i32
  }
  func.func @transform_3(%arg0: i32) -> (i32, i32, i32) {
    %c0_i32 = arith.constant 0 : i32
    %c0_i32_0 = arith.constant 0 : i32
    %c0_i32_1 = arith.constant 0 : i32
    return %arg0, %c0_i32, %c0_i32_0 : i32, i32, i32
  }
}

module attributes {stable_mosaic.version = 11 : i64} {
  func.func @_mse_kernel(%arg0: i32, %arg1: memref<64x256xbf16, #tpu.memory_space<vmem>>, %arg2: memref<64x256xbf16, #tpu.memory_space<vmem>>, %arg3: memref<1x1xf32, #tpu.memory_space<smem>>, %arg4: memref<1xf32, #tpu.memory_space<smem>>) attributes {dimension_semantics = [#tpu.dimension_semantics<arbitrary>], iteration_bounds = array<i64: 1>, scalar_prefetch = 0 : i64, scratch_operands = 1 : i64, tpu.core_type = #tpu.core_type<tc>, window_params = [{transform_indices = @transform_0, window_bounds = array<i64: 64, 256>}, {transform_indices = @transform_1, window_bounds = array<i64: 64, 256>}, {transform_indices = @transform_2, window_bounds = array<i64: 1, 1>}]} {
    %c0_i32 = arith.constant 0 : i32
    %0 = arith.cmpi eq, %arg0, %c0_i32 : i32
    %1 = arith.extui %0 : i1 to i32
    %c0_i32_0 = arith.constant 0 : i32
    %2 = arith.cmpi ne, %1, %c0_i32_0 : i32
    scf.if %2 {
      %cst_8 = arith.constant 0.000000e+00 : f32
      %c0_9 = arith.constant 0 : index
      %19 = memref.load %arg4[%c0_9] : memref<1xf32, #tpu.memory_space<smem>>
      memref.store %cst_8, %arg4[%c0_9] : memref<1xf32, #tpu.memory_space<smem>>
    } else {
    }
    %c0 = arith.constant 0 : index
    %c0_1 = arith.constant 0 : index
    %3 = vector.load %arg1[%c0, %c0_1] : memref<64x256xbf16, #tpu.memory_space<vmem>>, vector<64x256xbf16>
    %4 = arith.extf %3 : vector<64x256xbf16> to vector<64x256xf32>
    %c0_2 = arith.constant 0 : index
    %c0_3 = arith.constant 0 : index
    %5 = vector.load %arg2[%c0_2, %c0_3] : memref<64x256xbf16, #tpu.memory_space<vmem>>, vector<64x256xbf16>
    %6 = arith.extf %5 : vector<64x256xbf16> to vector<64x256xf32>
    %7 = arith.subf %4, %6 : vector<64x256xf32>
    %c0_4 = arith.constant 0 : index
    %8 = memref.load %arg4[%c0_4] : memref<1xf32, #tpu.memory_space<smem>>
    %9 = arith.mulf %7, %7 : vector<64x256xf32>
    %10 = vector.shape_cast %9 : vector<64x256xf32> to vector<1x64x256xf32>
    %cst = arith.constant dense<0.000000e+00> : vector<1xf32>
    %11 = vector.multi_reduction <add>, %10, %cst [1, 2] : vector<1x64x256xf32> to vector<1xf32>
    %12 = vector.shape_cast %11 : vector<1xf32> to vector<1x1x1xf32>
    %13 = vector.extract %12[0, 0, 0] : f32 from vector<1x1x1xf32>
    %14 = arith.addf %8, %13 : f32
    %c0_5 = arith.constant 0 : index
    %15 = memref.load %arg4[%c0_5] : memref<1xf32, #tpu.memory_space<smem>>
    memref.store %14, %arg4[%c0_5] : memref<1xf32, #tpu.memory_space<smem>>
    %c0_i32_6 = arith.constant 0 : i32
    %16 = arith.cmpi eq, %arg0, %c0_i32_6 : i32
    %17 = arith.extui %16 : i1 to i32
    %c0_i32_7 = arith.constant 0 : i32
    %18 = arith.cmpi ne, %17, %c0_i32_7 : i32
    scf.if %18 {
      %c0_8 = arith.constant 0 : index
      %19 = memref.load %arg4[%c0_8] : memref<1xf32, #tpu.memory_space<smem>>
      %cst_9 = arith.constant 6.10351563E-5 : f32
      %20 = arith.mulf %19, %cst_9 : f32
      %c0_10 = arith.constant 0 : index
      %c0_11 = arith.constant 0 : index
      %21 = memref.load %arg3[%c0_10, %c0_11] : memref<1x1xf32, #tpu.memory_space<smem>>
      memref.store %20, %arg3[%c0_10, %c0_11] : memref<1x1xf32, #tpu.memory_space<smem>>
    } else {
    }
    return
  }
  func.func @transform_0(%arg0: i32) -> (i32, i32) {
    %c0_i32 = arith.constant 0 : i32
    %c0_i32_0 = arith.constant 0 : i32
    return %arg0, %c0_i32 : i32, i32
  }
  func.func @transform_1(%arg0: i32) -> (i32, i32) {
    %c0_i32 = arith.constant 0 : i32
    %c0_i32_0 = arith.constant 0 : i32
    return %arg0, %c0_i32 : i32, i32
  }
  func.func @transform_2(%arg0: i32) -> (i32, i32) {
    %c0_i32 = arith.constant 0 : i32
    %c0_i32_0 = arith.constant 0 : i32
    %c0_i32_1 = arith.constant 0 : i32
    return %c0_i32, %c0_i32_0 : i32, i32
  }
}

</mosaic_0001>

<bundles_post_ra>
// kernel: vgg_loss.9
= control target key start
LH: loop header
LB: loop body
LE: loop exit
PB: predicated region body
PF: predicated region fallthrough
CT: control target
= control target key end

     0   :  { %s4195_s12 = smov 0   ;;  %s5579_s0 = inlined_call_operand.vmem [shape: bf16[8,342,8], index: 0, kind: input, shape index: {}]   ;;  %s5580_s1 = inlined_call_operand.vmem [shape: bf16[9,8,64], index: 1, kind: input, shape index: {}]   ;;  %s5581_s2 = inlined_call_operand.vmem [shape: f32[1,64], index: 2, kind: input, shape index: {}]   ;;  %s5582_s3 = inlined_call_operand.vmem [shape: bf16[8,288,64], index: 3, kind: output, shape index: {}]  }
   0x1 LB: > { %s3321_s13 = sadd.s32 4294967295, %s4173_s12   ;;  %p3325_p0 = scmp.ge.s32.totalorder %s4173_s12, 1  ;;  %s4173_s12 = sphi %s4195_s12, %s13_s12  }
   0x2   : > { %p137_p1 = scmp.lt.s32.totalorder %s4173_s12, 9 }
   0x4   : > { %p138_p2 = pnand %p3325_p0, %p137_p1 }
   0x6   : > { %141 = sbr.rel (%p138_p2) target bundleno = 554 (0x22a), region = 32 }
   0xb   : > { %v3347_v0 = vld [vmem:[%s5580_s1 + $0x4] sm:$0xf]  ;;  %vm480_vm0 = vcmask 1043456   ;;  %p161_p3 = scmp.lt.s32.totalorder %s3321_s13, 7  ;;  %v3384_v2 = vld [vmem:[%s5580_s1 + $0x8] sm:$0xf] }
   0xc   : > { %4111 = vmatprep.subr.msk.bf16.mxu0 %vm480_vm0, %v3347_v0  ;;  %4112 = vmatprep.subr.msk.bf16.mxu1 %vm480_vm0, %v3347_v0  ;;  %v482_v1 = vsel %vm480_vm0, %v3347_v0, 0  ;;  %v272_v3 = vld [vmem:[%s5580_s1] sm:$0xf]  ;;  %vm276_vm1 = vsmask.f32 7424  ;;  %vm425_vm2 = vcmask 64512  }
   0xd   : > { %3768 = vmatpush3.bf16.msra.mxu0 %v482_v1  ;;  %4110 = vmatpush3.bf16.msra.mxu1 %v482_v1  ;;  %s5708_s13 = smov (!%p161_p3, %s3321_s13), 7  ;;  %v991_v12 = vsel %vm480_vm0, %v3384_v2, 0  ;;  %v698_v16 = vsel %vm480_vm0, %v272_v3, 0  ;;  %v4284_v32 = vld [vmem:[%s5580_s1 + $0x10] sm:$0xf]  ;;  %vm898_vm3 = vcmask 1046528  }
   0xe   : > { %4114 = vmatprep.subr.msk.bf16.mxu0 %vm480_vm0, %v3384_v2  ;;  %4113 = vmatprep.subr.msk.bf16.mxu1 %vm480_vm0, %v272_v3  ;;  %s4121_s20 = smul.u32 172, %s5708_s13  ;;  %v4312_v43 = vld [vmem:[%s5580_s1 + $0xc] sm:$0xf]  ;;  %vm1440_vm4 = vsmask.f32 6400  ;;  %vm1798_vm5 = vcmask 1045504  }
   0xf   : > { %vm2340_vm6 = vsmask.f32 5376  ;;  %vm2698_vm7 = vcmask 1044480   ;;  %s4122_s11 = smul.u32 144, %s5708_s13  ;;  %vm3229_vm8 = vcmask 519168  }
  0x10   : > { %s4223_s23 = scalar_lea.vmem %s5579_s0, %s4121_s20 }
  0x11   : > { %v4226_v4 = vld [vmem:[%s4223_s23] sm:$0xff]   ;;  %v4229_v5 = vld [vmem:[%s4223_s23 + $0x8] sm:$0xff]   ;;  %v4236_v10 = vld [vmem:[%s4223_s23 + $0x50] sm:$0xff]   ;;  %s5436_s16 = scalar_lea.vmem %s5582_s3, %s4122_s11 }
  0x12   : > { %v278_v6 = vshrl.u32 %v4226_v4, 16  ;;  %v280_v7 = vshll.u32 %v4226_v4, 16  ;;  %v5585_v8 = vshll.u32 %v4229_v5, 16  ;;  %v5584_v9 = vshrl.u32 %v4229_v5, 16  ;;  %5619 = vst [vmem:[#allocation2_spill] sm:$0xff] %v4236_v10  ;;  %v4239_v11 = vld [vmem:[%s4223_s23 + $0x58] sm:$0xff]  }
  0x13   : > { %5620 = vst [vmem:[#allocation3_spill] sm:$0xff] %v4239_v11  ;;  %v4245_v15 = vld [vmem:[%s4223_s23 + $0x10] sm:$0xff]   ;;  %v4249_v17 = vshll.u32 %v4236_v10, 16  ;;  %v4252_v18 = vshrl.u32 %v4236_v10, 16  ;;  %v4255_v19 = vshll.u32 %v4239_v11, 16  ;;  %v4258_v20 = vshrl.u32 %v4239_v11, 16 }
  0x14   : > { %v282_v13 = vrot.slane %v280_v7, 1  ;;  %v287_v14 = vrot.slane %v5585_v8, 1  ;;  %v4263_v23 = vshll.u32 %v4245_v15, 16  ;;  %v4266_v24 = vld [vmem:[%s4223_s23 + $0x60] sm:$0xff]   ;;  %v4271_v27 = vld [vmem:[%s4223_s23 + $0x18] sm:$0xff]   ;;  %v4274_v28 = vshrl.u32 %v4245_v15, 16 }
  0x15   : > { %5622 = vst [vmem:[#allocation5_spill] sm:$0xff] %v4266_v24  ;;  %v5583_v25 = vrot.slane %v4249_v17, 1  ;;  %v367_v26 = vrot.slane %v4255_v19, 1  ;;  %v4279_v31 = vshll.u32 %v4266_v24, 16  ;;  %v4292_v35 = vshll.u32 %v4271_v27, 16  ;;  %v4295_v36 = vld [vmem:[%s4223_s23 + $0x68] sm:$0xff]  }
  0x16   : > { %v283_v21 = vor.u32 %v282_v13, %v278_v6  ;;  %v291_v22 = vor.u32 %v5584_v9, %v287_v14  ;;  %5621 = vst [vmem:[#allocation4_spill] sm:$0xff] %v4263_v23  ;;  %5623 = vst [vmem:[#allocation6_spill] sm:$0xff] %v4274_v28  ;;  %v295_v30 = vrot.slane %v4263_v23, 1  ;;  %v4298_v37 = vshrl.u32 %v4266_v24, 16  ;;  %v4301_v38 = vld [vmem:[%s4223_s23 + $0x20] sm:$0xff]   ;;  %v4324_v48 = vld [vmem:[%s4223_s23 + $0x70] sm:$0xff]  }
  0x17   : > { %v363_v33 = vor.u32 %v4252_v18, %v5583_v25  ;;  %v371_v34 = vor.u32 %v4258_v20, %v367_v26  ;;  %5624 = vst [vmem:[#allocation7_spill] sm:$0xff] %v4295_v36  ;;  %v375_v40 = vrot.slane %v4279_v31, 1  ;;  %v4307_v42 = vshrl.u32 %v4271_v27, 16  ;;  %5626 = vst [vmem:[#allocation9_spill] sm:$0xff] %v4324_v48  ;;  %v4333_v52 = vld [vmem:[%s4223_s23 + $0x28] sm:$0xff]   ;;  %v4353_v60 = vld [vmem:[%s4223_s23 + $0x78] sm:$0xff]  }
  0x18   : > { %v288_v29 = vsel %vm276_vm1, %v283_v21, %v287_v14  ;;  %v296_v39 = vsel %vm276_vm1, %v291_v22, %v295_v30  ;;  %v299_v41 = vor.u32 %v4274_v28, %v295_v30  ;;  %v303_v45 = vrot.slane %v4292_v35, 1  ;;  %v4356_v61 = vld [vmem:[%s4223_s23 + $0x30] sm:$0xff]   ;;  %v4364_v1 = vld [vmem:[%s4223_s23 + $0x80] sm:$0xff]  }
  0x19   : > { %3769 = vmatprep.mubr.msk.bf16.mxu0 %vm425_vm2, %v288_v29  ;;  %v368_v44 = vsel %vm276_vm1, %v363_v33, %v367_v26  ;;  %v4318_v46 = vshll.u32 %v4295_v36, 16  ;;  %v4321_v47 = vshll.u32 %v4301_v38, 16  ;;  %v376_v49 = vsel %vm276_vm1, %v371_v34, %v375_v40  ;;  %5628 = vst [vmem:[#allocation11_spill] sm:$0xff] %v4356_v61  ;;  %5630 = vst [vmem:[#allocation13_spill] sm:$0xff] %v4364_v1  ;;  %v4395_v33 = vld [vmem:[%s4223_s23 + $0x88] sm:$0xff]  }
  0x1a   : > { %3770 = vmatmul.mubr.msk.bf16.vlgmr.msra.gmra.mxu0 %vm425_vm2, %v296_v39  ;;  %3789 = vmatprep.mubr.msk.bf16.mxu1 %vm425_vm2, %v368_v44  ;;  %v379_v50 = vor.u32 %v4298_v37, %v375_v40  ;;  %v4330_v51 = vshrl.u32 %v4295_v36, 16  ;;  %v304_v53 = vsel %vm276_vm1, %v299_v41, %v303_v45  ;;  %v307_v55 = vor.u32 %v4307_v42, %v303_v45  ;;  %v4405_v44 = vld [vmem:[%s4223_s23 + $0x40] sm:$0xff]  }
  0x1b   : > { %5625 = vst [vmem:[#allocation8_spill] sm:$0xff] %v4318_v46  ;;  %3844 = vmatpush3.bf16.msra.mxu0 %v991_v12  ;;  %3790 = vmatmul.mubr.msk.bf16.vlgmr.msra.gmra.mxu1 %vm425_vm2, %v376_v49  ;;  %v383_v54 = vrot.slane %v4318_v46, 1  ;;  %v311_v56 = vrot.slane %v4321_v47, 1  ;;  %v4344_v57 = vshll.u32 %v4324_v48, 16  ;;  %v4347_v58 = vshrl.u32 %v4301_v38, 16  ;;  %v4374_v12 = vld [vmem:[%s4223_s23 + $0x38] sm:$0xff]  }
  0x1c   : > { %4116 = vmatprep.subr.msk.bf16.mxu0 %vm480_vm0, %v4284_v32  ;;  %3806 = vmatpush3.bf16.msra.mxu1 %v698_v16  ;;  %v4350_v59 = vshll.u32 %v4333_v52, 16  ;;  %v4361_v0 = vshrl.u32 %v4324_v48, 16  ;;  %5631 = vst [vmem:[#allocation14_spill] sm:$0xff] %v4374_v12  ;;  %v4377_v13 = vshll.u32 %v4353_v60, 16  ;;  %v4380_v14 = vshrl.u32 %v4333_v52, 16  ;;  %5635 = vst [vmem:[#allocation18_spill] sm:$0xff] %v4405_v44 }
  0x1d   : > { %3773 = vmatprep.mubr.msk.bf16.mxu0 %vm425_vm2, %v304_v53  ;;  %5627 = vst [vmem:[#allocation10_spill] sm:$0xff] %v4344_v57  ;;  %v384_v62 = vsel %vm276_vm1, %v379_v50, %v383_v54  ;;  %v387_v63 = vor.u32 %v4330_v51, %v383_v54  ;;  %4115 = vmatprep.subr.msk.bf16.mxu1 %vm480_vm0, %v4312_v43  ;;  %v391_v3 = vrot.slane %v4344_v57, 1  ;;  %v4383_v16 = vshll.u32 %v4356_v61, 16 }
  0x1e   : > { %5629 = vst [vmem:[#allocation12_spill] sm:$0xff] %v4361_v0  ;;  %3793 = vmatprep.mubr.msk.bf16.mxu1 %vm425_vm2, %v384_v62  ;;  %v312_v2 = vsel %vm276_vm1, %v307_v55, %v311_v56  ;;  %v315_v6 = vor.u32 %v4347_v58, %v311_v56  ;;  %v319_v7 = vrot.slane %v4350_v59, 1  ;;  %5632 = vst [vmem:[#allocation15_spill] sm:$0xff] %v4377_v13  ;;  %v4386_v21 = vshrl.u32 %v4353_v60, 16  ;;  %v208_v56 = vld [vmem:[%s4223_s23 + $0x90] sm:$0xf] }
  0x1f   : > { %v392_v22 = vsel %vm276_vm1, %v387_v63, %v391_v3  ;;  %v395_v29 = vor.u32 %v4361_v0, %v391_v3  ;;  %v4392_v30 = vshll.u32 %v4364_v1, 16  ;;  %v399_v34 = vrot.slane %v4377_v13, 1 }
  0x20   : > { %5633 = vst [vmem:[#allocation16_spill] sm:$0xff] %v4386_v21  ;;  %v320_v26 = vsel %vm276_vm1, %v315_v6, %v319_v7  ;;  %v323_v39 = vor.u32 %v4380_v14, %v319_v7  ;;  %v327_v40 = vrot.slane %v4383_v16, 1  ;;  %v4402_v41 = vshrl.u32 %v4356_v61, 16 }
  0x21   : > { %5634 = vst [vmem:[#allocation17_spill] sm:$0xff] %v4392_v30  ;;  %v407_v45 = vrot.slane %v4392_v30, 1  ;;  %v4410_v49 = vshll.u32 %v4374_v12, 16  ;;  %v4413_v50 = vshrl.u32 %v4364_v1, 16  ;;  %v4416_v53 = vshll.u32 %v4395_v33, 16 }
  0x22   : > { %3774 = vmatmul.mubr.msk.bf16.gmra.mxu0 %vm425_vm2, %v312_v2  ;;  %v400_v54 = vsel %vm276_vm1, %v395_v29, %v399_v34  ;;  %v331_v55 = vor.u32 %v4402_v41, %v327_v40  ;;  %v403_v62 = vor.u32 %v4386_v21, %v399_v34  ;;  %v4426_v2 = vld [vmem:[%s4223_s23 + $0x48] sm:$0xff]   ;;  %v4431_v7 = vshll.u32 %v4405_v44, 16 }
  0x23   : > { %3777 = vmatprep.mubr.msk.bf16.mxu0 %vm425_vm2, %v320_v26  ;;  %5636 = vst [vmem:[#allocation19_spill] sm:$0xff] %v4413_v50  ;;  %5637 = vst [vmem:[#allocation20_spill] sm:$0xff] %v4416_v53  ;;  %3794 = vmatmul.mubr.msk.bf16.gmra.mxu1 %vm425_vm2, %v392_v22  ;;  %v335_v63 = vrot.slane %v4410_v49, 1  ;;  %v411_v3 = vor.u32 %v4413_v50, %v407_v45  ;;  %v415_v6 = vrot.slane %v4416_v53, 1  ;;  %v4435_v29 = vshrl.u32 %v4374_v12, 16 }
  0x24   : > { %3797 = vmatprep.mubr.msk.bf16.mxu1 %vm425_vm2, %v400_v54  ;;  %5638 = vst [vmem:[#allocation21_spill] sm:$0xff] %v4426_v2  ;;  %v3346_v22 = vcombine.low %v208_v56, %v208_v56  ;;  %v328_v26 = vsel %vm276_vm1, %v323_v39, %v327_v40  ;;  %v4439_v34 = vshrl.u32 %v4405_v44, 16  ;;  %v408_v25 = vsel %vm276_vm1, %v403_v62, %v407_v45 }
  0x25   : > { %v336_v54 = vsel %vm276_vm1, %v331_v55, %v335_v63  ;;  %v4443_v9 = vshrl.u32 %v4395_v33, 16  ;;  %v4446_v53 = vshll.u32 %v4426_v2, 16  ;;  %v416_v39 = vsel %vm276_vm1, %v411_v3, %v415_v6 }
  0x26   : > { %v421_v8 = vshll.u32 %v3346_v22, 16  ;;  %v343_v40 = vrot.slane %v4431_v7, 1  ;;  %v339_v55 = vor.u32 %v4435_v29, %v335_v63  ;;  %v4460_v3 = vshrl.u32 %v4426_v2, 16 }
  0x27   : > { %5639 = vst [vmem:[#allocation22_spill] sm:$0xff] %v4443_v9  ;;  %v351_v62 = vrot.slane %v4446_v53, 1  ;;  %v419_v30 = vor.u32 %v4443_v9, %v415_v6  ;;  %v5640_v63 = vshll.u32 %v4229_v5, 16  ;;  %v934_v6 = vrot.slane %v3346_v22, 1  ;;  %v4506_v9 = vld [vmem:[%s5580_s1 + $0x14] sm:$0xf] }
  0x28   : > { %v347_v45 = vor.u32 %v4439_v34, %v343_v40  ;;  %v423_v50 = vrot.slane %v421_v8, 1  ;;  %v902_v22 = vrot.slane %v4245_v15, 1 }
  0x29   : > { %v4465_v13 = vrot.slane %v5640_v63, 2  ;;  %v355_v8 = vor.u32 %v4460_v3, %v351_v62 }
  0x2a   : > { %3778 = vmatmul.mubr.msk.bf16.gmra.mxu0 %vm425_vm2, %v328_v26  ;;  %v344_v26 = vsel %vm276_vm1, %v339_v55, %v343_v40  ;;  %v5641_v40 = vshrl.u32 %v4229_v5, 16 }
  0x2b   : > { %3781 = vmatprep.mubr.msk.bf16.mxu0 %vm425_vm2, %v336_v54  ;;  %3798 = vmatmul.mubr.msk.bf16.gmra.mxu1 %vm425_vm2, %v408_v25  ;;  %v352_v54 = vsel %vm276_vm1, %v347_v45, %v351_v62  ;;  %v424_v25 = vsel %vm276_vm1, %v419_v30, %v423_v50  ;;  %v899_v30 = vrot.slane %v4226_v4, 1  ;;  %v900_v50 = vrot.slane %v4229_v5, 1 }
  0x2c   : > { %3801 = vmatprep.mubr.msk.bf16.mxu1 %vm425_vm2, %v416_v39  ;;  %v4470_v39 = vrot.slane %v4395_v33, 1  ;;  %v4476_v55 = vrot.slane %v5641_v40, 1  ;;  %v1452_v62 = vrot.slane %v4347_v58, 1 }
  0x2d   : > { %v901_v40 = vsel %vm898_vm3, %v899_v30, %v900_v50 }
  0x2e   : > { %v4483_v45 = vsel %vm898_vm3, %v4470_v39, %v934_v6  ;;  %v209_v6 = vld [vmem:[%s4223_s23 + $0x94] sm:$0xf] }
  0x2f   : > { %v4511_v30 = vcombine.low %v208_v56, %v209_v6  ;;  %v4528_v56 = vld [vmem:[%s5580_s1 + $0x18] sm:$0xf]  ;;  %v910_v6 = vrot.slane %v4356_v61, 1 }
  0x31   : > { %5643 = vst [vmem:[#allocation23_spill] sm:$0xff] %v4511_v30 }
  0x32   : > { %3782 = vmatmul.mubr.msk.bf16.gmra.mxu0 %vm425_vm2, %v344_v26  ;;  %v1453_v26 = vrot.slane %v4321_v47, 2 }
  0x33   : > { %3785 = vmatprep.mubr.msk.bf16.mxu0 %vm425_vm2, %v352_v54  ;;  %3802 = vmatmul.mubr.msk.bf16.gmra.mxu1 %vm425_vm2, %v424_v25  ;;  %v5642_v54 = vrot.slane %v4249_v17, 1 }
  0x34   : > { %3807 = vmatprep.mubr.msk.bf16.mxu1 %vm425_vm2, %v4226_v4  ;;  %v4494_v25 = vor.u32 %v1453_v26, %v1452_v62  ;;  %v1223_v4 = vsel %vm480_vm0, %v4312_v43, 0  ;;  %v4518_v43 = vsel %vm898_vm3, %v900_v50, %v902_v22  ;;  %v1581_v62 = vsel %vm480_vm0, %v4284_v32, 0 }
  0x35   : > { %v360_v63 = vsel %vm276_vm1, %v355_v8, %v5642_v54  ;;  %v904_v8 = vrot.slane %v4271_v27, 1  ;;  %v5596_v54 = vrot.slane %v4511_v30, 1  ;;  %v906_v50 = vrot.slane %v4301_v38, 1 }
  0x37   : > { %v4523_v26 = vsel %vm898_vm3, %v902_v22, %v904_v8  ;;  %v4540_v32 = vsel %vm898_vm3, %v4470_v39, %v5596_v54  ;;  %v908_v22 = vrot.slane %v4333_v52, 1  ;;  %v916_v54 = vrot.slane %v4426_v2, 1 }
  0x3a   : > { %3786 = vmatmul.mubr.msk.bf16.gmra.mxu0 %vm425_vm2, %v360_v63  ;;  %v4550_v63 = vsel %vm898_vm3, %v904_v8, %v906_v50  ;;  %v4566_v8 = vsel %vm898_vm3, %v908_v22, %v910_v6 }
  0x3b   : > { %3845 = vmatprep.mubr.msk.bf16.mxu0 %vm425_vm2, %v901_v40  ;;  %3808 = vmatmul.mubr.msk.bf16.vlgmr.msra.gmra.mxu1 %vm425_vm2, %v4229_v5  ;;  %v4553_v40 = vsel %vm898_vm3, %v906_v50, %v908_v22  ;;  %v914_v50 = vrot.slane %v4405_v44, 1 }
  0x3c   : > { %3882 = vmatpush3.bf16.msra.mxu1 %v1223_v4  ;;  %3811 = vmatprep.mubr.msk.bf16.mxu1 %vm425_vm2, %v4245_v15  ;;  %v912_v4 = vrot.slane %v4374_v12, 1 }
  0x3d   : > { %4117 = vmatprep.subr.msk.bf16.mxu1 %vm480_vm0, %v4506_v9 }
  0x3e   : > { %v4582_v22 = vsel %vm898_vm3, %v912_v4, %v914_v50 }
  0x42   : > { %3846 = vmatmul.mubr.msk.bf16.vlgmr.msra.gmra.mxu0 %vm425_vm2, %v4518_v43 }
  0x43   : > { %3920 = vmatpush3.bf16.msra.mxu0 %v1581_v62  ;;  %3849 = vmatprep.mubr.msk.bf16.mxu0 %vm425_vm2, %v4523_v26  ;;  %v4569_v62 = vsel %vm898_vm3, %v910_v6, %v912_v4  ;;  %v4585_v6 = vsel %vm898_vm3, %v914_v50, %v916_v54 }
  0x44   : > { %3812 = vmatmul.mubr.msk.bf16.gmra.mxu1 %vm425_vm2, %v4271_v27  ;;  %4118 = vmatprep.subr.msk.bf16.mxu0 %vm480_vm0, %v4528_v56 }
  0x45   : > { %3815 = vmatprep.mubr.msk.bf16.mxu1 %vm425_vm2, %v4301_v38 }
  0x4a   : > { %3850 = vmatmul.mubr.msk.bf16.gmra.mxu0 %vm425_vm2, %v4550_v63 }
  0x4b   : > { %3853 = vmatprep.mubr.msk.bf16.mxu0 %vm425_vm2, %v4553_v40 }
  0x4c   : > { %3816 = vmatmul.mubr.msk.bf16.gmra.mxu1 %vm425_vm2, %v4333_v52 }
  0x4d   : > { %3819 = vmatprep.mubr.msk.bf16.mxu1 %vm425_vm2, %v4356_v61  ;;  %v918_v61 = vrot.slane %v4236_v10, 1 }
  0x4f   : > { %v4598_v4 = vsel %vm898_vm3, %v916_v54, %v918_v61 }
  0x52   : > { %3854 = vmatmul.mubr.msk.bf16.gmra.mxu0 %vm425_vm2, %v4566_v8 }
  0x53   : > { %3857 = vmatprep.mubr.msk.bf16.mxu0 %vm425_vm2, %v4569_v62 }
  0x54   : > { %3820 = vmatmul.mubr.msk.bf16.gmra.mxu1 %vm425_vm2, %v4374_v12  ;;  %v920_v12 = vrot.slane %v4239_v11, 1 }
  0x55   : > { %3823 = vmatprep.mubr.msk.bf16.mxu1 %vm425_vm2, %v4405_v44  ;;  %v922_v44 = vrot.slane %v4266_v24, 1 }
  0x56   : > { %v4601_v50 = vsel %vm898_vm3, %v918_v61, %v920_v12 }
  0x57   : > { %v4614_v54 = vsel %vm898_vm3, %v920_v12, %v922_v44 }
  0x5a   : > { %3858 = vmatmul.mubr.msk.bf16.gmra.mxu0 %vm425_vm2, %v4582_v22 }
  0x5b   : > { %3861 = vmatprep.mubr.msk.bf16.mxu0 %vm425_vm2, %v4585_v6 }
  0x5c   : > { %3824 = vmatmul.mubr.msk.bf16.gmra.mxu1 %vm425_vm2, %v4426_v2  ;;  %v924_v2 = vrot.slane %v4295_v36, 1 }
  0x5d   : > { %3827 = vmatprep.mubr.msk.bf16.mxu1 %vm425_vm2, %v4236_v10  ;;  %v926_v10 = vrot.slane %v4324_v48, 1 }
  0x5e   : > { %v4617_v61 = vsel %vm898_vm3, %v922_v44, %v924_v2 }
  0x5f   : > { %v4630_v12 = vsel %vm898_vm3, %v924_v2, %v926_v10 }
  0x62   : > { %3862 = vmatmul.mubr.msk.bf16.gmra.mxu0 %vm425_vm2, %v4598_v4 }
  0x63   : > { %3865 = vmatprep.mubr.msk.bf16.mxu0 %vm425_vm2, %v4601_v50 }
  0x64   : > { %3828 = vmatmul.mubr.msk.bf16.gmra.mxu1 %vm425_vm2, %v4239_v11  ;;  %v928_v11 = vrot.slane %v4353_v60, 1 }
  0x65   : > { %3831 = vmatprep.mubr.msk.bf16.mxu1 %vm425_vm2, %v4266_v24  ;;  %v930_v24 = vrot.slane %v4364_v1, 1 }
  0x66   : > { %v4633_v44 = vsel %vm898_vm3, %v926_v10, %v928_v11 }
  0x67   : > { %v4645_v2 = vsel %vm898_vm3, %v928_v11, %v930_v24  ;;  %v4649_v10 = vsel %vm898_vm3, %v930_v24, %v4470_v39  ;;  %v1448_v11 = vrot.slane %v4307_v42, 1  ;;  %v1449_v24 = vrot.slane %v4292_v35, 2 }
  0x68   : > { %v5644_v39 = vor.u32 %v4465_v13, %v4476_v55  ;;  %v1457_v13 = vrot.slane %v4350_v59, 2  ;;  %v2123_v55 = vsel %vm480_vm0, %v4528_v56, 0 }
  0x6a   : > { %3866 = vmatmul.mubr.msk.bf16.gmra.mxu0 %vm425_vm2, %v4614_v54 }
  0x6b   : > { %3869 = vmatprep.mubr.msk.bf16.mxu0 %vm425_vm2, %v4617_v61 }
  0x6c   : > { %3832 = vmatmul.mubr.msk.bf16.gmra.mxu1 %vm425_vm2, %v4295_v36  ;;  %v1445_v36 = vrot.slane %v4263_v23, 2 }
  0x6d   : > { %3835 = vmatprep.mubr.msk.bf16.mxu1 %vm425_vm2, %v4324_v48  ;;  %v1444_v48 = vrot.slane %v4274_v28, 1  ;;  %v1891_v28 = vsel %vm480_vm0, %v4506_v9, 0 }
  0x72   : > { %3870 = vmatmul.mubr.msk.bf16.gmra.mxu0 %vm425_vm2, %v4630_v12 }
  0x73   : > { %3873 = vmatprep.mubr.msk.bf16.mxu0 %vm425_vm2, %v4633_v44 }
  0x74   : > { %3836 = vmatmul.mubr.msk.bf16.gmra.mxu1 %vm425_vm2, %v4353_v60 }
  0x75   : > { %3839 = vmatprep.mubr.msk.bf16.mxu1 %vm425_vm2, %v4364_v1  ;;  %v1446_v1 = vor.u32 %v1445_v36, %v1444_v48  ;;  %v1450_v36 = vor.u32 %v1449_v24, %v1448_v11  ;;  %v4675_v48 = vld [vmem:[%s5580_s1 + $0x1c] sm:$0xf]  ;;  %v2348_v11 = vrot.slane %v4347_v58, 2 }
  0x77   : > { %v1447_v23 = vsel %vm1440_vm4, %v5644_v39, %v1446_v1  ;;  %v1451_v9 = vsel %vm1440_vm4, %v1446_v1, %v1450_v36  ;;  %v1464_v39 = vrot.slane %v4435_v29, 1 }
  0x7a   : > { %3874 = vmatmul.mubr.msk.bf16.gmra.mxu0 %vm425_vm2, %v4645_v2 }
  0x7b   : > { %3877 = vmatprep.mubr.msk.bf16.mxu0 %vm425_vm2, %v4649_v10 }
  0x7c   : > { %3840 = vmatmul.mubr.msk.bf16.gmra.mxu1 %vm425_vm2, %v4395_v33 }
  0x7d   : > { %3883 = vmatprep.mubr.msk.bf16.mxu1 %vm425_vm2, %v4518_v43  ;;  %v1461_v43 = vrot.slane %v4383_v16, 2 }
  0x82   : > { %3878 = vmatmul.mubr.msk.bf16.gmra.mxu0 %vm425_vm2, %v4483_v45  ;;  %v1455_v45 = vsel %vm1440_vm4, %v1450_v36, %v4494_v25  ;;  %v1465_v36 = vrot.slane %v4410_v49, 2 }
  0x83   : > { %3921 = vmatprep.mubr.msk.bf16.mxu0 %vm425_vm2, %v1447_v23  ;;  %v1456_v23 = vrot.slane %v4380_v14, 1 }
  0x84   : > { %3884 = vmatmul.mubr.msk.bf16.vlgmr.msra.gmra.mxu1 %vm425_vm2, %v4523_v26  ;;  %v4695_v26 = vld [vmem:[%s5580_s1 + $0x20] sm:$0xf] }
  0x85   : > { %3958 = vmatpush3.bf16.msra.mxu1 %v1891_v28  ;;  %3887 = vmatprep.mubr.msk.bf16.mxu1 %vm425_vm2, %v4550_v63  ;;  %v1460_v28 = vrot.slane %v4402_v41, 1  ;;  %v1458_v1 = vor.u32 %v1457_v13, %v1456_v23  ;;  %v2349_v63 = vrot.slane %v4321_v47, 3  ;;  %v1469_v23 = vrot.slane %v4431_v7, 2 }
  0x86   : > { %4119 = vmatprep.subr.msk.bf16.mxu1 %vm480_vm0, %v4675_v48  ;;  %v1466_v47 = vor.u32 %v1465_v36, %v1464_v39  ;;  %v1485_v39 = vrot.slane %v4279_v31, 2 }
  0x87   : > { %v1462_v56 = vor.u32 %v1461_v43, %v1460_v28  ;;  %v1459_v24 = vsel %vm1440_vm4, %v4494_v25, %v1458_v1  ;;  %v4714_v13 = vor.u32 %v2349_v63, %v2348_v11  ;;  %v1476_v28 = vrot.slane %v4252_v18, 1 }
  0x88   : > { %v1477_v43 = vrot.slane %v4249_v17, 2  ;;  %v1481_v63 = vrot.slane %v4255_v19, 2 }
  0x89   : > { %v1467_v25 = vsel %vm1440_vm4, %v1462_v56, %v1466_v47 }
  0x8a   : > { %3922 = vmatmul.mubr.msk.bf16.vlgmr.msra.gmra.mxu0 %vm425_vm2, %v1451_v9  ;;  %v1468_v9 = vrot.slane %v4439_v34, 1 }
  0x8b   : > { %3996 = vmatpush3.bf16.msra.mxu0 %v2123_v55  ;;  %3925 = vmatprep.mubr.msk.bf16.mxu0 %vm425_vm2, %v1455_v45  ;;  %v1473_v55 = vrot.slane %v4446_v53, 2 }
  0x8c   : > { %3888 = vmatmul.mubr.msk.bf16.gmra.mxu1 %vm425_vm2, %v4553_v40  ;;  %4120 = vmatprep.subr.msk.bf16.mxu0 %vm480_vm0, %v4695_v26  ;;  %v1463_v40 = vsel %vm1440_vm4, %v1458_v1, %v1462_v56  ;;  %v1470_v58 = vor.u32 %v1469_v23, %v1468_v9  ;;  %v1480_v56 = vrot.slane %v4258_v20, 1  ;;  %v1489_v9 = vrot.slane %v4318_v46, 2 }
  0x8d   : > { %3891 = vmatprep.mubr.msk.bf16.mxu1 %vm425_vm2, %v4566_v8  ;;  %v1472_v8 = vrot.slane %v4460_v3, 1  ;;  %v2345_v46 = vrot.slane %v4292_v35, 3 }
  0x8e   : > { %v1471_v45 = vsel %vm1440_vm4, %v1466_v47, %v1470_v58  ;;  %v1492_v47 = vrot.slane %v4361_v0, 1 }
  0x92   : > { %3926 = vmatmul.mubr.msk.bf16.gmra.mxu0 %vm425_vm2, %v1459_v24  ;;  %v1484_v24 = vrot.slane %v4298_v37, 1 }
  0x93   : > { %3929 = vmatprep.mubr.msk.bf16.mxu0 %vm425_vm2, %v1463_v40  ;;  %v1488_v40 = vrot.slane %v4330_v51, 1 }
  0x94   : > { %3892 = vmatmul.mubr.msk.bf16.gmra.mxu1 %vm425_vm2, %v4569_v62  ;;  %v1474_v62 = vor.u32 %v1473_v55, %v1472_v8  ;;  %v1496_v8 = vrot.slane %v4386_v21, 1  ;;  %v5645_v55 = vld [vmem:[#allocation15_spill] sm:$0xff] }
  0x95   : > { %3895 = vmatprep.mubr.msk.bf16.mxu1 %vm425_vm2, %v4582_v22  ;;  %v1478_v22 = vor.u32 %v1477_v43, %v1476_v28  ;;  %v5646_v43 = vld [vmem:[#allocation19_spill] sm:$0xff] }
  0x96   : > { %v1475_v1 = vsel %vm1440_vm4, %v1470_v58, %v1474_v62  ;;  %v1493_v58 = vrot.slane %v4344_v57, 2 }
  0x97   : > { %v1479_v11 = vsel %vm1440_vm4, %v1474_v62, %v1478_v22  ;;  %v1500_v62 = vrot.slane %v5646_v43, 1 }
  0x9a   : > { %3930 = vmatmul.mubr.msk.bf16.gmra.mxu0 %vm425_vm2, %v1467_v25 }
  0x9b   : > { %3933 = vmatprep.mubr.msk.bf16.mxu0 %vm425_vm2, %v1471_v45  ;;  %v1497_v45 = vrot.slane %v5645_v55, 2  ;;  %v211_v55 = vld [vmem:[%s4223_s23 + $0x9c] sm:$0xf] }
  0x9c   : > { %3896 = vmatmul.mubr.msk.bf16.gmra.mxu1 %vm425_vm2, %v4585_v6  ;;  %v1482_v6 = vor.u32 %v1481_v63, %v1480_v56  ;;  %v5612_v56 = vshrl.u32 %v4511_v30, 16  ;;  %v5611_v63 = vshll.u32 %v4511_v30, 16 }
  0x9d   : > { %3899 = vmatprep.mubr.msk.bf16.mxu1 %vm425_vm2, %v4598_v4  ;;  %v1486_v4 = vor.u32 %v1485_v39, %v1484_v24  ;;  %v5648_v39 = vld [vmem:[#allocation22_spill] sm:$0xff] }
  0x9e   : > { %v1483_v36 = vsel %vm1440_vm4, %v1478_v22, %v1482_v6  ;;  %v5647_v22 = vld [vmem:[#allocation17_spill] sm:$0xff] }
  0x9f   : > { %v1487_v23 = vsel %vm1440_vm4, %v1482_v6, %v1486_v4  ;;  %v1504_v6 = vrot.slane %v5648_v39, 1  ;;  %v5668_v39 = vld [vmem:[#allocation9_spill] sm:$0xff] }
  0xa2   : > { %3934 = vmatmul.mubr.msk.bf16.gmra.mxu0 %vm425_vm2, %v1475_v1  ;;  %v1501_v1 = vrot.slane %v5647_v22, 2 }
  0xa3   : > { %3937 = vmatprep.mubr.msk.bf16.mxu0 %vm425_vm2, %v1479_v11  ;;  %v4773_v11 = vld [vmem:[%s4223_s23 + $0x98] sm:$0xf] }
  0xa4   : > { %3900 = vmatmul.mubr.msk.bf16.gmra.mxu1 %vm425_vm2, %v4601_v50  ;;  %v1490_v50 = vor.u32 %v1489_v9, %v1488_v40  ;;  %v1514_v9 = vrot.slane %v5611_v63, 2  ;;  %v5666_v63 = vld [vmem:[#allocation7_spill] sm:$0xff] }
  0xa5   : > { %3903 = vmatprep.mubr.msk.bf16.mxu1 %vm425_vm2, %v4614_v54  ;;  %v1494_v54 = vor.u32 %v1493_v58, %v1492_v47 }
  0xa6   : > { %v1491_v25 = vsel %vm1440_vm4, %v1486_v4, %v1490_v50  ;;  %v5649_v4 = vld [vmem:[#allocation20_spill] sm:$0xff] }
  0xa7   : > { %v1495_v28 = vsel %vm1440_vm4, %v1490_v50, %v1494_v54 }
  0xaa   : > { %3938 = vmatmul.mubr.msk.bf16.gmra.mxu0 %vm425_vm2, %v1483_v36  ;;  %v1505_v36 = vrot.slane %v5649_v4, 2 }
  0xab   : > { %3941 = vmatprep.mubr.msk.bf16.mxu0 %vm425_vm2, %v1487_v23  ;;  %v4785_v23 = vcombine.low %v4773_v11, %v4773_v11 }
  0xac   : > { %3904 = vmatmul.mubr.msk.bf16.gmra.mxu1 %vm425_vm2, %v4617_v61  ;;  %v1498_v61 = vor.u32 %v1497_v45, %v1496_v8  ;;  %v1800_v8 = vrot.slane %v4245_v15, 2  ;;  %v1802_v15 = vrot.slane %v4271_v27, 2  ;;  %v1806_v27 = vrot.slane %v4333_v52, 2 }
  0xad   : > { %3907 = vmatprep.mubr.msk.bf16.mxu1 %vm425_vm2, %v4630_v12  ;;  %v1502_v12 = vor.u32 %v1501_v1, %v1500_v62  ;;  %v1518_v47 = vshrl.u32 %v4785_v23, 16  ;;  %v1521_v58 = vshll.u32 %v4785_v23, 16  ;;  %v1834_v35 = vrot.slane %v4785_v23, 2 }
  0xae   : > { %v1499_v24 = vsel %vm1440_vm4, %v1494_v54, %v1498_v61  ;;  %v1214_v54 = vrot.slane %v4785_v23, 1 }
  0xaf   : > { %v1503_v40 = vsel %vm1440_vm4, %v1498_v61, %v1502_v12  ;;  %v1523_v62 = vrot.slane %v1521_v58, 2  ;;  %v5650_v61 = vrot.slane %v4511_v30, 1 }
  0xb2   : > { %3942 = vmatmul.mubr.msk.bf16.gmra.mxu0 %vm425_vm2, %v1491_v25  ;;  %v1799_v25 = vrot.slane %v4229_v5, 2 }
  0xb3   : > { %3945 = vmatprep.mubr.msk.bf16.mxu0 %vm425_vm2, %v1495_v28  ;;  %v1520_v28 = vrot.slane %v1518_v47, 1  ;;  %v5652_v47 = vld [vmem:[#allocation14_spill] sm:$0xff] }
  0xb4   : > { %3908 = vmatmul.mubr.msk.bf16.gmra.mxu1 %vm425_vm2, %v4633_v44  ;;  %v1511_v44 = vrot.slane %v5612_v56, 1  ;;  %v1810_v58 = vrot.slane %v5652_v47, 2 }
  0xb5   : > { %3911 = vmatprep.mubr.msk.bf16.mxu1 %vm425_vm2, %v4645_v2  ;;  %v1506_v2 = vor.u32 %v1505_v36, %v1504_v6  ;;  %v1524_v5 = vor.u32 %v1523_v62, %v1520_v28  ;;  %v1803_v6 = vsel %vm1798_vm5, %v1800_v8, %v1802_v15  ;;  %v2481_v36 = vsel %vm480_vm0, %v4675_v48, 0  ;;  %v5654_v62 = vld [vmem:[#allocation21_spill] sm:$0xff] }
  0xb6   : > { %v1515_v50 = vor.u32 %v1514_v9, %v1511_v44  ;;  %v2791_v9 = vsel %vm480_vm0, %v4695_v26, 0 }
  0xb7   : > { %v1507_v45 = vsel %vm1440_vm4, %v1502_v12, %v1506_v2  ;;  %v1804_v12 = vrot.slane %v4301_v38, 2  ;;  %v5651_v38 = vld [vmem:[#allocation11_spill] sm:$0xff] }
  0xb8   : > { %v1516_v1 = vsel %vm1440_vm4, %v1506_v2, %v1515_v50  ;;  %v1808_v44 = vrot.slane %v5651_v38, 2 }
  0xb9   : > { %v1807_v2 = vsel %vm1798_vm5, %v1804_v12, %v1806_v27 }
  0xba   : > { %3946 = vmatmul.mubr.msk.bf16.gmra.mxu0 %vm425_vm2, %v1499_v24  ;;  %v1525_v24 = vsel %vm1440_vm4, %v1515_v50, %v1524_v5  ;;  %v1809_v48 = vsel %vm1798_vm5, %v1806_v27, %v1808_v44  ;;  %v5653_v50 = vld [vmem:[#allocation18_spill] sm:$0xff] }
  0xbb   : > { %3949 = vmatprep.mubr.msk.bf16.mxu0 %vm425_vm2, %v1503_v40  ;;  %v1805_v40 = vsel %vm1798_vm5, %v1802_v15, %v1804_v12 }
  0xbc   : > { %3912 = vmatmul.mubr.msk.bf16.gmra.mxu1 %vm425_vm2, %v4649_v10  ;;  %v1215_v10 = vsel %vm898_vm3, %v5650_v61, %v1214_v54  ;;  %v1812_v54 = vrot.slane %v5653_v50, 2 }
  0xbd   : > { %3915 = vmatprep.mubr.msk.bf16.mxu1 %vm425_vm2, %v4540_v32  ;;  %v1801_v32 = vsel %vm1798_vm5, %v1799_v25, %v1800_v8  ;;  %v1811_v25 = vsel %vm1798_vm5, %v1808_v44, %v1810_v58  ;;  %v5660_v44 = vld [vmem:[#allocation3_spill] sm:$0xff] }
  0xbe   : > { %v1813_v8 = vsel %vm1798_vm5, %v1810_v58, %v1812_v54  ;;  %v5662_v58 = vld [vmem:[#allocation5_spill] sm:$0xff] }
  0xbf   : > { %v1820_v50 = vrot.slane %v5662_v58, 2 }
  0xc2   : > { %3950 = vmatmul.mubr.msk.bf16.gmra.mxu0 %vm425_vm2, %v1507_v45 }
  0xc3   : > { %3953 = vmatprep.mubr.msk.bf16.mxu0 %vm425_vm2, %v1516_v1  ;;  %v1814_v1 = vrot.slane %v5654_v62, 2 }
  0xc4   : > { %3916 = vmatmul.mubr.msk.bf16.gmra.mxu1 %vm425_vm2, %v1215_v10 }
  0xc5   : > { %3959 = vmatprep.mubr.msk.bf16.mxu1 %vm425_vm2, %v1801_v32  ;;  %v5656_v32 = vld [vmem:[#allocation2_spill] sm:$0xff] }
  0xc6   : > { %v1816_v5 = vrot.slane %v5656_v32, 2 }
  0xca   : > { %3954 = vmatmul.mubr.msk.bf16.gmra.mxu0 %vm425_vm2, %v1525_v24  ;;  %v1815_v24 = vsel %vm1798_vm5, %v1812_v54, %v1814_v1 }
  0xcb   : > { %3997 = vmatprep.mubr.msk.bf16.mxu0 %vm425_vm2, %v1803_v6 }
  0xcc   : > { %3960 = vmatmul.mubr.msk.bf16.vlgmr.msra.gmra.mxu1 %vm425_vm2, %v1803_v6 }
  0xcd   : > { %4034 = vmatpush3.bf16.msra.mxu1 %v2481_v36  ;;  %3963 = vmatprep.mubr.msk.bf16.mxu1 %vm425_vm2, %v1805_v40 }
  0xd2   : > { %3998 = vmatmul.mubr.msk.bf16.vlgmr.msra.gmra.mxu0 %vm425_vm2, %v1805_v40  ;;  %v1817_v40 = vsel %vm1798_vm5, %v1814_v1, %v1816_v5 }
  0xd3   : > { %4072 = vmatpush3.bf16.msra.mxu0 %v2791_v9  ;;  %4001 = vmatprep.mubr.msk.bf16.mxu0 %vm425_vm2, %v1807_v2  ;;  %v1818_v9 = vrot.slane %v5660_v44, 2 }
  0xd4   : > { %3964 = vmatmul.mubr.msk.bf16.gmra.mxu1 %vm425_vm2, %v1807_v2 }
  0xd5   : > { %3967 = vmatprep.mubr.msk.bf16.mxu1 %vm425_vm2, %v1809_v48 }
  0xda   : > { %v4832_v26 = vpop.f32.mrf.mxu0  ;;  %4002 = vmatmul.mubr.msk.bf16.gmra.mxu0 %vm425_vm2, %v1809_v48 }
  0xdb   : > { %4005 = vmatprep.mubr.msk.bf16.mxu0 %vm425_vm2, %v1811_v25  ;;  %v4837_v45 = vpop.f32.mrf.mxu1 }
  0xdc   : > { %3968 = vmatmul.mubr.msk.bf16.gmra.mxu1 %vm425_vm2, %v1811_v25  ;;  %v4840_v28 = vpop.f32.mrf.mxu0 }
  0xdd   : > { %3971 = vmatprep.mubr.msk.bf16.mxu1 %vm425_vm2, %v1813_v8  ;;  %v4844_v61 = vpop.f32.mrf.mxu1 }
  0xde   : > { %5655 = vst [vmem:[#allocation11_spill] sm:$0xff] %v4844_v61  ;;  %v4846_v10 = vpop.f32.mrf.mxu0  ;;  %v5677_v61 = vld [vmem:[#allocation4_spill] sm:$0xff] }
  0xdf   : > { %v4849_v15 = vpop.f32.mrf.mxu1 }
  0xe0   : > { %5657 = vst [vmem:[#allocation14_spill] sm:$0xff] %v4849_v15  ;;  %v4851_v12 = vpop.f32.mrf.mxu0 }
  0xe1   : > { %v4854_v6 = vpop.f32.mrf.mxu1 }
  0xe2   : > { %5658 = vst [vmem:[#allocation18_spill] sm:$0xff] %v4854_v6  ;;  %v4856_v36 = vpop.f32.mrf.mxu0  ;;  %4006 = vmatmul.mubr.msk.bf16.gmra.mxu0 %vm425_vm2, %v1813_v8  ;;  %v1819_v8 = vsel %vm1798_vm5, %v1816_v5, %v1818_v9  ;;  %v1822_v5 = vrot.slane %v5666_v63, 2  ;;  %v5676_v6 = vld [vmem:[#allocation6_spill] sm:$0xff] }
  0xe3   : > { %4009 = vmatprep.mubr.msk.bf16.mxu0 %vm425_vm2, %v1815_v24  ;;  %v4861_v27 = vpop.f32.mrf.mxu1  ;;  %v2341_v15 = vrot.slane %v5676_v6, 2 }
  0xe4   : > { %5659 = vst [vmem:[#allocation21_spill] sm:$0xff] %v4861_v27  ;;  %3972 = vmatmul.mubr.msk.bf16.gmra.mxu1 %vm425_vm2, %v1815_v24  ;;  %v4864_v38 = vpop.f32.mrf.mxu0  ;;  %v1821_v24 = vsel %vm1798_vm5, %v1818_v9, %v1820_v50  ;;  %v1823_v43 = vsel %vm1798_vm5, %v1820_v50, %v1822_v5  ;;  %v1826_v50 = vrot.slane %v4353_v60, 2 }
  0xe5   : > { %3975 = vmatprep.mubr.msk.bf16.mxu1 %vm425_vm2, %v1817_v40  ;;  %v4868_v2 = vpop.f32.mrf.mxu1 }
  0xe6   : > { %5661 = vst [vmem:[#allocation2_spill] sm:$0xff] %v4868_v2  ;;  %v4870_v48 = vpop.f32.mrf.mxu0 }
  0xe7   : > { %v4873_v54 = vpop.f32.mrf.mxu1 }
  0xe8   : > { %5663 = vst [vmem:[#allocation3_spill] sm:$0xff] %v4873_v54  ;;  %v4875_v25 = vpop.f32.mrf.mxu0 }
  0xe9   : > { %v4878_v1 = vpop.f32.mrf.mxu1 }
  0xea   : > { %5664 = vst [vmem:[#allocation5_spill] sm:$0xff] %v4878_v1  ;;  %v4880_v32 = vpop.f32.mrf.mxu0  ;;  %4010 = vmatmul.mubr.msk.bf16.gmra.mxu0 %vm425_vm2, %v1817_v40  ;;  %v1824_v40 = vrot.slane %v5668_v39, 2  ;;  %v5673_v1 = vld [vmem:[#allocation13_spill] sm:$0xff] }
  0xeb   : > { %4013 = vmatprep.mubr.msk.bf16.mxu0 %vm425_vm2, %v1819_v8  ;;  %v4885_v44 = vpop.f32.mrf.mxu1 }
  0xec   : > { %5665 = vst [vmem:[#allocation24_spill] sm:$0xff] %v4885_v44  ;;  %3976 = vmatmul.mubr.msk.bf16.gmra.mxu1 %vm425_vm2, %v1819_v8  ;;  %v4888_v58 = vpop.f32.mrf.mxu0  ;;  %v1825_v63 = vsel %vm1798_vm5, %v1822_v5, %v1824_v40 }
  0xed   : > { %3979 = vmatprep.mubr.msk.bf16.mxu1 %vm425_vm2, %v1821_v24  ;;  %v4892_v56 = vpop.f32.mrf.mxu1 }
  0xee   : > { %5667 = vst [vmem:[#allocation7_spill] sm:$0xff] %v4892_v56  ;;  %v4894_v4 = vpop.f32.mrf.mxu0 }
  0xef   : > { %v4897_v22 = vpop.f32.mrf.mxu1 }
  0xf0   : > { %5669 = vst [vmem:[#allocation9_spill] sm:$0xff] %v4897_v22  ;;  %v4899_v9 = vpop.f32.mrf.mxu0 }
  0xf1   : > { %v4902_v44 = vpop.f32.mrf.mxu1 }
  0xf2   : > { %5670 = vst [vmem:[#allocation25_spill] sm:$0xff] %v4902_v44  ;;  %v4904_v8 = vpop.f32.mrf.mxu0  ;;  %4014 = vmatmul.mubr.msk.bf16.gmra.mxu0 %vm425_vm2, %v1821_v24  ;;  %v1828_v24 = vrot.slane %v5673_v1, 2 }
  0xf3   : > { %4017 = vmatprep.mubr.msk.bf16.mxu0 %vm425_vm2, %v1823_v43  ;;  %v4909_v56 = vpop.f32.mrf.mxu1 }
  0xf4   : > { %5671 = vst [vmem:[#allocation26_spill] sm:$0xff] %v4909_v56  ;;  %3980 = vmatmul.mubr.msk.bf16.gmra.mxu1 %vm425_vm2, %v1823_v43  ;;  %v4912_v39 = vpop.f32.mrf.mxu0  ;;  %v1827_v56 = vsel %vm1798_vm5, %v1824_v40, %v1826_v50  ;;  %v1829_v60 = vsel %vm1798_vm5, %v1826_v50, %v1828_v24  ;;  %v1830_v40 = vrot.slane %v4395_v33, 2 }
  0xf5   : > { %3983 = vmatprep.mubr.msk.bf16.mxu1 %vm425_vm2, %v1825_v63  ;;  %v4916_v22 = vpop.f32.mrf.mxu1 }
  0xf6   : > { %5672 = vst [vmem:[#allocation27_spill] sm:$0xff] %v4916_v22  ;;  %v4918_v44 = vpop.f32.mrf.mxu0 }
  0xf7   : > { %v4921_v5 = vpop.f32.mrf.mxu1 }
  0xf8   : > { %5674 = vst [vmem:[#allocation13_spill] sm:$0xff] %v4921_v5  ;;  %v4923_v54 = vpop.f32.mrf.mxu0 }
  0xf9   : > { %v4926_v43 = vpop.f32.mrf.mxu1 }
  0xfa   : > { %5675 = vst [vmem:[#allocation28_spill] sm:$0xff] %v4926_v43  ;;  %v4928_v2 = vpop.f32.mrf.mxu0  ;;  %4018 = vmatmul.mubr.msk.bf16.gmra.mxu0 %vm425_vm2, %v1825_v63  ;;  %v1832_v43 = vrot.slane %v4511_v30, 2 }
  0xfb   : > { %4021 = vmatprep.mubr.msk.bf16.mxu0 %vm425_vm2, %v1827_v56  ;;  %v3809_v22 = vpop.f32.mrf.mxu1 }
  0xfc   : > { %3984 = vmatmul.mubr.msk.bf16.gmra.mxu1 %vm425_vm2, %v1827_v56  ;;  %v4934_v1 = vpop.f32.mrf.mxu0  ;;  %v743_v5 = vadd.f32 %v3809_v22, %v4832_v26  ;;  %v4947_v56 = vcombine.low %v4773_v11, %v211_v55  ;;  %v1831_v26 = vsel %vm1798_vm5, %v1828_v24, %v1830_v40  ;;  %v1833_v33 = vsel %vm1798_vm5, %v1830_v40, %v1832_v43  ;;  %v4972_v40 = vld [vmem:[%s4223_s23 + $0xa0] ss:$0 sps:$4 sm:$0xff]  }
  0xfd   : > { %3987 = vmatprep.mubr.msk.bf16.mxu1 %vm425_vm2, %v1829_v60  ;;  %v734_v21 = vpop.f32.mrf.mxu1  ;;  %v1835_v23 = vsel %vm1798_vm5, %v1832_v43, %v1834_v35  ;;  %v4155_v35 = vld [vmem:[%s4223_s23 + $0x18] sm:$0xff]  }
  0xfe   : > { %v4941_v63 = vpop.f32.mrf.mxu0  ;;  %v735_v50 = vadd.f32 %v734_v21, %v4840_v28  ;;  %v2342_v21 = vrot.slane %v5677_v61, 3  ;;  %v2344_v28 = vrot.slane %v4307_v42, 2  ;;  %v2112_v24 = vrot.slane %v4947_v56, 2 }
  0xff   : > { %v3810_v27 = vpop.f32.mrf.mxu1 }
 0x100   : > { %v4944_v57 = vpop.f32.mrf.mxu0  ;;  %v746_v22 = vadd.f32 %v3810_v27, %v4846_v10 }
 0x101   : > { %v737_v0 = vpop.f32.mrf.mxu1 }
 0x102   : > { %v3847_v30 = vpop.f32.mrf.mxu0  ;;  %4022 = vmatmul.mubr.msk.bf16.gmra.mxu0 %vm425_vm2, %v1829_v60  ;;  %v738_v55 = vadd.f32 %v737_v0, %v4851_v12  ;;  %v2346_v12 = vor.u32 %v2345_v46, %v2344_v28 }
 0x103   : > { %v4958_v11 = vadd.f32 %v3847_v30, %v743_v5  ;;  %4025 = vmatprep.mubr.msk.bf16.mxu0 %vm425_vm2, %v1831_v26  ;;  %v2343_v30 = vor.u32 %v2342_v21, %v2341_v15  ;;  %v2353_v21 = vrot.slane %v4350_v59, 3 }
 0x104   : > { %v3813_v10 = vpop.f32.mrf.mxu1  ;;  %3988 = vmatmul.mubr.msk.bf16.gmra.mxu1 %vm425_vm2, %v1831_v26  ;;  %v1027_v27 = vpop.f32.mrf.mxu0 }
 0x105   : > { %5678 = vst [vmem:[#allocation6_spill] sm:$0xff] %v4958_v11  ;;  %v759_v6 = vadd.f32 %v3813_v10, %v4856_v36  ;;  %v4964_v61 = vadd.f32 %v1027_v27, %v735_v50  ;;  %3991 = vmatprep.mubr.msk.bf16.mxu1 %vm425_vm2, %v1833_v33  ;;  %v2113_v36 = vsel %vm1798_vm5, %v1832_v43, %v2112_v24 }
 0x106   : > { %v750_v42 = vpop.f32.mrf.mxu1  ;;  %v3848_v0 = vpop.f32.mrf.mxu0 }
 0x107   : > { %v751_v5 = vadd.f32 %v750_v42, %v4864_v38  ;;  %v4969_v60 = vadd.f32 %v3848_v0, %v746_v22  ;;  %v2347_v38 = vsel %vm2340_vm6, %v2343_v30, %v2346_v12  ;;  %v2352_v22 = vrot.slane %v4380_v14, 2 }
 0x108   : > { %v3814_v26 = vpop.f32.mrf.mxu1  ;;  %v1030_v11 = vpop.f32.mrf.mxu0  ;;  %v2700_v42 = vrot.slane %v4155_v35, 3 }
 0x109   : > { %v762_v50 = vadd.f32 %v3814_v26, %v4870_v48  ;;  %v4976_v10 = vadd.f32 %v1030_v11, %v738_v55  ;;  %v2114_v48 = vrot.slane %v4972_v40, 2  ;;  %v4154_v11 = vld [vmem:[%s4223_s23 + $0x10] sm:$0xff]  }
 0x10a   : > { %v753_v46 = vpop.f32.mrf.mxu1  ;;  %v3851_v15 = vpop.f32.mrf.mxu0  ;;  %4026 = vmatmul.mubr.msk.bf16.gmra.mxu0 %vm425_vm2, %v1833_v33  ;;  %v2699_v33 = vrot.slane %v4154_v11, 3 }
 0x10b   : > { %v754_v28 = vadd.f32 %v753_v46, %v4875_v25  ;;  %v4984_v27 = vadd.f32 %v3851_v15, %v759_v6  ;;  %4029 = vmatprep.mubr.msk.bf16.mxu0 %vm425_vm2, %v2113_v36  ;;  %v2354_v6 = vor.u32 %v2353_v21, %v2352_v22  ;;  %v2115_v36 = vsel %vm1798_vm5, %v2112_v24, %v2114_v48 }
 0x10c   : > { %v3817_v43 = vpop.f32.mrf.mxu1  ;;  %3992 = vmatmul.mubr.msk.bf16.gmra.mxu1 %vm425_vm2, %v1835_v23  ;;  %v1043_v55 = vpop.f32.mrf.mxu0  ;;  %v2701_v15 = vsel %vm2698_vm7, %v2699_v33, %v2700_v42  ;;  %v2360_v21 = vrot.slane %v4435_v29, 2  ;;  %v2704_v33 = vrot.slane %v4333_v52, 3 }
 0x10d   : > { %v775_v14 = vadd.f32 %v3817_v43, %v4880_v32  ;;  %v4992_v0 = vadd.f32 %v1043_v55, %v751_v5  ;;  %4035 = vmatprep.mubr.msk.bf16.mxu1 %vm425_vm2, %v2347_v38  ;;  %v2356_v32 = vrot.slane %v4402_v41, 2  ;;  %v2357_v5 = vrot.slane %v4383_v16, 3 }
 0x10e   : > { %v766_v59 = vpop.f32.mrf.mxu1  ;;  %v3852_v25 = vpop.f32.mrf.mxu0  ;;  %v2355_v24 = vsel %vm2340_vm6, %v4714_v13, %v2354_v6  ;;  %v2361_v41 = vrot.slane %v4410_v49, 3 }
 0x10f   : > { %v767_v30 = vadd.f32 %v766_v59, %v4888_v58  ;;  %v4996_v26 = vadd.f32 %v3852_v25, %v762_v50  ;;  %v2351_v58 = vsel %vm2340_vm6, %v2346_v12, %v4714_v13  ;;  %v2358_v11 = vor.u32 %v2357_v5, %v2356_v32 }
 0x110   : > { %v3818_v23 = vpop.f32.mrf.mxu1  ;;  %v1046_v46 = vpop.f32.mrf.mxu0  ;;  %v2362_v35 = vor.u32 %v2361_v41, %v2360_v21  ;;  %v2365_v32 = vrot.slane %v4431_v7, 3 }
 0x111   : > { %v778_v38 = vadd.f32 %v3818_v23, %v4894_v4  ;;  %v5003_v43 = vadd.f32 %v1046_v46, %v754_v28  ;;  %v4156_v4 = vld [vmem:[%s4223_s23 + $0x20] sm:$0xff]   ;;  %v2359_v52 = vsel %vm2340_vm6, %v2354_v6, %v2358_v11  ;;  %v2369_v6 = vrot.slane %v4446_v53, 3 }
 0x112   : > { %v769_v50 = vpop.f32.mrf.mxu1  ;;  %v3855_v22 = vpop.f32.mrf.mxu0  ;;  %4030 = vmatmul.mubr.msk.bf16.gmra.mxu0 %vm425_vm2, %v2115_v36  ;;  %v2702_v28 = vrot.slane %v4156_v4, 3 }
 0x113   : > { %v770_v16 = vadd.f32 %v769_v50, %v4899_v9  ;;  %v5013_v48 = vadd.f32 %v3855_v22, %v775_v14  ;;  %4073 = vmatprep.mubr.msk.bf16.mxu0 %vm425_vm2, %v2701_v15  ;;  %v2364_v15 = vrot.slane %v4439_v34, 2 }
 0x114   : > { %v3821_v12 = vpop.f32.mrf.mxu1  ;;  %4036 = vmatmul.mubr.msk.bf16.vlgmr.msra.gmra.mxu1 %vm425_vm2, %v2351_v58  ;;  %v1059_v55 = vpop.f32.mrf.mxu0  ;;  %v2703_v25 = vsel %vm2698_vm7, %v2700_v42, %v2702_v28  ;;  %v2363_v42 = vsel %vm2340_vm6, %v2358_v11, %v2362_v35 }
 0x115   : > { %v791_v13 = vadd.f32 %v3821_v12, %v4904_v8  ;;  %v5020_v29 = vadd.f32 %v1059_v55, %v767_v30  ;;  %4039 = vmatprep.mubr.msk.bf16.mxu1 %vm425_vm2, %v2355_v24  ;;  %v2705_v8 = vsel %vm2698_vm7, %v2702_v28, %v2704_v33  ;;  %v2708_v24 = vrot.slane %v5652_v47, 3 }
 0x116   : > { %v782_v49 = vpop.f32.mrf.mxu1  ;;  %v3856_v9 = vpop.f32.mrf.mxu0  ;;  %v2366_v53 = vor.u32 %v2365_v32, %v2364_v15  ;;  %v2712_v15 = vrot.slane %v5654_v62, 3 }
 0x117   : > { %v783_v14 = vadd.f32 %v782_v49, %v4912_v39  ;;  %v5024_v59 = vadd.f32 %v3856_v9, %v778_v38  ;;  %v2368_v38 = vrot.slane %v4460_v3, 2 }
 0x118   : > { %v3822_v36 = vpop.f32.mrf.mxu1  ;;  %v1062_v23 = vpop.f32.mrf.mxu0 }
 0x119   : > { %v794_v30 = vadd.f32 %v3822_v36, %v4918_v44  ;;  %v5030_v46 = vadd.f32 %v1062_v23, %v770_v16  ;;  %v4157_v44 = vld [vmem:[%s4223_s23 + $0x30] sm:$0xff]   ;;  %v2370_v16 = vor.u32 %v2369_v6, %v2368_v38  ;;  %v2376_v36 = vrot.slane %v4258_v20, 2 }
 0x11a   : > { %v785_v39 = vpop.f32.mrf.mxu1  ;;  %v3859_v5 = vpop.f32.mrf.mxu0  ;;  %4074 = vmatmul.mubr.msk.bf16.vlgmr.msra.gmra.mxu0 %vm425_vm2, %v2703_v25  ;;  %v2706_v34 = vrot.slane %v4157_v44, 3  ;;  %v2377_v23 = vrot.slane %v4255_v19, 3 }
 0x11b   : > { %v786_v58 = vadd.f32 %v785_v39, %v4923_v54  ;;  %v5039_v50 = vadd.f32 %v3859_v5, %v791_v13  ;;  %4077 = vmatprep.mubr.msk.bf16.mxu0 %vm425_vm2, %v2705_v8  ;;  %v2373_v13 = vrot.slane %v4249_v17, 3  ;;  %v4158_v17 = vld [vmem:[%s4223_s23 + $0x40] sm:$0xff]  }
 0x11c   : > { %v3825_v22 = vpop.f32.mrf.mxu1  ;;  %4040 = vmatmul.mubr.msk.bf16.gmra.mxu1 %vm425_vm2, %v2359_v52  ;;  %v1075_v7 = vpop.f32.mrf.mxu0  ;;  %v2707_v12 = vsel %vm2698_vm7, %v2704_v33, %v2706_v34  ;;  %v2709_v47 = vsel %vm2698_vm7, %v2706_v34, %v2708_v24  ;;  %v2371_v33 = vsel %vm2340_vm6, %v2366_v53, %v2370_v16  ;;  %v2380_v34 = vrot.slane %v4298_v37, 2  ;;  %v4159_v37 = vld [vmem:[%s4223_s23 + $0x50] sm:$0xff]  }
 0x11d   : > { %v807_v21 = vadd.f32 %v3825_v22, %v4928_v2  ;;  %v5046_v41 = vadd.f32 %v1075_v7, %v783_v14  ;;  %4043 = vmatprep.mubr.msk.bf16.mxu1 %vm425_vm2, %v2363_v42  ;;  %v2372_v2 = vrot.slane %v4252_v18, 2  ;;  %v2367_v14 = vsel %vm2340_vm6, %v2362_v35, %v2366_v53 }
 0x11e   : > { %v798_v3 = vpop.f32.mrf.mxu1  ;;  %v3860_v54 = vpop.f32.mrf.mxu0  ;;  %v2381_v22 = vrot.slane %v4279_v31, 3  ;;  %v2384_v53 = vrot.slane %v4330_v51, 2 }
 0x11f   : > { %v799_v4 = vadd.f32 %v798_v3, %v4934_v1  ;;  %v5050_v28 = vadd.f32 %v3860_v54, %v794_v30  ;;  %v2374_v30 = vor.u32 %v2373_v13, %v2372_v2  ;;  %v5679_v3 = vld [vmem:[#allocation8_spill] sm:$0xff]  ;;  %v5681_v2 = vld [vmem:[#allocation14_spill] sm:$0xff] }
 0x120   : > { %v3826_v55 = vpop.f32.mrf.mxu1  ;;  %v1078_v11 = vpop.f32.mrf.mxu0  ;;  %v2385_v54 = vrot.slane %v5679_v3, 3  ;;  %v2382_v51 = vor.u32 %v2381_v22, %v2380_v34  ;;  %v5686_v34 = vld [vmem:[#allocation16_spill] sm:$0xff] }
 0x121   : > { %v810_v49 = vadd.f32 %v3826_v55, %v4941_v63  ;;  %v5057_v9 = vadd.f32 %v1078_v11, %v786_v58  ;;  %v2710_v63 = vrot.slane %v4158_v17, 3  ;;  %v2375_v6 = vsel %vm2340_vm6, %v2370_v16, %v2374_v30  ;;  %v5680_v16 = vld [vmem:[#allocation11_spill] sm:$0xff]  ;;  %v4160_v11 = vld [vmem:[%s4223_s23 + $0x58] sm:$0xff]  }
 0x122   : > { %v801_v1 = vpop.f32.mrf.mxu1  ;;  %v3863_v25 = vpop.f32.mrf.mxu0  ;;  %4078 = vmatmul.mubr.msk.bf16.gmra.mxu0 %vm425_vm2, %v2707_v12  ;;  %v2714_v12 = vrot.slane %v4159_v37, 3  ;;  %v2392_v22 = vrot.slane %v5686_v34, 2  ;;  %v5694_v34 = vld [vmem:[#allocation22_spill] sm:$0xff] }
 0x123   : > { %v802_v18 = vadd.f32 %v801_v1, %v4944_v57  ;;  %v5065_v52 = vadd.f32 %v3863_v25, %v807_v21  ;;  %4081 = vmatprep.mubr.msk.bf16.mxu0 %vm425_vm2, %v2709_v47  ;;  %v2378_v57 = vor.u32 %v2377_v23, %v2376_v36  ;;  %v2711_v5 = vsel %vm2698_vm7, %v2708_v24, %v2710_v63 }
 0x124   : > { %v3829_v8 = vpop.f32.mrf.mxu1  ;;  %4044 = vmatmul.mubr.msk.bf16.gmra.mxu1 %vm425_vm2, %v2367_v14  ;;  %v1091_v35 = vpop.f32.mrf.mxu0  ;;  %v2713_v58 = vsel %vm2698_vm7, %v2710_v63, %v2712_v15  ;;  %v2716_v47 = vrot.slane %v4160_v11, 3  ;;  %v2386_v25 = vor.u32 %v2385_v54, %v2384_v53  ;;  %v4161_v54 = vld [vmem:[%s4223_s23 + $0x60] sm:$0xff]  }
 0x125   : > { %v5071_v32 = vadd.f32 %v1091_v35, %v799_v4  ;;  %4047 = vmatprep.mubr.msk.bf16.mxu1 %vm425_vm2, %v2371_v33  ;;  %v823_v62 = vadd.f32 %v3829_v8, %v4837_v45  ;;  %v2379_v24 = vsel %vm2340_vm6, %v2374_v30, %v2378_v57  ;;  %v5682_v33 = vld [vmem:[#allocation18_spill] sm:$0xff]  ;;  %v5683_v35 = vld [vmem:[#allocation12_spill] sm:$0xff] }
 0x126   : > { %v814_v19 = vpop.f32.mrf.mxu1  ;;  %v3864_v20 = vpop.f32.mrf.mxu0  ;;  %v2717_v8 = vsel %vm2698_vm7, %v2714_v12, %v2716_v47  ;;  %v2388_v30 = vrot.slane %v5683_v35, 2 }
 0x127   : > { %v5074_v39 = vadd.f32 %v3864_v20, %v810_v49  ;;  %v815_v4 = vadd.f32 %v814_v19, %v5680_v16  ;;  %v5684_v19 = vld [vmem:[#allocation10_spill] sm:$0xff]  ;;  %v2718_v16 = vrot.slane %v4161_v54, 3  ;;  %v4163_v54 = vld [vmem:[%s4223_s23 + $0x70] sm:$0xff]  }
 0x128   : > { %v3830_v42 = vpop.f32.mrf.mxu1  ;;  %v1094_v38 = vpop.f32.mrf.mxu0  ;;  %v2389_v20 = vrot.slane %v5684_v19, 3 }
 0x129   : > { %v5080_v44 = vadd.f32 %v1094_v38, %v802_v18  ;;  %v826_v13 = vadd.f32 %v3830_v42, %v5681_v2  ;;  %v2715_v18 = vsel %vm2698_vm7, %v2712_v15, %v2714_v12  ;;  %v2387_v15 = vsel %vm2340_vm6, %v2382_v51, %v2386_v25  ;;  %v4162_v12 = vld [vmem:[%s4223_s23 + $0x68] sm:$0xff]  }
 0x12a   : > { %v817_v7 = vpop.f32.mrf.mxu1  ;;  %v3867_v21 = vpop.f32.mrf.mxu0  ;;  %4082 = vmatmul.mubr.msk.bf16.gmra.mxu0 %vm425_vm2, %v2711_v5  ;;  %v5685_v5 = vld [vmem:[#allocation21_spill] sm:$0xff]  ;;  %v2390_v37 = vor.u32 %v2389_v20, %v2388_v30  ;;  %v5691_v30 = vld [vmem:[#allocation24_spill] sm:$0xff] }
 0x12b   : > { %v5089_v45 = vadd.f32 %v3867_v21, %v823_v62  ;;  %4085 = vmatprep.mubr.msk.bf16.mxu0 %vm425_vm2, %v2713_v58  ;;  %v818_v36 = vadd.f32 %v817_v7, %v5682_v33  ;;  %v5687_v7 = vld [vmem:[#allocation15_spill] sm:$0xff] }
 0x12c   : > { %v3833_v55 = vpop.f32.mrf.mxu1  ;;  %4048 = vmatmul.mubr.msk.bf16.gmra.mxu1 %vm425_vm2, %v2375_v6  ;;  %v1107_v31 = vpop.f32.mrf.mxu0  ;;  %v2383_v6 = vsel %vm2340_vm6, %v2378_v57, %v2382_v51  ;;  %v2393_v21 = vrot.slane %v5687_v7, 3  ;;  %v2391_v35 = vsel %vm2340_vm6, %v2386_v25, %v2390_v37  ;;  %v5695_v25 = vld [vmem:[#allocation20_spill] sm:$0xff] }
 0x12d   : > { %v5096_v49 = vadd.f32 %v1107_v31, %v815_v4  ;;  %4051 = vmatprep.mubr.msk.bf16.mxu1 %vm425_vm2, %v2379_v24  ;;  %v839_v42 = vadd.f32 %v3833_v55, %v5685_v5  ;;  %v5688_v24 = vld [vmem:[#allocation2_spill] sm:$0xff]  ;;  %v2720_v55 = vrot.slane %v4162_v12, 3  ;;  %v5689_v31 = vld [vmem:[#allocation3_spill] sm:$0xff]  ;;  %v2401_v7 = vrot.slane %v5695_v25, 3  ;;  %v4164_v12 = vld [vmem:[%s4223_s23 + $0x78] sm:$0xff]  }
 0x12e   : > { %v830_v14 = vpop.f32.mrf.mxu1  ;;  %v3868_v1 = vpop.f32.mrf.mxu0  ;;  %v5692_v5 = vld [vmem:[#allocation19_spill] sm:$0xff]  ;;  %v5702_v25 = vld [vmem:[#allocation26_spill] sm:$0xff] }
 0x12f   : > { %v5100_v23 = vadd.f32 %v3868_v1, %v826_v13  ;;  %v831_v53 = vadd.f32 %v830_v14, %v5688_v24  ;;  %v2394_v14 = vor.u32 %v2393_v21, %v2392_v22  ;;  %v5690_v1 = vld [vmem:[#allocation5_spill] sm:$0xff]  ;;  %v2400_v22 = vrot.slane %v5694_v34, 2  ;;  %v5696_v21 = vld [vmem:[#allocation7_spill] sm:$0xff] }
 0x130   : > { %v3834_v17 = vpop.f32.mrf.mxu1  ;;  %v1110_v63 = vpop.f32.mrf.mxu0 }
 0x131   : > { %v5107_v38 = vadd.f32 %v1110_v63, %v818_v36  ;;  %v842_v11 = vadd.f32 %v3834_v17, %v5689_v31  ;;  %v2721_v17 = vsel %vm2698_vm7, %v2718_v16, %v2720_v55  ;;  %v2724_v31 = vrot.slane %v4164_v12, 3  ;;  %v5703_v12 = vld [vmem:[#allocation27_spill] sm:$0xff] }
 0x132   : > { %v833_v58 = vpop.f32.mrf.mxu1  ;;  %v3871_v62 = vpop.f32.mrf.mxu0  ;;  %4086 = vmatmul.mubr.msk.bf16.gmra.mxu0 %vm425_vm2, %v2715_v18  ;;  %v2719_v18 = vsel %vm2698_vm7, %v2716_v47, %v2718_v16  ;;  %v2395_v47 = vsel %vm2340_vm6, %v2390_v37, %v2394_v14  ;;  %v2722_v16 = vrot.slane %v4163_v54, 3 }
 0x133   : > { %v5115_v3 = vadd.f32 %v3871_v62, %v839_v42  ;;  %4089 = vmatprep.mubr.msk.bf16.mxu0 %vm425_vm2, %v2717_v8  ;;  %v834_v33 = vadd.f32 %v833_v58, %v5690_v1  ;;  %v2396_v42 = vrot.slane %v5692_v5, 2 }
 0x134   : > { %v3837_v57 = vpop.f32.mrf.mxu1  ;;  %4052 = vmatmul.mubr.msk.bf16.gmra.mxu1 %vm425_vm2, %v2383_v6  ;;  %v1123_v4 = vpop.f32.mrf.mxu0  ;;  %v5693_v6 = vld [vmem:[#allocation17_spill] sm:$0xff]  ;;  %v2723_v5 = vsel %vm2698_vm7, %v2720_v55, %v2722_v16 }
 0x135   : > { %v5122_v2 = vadd.f32 %v1123_v4, %v831_v53  ;;  %4055 = vmatprep.mubr.msk.bf16.mxu1 %vm425_vm2, %v2387_v15  ;;  %v855_v19 = vadd.f32 %v3837_v57, %v5691_v30  ;;  %v2397_v58 = vrot.slane %v5693_v6, 3  ;;  %v5698_v30 = vld [vmem:[#allocation25_spill] sm:$0xff] }
 0x136   : > { %v846_v13 = vpop.f32.mrf.mxu1  ;;  %v3872_v51 = vpop.f32.mrf.mxu0 }
 0x137   : > { %v5126_v36 = vadd.f32 %v3872_v51, %v842_v11  ;;  %v847_v24 = vadd.f32 %v846_v13, %v5696_v21  ;;  %v5697_v11 = vld [vmem:[#allocation9_spill] sm:$0xff]  ;;  %v2398_v1 = vor.u32 %v2397_v58, %v2396_v42 }
 0x138   : > { %v3838_v63 = vpop.f32.mrf.mxu1  ;;  %v1126_v8 = vpop.f32.mrf.mxu0 }
 0x139   : > { %v5132_v20 = vadd.f32 %v1126_v8, %v834_v33  ;;  %v858_v37 = vadd.f32 %v3838_v63, %v5697_v11  ;;  %v2409_v8 = vshrl.u32 %v4947_v56, 16 }
 0x13a   : > { %v849_v62 = vpop.f32.mrf.mxu1  ;;  %v3875_v15 = vpop.f32.mrf.mxu0  ;;  %4090 = vmatmul.mubr.msk.bf16.gmra.mxu0 %vm425_vm2, %v2719_v18  ;;  %v2402_v18 = vor.u32 %v2401_v7, %v2400_v22 }
 0x13b   : > { %v5141_v53 = vadd.f32 %v3875_v15, %v855_v19  ;;  %4093 = vmatprep.mubr.msk.bf16.mxu0 %vm425_vm2, %v2721_v17  ;;  %v2412_v17 = vshll.u32 %v4947_v56, 16  ;;  %v850_v19 = vadd.f32 %v849_v62, %v5698_v30  ;;  %v2725_v15 = vsel %vm2698_vm7, %v2722_v16, %v2724_v31 }
 0x13c   : > { %v3841_v57 = vpop.f32.mrf.mxu1  ;;  %4056 = vmatmul.mubr.msk.bf16.gmra.mxu1 %vm425_vm2, %v2391_v35  ;;  %v1139_v4 = vpop.f32.mrf.mxu0  ;;  %v2399_v62 = vsel %vm2340_vm6, %v2394_v14, %v2398_v1  ;;  %v2403_v54 = vsel %vm2340_vm6, %v2398_v1, %v2402_v18  ;;  %v2411_v16 = vrot.slane %v2409_v8, 2  ;;  %v5704_v1 = vld [vmem:[#allocation13_spill] sm:$0xff] }
 0x13d   : > { %v5148_v51 = vadd.f32 %v1139_v4, %v847_v24  ;;  %4059 = vmatprep.mubr.msk.bf16.mxu1 %vm425_vm2, %v2395_v47  ;;  %v5699_v47 = vld [vmem:[#allocation23_spill] sm:$0xff]  ;;  %v871_v7 = vadd.f32 %v3841_v57, %v5702_v25  ;;  %v2414_v4 = vrot.slane %v2412_v17, 3  ;;  %v4165_v57 = vld [vmem:[%s4223_s23 + $0x80] sm:$0xff]  }
 0x13e   : > { %v862_v13 = vpop.f32.mrf.mxu1  ;;  %v3876_v33 = vpop.f32.mrf.mxu0  ;;  %v5700_v42 = vshrl.u32 %v5699_v47, 16  ;;  %v5701_v34 = vshll.u32 %v5699_v47, 16  ;;  %v5705_v17 = vld [vmem:[#allocation6_spill] sm:$0xff] }
 0x13f   : > { %v5154_v35 = vadd.f32 %v3876_v33, %v858_v37  ;;  %v863_v11 = vadd.f32 %v862_v13, %v5703_v12  ;;  %v2726_v33 = vrot.slane %v4165_v57, 3 }
 0x140   : > { %v3842_v6 = vpop.f32.mrf.mxu1  ;;  %v1142_v63 = vpop.f32.mrf.mxu0  ;;  %v2404_v58 = vrot.slane %v5700_v42, 2  ;;  %v2405_v22 = vrot.slane %v5701_v34, 3 }
 0x141   : > { %v5163_v21 = vadd.f32 %v1142_v63, %v850_v19  ;;  %v4166_v63 = vld [vmem:[%s4223_s23 + $0x88] sm:$0xff]   ;;  %v874_v8 = vadd.f32 %v3842_v6, %v5704_v1  ;;  %v2727_v57 = vsel %vm2698_vm7, %v2724_v31, %v2726_v33 }
 0x142   : > { %v865_v24 = vpop.f32.mrf.mxu1  ;;  %v3879_v55 = vpop.f32.mrf.mxu0  ;;  %4094 = vmatmul.mubr.msk.bf16.gmra.mxu0 %vm425_vm2, %v2723_v5  ;;  %v2406_v19 = vor.u32 %v2405_v22, %v2404_v58  ;;  %v2728_v42 = vrot.slane %v4166_v63, 3  ;;  %v2418_v5 = vshrl.u32 %v4972_v40, 16 }
 0x143   : > { %v5169_v37 = vadd.f32 %v3879_v55, %v871_v7  ;;  %4097 = vmatprep.mubr.msk.bf16.mxu0 %vm425_vm2, %v2725_v15  ;;  %v2421_v15 = vshll.u32 %v4972_v40, 16  ;;  %v2415_v55 = vor.u32 %v2414_v4, %v2411_v16 }
 0x144   : > { %v3885_v30 = vpop.f32.mrf.mxu1  ;;  %4060 = vmatmul.mubr.msk.bf16.gmra.mxu1 %vm425_vm2, %v2399_v62  ;;  %v1155_v14 = vpop.f32.mrf.mxu0  ;;  %v5706_v62 = vld [vmem:[#allocation28_spill] sm:$0xff]  ;;  %v2420_v1 = vrot.slane %v2418_v5, 2  ;;  %v2732_v5 = vrot.slane %v4947_v56, 3 }
 0x145   : > { %v1404_v34 = vadd.f32 %v3885_v30, %v5705_v17  ;;  %v5178_v13 = vadd.f32 %v1155_v14, %v863_v11  ;;  %4063 = vmatprep.mubr.msk.bf16.mxu1 %vm425_vm2, %v2403_v54  ;;  %v866_v12 = vadd.f32 %v865_v24, %v5706_v62  ;;  %v2407_v11 = vsel %vm2340_vm6, %v2402_v18, %v2406_v19 }
 0x146   : > { %v1259_v25 = vpop.f32.mrf.mxu1  ;;  %v3880_v7 = vpop.f32.mrf.mxu0  ;;  %v2729_v30 = vsel %vm2698_vm7, %v2726_v33, %v2728_v42  ;;  %v2423_v16 = vrot.slane %v2421_v15, 3  ;;  %v2730_v18 = vrot.slane %v5699_v47, 3 }
 0x147   : > { %v1402_v58 = vadd.f32 %v1259_v25, %v4964_v61  ;;  %v5184_v22 = vadd.f32 %v3880_v7, %v874_v8  ;;  %v2416_v61 = vsel %vm2340_vm6, %v2406_v19, %v2415_v55 }
 0x148   : > { %v3886_v6 = vpop.f32.mrf.mxu1  ;;  %v1158_v63 = vpop.f32.mrf.mxu0  ;;  %v2424_v19 = vor.u32 %v2423_v16, %v2420_v1  ;;  %v2731_v47 = vsel %vm2698_vm7, %v2728_v42, %v2730_v18  ;;  %v2734_v42 = vrot.slane %v4972_v40, 3 }
 0x149   : > { %v1405_v54 = vadd.f32 %v3886_v6, %v4969_v60  ;;  %v5190_v14 = vadd.f32 %v1158_v63, %v866_v12 }
 0x14a   : > { %v1262_v4 = vpop.f32.mrf.mxu1  ;;  %v3923_v24 = vpop.f32.mrf.mxu0  ;;  %4098 = vmatmul.mubr.msk.bf16.gmra.mxu0 %vm425_vm2, %v2727_v57  ;;  %v2733_v57 = vsel %vm2698_vm7, %v2730_v18, %v2732_v5 }
 0x14b   : > { %v1403_v31 = vadd.f32 %v1262_v4, %v4976_v10  ;;  %v5195_v8 = vadd.f32 %v3923_v24, %v1404_v34  ;;  %4101 = vmatprep.mubr.msk.bf16.mxu0 %vm425_vm2, %v2729_v30 }
 0x14c   : > { %v3889_v33 = vpop.f32.mrf.mxu1  ;;  %4064 = vmatmul.mubr.msk.bf16.gmra.mxu1 %vm425_vm2, %v2407_v11  ;;  %v1617_v60 = vpop.f32.mrf.mxu0 }
 0x14d   : > { %v1408_v17 = vadd.f32 %v3889_v33, %v4984_v27  ;;  %v5202_v15 = vadd.f32 %v1617_v60, %v1402_v58  ;;  %4067 = vmatprep.mubr.msk.bf16.mxu1 %vm425_vm2, %v2416_v61  ;;  %v2425_v58 = vsel %vm2340_vm6, %v2415_v55, %v2424_v19 }
 0x14e   : > { %v1275_v10 = vpop.f32.mrf.mxu1  ;;  %v3924_v34 = vpop.f32.mrf.mxu0 }
 0x14f   : > { %v1406_v25 = vadd.f32 %v1275_v10, %v4992_v0  ;;  %v5206_v7 = vadd.f32 %v3924_v34, %v1405_v54 }
 0x150   : > { %v3890_v62 = vpop.f32.mrf.mxu1  ;;  %v1620_v12 = vpop.f32.mrf.mxu0 }
 0x151   : > { %v1409_v56 = vadd.f32 %v3890_v62, %v4996_v26  ;;  %v5211_v27 = vadd.f32 %v1620_v12, %v1403_v31 }
 0x152   : > { %v1278_v6 = vpop.f32.mrf.mxu1  ;;  %v3927_v63 = vpop.f32.mrf.mxu0  ;;  %4102 = vmatmul.mubr.msk.bf16.gmra.mxu0 %vm425_vm2, %v2731_v47 }
 0x153   : > { %v1407_v0 = vadd.f32 %v1278_v6, %v5003_v43  ;;  %v5216_v11 = vadd.f32 %v3927_v63, %v1408_v17  ;;  %4105 = vmatprep.mubr.msk.bf16.mxu0 %vm425_vm2, %v2733_v57  ;;  %v2735_v43 = vsel %vm2698_vm7, %v2732_v5, %v2734_v42 }
 0x154   : > { %v3893_v30 = vpop.f32.mrf.mxu1  ;;  %4068 = vmatmul.mubr.msk.bf16.gmra.mxu1 %vm425_vm2, %v2425_v58  ;;  %v1633_v26 = vpop.f32.mrf.mxu0 }
 0x155   : > { %v1412_v54 = vadd.f32 %v3893_v30, %v5013_v48  ;;  %v5222_v1 = vadd.f32 %v1633_v26, %v1406_v25 }
 0x156   : > { %v1291_v55 = vpop.f32.mrf.mxu1  ;;  %v3928_v16 = vpop.f32.mrf.mxu0 }
 0x157   : > { %v1410_v4 = vadd.f32 %v1291_v55, %v5020_v29  ;;  %v5225_v24 = vadd.f32 %v3928_v16, %v1409_v56 }
 0x158   : > { %v3894_v61 = vpop.f32.mrf.mxu1  ;;  %v1636_v31 = vpop.f32.mrf.mxu0 }
 0x159   : > { %v1413_v40 = vadd.f32 %v3894_v61, %v5024_v59  ;;  %v5229_v18 = vadd.f32 %v1636_v31, %v1407_v0 }
 0x15a   : > { %v1294_v33 = vpop.f32.mrf.mxu1  ;;  %v3931_v60 = vpop.f32.mrf.mxu0  ;;  %4106 = vmatmul.mubr.msk.bf16.gmra.mxu0 %vm425_vm2, %v2735_v43 }
 0x15b   : > { %v1411_v48 = vadd.f32 %v1294_v33, %v5030_v46  ;;  %v5233_v17 = vadd.f32 %v3931_v60, %v1412_v54 }
 0x15c   : > { %v3897_v19 = vpop.f32.mrf.mxu1  ;;  %v1649_v29 = vpop.f32.mrf.mxu0 }
 0x15d   : > { %v1416_v10 = vadd.f32 %v3897_v19, %v5039_v50  ;;  %v5236_v34 = vadd.f32 %v1649_v29, %v1410_v4 }
 0x15e   : > { %v1307_v5 = vpop.f32.mrf.mxu1  ;;  %v3932_v25 = vpop.f32.mrf.mxu0 }
 0x15f   : > { %v1414_v59 = vadd.f32 %v1307_v5, %v5046_v41  ;;  %v5239_v47 = vadd.f32 %v3932_v25, %v1413_v40 }
 0x160   : > { %v3898_v62 = vpop.f32.mrf.mxu1  ;;  %v1652_v12 = vpop.f32.mrf.mxu0 }
 0x161   : > { %v1417_v57 = vadd.f32 %v3898_v62, %v5050_v28  ;;  %v5242_v56 = vadd.f32 %v1652_v12, %v1411_v48 }
 0x162   : > { %v1310_v46 = vpop.f32.mrf.mxu1  ;;  %v3935_v58 = vpop.f32.mrf.mxu0 }
 0x163   : > { %v1415_v6 = vadd.f32 %v1310_v46, %v5057_v9  ;;  %v5245_v63 = vadd.f32 %v3935_v58, %v1416_v10 }
 0x164   : > { %v3901_v50 = vpop.f32.mrf.mxu1  ;;  %v1665_v0 = vpop.f32.mrf.mxu0 }
 0x165   : > { %v1420_v42 = vadd.f32 %v3901_v50, %v5065_v52  ;;  %v5248_v30 = vadd.f32 %v1665_v0, %v1414_v59 }
 0x166   : > { %v1323_v41 = vpop.f32.mrf.mxu1  ;;  %v3936_v26 = vpop.f32.mrf.mxu0 }
 0x167   : > { %v1418_v54 = vadd.f32 %v1323_v41, %v5071_v32  ;;  %v5251_v55 = vadd.f32 %v3936_v26, %v1417_v57 }
 0x168   : > { %v3902_v28 = vpop.f32.mrf.mxu1  ;;  %v1668_v16 = vpop.f32.mrf.mxu0 }
 0x169   : > { %v1421_v4 = vadd.f32 %v3902_v28, %v5074_v39  ;;  %v5254_v43 = vadd.f32 %v1668_v16, %v1415_v6 }
 0x16a   : > { %v1326_v9 = vpop.f32.mrf.mxu1  ;;  %v3939_v61 = vpop.f32.mrf.mxu0 }
 0x16b   : > { %v1419_v31 = vadd.f32 %v1326_v9, %v5080_v44  ;;  %v5257_v40 = vadd.f32 %v3939_v61, %v1420_v42 }
 0x16c   : > { %v3905_v52 = vpop.f32.mrf.mxu1  ;;  %v1681_v33 = vpop.f32.mrf.mxu0 }
 0x16d   : > { %v1424_v60 = vadd.f32 %v3905_v52, %v5089_v45  ;;  %v5260_v48 = vadd.f32 %v1681_v33, %v1418_v54 }
 0x16e   : > { %v1339_v32 = vpop.f32.mrf.mxu1  ;;  %v3940_v19 = vpop.f32.mrf.mxu0 }
 0x16f   : > { %v1422_v29 = vadd.f32 %v1339_v32, %v5096_v49  ;;  %v5263_v10 = vadd.f32 %v3940_v19, %v1421_v4 }
 0x170   : > { %v3906_v39 = vpop.f32.mrf.mxu1  ;;  %v1684_v5 = vpop.f32.mrf.mxu0 }
 0x171   : > { %v1425_v25 = vadd.f32 %v3906_v39, %v5100_v23  ;;  %v5266_v59 = vadd.f32 %v1684_v5, %v1419_v31 }
 0x172   : > { %v1342_v44 = vpop.f32.mrf.mxu1  ;;  %v3943_v62 = vpop.f32.mrf.mxu0 }
 0x173   : > { %v1423_v12 = vadd.f32 %v1342_v44, %v5107_v38  ;;  %v5269_v57 = vadd.f32 %v3943_v62, %v1424_v60 }
 0x174   : > { %v3909_v45 = vpop.f32.mrf.mxu1  ;;  %v1697_v46 = vpop.f32.mrf.mxu0 }
 0x175   : > { %v1428_v58 = vadd.f32 %v3909_v45, %v5115_v3  ;;  %v5272_v6 = vadd.f32 %v1697_v46, %v1422_v29 }
 0x176   : > { %v1355_v49 = vpop.f32.mrf.mxu1  ;;  %v3944_v50 = vpop.f32.mrf.mxu0 }
 0x177   : > { %v1426_v0 = vadd.f32 %v1355_v49, %v5122_v2  ;;  %v5275_v42 = vadd.f32 %v3944_v50, %v1425_v25 }
 0x178   : > { %v3910_v23 = vpop.f32.mrf.mxu1  ;;  %v1700_v41 = vpop.f32.mrf.mxu0 }
 0x179   : > { %v1429_v26 = vadd.f32 %v3910_v23, %v5126_v36  ;;  %v5278_v54 = vadd.f32 %v1700_v41, %v1423_v12 }
 0x17a   : > { %v1358_v38 = vpop.f32.mrf.mxu1  ;;  %v3947_v28 = vpop.f32.mrf.mxu0 }
 0x17b   : > { %v1427_v16 = vadd.f32 %v1358_v38, %v5132_v20  ;;  %v5281_v4 = vadd.f32 %v3947_v28, %v1428_v58 }
 0x17c   : > { %v3913_v3 = vpop.f32.mrf.mxu1  ;;  %v1713_v9 = vpop.f32.mrf.mxu0 }
 0x17d   : > { %v1432_v61 = vadd.f32 %v3913_v3, %v5141_v53  ;;  %v5284_v31 = vadd.f32 %v1713_v9, %v1426_v0 }
 0x17e   : > { %v1371_v2 = vpop.f32.mrf.mxu1  ;;  %v3948_v52 = vpop.f32.mrf.mxu0 }
 0x17f   : > { %v1430_v33 = vadd.f32 %v1371_v2, %v5148_v51  ;;  %v5287_v60 = vadd.f32 %v3948_v52, %v1429_v26 }
 0x180   : > { %v3914_v36 = vpop.f32.mrf.mxu1  ;;  %v1716_v32 = vpop.f32.mrf.mxu0 }
 0x181   : > { %v1433_v19 = vadd.f32 %v3914_v36, %v5154_v35  ;;  %v5290_v29 = vadd.f32 %v1716_v32, %v1427_v16 }
 0x182   : > { %v1374_v20 = vpop.f32.mrf.mxu1  ;;  %v3951_v39 = vpop.f32.mrf.mxu0 }
 0x183   : > { %v1431_v5 = vadd.f32 %v1374_v20, %v5163_v21  ;;  %v5293_v25 = vadd.f32 %v3951_v39, %v1432_v61 }
 0x184   : > { %v3917_v53 = vpop.f32.mrf.mxu1  ;;  %v1729_v44 = vpop.f32.mrf.mxu0 }
 0x185   : > { %v1436_v62 = vadd.f32 %v3917_v53, %v5169_v37  ;;  %v5296_v12 = vadd.f32 %v1729_v44, %v1430_v33 }
 0x186   : > { %v1387_v51 = vpop.f32.mrf.mxu1  ;;  %v3952_v45 = vpop.f32.mrf.mxu0 }
 0x187   : > { %v1434_v46 = vadd.f32 %v1387_v51, %v5178_v13  ;;  %v5299_v58 = vadd.f32 %v3952_v45, %v1433_v19 }
 0x188   : > { %v3918_v35 = vpop.f32.mrf.mxu1  ;;  %v1732_v49 = vpop.f32.mrf.mxu0 }
 0x189   : > { %v1437_v50 = vadd.f32 %v3918_v35, %v5184_v22  ;;  %v5302_v0 = vadd.f32 %v1732_v49, %v1431_v5 }
 0x18a   : > { %v1390_v21 = vpop.f32.mrf.mxu1  ;;  %v3955_v23 = vpop.f32.mrf.mxu0 }
 0x18b   : > { %v1435_v41 = vadd.f32 %v1390_v21, %v5190_v14  ;;  %v5305_v26 = vadd.f32 %v3955_v23, %v1436_v62 }
 0x18c   : > { %v3961_v37 = vpop.f32.mrf.mxu1  ;;  %v1745_v38 = vpop.f32.mrf.mxu0 }
 0x18d   : > { %v2072_v28 = vadd.f32 %v3961_v37, %v5195_v8  ;;  %v5308_v16 = vadd.f32 %v1745_v38, %v1434_v46 }
 0x18e   : > { %v1927_v13 = vpop.f32.mrf.mxu1  ;;  %v3956_v3 = vpop.f32.mrf.mxu0 }
 0x18f   : > { %v2070_v9 = vadd.f32 %v1927_v13, %v5202_v15  ;;  %v5311_v61 = vadd.f32 %v3956_v3, %v1437_v50 }
 0x190   : > { %v3962_v22 = vpop.f32.mrf.mxu1  ;;  %v1748_v2 = vpop.f32.mrf.mxu0 }
 0x191   : > { %v2073_v52 = vadd.f32 %v3962_v22, %v5206_v7  ;;  %v5314_v33 = vadd.f32 %v1748_v2, %v1435_v41 }
 0x192   : > { %v1930_v14 = vpop.f32.mrf.mxu1  ;;  %v3999_v36 = vpop.f32.mrf.mxu0 }
 0x193   : > { %v2071_v32 = vadd.f32 %v1930_v14, %v5211_v27  ;;  %v5317_v19 = vadd.f32 %v3999_v36, %v2072_v28 }
 0x194   : > { %v3965_v8 = vpop.f32.mrf.mxu1  ;;  %v2159_v20 = vpop.f32.mrf.mxu0 }
 0x195   : > { %v2076_v39 = vadd.f32 %v3965_v8, %v5216_v11  ;;  %v5320_v5 = vadd.f32 %v2159_v20, %v2070_v9 }
 0x196   : > { %v1943_v15 = vpop.f32.mrf.mxu1  ;;  %v4000_v53 = vpop.f32.mrf.mxu0 }
 0x197   : > { %v2074_v44 = vadd.f32 %v1943_v15, %v5222_v1  ;;  %v5323_v62 = vadd.f32 %v4000_v53, %v2073_v52 }
 0x198   : > { %v3966_v7 = vpop.f32.mrf.mxu1  ;;  %v2162_v51 = vpop.f32.mrf.mxu0 }
 0x199   : > { %v2077_v45 = vadd.f32 %v3966_v7, %v5225_v24  ;;  %v5326_v46 = vadd.f32 %v2162_v51, %v2071_v32 }
 0x19a   : > { %v1946_v27 = vpop.f32.mrf.mxu1  ;;  %v4003_v35 = vpop.f32.mrf.mxu0 }
 0x19b   : > { %v2075_v49 = vadd.f32 %v1946_v27, %v5229_v18  ;;  %v5329_v50 = vadd.f32 %v4003_v35, %v2076_v39 }
 0x19c   : > { %v3969_v11 = vpop.f32.mrf.mxu1  ;;  %v2175_v21 = vpop.f32.mrf.mxu0 }
 0x19d   : > { %v2080_v23 = vadd.f32 %v3969_v11, %v5233_v17  ;;  %v5332_v41 = vadd.f32 %v2175_v21, %v2074_v44 }
 0x19e   : > { %v1959_v1 = vpop.f32.mrf.mxu1  ;;  %v4004_v37 = vpop.f32.mrf.mxu0 }
 0x19f   : > { %v2078_v38 = vadd.f32 %v1959_v1, %v5236_v34  ;;  %v5335_v28 = vadd.f32 %v4004_v37, %v2077_v45 }
 0x1a0   : > { %v3970_v24 = vpop.f32.mrf.mxu1  ;;  %v2178_v13 = vpop.f32.mrf.mxu0 }
 0x1a1   : > { %v2081_v3 = vadd.f32 %v3970_v24, %v5239_v47  ;;  %v5338_v9 = vadd.f32 %v2178_v13, %v2075_v49 }
 0x1a2   : > { %v1962_v18 = vpop.f32.mrf.mxu1  ;;  %v4007_v22 = vpop.f32.mrf.mxu0 }
 0x1a3   : > { %v2079_v2 = vadd.f32 %v1962_v18, %v5242_v56  ;;  %v5341_v52 = vadd.f32 %v4007_v22, %v2080_v23 }
 0x1a4   : > { %v3973_v17 = vpop.f32.mrf.mxu1  ;;  %v2191_v14 = vpop.f32.mrf.mxu0 }
 0x1a5   : > { %v2084_v36 = vadd.f32 %v3973_v17, %v5245_v63  ;;  %v5344_v32 = vadd.f32 %v2191_v14, %v2078_v38 }
 0x1a6   : > { %v1975_v34 = vpop.f32.mrf.mxu1  ;;  %v4008_v8 = vpop.f32.mrf.mxu0 }
 0x1a7   : > { %v2082_v20 = vadd.f32 %v1975_v34, %v5248_v30  ;;  %v5347_v39 = vadd.f32 %v4008_v8, %v2081_v3 }
 0x1a8   : > { %v3974_v47 = vpop.f32.mrf.mxu1  ;;  %v2194_v15 = vpop.f32.mrf.mxu0 }
 0x1a9   : > { %v2085_v53 = vadd.f32 %v3974_v47, %v5251_v55  ;;  %v5350_v44 = vadd.f32 %v2194_v15, %v2079_v2 }
 0x1aa   : > { %v1978_v56 = vpop.f32.mrf.mxu1  ;;  %v4011_v7 = vpop.f32.mrf.mxu0 }
 0x1ab   : > { %v2083_v51 = vadd.f32 %v1978_v56, %v5254_v43  ;;  %v5353_v45 = vadd.f32 %v4011_v7, %v2084_v36 }
 0x1ac   : > { %v3977_v63 = vpop.f32.mrf.mxu1  ;;  %v2207_v27 = vpop.f32.mrf.mxu0 }
 0x1ad   : > { %v2088_v35 = vadd.f32 %v3977_v63, %v5257_v40  ;;  %v5356_v49 = vadd.f32 %v2207_v27, %v2082_v20 }
 0x1ae   : > { %v1991_v30 = vpop.f32.mrf.mxu1  ;;  %v4012_v11 = vpop.f32.mrf.mxu0 }
 0x1af   : > { %v2086_v21 = vadd.f32 %v1991_v30, %v5260_v48  ;;  %v5359_v23 = vadd.f32 %v4012_v11, %v2085_v53 }
 0x1b0   : > { %v3978_v55 = vpop.f32.mrf.mxu1  ;;  %v2210_v1 = vpop.f32.mrf.mxu0 }
 0x1b1   : > { %v2089_v37 = vadd.f32 %v3978_v55, %v5263_v10  ;;  %v5362_v38 = vadd.f32 %v2210_v1, %v2083_v51 }
 0x1b2   : > { %v1994_v43 = vpop.f32.mrf.mxu1  ;;  %v4015_v24 = vpop.f32.mrf.mxu0 }
 0x1b3   : > { %v2087_v13 = vadd.f32 %v1994_v43, %v5266_v59  ;;  %v5365_v3 = vadd.f32 %v4015_v24, %v2088_v35 }
 0x1b4   : > { %v3981_v40 = vpop.f32.mrf.mxu1  ;;  %v2223_v18 = vpop.f32.mrf.mxu0 }
 0x1b5   : > { %v2092_v22 = vadd.f32 %v3981_v40, %v5269_v57  ;;  %v5368_v2 = vadd.f32 %v2223_v18, %v2086_v21 }
 0x1b6   : > { %v2007_v48 = vpop.f32.mrf.mxu1  ;;  %v4016_v17 = vpop.f32.mrf.mxu0 }
 0x1b7   : > { %v2090_v14 = vadd.f32 %v2007_v48, %v5272_v6  ;;  %v5371_v36 = vadd.f32 %v4016_v17, %v2089_v37 }
 0x1b8   : > { %v3982_v10 = vpop.f32.mrf.mxu1  ;;  %v2226_v34 = vpop.f32.mrf.mxu0 }
 0x1b9   : > { %v2093_v8 = vadd.f32 %v3982_v10, %v5275_v42  ;;  %v5374_v20 = vadd.f32 %v2226_v34, %v2087_v13 }
 0x1ba   : > { %v2010_v59 = vpop.f32.mrf.mxu1  ;;  %v4019_v47 = vpop.f32.mrf.mxu0 }
 0x1bb   : > { %v2091_v15 = vadd.f32 %v2010_v59, %v5278_v54  ;;  %v5377_v53 = vadd.f32 %v4019_v47, %v2092_v22 }
 0x1bc   : > { %v3985_v57 = vpop.f32.mrf.mxu1  ;;  %v2239_v56 = vpop.f32.mrf.mxu0 }
 0x1bd   : > { %v2096_v7 = vadd.f32 %v3985_v57, %v5281_v4  ;;  %v5380_v51 = vadd.f32 %v2239_v56, %v2090_v14 }
 0x1be   : > { %v2023_v6 = vpop.f32.mrf.mxu1  ;;  %v4020_v63 = vpop.f32.mrf.mxu0 }
 0x1bf   : > { %v2094_v27 = vadd.f32 %v2023_v6, %v5284_v31  ;;  %v5383_v35 = vadd.f32 %v4020_v63, %v2093_v8 }
 0x1c0   : > { %v3986_v42 = vpop.f32.mrf.mxu1  ;;  %v2242_v30 = vpop.f32.mrf.mxu0 }
 0x1c1   : > { %v2097_v11 = vadd.f32 %v3986_v42, %v5287_v60  ;;  %v5386_v21 = vadd.f32 %v2242_v30, %v2091_v15 }
 0x1c2   : > { %v2026_v54 = vpop.f32.mrf.mxu1  ;;  %v4023_v55 = vpop.f32.mrf.mxu0 }
 0x1c3   : > { %v2095_v1 = vadd.f32 %v2026_v54, %v5290_v29  ;;  %v5389_v37 = vadd.f32 %v4023_v55, %v2096_v7 }
 0x1c4   : > { %v3989_v4 = vpop.f32.mrf.mxu1  ;;  %v2255_v43 = vpop.f32.mrf.mxu0 }
 0x1c5   : > { %v2100_v24 = vadd.f32 %v3989_v4, %v5293_v25  ;;  %v5392_v13 = vadd.f32 %v2255_v43, %v2094_v27 }
 0x1c6   : > { %v2039_v31 = vpop.f32.mrf.mxu1  ;;  %v4024_v40 = vpop.f32.mrf.mxu0 }
 0x1c7   : > { %v2098_v18 = vadd.f32 %v2039_v31, %v5296_v12  ;;  %v5395_v22 = vadd.f32 %v4024_v40, %v2097_v11 }
 0x1c8   : > { %v3990_v60 = vpop.f32.mrf.mxu1  ;;  %v2258_v48 = vpop.f32.mrf.mxu0 }
 0x1c9   : > { %v2101_v17 = vadd.f32 %v3990_v60, %v5299_v58  ;;  %v5398_v14 = vadd.f32 %v2258_v48, %v2095_v1 }
 0x1ca   : > { %v2042_v29 = vpop.f32.mrf.mxu1  ;;  %v4027_v10 = vpop.f32.mrf.mxu0 }
 0x1cb   : > { %v2099_v34 = vadd.f32 %v2042_v29, %v5302_v0  ;;  %v5401_v8 = vadd.f32 %v4027_v10, %v2100_v24 }
 0x1cc   : > { %v3993_v25 = vpop.f32.mrf.mxu1  ;;  %v2271_v59 = vpop.f32.mrf.mxu0 }
 0x1cd   : > { %v2104_v47 = vadd.f32 %v3993_v25, %v5305_v26  ;;  %v5404_v15 = vadd.f32 %v2271_v59, %v2098_v18 }
 0x1ce   : > { %v2055_v12 = vpop.f32.mrf.mxu1  ;;  %v4028_v57 = vpop.f32.mrf.mxu0 }
 0x1cf   : > { %v2102_v56 = vadd.f32 %v2055_v12, %v5308_v16  ;;  %v5407_v7 = vadd.f32 %v4028_v57, %v2101_v17 }
 0x1d0   : > { %v3994_v58 = vpop.f32.mrf.mxu1  ;;  %v2274_v6 = vpop.f32.mrf.mxu0 }
 0x1d1   : > { %v2105_v63 = vadd.f32 %v3994_v58, %v5311_v61  ;;  %v5410_v27 = vadd.f32 %v2274_v6, %v2099_v34 }
 0x1d2   : > { %v2058_v0 = vpop.f32.mrf.mxu1  ;;  %v4031_v42 = vpop.f32.mrf.mxu0 }
 0x1d3   : > { %v2103_v30 = vadd.f32 %v2058_v0, %v5314_v33  ;;  %v5413_v11 = vadd.f32 %v4031_v42, %v2104_v47  ;;  %v5425_v33 = vld [vmem:[%s5581_s2] ss:$0 sm:$0xff] }
 0x1d4   : > { %v4037_v26 = vpop.f32.mrf.mxu1  ;;  %v2287_v54 = vpop.f32.mrf.mxu0 }
 0x1d5   : > { %v5415_v55 = vadd.f32 %v2287_v54, %v2102_v56  ;;  %v2662_v61 = vadd.f32 %v4037_v26, %v5317_v19 }
 0x1d6   : > { %v2517_v16 = vpop.f32.mrf.mxu1  ;;  %v4032_v1 = vpop.f32.mrf.mxu0 }
 0x1d7   : > { %v5417_v4 = vadd.f32 %v4032_v1, %v2105_v63  ;;  %v2660_v60 = vadd.f32 %v2517_v16, %v5320_v5 }
 0x1d8   : > { %v4038_v43 = vpop.f32.mrf.mxu1  ;;  %v2290_v24 = vpop.f32.mrf.mxu0 }
 0x1d9   : > { %v5420_v31 = vadd.f32 %v2290_v24, %v2103_v30  ;;  %v2663_v10 = vadd.f32 %v4038_v43, %v5323_v62 }
 0x1da   : > { %v2520_v40 = vpop.f32.mrf.mxu1  ;;  %v4075_v18 = vpop.f32.mrf.mxu0 }
 0x1db   : > { %v2972_v48 = vadd.f32 %v4075_v18, %v2662_v61  ;;  %v2661_v56 = vadd.f32 %v2520_v40, %v5326_v46 }
 0x1dc   : > { %v4041_v17 = vpop.f32.mrf.mxu1  ;;  %v2827_v29 = vpop.f32.mrf.mxu0 }
 0x1dd   : > { %v3015_v34 = vadd.f32 %v5425_v33, %v2972_v48  ;;  %v2970_v19 = vadd.f32 %v2827_v29, %v2660_v60  ;;  %v2666_v58 = vadd.f32 %v4041_v17, %v5329_v50 }
 0x1de   : > { %v2533_v25 = vpop.f32.mrf.mxu1  ;;  %v4076_v59 = vpop.f32.mrf.mxu0 }
 0x1df   : > { %v3051_v47 = vmax.f32 %v3015_v34, 0.0  ;;  %v3013_v12 = vadd.f32 %v5425_v33, %v2970_v19  ;;  %v2973_v57 = vadd.f32 %v4076_v59, %v2663_v10  ;;  %v2664_v46 = vadd.f32 %v2533_v25, %v5332_v41 }
 0x1e0   : > { %v4042_v5 = vpop.f32.mrf.mxu1  ;;  %v2830_v62 = vpop.f32.mrf.mxu0 }
 0x1e1   : > { %v3562_v6 = vpack.c.bf16 %v3051_v47, %v3051_v47  ;;  %v3049_v63 = vmax.f32 %v3013_v12, 0.0  ;;  %v3016_v0 = vadd.f32 %v5425_v33, %v2973_v57  ;;  %v2971_v30 = vadd.f32 %v2830_v62, %v2661_v56 }
 0x1e2   : > { %v2536_v42 = vpop.f32.mrf.mxu1  ;;  %v4079_v26 = vpop.f32.mrf.mxu0  ;;  %v2667_v50 = vadd.f32 %v4042_v5, %v5335_v28 }
 0x1e3   : > { %3232 = vst.msk [vmem:[%s5436_s16 + $0x8] sm:$0xf] %vm3229_vm8, %v3562_v6  ;;  %v3560_v54 = vpack.c.bf16 %v3049_v63, %v3049_v63  ;;  %v3052_v16 = vmax.f32 %v3016_v0, 0.0  ;;  %v2976_v1 = vadd.f32 %v4079_v26, %v2666_v58  ;;  %v3014_v43 = vadd.f32 %v5425_v33, %v2971_v30 }
 0x1e4   : > { %v4045_v24 = vpop.f32.mrf.mxu1  ;;  %v2843_v61 = vpop.f32.mrf.mxu0  ;;  %v2665_v19 = vadd.f32 %v2536_v42, %v5338_v9 }
 0x1e5   : > { %3230 = vst.msk [vmem:[%s5436_s16] sm:$0xf] %vm3229_vm8, %v3560_v54  ;;  %v3563_v40 = vpack.c.bf16 %v3052_v16, %v3052_v16  ;;  %v3019_v18 = vadd.f32 %v5425_v33, %v2976_v1  ;;  %v2974_v60 = vadd.f32 %v2843_v61, %v2664_v46  ;;  %v3050_v48 = vmax.f32 %v3014_v43, 0.0 }
 0x1e6   : > { %v2549_v17 = vpop.f32.mrf.mxu1  ;;  %v4080_v29 = vpop.f32.mrf.mxu0  ;;  %v2670_v47 = vadd.f32 %v4045_v24, %v5341_v52 }
 0x1e7   : > { %3233 = vst.msk [vmem:[%s5436_s16 + $0xc] sm:$0xf] %vm3229_vm8, %v3563_v40  ;;  %v3055_v41 = vmax.f32 %v3019_v18, 0.0  ;;  %v3017_v10 = vadd.f32 %v5425_v33, %v2974_v60  ;;  %v2977_v34 = vadd.f32 %v4080_v29, %v2667_v50  ;;  %v3561_v25 = vpack.c.bf16 %v3050_v48, %v3050_v48 }
 0x1e8   : > { %v4046_v59 = vpop.f32.mrf.mxu1  ;;  %v2846_v28 = vpop.f32.mrf.mxu0  ;;  %v2668_v9 = vadd.f32 %v2549_v17, %v5344_v32 }
 0x1e9   : > { %v3566_v12 = vpack.c.bf16 %v3055_v41, %v3055_v41  ;;  %v3053_v57 = vmax.f32 %v3017_v10, 0.0  ;;  %v3020_v56 = vadd.f32 %v5425_v33, %v2977_v34  ;;  %3231 = vst.msk [vmem:[%s5436_s16 + $0x4] sm:$0xf] %vm3229_vm8, %v3561_v25  ;;  %v2975_v62 = vadd.f32 %v2846_v28, %v2665_v19 }
 0x1ea   : > { %v2552_v5 = vpop.f32.mrf.mxu1  ;;  %v4083_v58 = vpop.f32.mrf.mxu0  ;;  %v2671_v26 = vadd.f32 %v4046_v59, %v5347_v39 }
 0x1eb   : > { %3236 = vst.msk [vmem:[%s5436_s16 + $0x18] sm:$0xf] %vm3229_vm8, %v3566_v12  ;;  %v3564_v6 = vpack.c.bf16 %v3053_v57, %v3053_v57  ;;  %v3056_v63 = vmax.f32 %v3020_v56, 0.0  ;;  %v2980_v0 = vadd.f32 %v4083_v58, %v2670_v47  ;;  %v3018_v52 = vadd.f32 %v5425_v33, %v2975_v62 }
 0x1ec   : > { %v4049_v42 = vpop.f32.mrf.mxu1  ;;  %v2859_v30 = vpop.f32.mrf.mxu0  ;;  %v2669_v40 = vadd.f32 %v2552_v5, %v5350_v44 }
 0x1ed   : > { %3234 = vst.msk [vmem:[%s5436_s16 + $0x10] sm:$0xf] %vm3229_vm8, %v3564_v6  ;;  %v3567_v46 = vpack.c.bf16 %v3056_v63, %v3056_v63  ;;  %v3023_v54 = vadd.f32 %v5425_v33, %v2980_v0  ;;  %v2978_v16 = vadd.f32 %v2859_v30, %v2668_v9  ;;  %v3054_v1 = vmax.f32 %v3018_v52, 0.0 }
 0x1ee   : > { %v2565_v43 = vpop.f32.mrf.mxu1  ;;  %v4084_v24 = vpop.f32.mrf.mxu0  ;;  %v2674_v48 = vadd.f32 %v4049_v42, %v5353_v45 }
 0x1ef   : > { %3237 = vst.msk [vmem:[%s5436_s16 + $0x1c] sm:$0xf] %vm3229_vm8, %v3567_v46  ;;  %v3059_v32 = vmax.f32 %v3023_v54, 0.0  ;;  %v3021_v61 = vadd.f32 %v5425_v33, %v2978_v16  ;;  %v2981_v50 = vadd.f32 %v4084_v24, %v2671_v26  ;;  %v3565_v18 = vpack.c.bf16 %v3054_v1, %v3054_v1 }
 0x1f0   : > { %v4050_v60 = vpop.f32.mrf.mxu1  ;;  %v2862_v39 = vpop.f32.mrf.mxu0  ;;  %v2672_v44 = vadd.f32 %v2565_v43, %v5356_v49 }
 0x1f1   : > { %v3570_v17 = vpack.c.bf16 %v3059_v32, %v3059_v32  ;;  %v3057_v29 = vmax.f32 %v3021_v61, 0.0  ;;  %v3024_v41 = vadd.f32 %v5425_v33, %v2981_v50  ;;  %3235 = vst.msk [vmem:[%s5436_s16 + $0x14] sm:$0xf] %vm3229_vm8, %v3565_v18  ;;  %v2979_v34 = vadd.f32 %v2862_v39, %v2669_v40 }
 0x1f2   : > { %v2568_v10 = vpop.f32.mrf.mxu1  ;;  %v4087_v19 = vpop.f32.mrf.mxu0  ;;  %v2675_v57 = vadd.f32 %v4050_v60, %v5359_v23 }
 0x1f3   : > { %3240 = vst.msk [vmem:[%s5436_s16 + $0x28] sm:$0xf] %vm3229_vm8, %v3570_v17  ;;  %v3568_v25 = vpack.c.bf16 %v3057_v29, %v3057_v29  ;;  %v3060_v59 = vmax.f32 %v3024_v41, 0.0  ;;  %v2984_v28 = vadd.f32 %v4087_v19, %v2674_v48  ;;  %v3022_v45 = vadd.f32 %v5425_v33, %v2979_v34 }
 0x1f4   : > { %v4053_v47 = vpop.f32.mrf.mxu1  ;;  %v2875_v12 = vpop.f32.mrf.mxu0  ;;  %v2673_v52 = vadd.f32 %v2568_v10, %v5362_v38 }
 0x1f5   : > { %3238 = vst.msk [vmem:[%s5436_s16 + $0x20] sm:$0xf] %vm3229_vm8, %v3568_v25  ;;  %v3571_v56 = vpack.c.bf16 %v3060_v59, %v3060_v59  ;;  %v3027_v5 = vadd.f32 %v5425_v33, %v2984_v28  ;;  %v2982_v62 = vadd.f32 %v2875_v12, %v2672_v44  ;;  %v3058_v58 = vmax.f32 %v3022_v45, 0.0 }
 0x1f6   : > { %v2581_v9 = vpop.f32.mrf.mxu1  ;;  %v4088_v6 = vpop.f32.mrf.mxu0  ;;  %v2678_v26 = vadd.f32 %v4053_v47, %v5365_v3 }
 0x1f7   : > { %3241 = vst.msk [vmem:[%s5436_s16 + $0x2c] sm:$0xf] %vm3229_vm8, %v3571_v56  ;;  %v3063_v49 = vmax.f32 %v3027_v5, 0.0  ;;  %v3025_v63 = vadd.f32 %v5425_v33, %v2982_v62  ;;  %v2985_v0 = vadd.f32 %v4088_v6, %v2675_v57  ;;  %v3569_v42 = vpack.c.bf16 %v3058_v58, %v3058_v58 }
 0x1f8   : > { %v4054_v30 = vpop.f32.mrf.mxu1  ;;  %v2878_v23 = vpop.f32.mrf.mxu0  ;;  %v2676_v38 = vadd.f32 %v2581_v9, %v5368_v2 }
 0x1f9   : > { %v3574_v46 = vpack.c.bf16 %v3063_v49, %v3063_v49  ;;  %v3061_v54 = vmax.f32 %v3025_v63, 0.0  ;;  %v3028_v16 = vadd.f32 %v5425_v33, %v2985_v0  ;;  %3239 = vst.msk [vmem:[%s5436_s16 + $0x24] sm:$0xf] %vm3229_vm8, %v3569_v42  ;;  %v2983_v43 = vadd.f32 %v2878_v23, %v2673_v52 }
 0x1fa   : > { %v2584_v1 = vpop.f32.mrf.mxu1  ;;  %v4091_v24 = vpop.f32.mrf.mxu0  ;;  %v2679_v60 = vadd.f32 %v4054_v30, %v5371_v36 }
 0x1fb   : > { %3244 = vst.msk [vmem:[%s5436_s16 + $0x38] sm:$0xf] %vm3229_vm8, %v3574_v46  ;;  %v3572_v32 = vpack.c.bf16 %v3061_v54, %v3061_v54  ;;  %v3064_v61 = vmax.f32 %v3028_v16, 0.0  ;;  %v2988_v50 = vadd.f32 %v4091_v24, %v2678_v26  ;;  %v3026_v3 = vadd.f32 %v5425_v33, %v2983_v43 }
 0x1fc   : > { %v4057_v40 = vpop.f32.mrf.mxu1  ;;  %v2891_v18 = vpop.f32.mrf.mxu0  ;;  %v2677_v44 = vadd.f32 %v2584_v1, %v5374_v20 }
 0x1fd   : > { %3242 = vst.msk [vmem:[%s5436_s16 + $0x30] sm:$0xf] %vm3229_vm8, %v3572_v32  ;;  %v3575_v39 = vpack.c.bf16 %v3064_v61, %v3064_v61  ;;  %v3031_v48 = vadd.f32 %v5425_v33, %v2988_v50  ;;  %v2986_v17 = vadd.f32 %v2891_v18, %v2676_v38  ;;  %v3062_v29 = vmax.f32 %v3026_v3, 0.0 }
 0x1fe   : > { %v2597_v41 = vpop.f32.mrf.mxu1  ;;  %v4092_v10 = vpop.f32.mrf.mxu0  ;;  %v2682_v28 = vadd.f32 %v4057_v40, %v5377_v53 }
 0x1ff   : > { %3245 = vst.msk [vmem:[%s5436_s16 + $0x3c] sm:$0xf] %vm3229_vm8, %v3575_v39  ;;  %v3067_v2 = vmax.f32 %v3031_v48, 0.0  ;;  %v3029_v34 = vadd.f32 %v5425_v33, %v2986_v17  ;;  %v2989_v19 = vadd.f32 %v4092_v10, %v2679_v60  ;;  %v3573_v25 = vpack.c.bf16 %v3062_v29, %v3062_v29 }
 0x200   : > { %v4058_v59 = vpop.f32.mrf.mxu1  ;;  %v2894_v36 = vpop.f32.mrf.mxu0  ;;  %v2680_v20 = vadd.f32 %v2597_v41, %v5380_v51 }
 0x201   : > { %v3578_v45 = vpack.c.bf16 %v3067_v2, %v3067_v2  ;;  %v3065_v47 = vmax.f32 %v3029_v34, 0.0  ;;  %v3032_v12 = vadd.f32 %v5425_v33, %v2989_v19  ;;  %3243 = vst.msk [vmem:[%s5436_s16 + $0x34] sm:$0xf] %vm3229_vm8, %v3573_v25  ;;  %v2987_v56 = vadd.f32 %v2894_v36, %v2677_v44 }
 0x202   : > { %v2600_v57 = vpop.f32.mrf.mxu1  ;;  %v4095_v5 = vpop.f32.mrf.mxu0  ;;  %v2683_v63 = vadd.f32 %v4058_v59, %v5383_v35 }
 0x203   : > { %3248 = vst.msk [vmem:[%s5436_s16 + $0x48] sm:$0xf] %vm3229_vm8, %v3578_v45  ;;  %v3576_v62 = vpack.c.bf16 %v3065_v47, %v3065_v47  ;;  %v3068_v58 = vmax.f32 %v3032_v12, 0.0  ;;  %v2992_v9 = vadd.f32 %v4095_v5, %v2682_v28  ;;  %v3030_v53 = vadd.f32 %v5425_v33, %v2987_v56 }
 0x204   : > { %v4061_v6 = vpop.f32.mrf.mxu1  ;;  %v2907_v49 = vpop.f32.mrf.mxu0  ;;  %v2681_v16 = vadd.f32 %v2600_v57, %v5386_v21 }
 0x205   : > { %3246 = vst.msk [vmem:[%s5436_s16 + $0x40] sm:$0xf] %vm3229_vm8, %v3576_v62  ;;  %v3579_v0 = vpack.c.bf16 %v3068_v58, %v3068_v58  ;;  %v3035_v52 = vadd.f32 %v5425_v33, %v2992_v9  ;;  %v2990_v42 = vadd.f32 %v2907_v49, %v2680_v20  ;;  %v3066_v30 = vmax.f32 %v3030_v53, 0.0 }
 0x206   : > { %v2613_v23 = vpop.f32.mrf.mxu1  ;;  %v4096_v26 = vpop.f32.mrf.mxu0  ;;  %v2686_v24 = vadd.f32 %v4061_v6, %v5389_v37 }
 0x207   : > { %3249 = vst.msk [vmem:[%s5436_s16 + $0x4c] sm:$0xf] %vm3229_vm8, %v3579_v0  ;;  %v3071_v51 = vmax.f32 %v3035_v52, 0.0  ;;  %v3033_v46 = vadd.f32 %v5425_v33, %v2990_v42  ;;  %v2993_v54 = vadd.f32 %v4096_v26, %v2683_v63  ;;  %v3577_v1 = vpack.c.bf16 %v3066_v30, %v3066_v30 }
 0x208   : > { %v4062_v43 = vpop.f32.mrf.mxu1  ;;  %v2910_v35 = vpop.f32.mrf.mxu0  ;;  %v2684_v21 = vadd.f32 %v2613_v23, %v5392_v13 }
 0x209   : > { %v3582_v38 = vpack.c.bf16 %v3071_v51, %v3071_v51  ;;  %v3069_v32 = vmax.f32 %v3033_v46, 0.0  ;;  %v3036_v61 = vadd.f32 %v5425_v33, %v2993_v54  ;;  %3247 = vst.msk [vmem:[%s5436_s16 + $0x44] sm:$0xf] %vm3229_vm8, %v3577_v1  ;;  %v2991_v3 = vadd.f32 %v2910_v35, %v2681_v16 }
 0x20a   : > { %v2616_v50 = vpop.f32.mrf.mxu1  ;;  %v4099_v40 = vpop.f32.mrf.mxu0  ;;  %v2687_v29 = vadd.f32 %v4062_v43, %v5395_v22 }
 0x20b   : > { %3252 = vst.msk [vmem:[%s5436_s16 + $0x58] sm:$0xf] %vm3229_vm8, %v3582_v38  ;;  %v3580_v18 = vpack.c.bf16 %v3069_v32, %v3069_v32  ;;  %v3072_v60 = vmax.f32 %v3036_v61, 0.0  ;;  %v2996_v39 = vadd.f32 %v4099_v40, %v2686_v24  ;;  %v3034_v37 = vadd.f32 %v5425_v33, %v2991_v3 }
 0x20c   : > { %v4065_v48 = vpop.f32.mrf.mxu1  ;;  %v2923_v17 = vpop.f32.mrf.mxu0  ;;  %v2685_v36 = vadd.f32 %v2616_v50, %v5398_v14 }
 0x20d   : > { %3250 = vst.msk [vmem:[%s5436_s16 + $0x50] sm:$0xf] %vm3229_vm8, %v3580_v18  ;;  %v3583_v41 = vpack.c.bf16 %v3072_v60, %v3072_v60  ;;  %v3039_v10 = vadd.f32 %v5425_v33, %v2996_v39  ;;  %v2994_v2 = vadd.f32 %v2923_v17, %v2684_v21  ;;  %v3070_v34 = vmax.f32 %v3034_v37, 0.0 }
 0x20e   : > { %v2629_v19 = vpop.f32.mrf.mxu1  ;;  %v4100_v44 = vpop.f32.mrf.mxu0  ;;  %v2690_v47 = vadd.f32 %v4065_v48, %v5401_v8 }
 0x20f   : > { %3253 = vst.msk [vmem:[%s5436_s16 + $0x5c] sm:$0xf] %vm3229_vm8, %v3583_v41  ;;  %v3075_v13 = vmax.f32 %v3039_v10, 0.0  ;;  %v3037_v25 = vadd.f32 %v5425_v33, %v2994_v2  ;;  %v2997_v59 = vadd.f32 %v4100_v44, %v2687_v29  ;;  %v3581_v28 = vpack.c.bf16 %v3070_v34, %v3070_v34 }
 0x210   : > { %v4066_v45 = vpop.f32.mrf.mxu1  ;;  %v2926_v22 = vpop.f32.mrf.mxu0  ;;  %v2688_v14 = vadd.f32 %v2629_v19, %v5404_v15 }
 0x211   : > { %v3586_v12 = vpack.c.bf16 %v3075_v13, %v3075_v13  ;;  %v3073_v57 = vmax.f32 %v3037_v25, 0.0  ;;  %v3040_v56 = vadd.f32 %v5425_v33, %v2997_v59  ;;  %3251 = vst.msk [vmem:[%s5436_s16 + $0x54] sm:$0xf] %vm3229_vm8, %v3581_v28  ;;  %v2995_v20 = vadd.f32 %v2926_v22, %v2685_v36 }
 0x212   : > { %v2632_v5 = vpop.f32.mrf.mxu1  ;;  %v4103_v62 = vpop.f32.mrf.mxu0  ;;  %v2691_v63 = vadd.f32 %v4066_v45, %v5407_v7 }
 0x213   : > { %3256 = vst.msk [vmem:[%s5436_s16 + $0x68] sm:$0xf] %vm3229_vm8, %v3586_v12  ;;  %v3584_v58 = vpack.c.bf16 %v3073_v57, %v3073_v57  ;;  %v3076_v9 = vmax.f32 %v3040_v56, 0.0  ;;  %v3000_v53 = vadd.f32 %v4103_v62, %v2690_v47  ;;  %v3038_v8 = vadd.f32 %v5425_v33, %v2995_v20 }
 0x214   : > { %v4069_v6 = vpop.f32.mrf.mxu1  ;;  %v2939_v49 = vpop.f32.mrf.mxu0  ;;  %v2689_v54 = vadd.f32 %v2632_v5, %v5410_v27 }
 0x215   : > { %3254 = vst.msk [vmem:[%s5436_s16 + $0x60] sm:$0xf] %vm3229_vm8, %v3584_v58  ;;  %v3587_v0 = vpack.c.bf16 %v3076_v9, %v3076_v9  ;;  %v3043_v52 = vadd.f32 %v5425_v33, %v3000_v53  ;;  %v2998_v42 = vadd.f32 %v2939_v49, %v2688_v14  ;;  %v3074_v30 = vmax.f32 %v3038_v8, 0.0 }
 0x216   : > { %v2645_v23 = vpop.f32.mrf.mxu1  ;;  %v4104_v26 = vpop.f32.mrf.mxu0  ;;  %v2694_v43 = vadd.f32 %v4069_v6, %v5413_v11 }
 0x217   : > { %3257 = vst.msk [vmem:[%s5436_s16 + $0x6c] sm:$0xf] %vm3229_vm8, %v3587_v0  ;;  %v3079_v15 = vmax.f32 %v3043_v52, 0.0  ;;  %v3041_v51 = vadd.f32 %v5425_v33, %v2998_v42  ;;  %v3001_v46 = vadd.f32 %v4104_v26, %v2691_v63  ;;  %v3585_v16 = vpack.c.bf16 %v3074_v30, %v3074_v30 }
 0x218   : > { %v4070_v1 = vpop.f32.mrf.mxu1  ;;  %v2942_v7 = vpop.f32.mrf.mxu0  ;;  %v2692_v50 = vadd.f32 %v2645_v23, %v5415_v55 }
 0x219   : > { %v3590_v35 = vpack.c.bf16 %v3079_v15, %v3079_v15  ;;  %v3077_v24 = vmax.f32 %v3041_v51, 0.0  ;;  %v3044_v38 = vadd.f32 %v5425_v33, %v3001_v46  ;;  %3255 = vst.msk [vmem:[%s5436_s16 + $0x64] sm:$0xf] %vm3229_vm8, %v3585_v16  ;;  %v2999_v32 = vadd.f32 %v2942_v7, %v2689_v54 }
 0x21a   : > { %v4107_v61 = vpop.f32.mrf.mxu0  ;;  %v2648_v21 = vpop.f32.mrf.mxu1  ;;  %v2695_v60 = vadd.f32 %v4070_v1, %v5417_v4 }
 0x21b   : > { %3260 = vst.msk [vmem:[%s5436_s16 + $0x78] sm:$0xf] %vm3229_vm8, %v3590_v35  ;;  %v3588_v27 = vpack.c.bf16 %v3077_v24, %v3077_v24  ;;  %v3080_v3 = vmax.f32 %v3044_v38, 0.0  ;;  %v3004_v40 = vadd.f32 %v4107_v61, %v2694_v43  ;;  %v3042_v18 = vadd.f32 %v5425_v33, %v2999_v32 }
 0x21c   : > { %v2955_v11 = vpop.f32.mrf.mxu0  ;;  %v2693_v55 = vadd.f32 %v2648_v21, %v5420_v31 }
 0x21d   : > { %3258 = vst.msk [vmem:[%s5436_s16 + $0x70] sm:$0xf] %vm3229_vm8, %v3588_v27  ;;  %v3591_v39 = vpack.c.bf16 %v3080_v3, %v3080_v3  ;;  %v3047_v37 = vadd.f32 %v5425_v33, %v3004_v40  ;;  %v3002_v48 = vadd.f32 %v2955_v11, %v2692_v50  ;;  %v3078_v17 = vmax.f32 %v3042_v18, 0.0 }
 0x21e   : > { %v4108_v29 = vpop.f32.mrf.mxu0 }
 0x21f   : > { %3261 = vst.msk [vmem:[%s5436_s16 + $0x7c] sm:$0xf] %vm3229_vm8, %v3591_v39  ;;  %v3083_v41 = vmax.f32 %v3047_v37, 0.0  ;;  %v3045_v10 = vadd.f32 %v5425_v33, %v3002_v48  ;;  %v3005_v2 = vadd.f32 %v4108_v29, %v2695_v60  ;;  %v3589_v34 = vpack.c.bf16 %v3078_v17, %v3078_v17 }
 0x220   : > { %v2958_v4 = vpop.f32.mrf.mxu0 }
 0x221   : > { %v3594_v19 = vpack.c.bf16 %v3083_v41, %v3083_v41  ;;  %v3081_v44 = vmax.f32 %v3045_v10, 0.0  ;;  %v3048_v13 = vadd.f32 %v5425_v33, %v3005_v2  ;;  %v3003_v25 = vadd.f32 %v2958_v4, %v2693_v55  ;;  %3259 = vst.msk [vmem:[%s5436_s16 + $0x74] sm:$0xf] %vm3229_vm8, %v3589_v34 }
 0x223   : > { %3264 = vst.msk [vmem:[%s5436_s16 + $0x88] sm:$0xf] %vm3229_vm8, %v3594_v19  ;;  %v3592_v59 = vpack.c.bf16 %v3081_v44, %v3081_v44  ;;  %v3084_v36 = vmax.f32 %v3048_v13, 0.0  ;;  %v3046_v31 = vadd.f32 %v5425_v33, %v3003_v25 }
 0x225   : > { %3262 = vst.msk [vmem:[%s5436_s16 + $0x80] sm:$0xf] %vm3229_vm8, %v3592_v59  ;;  %v3595_v28 = vpack.c.bf16 %v3084_v36, %v3084_v36  ;;  %v3082_v45 = vmax.f32 %v3046_v31, 0.0 }
 0x227   : > { %3265 = vst.msk [vmem:[%s5436_s16 + $0x8c] sm:$0xf] %vm3229_vm8, %v3595_v28  ;;  %v3593_v22 = vpack.c.bf16 %v3082_v45, %v3082_v45 }
 0x229   : > { %3263 = vst.msk [vmem:[%s5436_s16 + $0x84] sm:$0xf] %vm3229_vm8, %v3593_v22 }
 0x22a PF: > { %s13_s12 = sadd.s32 1, %s4173_s12  }
 0x22b   : > { %p10_p4 = scmp.ge.s32.totalorder %s13_s12, 10  }
 0x22d   :  { %12 = sbr.rel (!%p10_p4) target bundleno = 1 (0x1), region = 70 }

// kernel: vgg_loss.11
= control target key start
LH: loop header
LB: loop body
LE: loop exit
PB: predicated region body
PF: predicated region fallthrough
CT: control target
= control target key end

     0   :  { %s395_s6 = smov 0   ;;  %s397_s7 = smov 0   ;;  %s440_s0 = inlined_call_operand.vmem [shape: bf16[8,8,2,8,128], index: 0, kind: input, shape index: {}]   ;;  %s441_s1 = inlined_call_operand.vmem [shape: bf16[8,8,8,64], index: 1, kind: output, shape index: {}]  }
   0x1   :  { %s399_s8 = smov 0  }
   0x2 LB: > { %s23_s9 = sadd.s32 1, %s378_s7  ;;  %p326_p0 = scmp.ge.s32.totalorder %s382_s8, 1  ;;  %s382_s8 = sphi %s399_s8, %s11_s8   ;;  %s378_s7 = sphi %s397_s7, %s443_s7   ;;  %s374_s6 = sphi %s395_s6, %s442_s6  }
   0x3   : > { %p25_p1 = scmp.ge.s32.totalorder %s23_s9, 8  ;;  %p109_p2 = scmp.lt.s32.totalorder %s382_s8, 9 }
   0x5   : > { %s445_s9 = smov (%p25_p1, %s23_s9), 0  ;;  %p110_p3 = pnand %p326_p0, %p109_p2 }
   0x6   : > { %p139_p4 = scmp.lt.s32.totalorder (!%p110_p3), %s374_s6, 7  ;;  %s384_s14 = smov (!%p110_p3), 64  }
   0x7   : > { %113 = sbr.rel (%p110_p3) target bundleno = 149 (0x95), region = 24 }
   0xc   : > { %s447_s6 = smov (!%p139_p4, %s374_s6), 7  ;;  %vm223_vm0 = vcmask 519168  }
   0xd   : > { %s333_s10 = sshll.u32 %s447_s6, 6  ;;  %s334_s15 = sshll.u32 %s447_s6, 5 }
   0xe   : > { %s147_s13 = scalar_lea.vmem %s440_s0, %s333_s10  ;;  %s157_s18 = scalar_lea.vmem %s441_s1, %s334_s15 }
   0xf   : > { %v163_v0 = vld [vmem:[%s147_s13 + $0x10] sm:$0xf]  ;;  %v164_v1 = vld [vmem:[%s147_s13 + $0x14] sm:$0xf]  ;;  %v159_v2 = vld [vmem:[%s147_s13] sm:$0xf] }
  0x10   : > { %v177_v3 = vmax.bf16 %v164_v1, %v163_v0  ;;  %v160_v4 = vld [vmem:[%s147_s13 + $0x4] sm:$0xf]  ;;  %v165_v5 = vld [vmem:[%s147_s13 + $0x18] sm:$0xf]  ;;  %v166_v6 = vld [vmem:[%s147_s13 + $0x1c] sm:$0xf] }
  0x11   : > { %v175_v7 = vmax.bf16 %v160_v4, %v159_v2  ;;  %v161_v8 = vld [vmem:[%s147_s13 + $0x8] sm:$0xf]  ;;  %v162_v9 = vld [vmem:[%s147_s13 + $0xc] sm:$0xf]  ;;  %v178_v10 = vmax.bf16 %v166_v6, %v165_v5  ;;  %v167_v14 = vld [vmem:[%s147_s13 + $0x20] sm:$0xf] }
  0x12   : > { %195 = vrot.lane.b32.xlu1 %v177_v3, %s384_s14  ;;  %v176_v11 = vmax.bf16 %v162_v9, %v161_v8  ;;  %v169_v12 = vld [vmem:[%s147_s13 + $0x28] sm:$0xf]  ;;  %v170_v13 = vld [vmem:[%s147_s13 + $0x2c] sm:$0xf]  ;;  %v168_v15 = vld [vmem:[%s147_s13 + $0x24] sm:$0xf] }
  0x13   : > { %191 = vrot.lane.b32.xlu0 %v175_v7, %s384_s14  ;;  %v180_v16 = vmax.bf16 %v170_v13, %v169_v12  ;;  %v179_v17 = vmax.bf16 %v168_v15, %v167_v14  ;;  %v173_v18 = vld [vmem:[%s147_s13 + $0x38] sm:$0xf]  ;;  %v174_v19 = vld [vmem:[%s147_s13 + $0x3c] sm:$0xf]  ;;  %v171_v20 = vld [vmem:[%s147_s13 + $0x30] sm:$0xf] }
  0x14   : > { %v172_v21 = vld [vmem:[%s147_s13 + $0x34] sm:$0xf]  ;;  %v182_v22 = vmax.bf16 %v174_v19, %v173_v18 }
  0x15   : > { %v181_v23 = vmax.bf16 %v172_v21, %v171_v20 }
  0x16   : > { %197 = vrot.lane.b32.xlu1 %v178_v10, %s384_s14 }
  0x17   : > { %193 = vrot.lane.b32.xlu0 %v176_v11, %s384_s14 }
  0x1a   : > { %201 = vrot.lane.b32.xlu1 %v180_v16, %s384_s14 }
  0x1b   : > { %199 = vrot.lane.b32.xlu0 %v179_v17, %s384_s14 }
  0x1e   : > { %205 = vrot.lane.b32.xlu1 %v182_v22, %s384_s14 }
  0x1f   : > { %203 = vrot.lane.b32.xlu0 %v181_v23, %s384_s14 }
  0x84   : > { %v196_v24 = vpop.permute.xlu1 %195 }
  0x85   : > { %v217_v25 = vmax.bf16 %v196_v24, %v177_v3  ;;  %v192_v26 = vpop.permute.xlu0 %191 }
  0x86   : > { %v215_v27 = vmax.bf16 %v192_v26, %v175_v7 }
  0x87   : > { %226 = vst.msk [vmem:[%s157_s18 + $0x8] sm:$0xf] %vm223_vm0, %v217_v25 }
  0x88   : > { %224 = vst.msk [vmem:[%s157_s18] sm:$0xf] %vm223_vm0, %v215_v27  ;;  %v198_v28 = vpop.permute.xlu1 %197 }
  0x89   : > { %v218_v29 = vmax.bf16 %v198_v28, %v178_v10  ;;  %v194_v30 = vpop.permute.xlu0 %193 }
  0x8a   : > { %v216_v31 = vmax.bf16 %v194_v30, %v176_v11 }
  0x8b   : > { %227 = vst.msk [vmem:[%s157_s18 + $0xc] sm:$0xf] %vm223_vm0, %v218_v29 }
  0x8c   : > { %225 = vst.msk [vmem:[%s157_s18 + $0x4] sm:$0xf] %vm223_vm0, %v216_v31  ;;  %v202_v32 = vpop.permute.xlu1 %201 }
  0x8d   : > { %v220_v33 = vmax.bf16 %v202_v32, %v180_v16  ;;  %v200_v34 = vpop.permute.xlu0 %199 }
  0x8e   : > { %v219_v35 = vmax.bf16 %v200_v34, %v179_v17 }
  0x8f   : > { %229 = vst.msk [vmem:[%s157_s18 + $0x14] sm:$0xf] %vm223_vm0, %v220_v33 }
  0x90   : > { %228 = vst.msk [vmem:[%s157_s18 + $0x10] sm:$0xf] %vm223_vm0, %v219_v35  ;;  %v206_v36 = vpop.permute.xlu1 %205 }
  0x91   : > { %v222_v37 = vmax.bf16 %v206_v36, %v182_v22  ;;  %v204_v38 = vpop.permute.xlu0 %203 }
  0x92   : > { %v221_v39 = vmax.bf16 %v204_v38, %v181_v23 }
  0x93   : > { %231 = vst.msk [vmem:[%s157_s18 + $0x1c] sm:$0xf] %vm223_vm0, %v222_v37 }
  0x94   : > { %230 = vst.msk [vmem:[%s157_s18 + $0x18] sm:$0xf] %vm223_vm0, %v221_v39 }
  0x95 PF: > { %s11_s8 = sadd.s32 1, %s382_s8   ;;  %s442_s6 = smov %s378_s7 }
  0x96   : > { %p8_p5 = scmp.ge.s32.totalorder %s11_s8, 10   ;;  %s443_s7 = smov %s445_s9 }
  0x98   :  { %10 = sbr.rel (!%p8_p5) target bundleno = 2 (0x2), region = 54 }

// kernel: vgg_loss.10
= control target key start
LH: loop header
LB: loop body
LE: loop exit
PB: predicated region body
PF: predicated region fallthrough
CT: control target
= control target key end

     0   :  { %s4654_s12 = smov 0   ;;  %s6115_s0 = inlined_call_operand.vmem [shape: bf16[8,342,64], index: 0, kind: input, shape index: {}]   ;;  %s6116_s1 = inlined_call_operand.vmem [shape: bf16[9,64,64], index: 1, kind: input, shape index: {}]   ;;  %s6117_s2 = inlined_call_operand.vmem [shape: f32[1,64], index: 2, kind: input, shape index: {}]   ;;  %s6118_s3 = inlined_call_operand.vmem [shape: bf16[8,288,64], index: 3, kind: output, shape index: {}]  }
   0x1 LB: > { %s3572_s13 = sadd.s32 4294967295, %s4632_s12   ;;  %p3576_p0 = scmp.ge.s32.totalorder %s4632_s12, 1  ;;  %s4632_s12 = sphi %s4654_s12, %s13_s12  }
   0x2   : > { %p137_p1 = scmp.lt.s32.totalorder %s4632_s12, 9 }
   0x4   : > { %p138_p2 = pnand %p3576_p0, %p137_p1 }
   0x6   : > { %141 = sbr.rel (%p138_p2) target bundleno = 556 (0x22c), region = 32 }
   0xb   : > { %v4551_v0 = vld [vmem:[%s6116_s1 + $0x38] sm:$0xff]   ;;  %p161_p3 = scmp.lt.s32.totalorder %s3572_s13, 7  ;;  %v4552_v1 = vld [vmem:[%s6116_s1 + $0x30] sm:$0xff]   ;;  %v4553_v2 = vld [vmem:[%s6116_s1 + $0x28] sm:$0xff]   ;;  %vm463_vm0 = vcmask 523264   ;;  %vm960_vm2 = vcmask 1046528  }
   0xc   : > { %4137 = vmatprep.subr.bf16.mxu0 %v4551_v0  ;;  %4533 = vmatprep.subr.bf16.mxu1 %v4551_v0  ;;  %v4554_v3 = vld [vmem:[%s6116_s1 + $0x20] sm:$0xff]   ;;  %v4561_v10 = vld [vmem:[%s6116_s1 + $0x58] sm:$0xff]   ;;  %vm290_vm1 = vsmask.f32 7424  ;;  %v4567_v50 = vld [vmem:[%s6116_s1 + $0x50] sm:$0xff]   ;;  %vm1944_vm4 = vcmask 1045504  }
   0xd   : > { %s6233_s13 = smov (!%p161_p3, %s3572_s13), 7  ;;  %4138 = vmatpush3.bf16.msra.mxu0 %v4551_v0  ;;  %4537 = vmatpush3.bf16.msra.mxu1 %v4551_v0  ;;  %v4562_v16 = vld [vmem:[%s6116_s1 + $0x18] sm:$0xff]   ;;  %v4568_v55 = vld [vmem:[%s6116_s1 + $0x10] sm:$0xff]   ;;  %vm1558_vm3 = vsmask.f32 6400  ;;  %vm2928_vm6 = vcmask 1044480  }
   0xe   : > { %4139 = vmatprep.subr.bf16.mxu0 %v4552_v1  ;;  %4534 = vmatprep.subr.bf16.mxu1 %v4552_v1  ;;  %s4541_s20 = smul.u32 172, %s6233_s13  ;;  %vm2542_vm5 = vsmask.f32 5376  ;;  %vm3480_vm7 = vcmask 519168  }
   0xf   : > { %s4542_s18 = smul.u32 144, %s6233_s13 }
  0x10   : > { %s4680_s25 = scalar_lea.vmem %s6115_s0, %s4541_s20 }
  0x11   : > { %4140 = vmatpush3.bf16.msra.mxu0 %v4552_v1  ;;  %4538 = vmatpush3.bf16.msra.mxu1 %v4552_v1  ;;  %v4683_v4 = vld [vmem:[%s4680_s25] sm:$0xff]   ;;  %v4686_v5 = vld [vmem:[%s4680_s25 + $0x8] sm:$0xff]   ;;  %v4696_v11 = vld [vmem:[%s4680_s25 + $0x50] sm:$0xff]   ;;  %s5972_s21 = scalar_lea.vmem %s6118_s3, %s4542_s18 }
  0x12   : > { %4141 = vmatprep.subr.bf16.mxu0 %v4553_v2  ;;  %4535 = vmatprep.subr.bf16.mxu1 %v4553_v2  ;;  %v292_v6 = vshrl.u32 %v4683_v4, 16  ;;  %v294_v7 = vshll.u32 %v4683_v4, 16  ;;  %v6121_v8 = vshll.u32 %v4686_v5, 16  ;;  %v6119_v9 = vshrl.u32 %v4686_v5, 16  ;;  %v4699_v12 = vld [vmem:[%s4680_s25 + $0x58] sm:$0xff]   ;;  %v4704_v15 = vld [vmem:[%s4680_s25 + $0x10] sm:$0xff]  }
  0x13   : > { %v4710_v17 = vshll.u32 %v4696_v11, 16  ;;  %v4713_v18 = vshrl.u32 %v4696_v11, 16  ;;  %v4716_v19 = vshll.u32 %v4699_v12, 16  ;;  %v4719_v20 = vshrl.u32 %v4699_v12, 16  ;;  %v4727_v24 = vld [vmem:[%s4680_s25 + $0x60] sm:$0xff]   ;;  %v4732_v27 = vld [vmem:[%s4680_s25 + $0x18] sm:$0xff]  }
  0x14   : > { %v296_v13 = vrot.slane %v294_v7, 1  ;;  %v301_v14 = vrot.slane %v6121_v8, 1  ;;  %v4724_v23 = vshll.u32 %v4704_v15, 16  ;;  %6151 = vst [vmem:[#allocation3_spill] sm:$0xff] %v4732_v27  ;;  %v4735_v28 = vshrl.u32 %v4704_v15, 16  ;;  %v4751_v35 = vld [vmem:[%s4680_s25 + $0x68] sm:$0xff]  }
  0x15   : > { %4142 = vmatpush3.bf16.msra.mxu0 %v4553_v2  ;;  %4539 = vmatpush3.bf16.msra.mxu1 %v4553_v2  ;;  %v6120_v25 = vrot.slane %v4710_v17, 1  ;;  %v381_v26 = vrot.slane %v4716_v19, 1  ;;  %v4740_v31 = vshll.u32 %v4727_v24, 16  ;;  %v4748_v34 = vshll.u32 %v4732_v27, 16  ;;  %v4757_v37 = vld [vmem:[%s4680_s25 + $0x20] sm:$0xff]   ;;  %v4775_v46 = vld [vmem:[%s4680_s25 + $0x70] sm:$0xff]  }
  0x16   : > { %4143 = vmatprep.subr.bf16.mxu0 %v4554_v3  ;;  %4536 = vmatprep.subr.bf16.mxu1 %v4554_v3  ;;  %v297_v21 = vor.u32 %v296_v13, %v292_v6  ;;  %v305_v22 = vor.u32 %v6119_v9, %v301_v14  ;;  %6150 = vst [vmem:[#allocation2_spill] sm:$0xff] %v4724_v23  ;;  %v309_v30 = vrot.slane %v4724_v23, 1  ;;  %v4754_v36 = vshrl.u32 %v4727_v24, 16  ;;  %v4795_v56 = vld [vmem:[%s4680_s25 + $0x28] sm:$0xff]   ;;  %v4805_v59 = vld [vmem:[%s4680_s25 + $0x78] sm:$0xff]   ;;  %v4813_v63 = vld [vmem:[%s4680_s25 + $0x30] sm:$0xff]  }
  0x17   : > { %v377_v32 = vor.u32 %v4713_v18, %v6120_v25  ;;  %v385_v33 = vor.u32 %v4719_v20, %v381_v26  ;;  %6152 = vst [vmem:[#allocation4_spill] sm:$0xff] %v4757_v37  ;;  %v389_v39 = vrot.slane %v4740_v31, 1  ;;  %v4763_v41 = vshrl.u32 %v4732_v27, 16  ;;  %6154 = vst [vmem:[#allocation6_spill] sm:$0xff] %v4813_v63  ;;  %v4823_v6 = vld [vmem:[%s4680_s25 + $0x80] sm:$0xff]   ;;  %v4583_v8 = vld [vmem:[%s6116_s1 + $0x78] sm:$0xff]  }
  0x18   : > { %v302_v29 = vsel %vm290_vm1, %v297_v21, %v301_v14  ;;  %v310_v38 = vsel %vm290_vm1, %v305_v22, %v309_v30  ;;  %v313_v40 = vor.u32 %v4735_v28, %v309_v30  ;;  %v317_v43 = vrot.slane %v4748_v34, 1 }
  0x19   : > { %4144 = vmatpush3.bf16.msra.mxu0 %v4554_v3  ;;  %4540 = vmatpush3.bf16.msra.mxu1 %v4554_v3  ;;  %v382_v42 = vsel %vm290_vm1, %v377_v32, %v381_v26  ;;  %v4769_v44 = vshll.u32 %v4751_v35, 16  ;;  %v4772_v45 = vshll.u32 %v4757_v37, 16  ;;  %v390_v47 = vsel %vm290_vm1, %v385_v33, %v389_v39 }
  0x1a   : > { %4225 = vmatprep.subr.bf16.mxu0 %v4561_v10  ;;  %4181 = vmatprep.subr.bf16.mxu1 %v4562_v16  ;;  %v393_v48 = vor.u32 %v4754_v36, %v389_v39  ;;  %v4781_v49 = vshrl.u32 %v4751_v35, 16  ;;  %v318_v51 = vsel %vm290_vm1, %v313_v40, %v317_v43  ;;  %v321_v53 = vor.u32 %v4763_v41, %v317_v43  ;;  %v4573_v39 = vld [vmem:[%s6116_s1 + $0x48] sm:$0xff]  }
  0x1b   : > { %4145 = vmatprep.mubr.msk.bf16.mxu0 %vm463_vm0, %v302_v29  ;;  %4165 = vmatprep.mubr.msk.bf16.mxu1 %vm463_vm0, %v382_v42  ;;  %v397_v52 = vrot.slane %v4769_v44, 1  ;;  %v325_v54 = vrot.slane %v4772_v45, 1  ;;  %v4799_v57 = vshll.u32 %v4775_v46, 16  ;;  %v4802_v58 = vshrl.u32 %v4757_v37, 16  ;;  %v4574_v42 = vld [vmem:[%s6116_s1 + $0x8] sm:$0xff]  }
  0x1c   : > { %4146 = vmatmul.mubr.msk.bf16.vlgmr.msra.gmra.mxu0 %vm463_vm0, %v310_v38  ;;  %4166 = vmatmul.mubr.msk.bf16.vlgmr.msra.gmra.mxu1 %vm463_vm0, %v390_v47  ;;  %v4810_v62 = vshll.u32 %v4795_v56, 16  ;;  %v4820_v3 = vshrl.u32 %v4775_v46, 16  ;;  %v4830_v13 = vshrl.u32 %v4795_v56, 16  ;;  %v4833_v14 = vshll.u32 %v4813_v63, 16 }
  0x1d   : > { %4226 = vmatpush3.bf16.msra.mxu0 %v4561_v10  ;;  %4149 = vmatprep.mubr.msk.bf16.mxu0 %vm463_vm0, %v318_v51  ;;  %6153 = vst [vmem:[#allocation5_spill] sm:$0xff] %v4799_v57  ;;  %v398_v60 = vsel %vm290_vm1, %v393_v48, %v397_v52  ;;  %v401_v61 = vor.u32 %v4781_v49, %v397_v52  ;;  %v405_v1 = vrot.slane %v4799_v57, 1  ;;  %v4827_v10 = vshll.u32 %v4805_v59, 16  ;;  %v4864_v48 = vld [vmem:[%s4680_s25 + $0x38] sm:$0xff]   ;;  %v4870_v51 = vld [vmem:[%s4680_s25 + $0x88] sm:$0xff]  }
  0x1e   : > { %4182 = vmatpush3.bf16.msra.mxu1 %v4562_v16  ;;  %4227 = vmatprep.subr.bf16.mxu0 %v4567_v50  ;;  %v326_v0 = vsel %vm290_vm1, %v321_v53, %v325_v54  ;;  %v329_v2 = vor.u32 %v4802_v58, %v325_v54  ;;  %6155 = vst [vmem:[#allocation7_spill] sm:$0xff] %v4820_v3  ;;  %v333_v7 = vrot.slane %v4810_v62, 1  ;;  %v4838_v22 = vshrl.u32 %v4805_v59, 16 }
  0x1f   : > { %4183 = vmatprep.subr.bf16.mxu1 %v4568_v55  ;;  %4169 = vmatprep.mubr.msk.bf16.mxu1 %vm463_vm0, %v398_v60  ;;  %6156 = vst [vmem:[#allocation8_spill] sm:$0xff] %v4827_v10  ;;  %v406_v16 = vsel %vm290_vm1, %v401_v61, %v405_v1  ;;  %v409_v21 = vor.u32 %v4820_v3, %v405_v1  ;;  %v4841_v26 = vshll.u32 %v4823_v6, 16  ;;  %v413_v30 = vrot.slane %v4827_v10, 1  ;;  %v4884_v61 = vld [vmem:[%s4680_s25 + $0x90] sm:$0xf] }
  0x20   : > { %6157 = vst [vmem:[#allocation9_spill] sm:$0xff] %v4838_v22  ;;  %v334_v29 = vsel %vm290_vm1, %v329_v2, %v333_v7  ;;  %v341_v32 = vrot.slane %v4833_v14, 1  ;;  %v337_v33 = vor.u32 %v4830_v13, %v333_v7  ;;  %v4859_v43 = vshrl.u32 %v4813_v63, 16  ;;  %6159 = vst [vmem:[#allocation11_spill] sm:$0xff] %v4864_v48 }
  0x21   : > { %4228 = vmatpush3.bf16.msra.mxu0 %v4567_v50  ;;  %6158 = vst [vmem:[#allocation10_spill] sm:$0xff] %v4841_v26  ;;  %v421_v38 = vrot.slane %v4841_v26, 1  ;;  %v414_v40 = vsel %vm290_vm1, %v409_v21, %v413_v30  ;;  %v417_v47 = vor.u32 %v4838_v22, %v413_v30  ;;  %v4867_v50 = vshrl.u32 %v4823_v6, 16 }
  0x22   : > { %4184 = vmatpush3.bf16.msra.mxu1 %v4568_v55  ;;  %4229 = vmatprep.subr.bf16.mxu0 %v4573_v39  ;;  %v342_v52 = vsel %vm290_vm1, %v337_v33, %v341_v32  ;;  %v345_v53 = vor.u32 %v4859_v43, %v341_v32  ;;  %v4875_v54 = vshll.u32 %v4864_v48, 16  ;;  %v4878_v55 = vld [vmem:[%s4680_s25 + $0x40] sm:$0xff]   ;;  %v4881_v60 = vshrl.u32 %v4864_v48, 16 }
  0x23   : > { %6160 = vst [vmem:[#allocation12_spill] sm:$0xff] %v4867_v50  ;;  %4185 = vmatprep.subr.bf16.mxu1 %v4574_v42  ;;  %6161 = vst [vmem:[#allocation13_spill] sm:$0xff] %v4878_v55  ;;  %v425_v1 = vor.u32 %v4867_v50, %v421_v38  ;;  %v4891_v2 = vshll.u32 %v4870_v51, 16  ;;  %v3597_v7 = vcombine.low %v4884_v61, %v4884_v61  ;;  %v4901_v30 = vshll.u32 %v4878_v55, 16 }
  0x24   : > { %4150 = vmatmul.mubr.msk.bf16.gmra.mxu0 %vm463_vm0, %v326_v0  ;;  %4170 = vmatmul.mubr.msk.bf16.gmra.mxu1 %vm463_vm0, %v406_v16  ;;  %v4580_v0 = vld [vmem:[%s6116_s1] sm:$0xff]   ;;  %v4896_v16 = vshrl.u32 %v4870_v51, 16  ;;  %v422_v21 = vsel %vm290_vm1, %v417_v47, %v421_v38  ;;  %v4915_v9 = vshrl.u32 %v4878_v55, 16  ;;  %v1570_v26 = vrot.slane %v4802_v58, 1 }
  0x25   : > { %4153 = vmatprep.mubr.msk.bf16.mxu0 %vm463_vm0, %v334_v29  ;;  %4173 = vmatprep.mubr.msk.bf16.mxu1 %vm463_vm0, %v414_v40  ;;  %6162 = vst [vmem:[#allocation14_spill] sm:$0xff] %v4891_v2  ;;  %v349_v29 = vrot.slane %v4875_v54, 1  ;;  %v429_v32 = vrot.slane %v4891_v2, 1  ;;  %v435_v33 = vshll.u32 %v3597_v7, 16  ;;  %v4909_v40 = vld [vmem:[%s4680_s25 + $0x48] sm:$0xff]   ;;  %v357_v47 = vrot.slane %v4901_v30, 1 }
  0x26   : > { %4230 = vmatpush3.bf16.msra.mxu0 %v4573_v39  ;;  %4186 = vmatpush3.bf16.msra.mxu1 %v4574_v42  ;;  %6163 = vst [vmem:[#allocation15_spill] sm:$0xff] %v4896_v16  ;;  %v4581_v39 = vld [vmem:[%s6116_s1 + $0x40] sm:$0xff]   ;;  %6164 = vst [vmem:[#allocation16_spill] sm:$0xff] %v4909_v40  ;;  %v4921_v25 = vshll.u32 %v4909_v40, 16  ;;  %v961_v2 = vrot.slane %v4683_v4, 1 }
  0x27   : > { %4187 = vmatprep.subr.bf16.mxu1 %v4580_v0  ;;  %v350_v42 = vsel %vm290_vm1, %v345_v53, %v349_v29  ;;  %v353_v38 = vor.u32 %v4881_v60, %v349_v29  ;;  %v433_v53 = vor.u32 %v4896_v16, %v429_v32  ;;  %v437_v29 = vrot.slane %v435_v33, 1  ;;  %4231 = vmatprep.subr.bf16.mxu0 %v4581_v39 }
  0x29   : > { %v438_v33 = vsel %vm290_vm1, %v433_v53, %v437_v29  ;;  %v4952_v53 = vrot.slane %v4870_v51, 1  ;;  %v996_v29 = vrot.slane %v3597_v7, 1  ;;  %v1571_v7 = vrot.slane %v4772_v45, 2 }
  0x2a   : > { %4188 = vmatpush3.bf16.msra.mxu1 %v4580_v0  ;;  %v361_v0 = vor.u32 %v4915_v9, %v357_v47  ;;  %4232 = vmatpush3.bf16.msra.mxu0 %v4581_v39 }
  0x2b   : > { %4269 = vmatprep.subr.bf16.mxu1 %v4583_v8 }
  0x2c   : > { %4154 = vmatmul.mubr.msk.bf16.gmra.mxu0 %vm463_vm0, %v342_v52  ;;  %4174 = vmatmul.mubr.msk.bf16.gmra.mxu1 %vm463_vm0, %v422_v21  ;;  %v430_v52 = vsel %vm290_vm1, %v425_v1, %v429_v32  ;;  %v365_v21 = vrot.slane %v4921_v25, 1  ;;  %v4584_v1 = vld [vmem:[%s6116_s1 + $0x98] sm:$0xff]  }
  0x2d   : > { %4157 = vmatprep.mubr.msk.bf16.mxu0 %vm463_vm0, %v350_v42  ;;  %4177 = vmatprep.mubr.msk.bf16.mxu1 %vm463_vm0, %v430_v52  ;;  %v358_v42 = vsel %vm290_vm1, %v353_v38, %v357_v47  ;;  %v4935_v52 = vshrl.u32 %v4909_v40, 16  ;;  %v962_v38 = vrot.slane %v4686_v5, 1  ;;  %v6165_v47 = vshll.u32 %v4686_v5, 16 }
  0x2e   : > { %v366_v32 = vsel %vm290_vm1, %v361_v0, %v365_v21  ;;  %4313 = vmatprep.subr.bf16.mxu0 %v4584_v1  ;;  %v6166_v0 = vrot.slane %v4710_v17, 1 }
  0x2f   : > { %v369_v39 = vor.u32 %v4935_v52, %v365_v21  ;;  %v4947_v16 = vrot.slane %v6165_v47, 2  ;;  %v4964_v47 = vsel %vm960_vm2, %v4952_v53, %v996_v29  ;;  %v966_v29 = vrot.slane %v4732_v27, 1 }
  0x31   : > { %v374_v21 = vsel %vm290_vm1, %v369_v39, %v6166_v0  ;;  %v4585_v39 = vld [vmem:[%s6116_s1 + $0x70] sm:$0xff]   ;;  %v4976_v0 = vor.u32 %v1571_v7, %v1570_v26 }
  0x32   : > { %v4586_v7 = vld [vmem:[%s6116_s1 + $0x90] sm:$0xff]  }
  0x34   : > { %4158 = vmatmul.mubr.msk.bf16.gmra.mxu0 %vm463_vm0, %v358_v42  ;;  %4178 = vmatmul.mubr.msk.bf16.gmra.mxu1 %vm463_vm0, %v438_v33  ;;  %v6167_v42 = vshrl.u32 %v4686_v5, 16  ;;  %v963_v33 = vsel %vm960_vm2, %v961_v2, %v962_v38  ;;  %v964_v2 = vrot.slane %v4704_v15, 1 }
  0x35   : > { %4161 = vmatprep.mubr.msk.bf16.mxu0 %vm463_vm0, %v366_v32  ;;  %4189 = vmatprep.mubr.msk.bf16.mxu1 %vm463_vm0, %v4683_v4 }
  0x36   : > { %v4959_v32 = vrot.slane %v6167_v42, 1  ;;  %v209_v42 = vld [vmem:[%s4680_s25 + $0x94] sm:$0xf]  ;;  %v4991_v26 = vsel %vm960_vm2, %v964_v2, %v966_v29 }
  0x37   : > { %v4997_v4 = vcombine.low %v4884_v61, %v209_v42  ;;  %v970_v61 = vrot.slane %v4795_v56, 1 }
  0x39   : > { %6168 = vst [vmem:[#allocation17_spill] sm:$0xff] %v4997_v4 }
  0x3c   : > { %4162 = vmatmul.mubr.msk.bf16.gmra.mxu0 %vm463_vm0, %v374_v21  ;;  %4190 = vmatmul.mubr.msk.bf16.vlgmr.msra.gmra.mxu1 %vm463_vm0, %v4686_v5  ;;  %v4587_v21 = vld [vmem:[%s6116_s1 + $0x68] sm:$0xff]  }
  0x3d   : > { %4233 = vmatprep.mubr.msk.bf16.mxu0 %vm463_vm0, %v963_v33  ;;  %4193 = vmatprep.mubr.msk.bf16.mxu1 %vm463_vm0, %v4704_v15  ;;  %v4988_v33 = vsel %vm960_vm2, %v962_v38, %v964_v2  ;;  %v968_v38 = vrot.slane %v4757_v37, 1  ;;  %v5019_v2 = vld [vmem:[%s6116_s1 + $0xb8] sm:$0xff]  }
  0x3e   : > { %4270 = vmatpush3.bf16.msra.mxu1 %v4583_v8  ;;  %v4589_v8 = vld [vmem:[%s6116_s1 + $0x60] sm:$0xff]  }
  0x3f   : > { %4271 = vmatprep.subr.bf16.mxu1 %v4585_v39  ;;  %v5022_v42 = vsel %vm960_vm2, %v966_v29, %v968_v38  ;;  %v972_v29 = vrot.slane %v4813_v63, 1 }
  0x42   : > { %4272 = vmatpush3.bf16.msra.mxu1 %v4585_v39  ;;  %v4588_v39 = vld [vmem:[%s6116_s1 + $0x88] sm:$0xff]  }
  0x43   : > { %4273 = vmatprep.subr.bf16.mxu1 %v4587_v21 }
  0x44   : > { %4234 = vmatmul.mubr.msk.bf16.vlgmr.msra.gmra.mxu0 %vm463_vm0, %v4988_v33  ;;  %4194 = vmatmul.mubr.msk.bf16.gmra.mxu1 %vm463_vm0, %v4732_v27 }
  0x45   : > { %4314 = vmatpush3.bf16.msra.mxu0 %v4584_v1  ;;  %4237 = vmatprep.mubr.msk.bf16.mxu0 %vm463_vm0, %v4991_v26  ;;  %v6130_v1 = vrot.slane %v4997_v4, 1 }
  0x46   : > { %4315 = vmatprep.subr.bf16.mxu0 %v4586_v7  ;;  %4197 = vmatprep.mubr.msk.bf16.mxu1 %vm463_vm0, %v4757_v37  ;;  %v4590_v37 = vld [vmem:[%s6116_s1 + $0x80] sm:$0xff]  }
  0x47   : > { %4274 = vmatpush3.bf16.msra.mxu1 %v4587_v21  ;;  %v5028_v27 = vsel %vm960_vm2, %v4952_v53, %v6130_v1  ;;  %v5031_v21 = vsel %vm960_vm2, %v968_v38, %v970_v61  ;;  %v5053_v38 = vsel %vm960_vm2, %v970_v61, %v972_v29  ;;  %v976_v1 = vrot.slane %v4878_v55, 1 }
  0x48   : > { %4275 = vmatprep.subr.bf16.mxu1 %v4589_v8  ;;  %v978_v61 = vrot.slane %v4909_v40, 1 }
  0x49   : > { %4316 = vmatpush3.bf16.msra.mxu0 %v4586_v7  ;;  %v974_v7 = vrot.slane %v4864_v48, 1 }
  0x4a   : > { %4317 = vmatprep.subr.bf16.mxu0 %v4588_v39 }
  0x4b   : > { %4276 = vmatpush3.bf16.msra.mxu1 %v4589_v8  ;;  %v5048_v8 = vld [vmem:[%s6116_s1 + $0xd8] sm:$0xff]  }
  0x4c   : > { %4238 = vmatmul.mubr.msk.bf16.gmra.mxu0 %vm463_vm0, %v5022_v42  ;;  %4357 = vmatprep.subr.bf16.mxu1 %v5019_v2 }
  0x4d   : > { %4241 = vmatprep.mubr.msk.bf16.mxu0 %vm463_vm0, %v5031_v21  ;;  %4318 = vmatpush3.bf16.msra.mxu0 %v4588_v39  ;;  %v5056_v39 = vsel %vm960_vm2, %v972_v29, %v974_v7  ;;  %v5073_v29 = vsel %vm960_vm2, %v976_v1, %v978_v61 }
  0x4e   : > { %4198 = vmatmul.mubr.msk.bf16.gmra.mxu1 %vm463_vm0, %v4795_v56  ;;  %4319 = vmatprep.subr.bf16.mxu0 %v4590_v37 }
  0x4f   : > { %4201 = vmatprep.mubr.msk.bf16.mxu1 %vm463_vm0, %v4813_v63  ;;  %v980_v63 = vrot.slane %v4696_v11, 1 }
  0x51   : > { %4320 = vmatpush3.bf16.msra.mxu0 %v4590_v37  ;;  %v5070_v37 = vsel %vm960_vm2, %v974_v7, %v976_v1  ;;  %v5086_v7 = vsel %vm960_vm2, %v978_v61, %v980_v63  ;;  %v988_v61 = vrot.slane %v4775_v46, 1 }
  0x52   : > { %4401 = vmatprep.subr.bf16.mxu0 %v5048_v8 }
  0x54   : > { %4242 = vmatmul.mubr.msk.bf16.gmra.mxu0 %vm463_vm0, %v5053_v38 }
  0x55   : > { %4245 = vmatprep.mubr.msk.bf16.mxu0 %vm463_vm0, %v5056_v39 }
  0x56   : > { %4202 = vmatmul.mubr.msk.bf16.gmra.mxu1 %vm463_vm0, %v4864_v48  ;;  %v982_v48 = vrot.slane %v4699_v12, 1 }
  0x57   : > { %4205 = vmatprep.mubr.msk.bf16.mxu1 %vm463_vm0, %v4878_v55  ;;  %v984_v55 = vrot.slane %v4727_v24, 1 }
  0x58   : > { %v5089_v1 = vsel %vm960_vm2, %v980_v63, %v982_v48 }
  0x5c   : > { %4246 = vmatmul.mubr.msk.bf16.gmra.mxu0 %vm463_vm0, %v5070_v37 }
  0x5d   : > { %4249 = vmatprep.mubr.msk.bf16.mxu0 %vm463_vm0, %v5073_v29 }
  0x5e   : > { %4206 = vmatmul.mubr.msk.bf16.gmra.mxu1 %vm463_vm0, %v4909_v40  ;;  %v986_v40 = vrot.slane %v4751_v35, 1 }
  0x5f   : > { %4209 = vmatprep.mubr.msk.bf16.mxu1 %vm463_vm0, %v4696_v11  ;;  %v5102_v11 = vsel %vm960_vm2, %v982_v48, %v984_v55 }
  0x60   : > { %v5105_v63 = vsel %vm960_vm2, %v984_v55, %v986_v40  ;;  %v992_v55 = vrot.slane %v4823_v6, 1 }
  0x64   : > { %4250 = vmatmul.mubr.msk.bf16.gmra.mxu0 %vm463_vm0, %v5086_v7 }
  0x65   : > { %4253 = vmatprep.mubr.msk.bf16.mxu0 %vm463_vm0, %v5089_v1 }
  0x66   : > { %4210 = vmatmul.mubr.msk.bf16.gmra.mxu1 %vm463_vm0, %v4699_v12  ;;  %v990_v12 = vrot.slane %v4805_v59, 1 }
  0x67   : > { %4213 = vmatprep.mubr.msk.bf16.mxu1 %vm463_vm0, %v4727_v24  ;;  %v5118_v24 = vsel %vm960_vm2, %v986_v40, %v988_v61  ;;  %v1562_v40 = vrot.slane %v4735_v28, 1 }
  0x68   : > { %v5121_v48 = vsel %vm960_vm2, %v988_v61, %v990_v12  ;;  %v1563_v61 = vrot.slane %v4724_v23, 2 }
  0x6c   : > { %4254 = vmatmul.mubr.msk.bf16.gmra.mxu0 %vm463_vm0, %v5102_v11 }
  0x6d   : > { %4257 = vmatprep.mubr.msk.bf16.mxu0 %vm463_vm0, %v5105_v63 }
  0x6e   : > { %4214 = vmatmul.mubr.msk.bf16.gmra.mxu1 %vm463_vm0, %v4751_v35  ;;  %v5133_v35 = vsel %vm960_vm2, %v990_v12, %v992_v55  ;;  %v1567_v12 = vrot.slane %v4748_v34, 2 }
  0x6f   : > { %4217 = vmatprep.mubr.msk.bf16.mxu1 %vm463_vm0, %v4775_v46  ;;  %v5137_v46 = vsel %vm960_vm2, %v992_v55, %v4952_v53  ;;  %v1566_v53 = vrot.slane %v4763_v41, 1  ;;  %v6169_v55 = vor.u32 %v4947_v16, %v4959_v32  ;;  %v4595_v16 = vld [vmem:[%s6116_s1 + $0xa8] sm:$0xff]  }
  0x74   : > { %4258 = vmatmul.mubr.msk.bf16.gmra.mxu0 %vm463_vm0, %v5118_v24 }
  0x75   : > { %4261 = vmatprep.mubr.msk.bf16.mxu0 %vm463_vm0, %v5121_v48 }
  0x76   : > { %4218 = vmatmul.mubr.msk.bf16.gmra.mxu1 %vm463_vm0, %v4805_v59  ;;  %v1564_v59 = vor.u32 %v1563_v61, %v1562_v40  ;;  %v4593_v40 = vld [vmem:[%s6116_s1 + $0xb0] sm:$0xff]  }
  0x77   : > { %4221 = vmatprep.mubr.msk.bf16.mxu1 %vm463_vm0, %v4823_v6 }
  0x78   : > { %v1565_v23 = vsel %vm1558_vm3, %v6169_v55, %v1564_v59  ;;  %v4596_v55 = vld [vmem:[%s6116_s1 + $0xc8] sm:$0xff]  }
  0x7c   : > { %4262 = vmatmul.mubr.msk.bf16.gmra.mxu0 %vm463_vm0, %v5133_v35 }
  0x7d   : > { %4265 = vmatprep.mubr.msk.bf16.mxu0 %vm463_vm0, %v5137_v46 }
  0x7e   : > { %4222 = vmatmul.mubr.msk.bf16.gmra.mxu1 %vm463_vm0, %v4870_v51 }
  0x7f   : > { %4277 = vmatprep.mubr.msk.bf16.mxu1 %vm463_vm0, %v4988_v33  ;;  %v1568_v33 = vor.u32 %v1567_v12, %v1566_v53 }
  0x81   : > { %v1569_v32 = vsel %vm1558_vm3, %v1564_v59, %v1568_v33  ;;  %v1573_v61 = vsel %vm1558_vm3, %v1568_v33, %v4976_v0  ;;  %v4597_v59 = vld [vmem:[%s6116_s1 + $0xa0] sm:$0xff]   ;;  %v2550_v33 = vrot.slane %v4802_v58, 2  ;;  %v1586_v58 = vrot.slane %v4915_v9, 1 }
  0x84   : > { %4266 = vmatmul.mubr.msk.bf16.gmra.mxu0 %vm463_vm0, %v4964_v47  ;;  %v1574_v47 = vrot.slane %v4830_v13, 1 }
  0x85   : > { %4321 = vmatprep.mubr.msk.bf16.mxu0 %vm463_vm0, %v1565_v23  ;;  %v1575_v23 = vrot.slane %v4810_v62, 2 }
  0x86   : > { %4278 = vmatmul.mubr.msk.bf16.vlgmr.msra.gmra.mxu1 %vm463_vm0, %v4991_v26  ;;  %v1578_v26 = vrot.slane %v4859_v43, 1 }
  0x87   : > { %4281 = vmatprep.mubr.msk.bf16.mxu1 %vm463_vm0, %v5022_v42  ;;  %4358 = vmatpush3.bf16.msra.mxu1 %v5019_v2  ;;  %v1579_v42 = vrot.slane %v4833_v14, 2  ;;  %v4594_v2 = vld [vmem:[%s6116_s1 + $0xd0] sm:$0xff]   ;;  %v1576_v53 = vor.u32 %v1575_v23, %v1574_v47  ;;  %v1583_v47 = vrot.slane %v4875_v54, 2 }
  0x88   : > { %4359 = vmatprep.subr.bf16.mxu1 %v4593_v40 }
  0x89   : > { %v1580_v12 = vor.u32 %v1579_v42, %v1578_v26  ;;  %v5219_v26 = vld [vmem:[%s6116_s1 + $0x118] sm:$0xff]  }
  0x8b   : > { %4360 = vmatpush3.bf16.msra.mxu1 %v4593_v40  ;;  %v2551_v40 = vrot.slane %v4772_v45, 3  ;;  %v1581_v45 = vsel %vm1558_vm3, %v1576_v53, %v1580_v12 }
  0x8c   : > { %4322 = vmatmul.mubr.msk.bf16.vlgmr.msra.gmra.mxu0 %vm463_vm0, %v1569_v32  ;;  %4361 = vmatprep.subr.bf16.mxu1 %v4595_v16  ;;  %v1582_v32 = vrot.slane %v4881_v60, 1 }
  0x8d   : > { %4402 = vmatpush3.bf16.msra.mxu0 %v5048_v8  ;;  %4325 = vmatprep.mubr.msk.bf16.mxu0 %vm463_vm0, %v1573_v61  ;;  %v5197_v8 = vld [vmem:[%s6116_s1 + $0xf8] sm:$0xff]   ;;  %v5209_v23 = vor.u32 %v2551_v40, %v2550_v33  ;;  %v1598_v33 = vrot.slane %v4719_v20, 1 }
  0x8e   : > { %4282 = vmatmul.mubr.msk.bf16.gmra.mxu1 %vm463_vm0, %v5031_v21  ;;  %4403 = vmatprep.subr.bf16.mxu0 %v4594_v2  ;;  %v1577_v21 = vsel %vm1558_vm3, %v4976_v0, %v1576_v53  ;;  %v1584_v0 = vor.u32 %v1583_v47, %v1582_v32  ;;  %v1602_v47 = vrot.slane %v4754_v36, 1 }
  0x8f   : > { %4285 = vmatprep.mubr.msk.bf16.mxu1 %vm463_vm0, %v5053_v38  ;;  %4362 = vmatpush3.bf16.msra.mxu1 %v4595_v16  ;;  %v1587_v38 = vrot.slane %v4901_v30, 2  ;;  %v4598_v16 = vld [vmem:[%s6116_s1 + $0xc0] sm:$0xff]  }
  0x90   : > { %4363 = vmatprep.subr.bf16.mxu1 %v4597_v59  ;;  %v1585_v42 = vsel %vm1558_vm3, %v1580_v12, %v1584_v0 }
  0x91   : > { %4404 = vmatpush3.bf16.msra.mxu0 %v4594_v2  ;;  %v1588_v61 = vor.u32 %v1587_v38, %v1586_v58  ;;  %v1590_v2 = vrot.slane %v4935_v52, 1  ;;  %v1606_v38 = vrot.slane %v4781_v49, 1 }
  0x92   : > { %4405 = vmatprep.subr.bf16.mxu0 %v4596_v55 }
  0x93   : > { %4364 = vmatpush3.bf16.msra.mxu1 %v4597_v59  ;;  %v1591_v59 = vrot.slane %v4921_v25, 2  ;;  %v1589_v53 = vsel %vm1558_vm3, %v1584_v0, %v1588_v61 }
  0x94   : > { %4326 = vmatmul.mubr.msk.bf16.gmra.mxu0 %vm463_vm0, %v1577_v21  ;;  %4445 = vmatprep.subr.bf16.mxu1 %v5197_v8  ;;  %v1599_v21 = vrot.slane %v4716_v19, 2 }
  0x95   : > { %4329 = vmatprep.mubr.msk.bf16.mxu0 %vm463_vm0, %v1581_v45  ;;  %4406 = vmatpush3.bf16.msra.mxu0 %v4596_v55  ;;  %v1595_v55 = vrot.slane %v4710_v17, 2  ;;  %v1603_v45 = vrot.slane %v4740_v31, 2 }
  0x96   : > { %4286 = vmatmul.mubr.msk.bf16.gmra.mxu1 %vm463_vm0, %v5056_v39  ;;  %4407 = vmatprep.subr.bf16.mxu0 %v4598_v16  ;;  %v1594_v39 = vrot.slane %v4713_v18, 1 }
  0x97   : > { %4289 = vmatprep.mubr.msk.bf16.mxu1 %vm463_vm0, %v5070_v37  ;;  %v1592_v37 = vor.u32 %v1591_v59, %v1590_v2  ;;  %v1614_v59 = vrot.slane %v4838_v22, 1 }
  0x98   : > { %v1596_v12 = vor.u32 %v1595_v55, %v1594_v39  ;;  %v1618_v55 = vrot.slane %v4867_v50, 1 }
  0x99   : > { %4408 = vmatpush3.bf16.msra.mxu0 %v4598_v16  ;;  %v1593_v40 = vsel %vm1558_vm3, %v1588_v61, %v1592_v37  ;;  %v1607_v16 = vrot.slane %v4769_v44, 2  ;;  %v1610_v61 = vrot.slane %v4820_v3, 1 }
  0x9a   : > { %4489 = vmatprep.subr.bf16.mxu0 %v5219_v26  ;;  %v1597_v32 = vsel %vm1558_vm3, %v1592_v37, %v1596_v12  ;;  %v6170_v37 = vld [vmem:[#allocation10_spill] sm:$0xff] }
  0x9c   : > { %4330 = vmatmul.mubr.msk.bf16.gmra.mxu0 %vm463_vm0, %v1585_v42  ;;  %v1611_v42 = vrot.slane %v4799_v57, 2 }
  0x9d   : > { %4333 = vmatprep.mubr.msk.bf16.mxu0 %vm463_vm0, %v1589_v53  ;;  %v1615_v53 = vrot.slane %v4827_v10, 2  ;;  %v211_v10 = vld [vmem:[%s4680_s25 + $0x9c] sm:$0xf] }
  0x9e   : > { %4290 = vmatmul.mubr.msk.bf16.gmra.mxu1 %vm463_vm0, %v5073_v29  ;;  %v1600_v29 = vor.u32 %v1599_v21, %v1598_v33  ;;  %v6136_v33 = vshll.u32 %v4997_v4, 16  ;;  %v5275_v21 = vld [vmem:[%s4680_s25 + $0x98] sm:$0xf] }
  0x9f   : > { %4293 = vmatprep.mubr.msk.bf16.mxu1 %vm463_vm0, %v5086_v7  ;;  %v1604_v7 = vor.u32 %v1603_v45, %v1602_v47  ;;  %v6171_v47 = vld [vmem:[#allocation15_spill] sm:$0xff] }
  0xa0   : > { %v1601_v58 = vsel %vm1558_vm3, %v1596_v12, %v1600_v29  ;;  %v1619_v12 = vrot.slane %v6170_v37, 2  ;;  %v1622_v45 = vrot.slane %v6171_v47, 1 }
  0xa1   : > { %v1605_v0 = vsel %vm1558_vm3, %v1600_v29, %v1604_v7  ;;  %v6172_v29 = vld [vmem:[#allocation14_spill] sm:$0xff] }
  0xa4   : > { %4334 = vmatmul.mubr.msk.bf16.gmra.mxu0 %vm463_vm0, %v1593_v40  ;;  %v6137_v40 = vshrl.u32 %v4997_v4, 16 }
  0xa5   : > { %4337 = vmatprep.mubr.msk.bf16.mxu0 %vm463_vm0, %v1597_v32 }
  0xa6   : > { %4294 = vmatmul.mubr.msk.bf16.gmra.mxu1 %vm463_vm0, %v5089_v1  ;;  %v1608_v1 = vor.u32 %v1607_v16, %v1606_v38  ;;  %v1632_v38 = vrot.slane %v6136_v33, 2  ;;  %v5287_v16 = vcombine.low %v5275_v21, %v5275_v21 }
  0xa7   : > { %4297 = vmatprep.mubr.msk.bf16.mxu1 %vm463_vm0, %v5102_v11  ;;  %v1612_v11 = vor.u32 %v1611_v42, %v1610_v61 }
  0xa8   : > { %v1609_v2 = vsel %vm1558_vm3, %v1604_v7, %v1608_v1  ;;  %v1623_v7 = vrot.slane %v6172_v29, 2  ;;  %v1639_v61 = vshll.u32 %v5287_v16, 16 }
  0xa9   : > { %v1613_v39 = vsel %vm1558_vm3, %v1608_v1, %v1612_v11  ;;  %v1304_v1 = vrot.slane %v5287_v16, 1 }
  0xac   : > { %4338 = vmatmul.mubr.msk.bf16.gmra.mxu0 %vm463_vm0, %v1601_v58 }
  0xad   : > { %4341 = vmatprep.mubr.msk.bf16.mxu0 %vm463_vm0, %v1605_v0  ;;  %v1636_v0 = vshrl.u32 %v5287_v16, 16 }
  0xae   : > { %4298 = vmatmul.mubr.msk.bf16.gmra.mxu1 %vm463_vm0, %v5105_v63  ;;  %v1616_v63 = vor.u32 %v1615_v53, %v1614_v59 }
  0xaf   : > { %4301 = vmatprep.mubr.msk.bf16.mxu1 %vm463_vm0, %v5118_v24  ;;  %v1620_v24 = vor.u32 %v1619_v12, %v1618_v55  ;;  %v1638_v53 = vrot.slane %v1636_v0, 1  ;;  %v6173_v12 = vrot.slane %v4997_v4, 1 }
  0xb0   : > { %v1617_v32 = vsel %vm1558_vm3, %v1612_v11, %v1616_v63  ;;  %v1945_v11 = vrot.slane %v4686_v5, 2 }
  0xb1   : > { %v1621_v58 = vsel %vm1558_vm3, %v1616_v63, %v1620_v24 }
  0xb4   : > { %4342 = vmatmul.mubr.msk.bf16.gmra.mxu0 %vm463_vm0, %v1609_v2  ;;  %v1946_v2 = vrot.slane %v4704_v15, 2  ;;  %v6174_v15 = vld [vmem:[#allocation3_spill] sm:$0xff] }
  0xb5   : > { %4345 = vmatprep.mubr.msk.bf16.mxu0 %vm463_vm0, %v1613_v39  ;;  %v1641_v39 = vrot.slane %v1639_v61, 2  ;;  %v1948_v63 = vrot.slane %v6174_v15, 2  ;;  %v4604_v61 = vld [vmem:[%s6116_s1 + $0xe8] sm:$0xff]   ;;  %v6179_v15 = vld [vmem:[#allocation16_spill] sm:$0xff] }
  0xb6   : > { %4302 = vmatmul.mubr.msk.bf16.gmra.mxu1 %vm463_vm0, %v5121_v48  ;;  %v1629_v48 = vrot.slane %v6137_v40, 1  ;;  %v5419_v40 = vld [vmem:[%s4680_s25 + $0x68] sm:$0xff]  }
  0xb7   : > { %4305 = vmatprep.mubr.msk.bf16.mxu1 %vm463_vm0, %v5133_v35  ;;  %v1624_v35 = vor.u32 %v1623_v7, %v1622_v45  ;;  %v1642_v5 = vor.u32 %v1641_v39, %v1638_v53  ;;  %v1949_v7 = vsel %vm1944_vm4, %v1946_v2, %v1948_v63  ;;  %v6178_v53 = vld [vmem:[#allocation13_spill] sm:$0xff]  ;;  %6189 = vst [vmem:[#allocation21_spill] sm:$0xff] %v5419_v40 }
  0xb8   : > { %v1633_v42 = vor.u32 %v1632_v38, %v1629_v48  ;;  %v4602_v48 = vld [vmem:[%s6116_s1 + $0xf0] sm:$0xff]   ;;  %v1952_v38 = vrot.slane %v4795_v56, 2  ;;  %v4606_v56 = vld [vmem:[%s6116_s1 + $0xe0] sm:$0xff]   ;;  %v1958_v39 = vrot.slane %v6178_v53, 2 }
  0xb9   : > { %v1625_v59 = vsel %vm1558_vm3, %v1620_v24, %v1624_v35  ;;  %v6175_v24 = vld [vmem:[#allocation4_spill] sm:$0xff] }
  0xba   : > { %v1634_v55 = vsel %vm1558_vm3, %v1624_v35, %v1633_v42  ;;  %v1643_v45 = vsel %vm1558_vm3, %v1633_v42, %v1642_v5  ;;  %v6176_v35 = vld [vmem:[#allocation6_spill] sm:$0xff]  ;;  %v4603_v42 = vld [vmem:[%s6116_s1 + $0x110] sm:$0xff]  }
  0xbb   : > { %v1954_v0 = vrot.slane %v6176_v35, 2 }
  0xbc   : > { %4346 = vmatmul.mubr.msk.bf16.gmra.mxu0 %vm463_vm0, %v1617_v32  ;;  %v1950_v32 = vrot.slane %v6175_v24, 2 }
  0xbd   : > { %4349 = vmatprep.mubr.msk.bf16.mxu0 %vm463_vm0, %v1621_v58 }
  0xbe   : > { %4306 = vmatmul.mubr.msk.bf16.gmra.mxu1 %vm463_vm0, %v5137_v46  ;;  %v1305_v46 = vsel %vm960_vm2, %v6173_v12, %v1304_v1  ;;  %v1951_v58 = vsel %vm1944_vm4, %v1948_v63, %v1950_v32  ;;  %v1953_v1 = vsel %vm1944_vm4, %v1950_v32, %v1952_v38  ;;  %v1960_v63 = vrot.slane %v6179_v15, 2 }
  0xbf   : > { %4309 = vmatprep.mubr.msk.bf16.mxu1 %vm463_vm0, %v5028_v27  ;;  %v1947_v27 = vsel %vm1944_vm4, %v1945_v11, %v1946_v2  ;;  %v4605_v11 = vld [vmem:[%s6116_s1 + $0x108] sm:$0xff]  }
  0xc0   : > { %v6177_v2 = vld [vmem:[#allocation11_spill] sm:$0xff] }
  0xc4   : > { %4350 = vmatmul.mubr.msk.bf16.gmra.mxu0 %vm463_vm0, %v1625_v59  ;;  %v1956_v59 = vrot.slane %v6177_v2, 2 }
  0xc5   : > { %4353 = vmatprep.mubr.msk.bf16.mxu0 %vm463_vm0, %v1634_v55 }
  0xc6   : > { %4310 = vmatmul.mubr.msk.bf16.gmra.mxu1 %vm463_vm0, %v1305_v46  ;;  %v1957_v55 = vsel %vm1944_vm4, %v1954_v0, %v1956_v59  ;;  %v1959_v46 = vsel %vm1944_vm4, %v1956_v59, %v1958_v39  ;;  %v5397_v59 = vld [vmem:[%s4680_s25 + $0x60] sm:$0xff]  }
  0xc7   : > { %4365 = vmatprep.mubr.msk.bf16.mxu1 %vm463_vm0, %v1947_v27  ;;  %6185 = vst [vmem:[#allocation16_spill] sm:$0xff] %v5397_v59  ;;  %v1966_v53 = vrot.slane %v5397_v59, 2 }
  0xcc   : > { %4354 = vmatmul.mubr.msk.bf16.gmra.mxu0 %vm463_vm0, %v1643_v45  ;;  %v5367_v45 = vld [vmem:[%s4680_s25 + $0x50] sm:$0xff]  }
  0xcd   : > { %4409 = vmatprep.mubr.msk.bf16.mxu0 %vm463_vm0, %v1949_v7 }
  0xce   : > { %4366 = vmatmul.mubr.msk.bf16.vlgmr.msra.gmra.mxu1 %vm463_vm0, %v1949_v7  ;;  %v1962_v7 = vrot.slane %v5367_v45, 2 }
  0xcf   : > { %4369 = vmatprep.mubr.msk.bf16.mxu1 %vm463_vm0, %v1951_v58  ;;  %4446 = vmatpush3.bf16.msra.mxu1 %v5197_v8  ;;  %v1955_v8 = vsel %vm1944_vm4, %v1952_v38, %v1954_v0  ;;  %v1961_v38 = vsel %vm1944_vm4, %v1958_v39, %v1960_v63 }
  0xd0   : > { %4447 = vmatprep.subr.bf16.mxu1 %v4602_v48 }
  0xd3   : > { %4448 = vmatpush3.bf16.msra.mxu1 %v4602_v48 }
  0xd4   : > { %4410 = vmatmul.mubr.msk.bf16.vlgmr.msra.gmra.mxu0 %vm463_vm0, %v1951_v58  ;;  %4449 = vmatprep.subr.bf16.mxu1 %v4604_v61 }
  0xd5   : > { %4490 = vmatpush3.bf16.msra.mxu0 %v5219_v26  ;;  %4413 = vmatprep.mubr.msk.bf16.mxu0 %vm463_vm0, %v1953_v1  ;;  %v4607_v26 = vld [vmem:[%s6116_s1 + $0x100] sm:$0xff]  }
  0xd6   : > { %4370 = vmatmul.mubr.msk.bf16.gmra.mxu1 %vm463_vm0, %v1953_v1  ;;  %4491 = vmatprep.subr.bf16.mxu0 %v4603_v42 }
  0xd7   : > { %4373 = vmatprep.mubr.msk.bf16.mxu1 %vm463_vm0, %v1955_v8  ;;  %4450 = vmatpush3.bf16.msra.mxu1 %v4604_v61  ;;  %v1963_v61 = vsel %vm1944_vm4, %v1960_v63, %v1962_v7 }
  0xd8   : > { %4451 = vmatprep.subr.bf16.mxu1 %v4606_v56 }
  0xd9   : > { %4492 = vmatpush3.bf16.msra.mxu0 %v4603_v42 }
  0xda   : > { %4493 = vmatprep.subr.bf16.mxu0 %v4605_v11 }
  0xdb   : > { %4452 = vmatpush3.bf16.msra.mxu1 %v4606_v56 }
  0xdc   : > { %v5350_v12 = vpop.f32.mrf.mxu0  ;;  %4414 = vmatmul.mubr.msk.bf16.gmra.mxu0 %vm463_vm0, %v1955_v8  ;;  %v5355_v27 = vpop.f32.mrf.mxu1  ;;  %v5389_v8 = vld [vmem:[%s4680_s25 + $0x58] sm:$0xff]  }
  0xdd   : > { %4417 = vmatprep.mubr.msk.bf16.mxu0 %vm463_vm0, %v1957_v55  ;;  %4494 = vmatpush3.bf16.msra.mxu0 %v4605_v11  ;;  %6183 = vst [vmem:[#allocation11_spill] sm:$0xff] %v5389_v8  ;;  %v1964_v56 = vrot.slane %v5389_v8, 2  ;;  %v2547_v8 = vrot.slane %v4748_v34, 3  ;;  %v1980_v34 = vrot.slane %v5287_v16, 2 }
  0xde   : > { %4374 = vmatmul.mubr.msk.bf16.gmra.mxu1 %vm463_vm0, %v1957_v55  ;;  %v5358_v5 = vpop.f32.mrf.mxu0  ;;  %4495 = vmatprep.subr.bf16.mxu0 %v4607_v26  ;;  %v5362_v24 = vpop.f32.mrf.mxu1 }
  0xdf   : > { %4377 = vmatprep.mubr.msk.bf16.mxu1 %vm463_vm0, %v1959_v46  ;;  %v1965_v55 = vsel %vm1944_vm4, %v1962_v7, %v1964_v56  ;;  %v1967_v63 = vsel %vm1944_vm4, %v1964_v56, %v1966_v53  ;;  %v1968_v7 = vrot.slane %v5419_v40, 2  ;;  %v5427_v56 = vld [vmem:[%s4680_s25 + $0x70] sm:$0xff]  }
  0xe0   : > { %v5364_v32 = vpop.f32.mrf.mxu0  ;;  %v5370_v58 = vpop.f32.mrf.mxu1  ;;  %6191 = vst [vmem:[#allocation23_spill] sm:$0xff] %v5427_v56  ;;  %v1970_v47 = vrot.slane %v5427_v56, 2 }
  0xe1   : > { %4496 = vmatpush3.bf16.msra.mxu0 %v4607_v26  ;;  %6180 = vst [vmem:[#allocation3_spill] sm:$0xff] %v5370_v58  ;;  %v1969_v50 = vsel %vm1944_vm4, %v1966_v53, %v1968_v7  ;;  %v6199_v58 = vld [vmem:[#allocation2_spill] sm:$0xff] }
  0xe2   : > { %v5372_v48 = vpop.f32.mrf.mxu0  ;;  %v5375_v35 = vpop.f32.mrf.mxu1 }
  0xe3   : > { %6181 = vst [vmem:[#allocation4_spill] sm:$0xff] %v5375_v35  ;;  %v2543_v35 = vrot.slane %v4735_v28, 2 }
  0xe4   : > { %v5377_v0 = vpop.f32.mrf.mxu0  ;;  %4418 = vmatmul.mubr.msk.bf16.gmra.mxu0 %vm463_vm0, %v1959_v46  ;;  %v5382_v42 = vpop.f32.mrf.mxu1 }
  0xe5   : > { %4421 = vmatprep.mubr.msk.bf16.mxu0 %vm463_vm0, %v1961_v38  ;;  %6182 = vst [vmem:[#allocation6_spill] sm:$0xff] %v5382_v42 }
  0xe6   : > { %4378 = vmatmul.mubr.msk.bf16.gmra.mxu1 %vm463_vm0, %v1961_v38  ;;  %v5385_v1 = vpop.f32.mrf.mxu0  ;;  %v5392_v11 = vpop.f32.mrf.mxu1 }
  0xe7   : > { %4381 = vmatprep.mubr.msk.bf16.mxu1 %vm463_vm0, %v1963_v61  ;;  %6184 = vst [vmem:[#allocation13_spill] sm:$0xff] %v5392_v11 }
  0xe8   : > { %v5394_v2 = vpop.f32.mrf.mxu0  ;;  %v5400_v39 = vpop.f32.mrf.mxu1 }
  0xe9   : > { %6186 = vst [vmem:[#allocation18_spill] sm:$0xff] %v5400_v39 }
  0xea   : > { %v5402_v26 = vpop.f32.mrf.mxu0  ;;  %v5405_v46 = vpop.f32.mrf.mxu1 }
  0xeb   : > { %6187 = vst [vmem:[#allocation19_spill] sm:$0xff] %v5405_v46 }
  0xec   : > { %v5407_v15 = vpop.f32.mrf.mxu0  ;;  %4422 = vmatmul.mubr.msk.bf16.gmra.mxu0 %vm463_vm0, %v1963_v61  ;;  %v5412_v38 = vpop.f32.mrf.mxu1 }
  0xed   : > { %4425 = vmatprep.mubr.msk.bf16.mxu0 %vm463_vm0, %v1965_v55  ;;  %6188 = vst [vmem:[#allocation20_spill] sm:$0xff] %v5412_v38 }
  0xee   : > { %4382 = vmatmul.mubr.msk.bf16.gmra.mxu1 %vm463_vm0, %v1965_v55  ;;  %v5415_v33 = vpop.f32.mrf.mxu0  ;;  %v5422_v29 = vpop.f32.mrf.mxu1 }
  0xef   : > { %4385 = vmatprep.mubr.msk.bf16.mxu1 %vm463_vm0, %v1967_v63  ;;  %6190 = vst [vmem:[#allocation22_spill] sm:$0xff] %v5422_v29  ;;  %v1971_v29 = vsel %vm1944_vm4, %v1968_v7, %v1970_v47 }
  0xf0   : > { %v5424_v61 = vpop.f32.mrf.mxu0  ;;  %v5430_v37 = vpop.f32.mrf.mxu1 }
  0xf1   : > { %6192 = vst [vmem:[#allocation24_spill] sm:$0xff] %v5430_v37  ;;  %v5449_v37 = vld [vmem:[%s4680_s25 + $0x78] sm:$0xff]  }
  0xf2   : > { %v5432_v55 = vpop.f32.mrf.mxu0  ;;  %v5435_v38 = vpop.f32.mrf.mxu1  ;;  %6195 = vst [vmem:[#allocation27_spill] sm:$0xff] %v5449_v37  ;;  %v1972_v53 = vrot.slane %v5449_v37, 2 }
  0xf3   : > { %6193 = vst [vmem:[#allocation25_spill] sm:$0xff] %v5435_v38 }
  0xf4   : > { %v5437_v46 = vpop.f32.mrf.mxu0  ;;  %4426 = vmatmul.mubr.msk.bf16.gmra.mxu0 %vm463_vm0, %v1967_v63  ;;  %v5442_v39 = vpop.f32.mrf.mxu1  ;;  %v1974_v63 = vrot.slane %v4823_v6, 2 }
  0xf5   : > { %4429 = vmatprep.mubr.msk.bf16.mxu0 %vm463_vm0, %v1969_v50  ;;  %6194 = vst [vmem:[#allocation26_spill] sm:$0xff] %v5442_v39 }
  0xf6   : > { %4386 = vmatmul.mubr.msk.bf16.gmra.mxu1 %vm463_vm0, %v1969_v50  ;;  %v5445_v56 = vpop.f32.mrf.mxu0  ;;  %v5452_v38 = vpop.f32.mrf.mxu1  ;;  %v1973_v50 = vsel %vm1944_vm4, %v1970_v47, %v1972_v53  ;;  %v1975_v37 = vsel %vm1944_vm4, %v1972_v53, %v1974_v63  ;;  %v1976_v47 = vrot.slane %v4870_v51, 2 }
  0xf7   : > { %4389 = vmatprep.mubr.msk.bf16.mxu1 %vm463_vm0, %v1971_v29  ;;  %6196 = vst [vmem:[#allocation28_spill] sm:$0xff] %v5452_v38 }
  0xf8   : > { %v5454_v40 = vpop.f32.mrf.mxu0  ;;  %v5457_v7 = vpop.f32.mrf.mxu1 }
  0xf9   : > { %6197 = vst [vmem:[#allocation29_spill] sm:$0xff] %v5457_v7 }
  0xfa   : > { %v5459_v39 = vpop.f32.mrf.mxu0  ;;  %v5462_v59 = vpop.f32.mrf.mxu1 }
  0xfb   : > { %6198 = vst [vmem:[#allocation30_spill] sm:$0xff] %v5462_v59  ;;  %v1978_v59 = vrot.slane %v4997_v4, 2 }
  0xfc   : > { %v5464_v11 = vpop.f32.mrf.mxu0  ;;  %4430 = vmatmul.mubr.msk.bf16.gmra.mxu0 %vm463_vm0, %v1971_v29  ;;  %v4191_v38 = vpop.f32.mrf.mxu1 }
  0xfd   : > { %4433 = vmatprep.mubr.msk.bf16.mxu0 %vm463_vm0, %v1973_v50  ;;  %v798_v7 = vadd.f32 %v4191_v38, %v5350_v12  ;;  %v1977_v38 = vsel %vm1944_vm4, %v1974_v63, %v1976_v47  ;;  %v1979_v51 = vsel %vm1944_vm4, %v1976_v47, %v1978_v59  ;;  %v5508_v47 = vld [vmem:[%s4680_s25 + $0xa0] ss:$0 sps:$4 sm:$0xff]   ;;  %v1981_v16 = vsel %vm1944_vm4, %v1978_v59, %v1980_v34  ;;  %v4617_v34 = vld [vmem:[%s4680_s25 + $0x18] sm:$0xff]  }
  0xfe   : > { %4390 = vmatmul.mubr.msk.bf16.gmra.mxu1 %vm463_vm0, %v1973_v50  ;;  %v5470_v6 = vpop.f32.mrf.mxu0  ;;  %v789_v22 = vpop.f32.mrf.mxu1  ;;  %v5483_v50 = vcombine.low %v5275_v21, %v211_v10 }
  0xff   : > { %4393 = vmatprep.mubr.msk.bf16.mxu1 %vm463_vm0, %v1975_v37  ;;  %v790_v53 = vadd.f32 %v789_v22, %v5358_v5  ;;  %v2544_v22 = vrot.slane %v6199_v58, 3  ;;  %v2546_v5 = vrot.slane %v4763_v41, 2 }
 0x100   : > { %v5477_v29 = vpop.f32.mrf.mxu0  ;;  %v4192_v42 = vpop.f32.mrf.mxu1 }
 0x101   : > { %v801_v12 = vadd.f32 %v4192_v42, %v5364_v32 }
 0x102   : > { %v5480_v57 = vpop.f32.mrf.mxu0  ;;  %v792_v3 = vpop.f32.mrf.mxu1 }
 0x103   : > { %v793_v10 = vadd.f32 %v792_v3, %v5372_v48  ;;  %v2548_v48 = vor.u32 %v2547_v8, %v2546_v5 }
 0x104   : > { %v4235_v4 = vpop.f32.mrf.mxu0  ;;  %4434 = vmatmul.mubr.msk.bf16.gmra.mxu0 %vm463_vm0, %v1975_v37  ;;  %v4195_v32 = vpop.f32.mrf.mxu1  ;;  %v2286_v37 = vrot.slane %v5483_v50, 2 }
 0x105   : > { %v5494_v21 = vadd.f32 %v4235_v4, %v798_v7  ;;  %4437 = vmatprep.mubr.msk.bf16.mxu0 %vm463_vm0, %v1977_v38  ;;  %v814_v28 = vadd.f32 %v4195_v32, %v5377_v0  ;;  %v2545_v4 = vor.u32 %v2544_v22, %v2543_v35  ;;  %v2555_v22 = vrot.slane %v4810_v62, 3 }
 0x106   : > { %4394 = vmatmul.mubr.msk.bf16.gmra.mxu1 %vm463_vm0, %v1977_v38  ;;  %v1110_v42 = vpop.f32.mrf.mxu0  ;;  %v805_v41 = vpop.f32.mrf.mxu1  ;;  %v2287_v0 = vsel %vm1944_vm4, %v1978_v59, %v2286_v37 }
 0x107   : > { %6200 = vst [vmem:[#allocation2_spill] sm:$0xff] %v5494_v21  ;;  %v5500_v58 = vadd.f32 %v1110_v42, %v790_v53  ;;  %4397 = vmatprep.mubr.msk.bf16.mxu1 %vm463_vm0, %v1979_v51  ;;  %v806_v63 = vadd.f32 %v805_v41, %v5385_v1  ;;  %v2549_v1 = vsel %vm2542_vm5, %v2545_v4, %v2548_v48  ;;  %v2930_v41 = vrot.slane %v4617_v34, 3 }
 0x108   : > { %v4236_v3 = vpop.f32.mrf.mxu0  ;;  %v4196_v38 = vpop.f32.mrf.mxu1 }
 0x109   : > { %v5505_v7 = vadd.f32 %v4236_v3, %v801_v12  ;;  %v817_v53 = vadd.f32 %v4196_v38, %v5394_v2  ;;  %v2554_v12 = vrot.slane %v4830_v13, 2  ;;  %v2288_v2 = vrot.slane %v5508_v47, 2 }
 0x10a   : > { %v1113_v21 = vpop.f32.mrf.mxu0  ;;  %v808_v35 = vpop.f32.mrf.mxu1 }
 0x10b   : > { %v5512_v32 = vadd.f32 %v1113_v21, %v793_v10  ;;  %v809_v5 = vadd.f32 %v808_v35, %v5402_v26  ;;  %v4616_v21 = vld [vmem:[%s4680_s25 + $0x10] sm:$0xff]  }
 0x10c   : > { %v4239_v8 = vpop.f32.mrf.mxu0  ;;  %4438 = vmatmul.mubr.msk.bf16.gmra.mxu0 %vm463_vm0, %v1979_v51  ;;  %v2929_v51 = vrot.slane %v4616_v21, 3 }
 0x10d   : > { %v5520_v42 = vadd.f32 %v4239_v8, %v814_v28  ;;  %4441 = vmatprep.mubr.msk.bf16.mxu0 %vm463_vm0, %v2287_v0  ;;  %v2556_v28 = vor.u32 %v2555_v22, %v2554_v12  ;;  %v2289_v0 = vsel %vm1944_vm4, %v2286_v37, %v2288_v2  ;;  %v2562_v22 = vrot.slane %v4881_v60, 2 }
 0x10e   : > { %v4199_v59 = vpop.f32.mrf.mxu1  ;;  %4398 = vmatmul.mubr.msk.bf16.gmra.mxu1 %vm463_vm0, %v1981_v16  ;;  %v1126_v10 = vpop.f32.mrf.mxu0  ;;  %v2931_v8 = vsel %vm2928_vm6, %v2929_v51, %v2930_v41  ;;  %v4619_v51 = vld [vmem:[%s4680_s25 + $0x28] sm:$0xff]  }
 0x10f   : > { %v830_v13 = vadd.f32 %v4199_v59, %v5407_v15  ;;  %v5528_v3 = vadd.f32 %v1126_v10, %v806_v63  ;;  %4453 = vmatprep.mubr.msk.bf16.mxu1 %vm463_vm0, %v2549_v1  ;;  %v2558_v15 = vrot.slane %v4859_v43, 2  ;;  %v2559_v63 = vrot.slane %v4833_v14, 3 }
 0x110   : > { %v821_v62 = vpop.f32.mrf.mxu1  ;;  %v4240_v26 = vpop.f32.mrf.mxu0  ;;  %v2557_v37 = vsel %vm2542_vm5, %v5209_v23, %v2556_v28  ;;  %v2563_v43 = vrot.slane %v4875_v54, 3  ;;  %v2934_v34 = vrot.slane %v4619_v51, 3 }
 0x111   : > { %v822_v4 = vadd.f32 %v821_v62, %v5415_v33  ;;  %v5532_v38 = vadd.f32 %v4240_v26, %v817_v53  ;;  %v2553_v33 = vsel %vm2542_vm5, %v2548_v48, %v5209_v23  ;;  %v2560_v21 = vor.u32 %v2559_v63, %v2558_v15 }
 0x112   : > { %v4200_v16 = vpop.f32.mrf.mxu1  ;;  %v1129_v35 = vpop.f32.mrf.mxu0  ;;  %v2566_v63 = vrot.slane %v4915_v9, 2  ;;  %v4620_v9 = vld [vmem:[%s4680_s25 + $0x30] sm:$0xff]  }
 0x113   : > { %v833_v1 = vadd.f32 %v4200_v16, %v5424_v61  ;;  %v5539_v59 = vadd.f32 %v1129_v35, %v809_v5  ;;  %v4618_v5 = vld [vmem:[%s4680_s25 + $0x20] sm:$0xff]  }
 0x114   : > { %v824_v53 = vpop.f32.mrf.mxu1  ;;  %v4243_v12 = vpop.f32.mrf.mxu0  ;;  %4442 = vmatmul.mubr.msk.bf16.gmra.mxu0 %vm463_vm0, %v2289_v0  ;;  %v2932_v48 = vrot.slane %v4618_v5, 3 }
 0x115   : > { %v825_v14 = vadd.f32 %v824_v53, %v5432_v55  ;;  %v5549_v61 = vadd.f32 %v4243_v12, %v830_v13  ;;  %4497 = vmatprep.mubr.msk.bf16.mxu0 %vm463_vm0, %v2931_v8  ;;  %v2564_v13 = vor.u32 %v2563_v43, %v2562_v22  ;;  %v2561_v8 = vsel %vm2542_vm5, %v2556_v28, %v2560_v21  ;;  %v4621_v43 = vld [vmem:[%s4680_s25 + $0x38] sm:$0xff]  }
 0x116   : > { %v4203_v2 = vpop.f32.mrf.mxu1  ;;  %4454 = vmatmul.mubr.msk.bf16.vlgmr.msra.gmra.mxu1 %vm463_vm0, %v2553_v33  ;;  %v1142_v10 = vpop.f32.mrf.mxu0  ;;  %v2933_v0 = vsel %vm2928_vm6, %v2930_v41, %v2932_v48  ;;  %v2570_v53 = vrot.slane %v4935_v52, 2  ;;  %v2571_v28 = vrot.slane %v4921_v25, 3 }
 0x117   : > { %v846_v23 = vadd.f32 %v4203_v2, %v5437_v46  ;;  %v5556_v60 = vadd.f32 %v1142_v10, %v822_v4  ;;  %4457 = vmatprep.mubr.msk.bf16.mxu1 %vm463_vm0, %v2557_v37  ;;  %v2935_v46 = vsel %vm2928_vm6, %v2932_v48, %v2934_v34  ;;  %v2565_v41 = vsel %vm2542_vm5, %v2560_v21, %v2564_v13 }
 0x118   : > { %v837_v54 = vpop.f32.mrf.mxu1  ;;  %v4244_v55 = vpop.f32.mrf.mxu0  ;;  %v2936_v37 = vrot.slane %v4620_v9, 3  ;;  %v2572_v2 = vor.u32 %v2571_v28, %v2570_v53 }
 0x119   : > { %v838_v62 = vadd.f32 %v837_v54, %v5445_v56  ;;  %v5560_v26 = vadd.f32 %v4244_v55, %v833_v1  ;;  %v2567_v56 = vrot.slane %v4901_v30, 3 }
 0x11a   : > { %v4204_v16 = vpop.f32.mrf.mxu1  ;;  %v1145_v35 = vpop.f32.mrf.mxu0  ;;  %v2937_v51 = vsel %vm2928_vm6, %v2934_v34, %v2936_v37 }
 0x11b   : > { %v849_v4 = vadd.f32 %v4204_v16, %v5454_v40  ;;  %v5566_v15 = vadd.f32 %v1145_v35, %v825_v14  ;;  %v2938_v14 = vrot.slane %v4621_v43, 3  ;;  %v2568_v25 = vor.u32 %v2567_v56, %v2566_v63 }
 0x11c   : > { %v840_v1 = vpop.f32.mrf.mxu1  ;;  %v4247_v33 = vpop.f32.mrf.mxu0  ;;  %4498 = vmatmul.mubr.msk.bf16.vlgmr.msra.gmra.mxu0 %vm463_vm0, %v2933_v0 }
 0x11d   : > { %v841_v12 = vadd.f32 %v840_v1, %v5459_v39  ;;  %v5575_v40 = vadd.f32 %v4247_v33, %v846_v23  ;;  %4501 = vmatprep.mubr.msk.bf16.mxu0 %vm463_vm0, %v2935_v46  ;;  %v2939_v55 = vsel %vm2928_vm6, %v2936_v37, %v2938_v14  ;;  %v2569_v35 = vsel %vm2542_vm5, %v2564_v13, %v2568_v25  ;;  %v4623_v33 = vld [vmem:[%s4680_s25 + $0x48] sm:$0xff]  }
 0x11e   : > { %v4207_v22 = vpop.f32.mrf.mxu1  ;;  %4458 = vmatmul.mubr.msk.bf16.gmra.mxu1 %vm463_vm0, %v2561_v8  ;;  %v1158_v30 = vpop.f32.mrf.mxu0  ;;  %v2573_v34 = vsel %vm2542_vm5, %v2568_v25, %v2572_v2  ;;  %v2578_v46 = vrot.slane %v4719_v20, 2  ;;  %v2582_v25 = vrot.slane %v4754_v36, 2  ;;  %v2944_v36 = vrot.slane %v5367_v45, 3 }
 0x11f   : > { %v862_v5 = vadd.f32 %v4207_v22, %v5464_v11  ;;  %v5582_v48 = vadd.f32 %v1158_v30, %v838_v62  ;;  %4461 = vmatprep.mubr.msk.bf16.mxu1 %vm463_vm0, %v2565_v41  ;;  %v2574_v11 = vrot.slane %v4713_v18, 2  ;;  %v2575_v62 = vrot.slane %v4710_v17, 3 }
 0x120   : > { %v853_v52 = vpop.f32.mrf.mxu1  ;;  %v4248_v39 = vpop.f32.mrf.mxu0  ;;  %v2942_v41 = vrot.slane %v4623_v33, 3  ;;  %v6206_v33 = vld [vmem:[#allocation6_spill] sm:$0xff] }
 0x121   : > { %v854_v10 = vadd.f32 %v853_v52, %v5470_v6  ;;  %v5586_v21 = vadd.f32 %v4248_v39, %v849_v4  ;;  %v2579_v4 = vrot.slane %v4716_v19, 3  ;;  %v2576_v1 = vor.u32 %v2575_v62, %v2574_v11  ;;  %v6202_v62 = vld [vmem:[#allocation3_spill] sm:$0xff] }
 0x122   : > { %v4208_v23 = vpop.f32.mrf.mxu1  ;;  %v1161_v54 = vpop.f32.mrf.mxu0  ;;  %v2583_v52 = vrot.slane %v4740_v31, 3  ;;  %v2945_v45 = vsel %vm2928_vm6, %v2942_v41, %v2944_v36 }
 0x123   : > { %v865_v0 = vadd.f32 %v4208_v23, %v5477_v29  ;;  %v5593_v16 = vadd.f32 %v1161_v54, %v841_v12  ;;  %v4622_v29 = vld [vmem:[%s4680_s25 + $0x40] sm:$0xff]   ;;  %v2577_v22 = vsel %vm2542_vm5, %v2572_v2, %v2576_v1  ;;  %v2587_v2 = vrot.slane %v4769_v44, 3 }
 0x124   : > { %v856_v6 = vpop.f32.mrf.mxu1  ;;  %v4251_v8 = vpop.f32.mrf.mxu0  ;;  %4502 = vmatmul.mubr.msk.bf16.gmra.mxu0 %vm463_vm0, %v2937_v51  ;;  %v2940_v63 = vrot.slane %v4622_v29, 3  ;;  %v2586_v51 = vrot.slane %v4781_v49, 2  ;;  %v2584_v44 = vor.u32 %v2583_v52, %v2582_v25  ;;  %v6209_v52 = vld [vmem:[#allocation13_spill] sm:$0xff] }
 0x125   : > { %v857_v18 = vadd.f32 %v856_v6, %v5480_v57  ;;  %v5601_v17 = vadd.f32 %v4251_v8, %v862_v5  ;;  %4505 = vmatprep.mubr.msk.bf16.mxu0 %vm463_vm0, %v2939_v55  ;;  %v2580_v57 = vor.u32 %v2579_v4, %v2578_v46  ;;  %v6201_v55 = vld [vmem:[#allocation11_spill] sm:$0xff]  ;;  %v6203_v8 = vld [vmem:[#allocation4_spill] sm:$0xff] }
 0x126   : > { %v4211_v13 = vpop.f32.mrf.mxu1  ;;  %4462 = vmatmul.mubr.msk.bf16.gmra.mxu1 %vm463_vm0, %v2569_v35  ;;  %v1174_v56 = vpop.f32.mrf.mxu0  ;;  %v2941_v12 = vsel %vm2928_vm6, %v2938_v14, %v2940_v63  ;;  %v2943_v30 = vsel %vm2928_vm6, %v2940_v63, %v2942_v41  ;;  %v2946_v11 = vrot.slane %v6201_v55, 3  ;;  %v2588_v6 = vor.u32 %v2587_v2, %v2586_v51  ;;  %v6204_v63 = vld [vmem:[#allocation7_spill] sm:$0xff] }
 0x127   : > { %v5607_v53 = vadd.f32 %v1174_v56, %v854_v10  ;;  %4465 = vmatprep.mubr.msk.bf16.mxu1 %vm463_vm0, %v2573_v34  ;;  %v878_v43 = vadd.f32 %v4211_v13, %v5355_v27  ;;  %v2581_v14 = vsel %vm2542_vm5, %v2576_v1, %v2580_v57  ;;  %v2590_v13 = vrot.slane %v6204_v63, 2  ;;  %v6205_v56 = vld [vmem:[#allocation5_spill] sm:$0xff] }
 0x128   : > { %v869_v19 = vpop.f32.mrf.mxu1  ;;  %v4252_v20 = vpop.f32.mrf.mxu0  ;;  %v2947_v29 = vsel %vm2928_vm6, %v2944_v36, %v2946_v11  ;;  %v2591_v1 = vrot.slane %v6205_v56, 3  ;;  %v2589_v41 = vsel %vm2542_vm5, %v2584_v44, %v2588_v6  ;;  %v6211_v36 = vld [vmem:[#allocation21_spill] sm:$0xff] }
 0x129   : > { %v5610_v28 = vadd.f32 %v4252_v20, %v865_v0  ;;  %v870_v23 = vadd.f32 %v869_v19, %v5362_v24 }
 0x12a   : > { %v4212_v9 = vpop.f32.mrf.mxu1  ;;  %v1177_v37 = vpop.f32.mrf.mxu0 }
 0x12b   : > { %v5616_v5 = vadd.f32 %v1177_v37, %v857_v18  ;;  %v881_v0 = vadd.f32 %v4212_v9, %v6202_v62 }
 0x12c   : > { %v872_v39 = vpop.f32.mrf.mxu1  ;;  %v4255_v10 = vpop.f32.mrf.mxu0  ;;  %4506 = vmatmul.mubr.msk.bf16.gmra.mxu0 %vm463_vm0, %v2941_v12  ;;  %v2585_v12 = vsel %vm2542_vm5, %v2580_v57, %v2584_v44 }
 0x12d   : > { %v5625_v54 = vadd.f32 %v4255_v10, %v878_v43  ;;  %4509 = vmatprep.mubr.msk.bf16.mxu0 %vm463_vm0, %v2943_v30  ;;  %v873_v34 = vadd.f32 %v872_v39, %v6203_v8  ;;  %v6208_v43 = vld [vmem:[#allocation8_spill] sm:$0xff] }
 0x12e   : > { %v4215_v27 = vpop.f32.mrf.mxu1  ;;  %4466 = vmatmul.mubr.msk.bf16.gmra.mxu1 %vm463_vm0, %v2577_v22  ;;  %v1190_v31 = vpop.f32.mrf.mxu0  ;;  %v6207_v22 = vld [vmem:[#allocation9_spill] sm:$0xff]  ;;  %v2595_v25 = vrot.slane %v6208_v43, 3  ;;  %v6218_v43 = vld [vmem:[#allocation14_spill] sm:$0xff] }
 0x12f   : > { %v5632_v35 = vadd.f32 %v1190_v31, %v870_v23  ;;  %4469 = vmatprep.mubr.msk.bf16.mxu1 %vm463_vm0, %v2581_v14  ;;  %v894_v19 = vadd.f32 %v4215_v27, %v6206_v33  ;;  %v2594_v30 = vrot.slane %v6207_v22, 2  ;;  %v6210_v14 = vld [vmem:[#allocation16_spill] sm:$0xff]  ;;  %v2592_v23 = vor.u32 %v2591_v1, %v2590_v13  ;;  %v6212_v31 = vld [vmem:[#allocation18_spill] sm:$0xff]  ;;  %v6217_v22 = vld [vmem:[#allocation15_spill] sm:$0xff] }
 0x130   : > { %v885_v49 = vpop.f32.mrf.mxu1  ;;  %v4256_v24 = vpop.f32.mrf.mxu0  ;;  %v2948_v51 = vrot.slane %v6210_v14, 3  ;;  %v2950_v27 = vrot.slane %v6211_v36, 3  ;;  %v6215_v33 = vld [vmem:[#allocation12_spill] sm:$0xff]  ;;  %v6220_v14 = vld [vmem:[#allocation23_spill] sm:$0xff] }
 0x131   : > { %v5636_v46 = vadd.f32 %v4256_v24, %v881_v0  ;;  %v886_v39 = vadd.f32 %v885_v49, %v6209_v52  ;;  %v2596_v49 = vor.u32 %v2595_v25, %v2594_v30  ;;  %v6213_v24 = vld [vmem:[#allocation19_spill] sm:$0xff]  ;;  %v2593_v63 = vsel %vm2542_vm5, %v2588_v6, %v2592_v23  ;;  %v6219_v25 = vld [vmem:[#allocation22_spill] sm:$0xff] }
 0x132   : > { %v4216_v4 = vpop.f32.mrf.mxu1  ;;  %v1193_v18 = vpop.f32.mrf.mxu0  ;;  %v2951_v13 = vsel %vm2928_vm6, %v2948_v51, %v2950_v27  ;;  %v2602_v30 = vrot.slane %v6217_v22, 2  ;;  %v2603_v6 = vrot.slane %v6218_v43, 3  ;;  %v6221_v36 = vld [vmem:[#allocation27_spill] sm:$0xff]  ;;  %v6227_v43 = vld [vmem:[#allocation26_spill] sm:$0xff] }
 0x133   : > { %v5643_v20 = vadd.f32 %v1193_v18, %v873_v34  ;;  %v897_v55 = vadd.f32 %v4216_v4, %v6212_v31  ;;  %v6214_v4 = vld [vmem:[#allocation20_spill] sm:$0xff]  ;;  %v2954_v31 = vrot.slane %v6221_v36, 3 }
 0x134   : > { %v888_v9 = vpop.f32.mrf.mxu1  ;;  %v4259_v37 = vpop.f32.mrf.mxu0  ;;  %4510 = vmatmul.mubr.msk.bf16.gmra.mxu0 %vm463_vm0, %v2945_v45  ;;  %v2949_v45 = vsel %vm2928_vm6, %v2946_v11, %v2948_v51  ;;  %v2597_v11 = vsel %vm2542_vm5, %v2592_v23, %v2596_v49  ;;  %v2952_v51 = vrot.slane %v6220_v14, 3  ;;  %v6228_v36 = vld [vmem:[#allocation28_spill] sm:$0xff] }
 0x135   : > { %v5651_v10 = vadd.f32 %v4259_v37, %v894_v19  ;;  %4513 = vmatprep.mubr.msk.bf16.mxu0 %vm463_vm0, %v2947_v29  ;;  %v889_v8 = vadd.f32 %v888_v9, %v6213_v24  ;;  %v2598_v19 = vrot.slane %v6215_v33, 2 }
 0x136   : > { %v4219_v2 = vpop.f32.mrf.mxu1  ;;  %4470 = vmatmul.mubr.msk.bf16.gmra.mxu1 %vm463_vm0, %v2585_v12  ;;  %v1206_v57 = vpop.f32.mrf.mxu0  ;;  %v6216_v12 = vld [vmem:[#allocation10_spill] sm:$0xff]  ;;  %v2953_v33 = vsel %vm2928_vm6, %v2950_v27, %v2952_v51 }
 0x137   : > { %v5658_v62 = vadd.f32 %v1206_v57, %v886_v39  ;;  %4473 = vmatprep.mubr.msk.bf16.mxu1 %vm463_vm0, %v2589_v41  ;;  %v910_v56 = vadd.f32 %v4219_v2, %v6214_v4  ;;  %v2599_v37 = vrot.slane %v6216_v12, 3  ;;  %v6223_v4 = vld [vmem:[#allocation25_spill] sm:$0xff] }
 0x138   : > { %v901_v0 = vpop.f32.mrf.mxu1  ;;  %v4260_v44 = vpop.f32.mrf.mxu0 }
 0x139   : > { %v5662_v34 = vadd.f32 %v4260_v44, %v897_v55  ;;  %v902_v52 = vadd.f32 %v901_v0, %v6219_v25  ;;  %v6222_v55 = vld [vmem:[#allocation24_spill] sm:$0xff]  ;;  %v2600_v24 = vor.u32 %v2599_v37, %v2598_v19 }
 0x13a   : > { %v4220_v18 = vpop.f32.mrf.mxu1  ;;  %v1209_v29 = vpop.f32.mrf.mxu0 }
 0x13b   : > { %v5668_v1 = vadd.f32 %v1209_v29, %v889_v8  ;;  %v913_v23 = vadd.f32 %v4220_v18, %v6222_v55  ;;  %v2611_v29 = vshrl.u32 %v5483_v50, 16 }
 0x13c   : > { %v904_v41 = vpop.f32.mrf.mxu1  ;;  %v4263_v9 = vpop.f32.mrf.mxu0  ;;  %4514 = vmatmul.mubr.msk.bf16.gmra.mxu0 %vm463_vm0, %v2949_v45  ;;  %v2604_v45 = vor.u32 %v2603_v6, %v2602_v30 }
 0x13d   : > { %v5677_v39 = vadd.f32 %v4263_v9, %v910_v56  ;;  %4517 = vmatprep.mubr.msk.bf16.mxu0 %vm463_vm0, %v2951_v13  ;;  %v2614_v13 = vshll.u32 %v5483_v50, 16  ;;  %v905_v56 = vadd.f32 %v904_v41, %v6223_v4  ;;  %v2955_v9 = vsel %vm2928_vm6, %v2952_v51, %v2954_v31 }
 0x13e   : > { %v4223_v2 = vpop.f32.mrf.mxu1  ;;  %4474 = vmatmul.mubr.msk.bf16.gmra.mxu1 %vm463_vm0, %v2593_v63  ;;  %v1222_v57 = vpop.f32.mrf.mxu0  ;;  %v2601_v41 = vsel %vm2542_vm5, %v2596_v49, %v2600_v24  ;;  %v2605_v14 = vsel %vm2542_vm5, %v2600_v24, %v2604_v45  ;;  %v2613_v51 = vrot.slane %v2611_v29, 2  ;;  %v6229_v24 = vld [vmem:[#allocation29_spill] sm:$0xff] }
 0x13f   : > { %v5684_v44 = vadd.f32 %v1222_v57, %v902_v52  ;;  %4477 = vmatprep.mubr.msk.bf16.mxu1 %vm463_vm0, %v2597_v11  ;;  %v6224_v11 = vld [vmem:[#allocation17_spill] sm:$0xff]  ;;  %v926_v6 = vadd.f32 %v4223_v2, %v6227_v43  ;;  %v2616_v57 = vrot.slane %v2614_v13, 3  ;;  %v4624_v2 = vld [vmem:[%s4680_s25 + $0x80] sm:$0xff]  }
 0x140   : > { %v917_v0 = vpop.f32.mrf.mxu1  ;;  %v4264_v8 = vpop.f32.mrf.mxu0  ;;  %v6225_v19 = vshrl.u32 %v6224_v11, 16  ;;  %v6226_v22 = vshll.u32 %v6224_v11, 16  ;;  %v6230_v13 = vld [vmem:[#allocation2_spill] sm:$0xff] }
 0x141   : > { %v5690_v63 = vadd.f32 %v4264_v8, %v913_v23  ;;  %v918_v55 = vadd.f32 %v917_v0, %v6228_v36  ;;  %v2956_v8 = vrot.slane %v4624_v2, 3 }
 0x142   : > { %v4224_v12 = vpop.f32.mrf.mxu1  ;;  %v1225_v18 = vpop.f32.mrf.mxu0  ;;  %v2606_v37 = vrot.slane %v6225_v19, 2  ;;  %v2607_v30 = vrot.slane %v6226_v22, 3 }
 0x143   : > { %v5699_v25 = vadd.f32 %v1225_v18, %v905_v56  ;;  %v4625_v18 = vld [vmem:[%s4680_s25 + $0x88] sm:$0xff]   ;;  %v929_v29 = vadd.f32 %v4224_v12, %v6229_v24  ;;  %v2957_v2 = vsel %vm2928_vm6, %v2954_v31, %v2956_v8 }
 0x144   : > { %v920_v52 = vpop.f32.mrf.mxu1  ;;  %v4267_v27 = vpop.f32.mrf.mxu0  ;;  %4518 = vmatmul.mubr.msk.bf16.gmra.mxu0 %vm463_vm0, %v2953_v33  ;;  %v2608_v56 = vor.u32 %v2607_v30, %v2606_v37  ;;  %v2958_v19 = vrot.slane %v4625_v18, 3  ;;  %v2620_v33 = vshrl.u32 %v5508_v47, 16 }
 0x145   : > { %v5705_v23 = vadd.f32 %v4267_v27, %v926_v6  ;;  %4521 = vmatprep.mubr.msk.bf16.mxu0 %vm463_vm0, %v2955_v9  ;;  %v2623_v9 = vshll.u32 %v5508_v47, 16  ;;  %v2617_v27 = vor.u32 %v2616_v57, %v2613_v51 }
 0x146   : > { %v4279_v4 = vpop.f32.mrf.mxu1  ;;  %4478 = vmatmul.mubr.msk.bf16.gmra.mxu1 %vm463_vm0, %v2601_v41  ;;  %v1238_v49 = vpop.f32.mrf.mxu0  ;;  %v6231_v41 = vld [vmem:[#allocation30_spill] sm:$0xff]  ;;  %v2622_v24 = vrot.slane %v2620_v33, 2  ;;  %v2962_v33 = vrot.slane %v5483_v50, 3 }
 0x147   : > { %v1515_v22 = vadd.f32 %v4279_v4, %v6230_v13  ;;  %v5714_v0 = vadd.f32 %v1238_v49, %v918_v55  ;;  %4481 = vmatprep.mubr.msk.bf16.mxu1 %vm463_vm0, %v2605_v14  ;;  %v921_v36 = vadd.f32 %v920_v52, %v6231_v41  ;;  %v2609_v55 = vsel %vm2542_vm5, %v2604_v45, %v2608_v56 }
 0x148   : > { %v1370_v43 = vpop.f32.mrf.mxu1  ;;  %v4268_v6 = vpop.f32.mrf.mxu0  ;;  %v2959_v4 = vsel %vm2928_vm6, %v2956_v8, %v2958_v19  ;;  %v2625_v51 = vrot.slane %v2623_v9, 3  ;;  %v2960_v45 = vrot.slane %v6224_v11, 3 }
 0x149   : > { %v1513_v37 = vadd.f32 %v1370_v43, %v5500_v58  ;;  %v5720_v30 = vadd.f32 %v4268_v6, %v929_v29  ;;  %v2618_v58 = vsel %vm2542_vm5, %v2608_v56, %v2617_v27 }
 0x14a   : > { %v4280_v12 = vpop.f32.mrf.mxu1  ;;  %v1241_v18 = vpop.f32.mrf.mxu0  ;;  %v2626_v56 = vor.u32 %v2625_v51, %v2622_v24  ;;  %v2961_v11 = vsel %vm2928_vm6, %v2958_v19, %v2960_v45  ;;  %v2964_v19 = vrot.slane %v5508_v47, 3 }
 0x14b   : > { %v1516_v14 = vadd.f32 %v4280_v12, %v5505_v7  ;;  %v5726_v49 = vadd.f32 %v1241_v18, %v921_v36 }
 0x14c   : > { %v1373_v57 = vpop.f32.mrf.mxu1  ;;  %v4323_v52 = vpop.f32.mrf.mxu0  ;;  %4522 = vmatmul.mubr.msk.bf16.gmra.mxu0 %vm463_vm0, %v2957_v2  ;;  %v2963_v2 = vsel %vm2928_vm6, %v2960_v45, %v2962_v33 }
 0x14d   : > { %v1514_v31 = vadd.f32 %v1373_v57, %v5512_v32  ;;  %v5731_v29 = vadd.f32 %v4323_v52, %v1515_v22  ;;  %4525 = vmatprep.mubr.msk.bf16.mxu0 %vm463_vm0, %v2959_v4 }
 0x14e   : > { %v4283_v8 = vpop.f32.mrf.mxu1  ;;  %4482 = vmatmul.mubr.msk.bf16.gmra.mxu1 %vm463_vm0, %v2609_v55  ;;  %v1756_v7 = vpop.f32.mrf.mxu0 }
 0x14f   : > { %v1519_v13 = vadd.f32 %v4283_v8, %v5520_v42  ;;  %v5738_v9 = vadd.f32 %v1756_v7, %v1513_v37  ;;  %4485 = vmatprep.mubr.msk.bf16.mxu1 %vm463_vm0, %v2618_v58  ;;  %v2627_v37 = vsel %vm2542_vm5, %v2617_v27, %v2626_v56 }
 0x150   : > { %v1386_v32 = vpop.f32.mrf.mxu1  ;;  %v4324_v22 = vpop.f32.mrf.mxu0 }
 0x151   : > { %v1517_v43 = vadd.f32 %v1386_v32, %v5528_v3  ;;  %v5742_v6 = vadd.f32 %v4324_v22, %v1516_v14 }
 0x152   : > { %v4284_v41 = vpop.f32.mrf.mxu1  ;;  %v1759_v36 = vpop.f32.mrf.mxu0 }
 0x153   : > { %v1520_v50 = vadd.f32 %v4284_v41, %v5532_v38  ;;  %v5747_v42 = vadd.f32 %v1759_v36, %v1514_v31 }
 0x154   : > { %v1389_v12 = vpop.f32.mrf.mxu1  ;;  %v4327_v18 = vpop.f32.mrf.mxu0  ;;  %4526 = vmatmul.mubr.msk.bf16.gmra.mxu0 %vm463_vm0, %v2961_v11 }
 0x155   : > { %v1518_v3 = vadd.f32 %v1389_v12, %v5539_v59  ;;  %v5752_v55 = vadd.f32 %v4327_v18, %v1519_v13  ;;  %4529 = vmatprep.mubr.msk.bf16.mxu0 %vm463_vm0, %v2963_v2  ;;  %v2965_v59 = vsel %vm2928_vm6, %v2962_v33, %v2964_v19 }
 0x156   : > { %v4287_v4 = vpop.f32.mrf.mxu1  ;;  %4486 = vmatmul.mubr.msk.bf16.gmra.mxu1 %vm463_vm0, %v2627_v37  ;;  %v1772_v38 = vpop.f32.mrf.mxu0 }
 0x157   : > { %v1523_v14 = vadd.f32 %v4287_v4, %v5549_v61  ;;  %v5758_v24 = vadd.f32 %v1772_v38, %v1517_v43 }
 0x158   : > { %v1402_v27 = vpop.f32.mrf.mxu1  ;;  %v4328_v51 = vpop.f32.mrf.mxu0 }
 0x159   : > { %v1521_v57 = vadd.f32 %v1402_v27, %v5556_v60  ;;  %v5761_v52 = vadd.f32 %v4328_v51, %v1520_v50 }
 0x15a   : > { %v4288_v58 = vpop.f32.mrf.mxu1  ;;  %v1775_v31 = vpop.f32.mrf.mxu0 }
 0x15b   : > { %v1524_v47 = vadd.f32 %v4288_v58, %v5560_v26  ;;  %v5765_v45 = vadd.f32 %v1775_v31, %v1518_v3 }
 0x15c   : > { %v1405_v8 = vpop.f32.mrf.mxu1  ;;  %v4331_v7 = vpop.f32.mrf.mxu0  ;;  %4530 = vmatmul.mubr.msk.bf16.gmra.mxu0 %vm463_vm0, %v2965_v59 }
 0x15d   : > { %v1522_v61 = vadd.f32 %v1405_v8, %v5566_v15  ;;  %v5769_v13 = vadd.f32 %v4331_v7, %v1523_v14 }
 0x15e   : > { %v4291_v56 = vpop.f32.mrf.mxu1  ;;  %v1788_v60 = vpop.f32.mrf.mxu0 }
 0x15f   : > { %v1527_v32 = vadd.f32 %v4291_v56, %v5575_v40  ;;  %v5772_v22 = vadd.f32 %v1788_v60, %v1521_v57 }
 0x160   : > { %v1418_v33 = vpop.f32.mrf.mxu1  ;;  %v4332_v43 = vpop.f32.mrf.mxu0 }
 0x161   : > { %v1525_v26 = vadd.f32 %v1418_v33, %v5582_v48  ;;  %v5775_v11 = vadd.f32 %v4332_v43, %v1524_v47 }
 0x162   : > { %v4292_v41 = vpop.f32.mrf.mxu1  ;;  %v1791_v36 = vpop.f32.mrf.mxu0 }
 0x163   : > { %v1528_v2 = vadd.f32 %v4292_v41, %v5586_v21  ;;  %v5778_v50 = vadd.f32 %v1791_v36, %v1522_v61 }
 0x164   : > { %v1421_v15 = vpop.f32.mrf.mxu1  ;;  %v4335_v37 = vpop.f32.mrf.mxu0 }
 0x165   : > { %v1526_v12 = vadd.f32 %v1421_v15, %v5593_v16  ;;  %v5781_v18 = vadd.f32 %v4335_v37, %v1527_v32 }
 0x166   : > { %v4295_v40 = vpop.f32.mrf.mxu1  ;;  %v1804_v3 = vpop.f32.mrf.mxu0 }
 0x167   : > { %v1531_v19 = vadd.f32 %v4295_v40, %v5601_v17  ;;  %v5784_v4 = vadd.f32 %v1804_v3, %v1525_v26 }
 0x168   : > { %v1434_v48 = vpop.f32.mrf.mxu1  ;;  %v4336_v38 = vpop.f32.mrf.mxu0 }
 0x169   : > { %v1529_v14 = vadd.f32 %v1434_v48, %v5607_v53  ;;  %v5787_v27 = vadd.f32 %v4336_v38, %v1528_v2 }
 0x16a   : > { %v4296_v21 = vpop.f32.mrf.mxu1  ;;  %v1807_v51 = vpop.f32.mrf.mxu0 }
 0x16b   : > { %v1532_v57 = vadd.f32 %v4296_v21, %v5610_v28  ;;  %v5790_v59 = vadd.f32 %v1807_v51, %v1526_v12 }
 0x16c   : > { %v1437_v16 = vpop.f32.mrf.mxu1  ;;  %v4339_v58 = vpop.f32.mrf.mxu0 }
 0x16d   : > { %v1530_v31 = vadd.f32 %v1437_v16, %v5616_v5  ;;  %v5793_v47 = vadd.f32 %v4339_v58, %v1531_v19 }
 0x16e   : > { %v4299_v17 = vpop.f32.mrf.mxu1  ;;  %v1820_v8 = vpop.f32.mrf.mxu0 }
 0x16f   : > { %v1535_v7 = vadd.f32 %v4299_v17, %v5625_v54  ;;  %v5796_v61 = vadd.f32 %v1820_v8, %v1529_v14 }
 0x170   : > { %v1450_v53 = vpop.f32.mrf.mxu1  ;;  %v4340_v56 = vpop.f32.mrf.mxu0 }
 0x171   : > { %v1533_v60 = vadd.f32 %v1450_v53, %v5632_v35  ;;  %v5799_v32 = vadd.f32 %v4340_v56, %v1532_v57 }
 0x172   : > { %v4300_v28 = vpop.f32.mrf.mxu1  ;;  %v1823_v33 = vpop.f32.mrf.mxu0 }
 0x173   : > { %v1536_v43 = vadd.f32 %v4300_v28, %v5636_v46  ;;  %v5802_v26 = vadd.f32 %v1823_v33, %v1530_v31 }
 0x174   : > { %v1453_v5 = vpop.f32.mrf.mxu1  ;;  %v4343_v41 = vpop.f32.mrf.mxu0 }
 0x175   : > { %v1534_v36 = vadd.f32 %v1453_v5, %v5643_v20  ;;  %v5805_v2 = vadd.f32 %v4343_v41, %v1535_v7 }
 0x176   : > { %v4303_v54 = vpop.f32.mrf.mxu1  ;;  %v1836_v15 = vpop.f32.mrf.mxu0 }
 0x177   : > { %v1539_v37 = vadd.f32 %v4303_v54, %v5651_v10  ;;  %v5808_v12 = vadd.f32 %v1836_v15, %v1533_v60 }
 0x178   : > { %v1466_v35 = vpop.f32.mrf.mxu1  ;;  %v4344_v40 = vpop.f32.mrf.mxu0 }
 0x179   : > { %v1537_v3 = vadd.f32 %v1466_v35, %v5658_v62  ;;  %v5811_v19 = vadd.f32 %v4344_v40, %v1536_v43 }
 0x17a   : > { %v4304_v46 = vpop.f32.mrf.mxu1  ;;  %v1839_v48 = vpop.f32.mrf.mxu0 }
 0x17b   : > { %v1540_v38 = vadd.f32 %v4304_v46, %v5662_v34  ;;  %v5814_v14 = vadd.f32 %v1839_v48, %v1534_v36 }
 0x17c   : > { %v1469_v20 = vpop.f32.mrf.mxu1  ;;  %v4347_v21 = vpop.f32.mrf.mxu0 }
 0x17d   : > { %v1538_v51 = vadd.f32 %v1469_v20, %v5668_v1  ;;  %v5817_v57 = vadd.f32 %v4347_v21, %v1539_v37 }
 0x17e   : > { %v4307_v10 = vpop.f32.mrf.mxu1  ;;  %v1852_v16 = vpop.f32.mrf.mxu0 }
 0x17f   : > { %v1543_v58 = vadd.f32 %v4307_v10, %v5677_v39  ;;  %v5820_v31 = vadd.f32 %v1852_v16, %v1537_v3 }
 0x180   : > { %v1482_v62 = vpop.f32.mrf.mxu1  ;;  %v4348_v17 = vpop.f32.mrf.mxu0 }
 0x181   : > { %v1541_v8 = vadd.f32 %v1482_v62, %v5684_v44  ;;  %v5823_v7 = vadd.f32 %v4348_v17, %v1540_v38 }
 0x182   : > { %v4308_v34 = vpop.f32.mrf.mxu1  ;;  %v1855_v53 = vpop.f32.mrf.mxu0 }
 0x183   : > { %v1544_v56 = vadd.f32 %v4308_v34, %v5690_v63  ;;  %v5826_v60 = vadd.f32 %v1855_v53, %v1538_v51 }
 0x184   : > { %v1485_v1 = vpop.f32.mrf.mxu1  ;;  %v4351_v28 = vpop.f32.mrf.mxu0 }
 0x185   : > { %v1542_v33 = vadd.f32 %v1485_v1, %v5699_v25  ;;  %v5829_v43 = vadd.f32 %v4351_v28, %v1543_v58 }
 0x186   : > { %v4311_v39 = vpop.f32.mrf.mxu1  ;;  %v1868_v5 = vpop.f32.mrf.mxu0 }
 0x187   : > { %v1547_v41 = vadd.f32 %v4311_v39, %v5705_v23  ;;  %v5832_v36 = vadd.f32 %v1868_v5, %v1541_v8 }
 0x188   : > { %v1498_v44 = vpop.f32.mrf.mxu1  ;;  %v4352_v54 = vpop.f32.mrf.mxu0 }
 0x189   : > { %v1545_v15 = vadd.f32 %v1498_v44, %v5714_v0  ;;  %v5835_v37 = vadd.f32 %v4352_v54, %v1544_v56 }
 0x18a   : > { %v4312_v63 = vpop.f32.mrf.mxu1  ;;  %v1871_v35 = vpop.f32.mrf.mxu0 }
 0x18b   : > { %v1548_v40 = vadd.f32 %v4312_v63, %v5720_v30  ;;  %v5838_v3 = vadd.f32 %v1871_v35, %v1542_v33 }
 0x18c   : > { %v1501_v25 = vpop.f32.mrf.mxu1  ;;  %v4355_v46 = vpop.f32.mrf.mxu0 }
 0x18d   : > { %v1546_v48 = vadd.f32 %v1501_v25, %v5726_v49  ;;  %v5841_v38 = vadd.f32 %v4355_v46, %v1547_v41 }
 0x18e   : > { %v4367_v23 = vpop.f32.mrf.mxu1  ;;  %v1884_v20 = vpop.f32.mrf.mxu0 }
 0x18f   : > { %v2239_v21 = vadd.f32 %v4367_v23, %v5731_v29  ;;  %v5844_v51 = vadd.f32 %v1884_v20, %v1545_v15 }
 0x190   : > { %v2094_v0 = vpop.f32.mrf.mxu1  ;;  %v4356_v10 = vpop.f32.mrf.mxu0 }
 0x191   : > { %v2237_v16 = vadd.f32 %v2094_v0, %v5738_v9  ;;  %v5847_v58 = vadd.f32 %v4356_v10, %v1548_v40 }
 0x192   : > { %v4368_v30 = vpop.f32.mrf.mxu1  ;;  %v1887_v62 = vpop.f32.mrf.mxu0 }
 0x193   : > { %v2240_v17 = vadd.f32 %v4368_v30, %v5742_v6  ;;  %v5850_v8 = vadd.f32 %v1887_v62, %v1546_v48 }
 0x194   : > { %v2097_v49 = vpop.f32.mrf.mxu1  ;;  %v4411_v34 = vpop.f32.mrf.mxu0 }
 0x195   : > { %v2238_v53 = vadd.f32 %v2097_v49, %v5747_v42  ;;  %v5853_v56 = vadd.f32 %v4411_v34, %v2239_v21 }
 0x196   : > { %v4371_v29 = vpop.f32.mrf.mxu1  ;;  %v2354_v1 = vpop.f32.mrf.mxu0 }
 0x197   : > { %v2243_v28 = vadd.f32 %v4371_v29, %v5752_v55  ;;  %v5856_v33 = vadd.f32 %v2354_v1, %v2237_v16 }
 0x198   : > { %v2110_v9 = vpop.f32.mrf.mxu1  ;;  %v4412_v39 = vpop.f32.mrf.mxu0 }
 0x199   : > { %v2241_v5 = vadd.f32 %v2110_v9, %v5758_v24  ;;  %v5859_v41 = vadd.f32 %v4412_v39, %v2240_v17 }
 0x19a   : > { %v4372_v6 = vpop.f32.mrf.mxu1  ;;  %v2357_v44 = vpop.f32.mrf.mxu0 }
 0x19b   : > { %v2244_v54 = vadd.f32 %v4372_v6, %v5761_v52  ;;  %v5862_v15 = vadd.f32 %v2357_v44, %v2238_v53 }
 0x19c   : > { %v2113_v42 = vpop.f32.mrf.mxu1  ;;  %v4415_v63 = vpop.f32.mrf.mxu0 }
 0x19d   : > { %v2242_v35 = vadd.f32 %v2113_v42, %v5765_v45  ;;  %v5865_v40 = vadd.f32 %v4415_v63, %v2243_v28 }
 0x19e   : > { %v4375_v55 = vpop.f32.mrf.mxu1  ;;  %v2370_v25 = vpop.f32.mrf.mxu0 }
 0x19f   : > { %v2247_v46 = vadd.f32 %v4375_v55, %v5769_v13  ;;  %v5868_v48 = vadd.f32 %v2370_v25, %v2241_v5 }
 0x1a0   : > { %v2126_v24 = vpop.f32.mrf.mxu1  ;;  %v4416_v23 = vpop.f32.mrf.mxu0 }
 0x1a1   : > { %v2245_v20 = vadd.f32 %v2126_v24, %v5772_v22  ;;  %v5871_v21 = vadd.f32 %v4416_v23, %v2244_v54 }
 0x1a2   : > { %v4376_v52 = vpop.f32.mrf.mxu1  ;;  %v2373_v0 = vpop.f32.mrf.mxu0 }
 0x1a3   : > { %v2248_v10 = vadd.f32 %v4376_v52, %v5775_v11  ;;  %v5874_v16 = vadd.f32 %v2373_v0, %v2242_v35 }
 0x1a4   : > { %v2129_v45 = vpop.f32.mrf.mxu1  ;;  %v4419_v30 = vpop.f32.mrf.mxu0 }
 0x1a5   : > { %v2246_v62 = vadd.f32 %v2129_v45, %v5778_v50  ;;  %v5877_v17 = vadd.f32 %v4419_v30, %v2247_v46 }
 0x1a6   : > { %v4379_v13 = vpop.f32.mrf.mxu1  ;;  %v2386_v49 = vpop.f32.mrf.mxu0 }
 0x1a7   : > { %v2251_v34 = vadd.f32 %v4379_v13, %v5781_v18  ;;  %v5880_v53 = vadd.f32 %v2386_v49, %v2245_v20 }
 0x1a8   : > { %v2142_v22 = vpop.f32.mrf.mxu1  ;;  %v4420_v29 = vpop.f32.mrf.mxu0 }
 0x1a9   : > { %v2249_v1 = vadd.f32 %v2142_v22, %v5784_v4  ;;  %v5883_v28 = vadd.f32 %v4420_v29, %v2248_v10 }
 0x1aa   : > { %v4380_v11 = vpop.f32.mrf.mxu1  ;;  %v2389_v9 = vpop.f32.mrf.mxu0 }
 0x1ab   : > { %v2252_v39 = vadd.f32 %v4380_v11, %v5787_v27  ;;  %v5886_v5 = vadd.f32 %v2389_v9, %v2246_v62 }
 0x1ac   : > { %v2145_v50 = vpop.f32.mrf.mxu1  ;;  %v4423_v6 = vpop.f32.mrf.mxu0 }
 0x1ad   : > { %v2250_v44 = vadd.f32 %v2145_v50, %v5790_v59  ;;  %v5889_v54 = vadd.f32 %v4423_v6, %v2251_v34 }
 0x1ae   : > { %v4383_v18 = vpop.f32.mrf.mxu1  ;;  %v2402_v42 = vpop.f32.mrf.mxu0 }
 0x1af   : > { %v2255_v63 = vadd.f32 %v4383_v18, %v5793_v47  ;;  %v5892_v35 = vadd.f32 %v2402_v42, %v2249_v1 }
 0x1b0   : > { %v2158_v4 = vpop.f32.mrf.mxu1  ;;  %v4424_v55 = vpop.f32.mrf.mxu0 }
 0x1b1   : > { %v2253_v25 = vadd.f32 %v2158_v4, %v5796_v61  ;;  %v5895_v46 = vadd.f32 %v4424_v55, %v2252_v39 }
 0x1b2   : > { %v4384_v27 = vpop.f32.mrf.mxu1  ;;  %v2405_v24 = vpop.f32.mrf.mxu0 }
 0x1b3   : > { %v2256_v23 = vadd.f32 %v4384_v27, %v5799_v32  ;;  %v5898_v20 = vadd.f32 %v2405_v24, %v2250_v44 }
 0x1b4   : > { %v2161_v59 = vpop.f32.mrf.mxu1  ;;  %v4427_v52 = vpop.f32.mrf.mxu0 }
 0x1b5   : > { %v2254_v0 = vadd.f32 %v2161_v59, %v5802_v26  ;;  %v5901_v10 = vadd.f32 %v4427_v52, %v2255_v63 }
 0x1b6   : > { %v4387_v47 = vpop.f32.mrf.mxu1  ;;  %v2418_v45 = vpop.f32.mrf.mxu0 }
 0x1b7   : > { %v2259_v30 = vadd.f32 %v4387_v47, %v5805_v2  ;;  %v5904_v62 = vadd.f32 %v2418_v45, %v2253_v25 }
 0x1b8   : > { %v2174_v61 = vpop.f32.mrf.mxu1  ;;  %v4428_v13 = vpop.f32.mrf.mxu0 }
 0x1b9   : > { %v2257_v49 = vadd.f32 %v2174_v61, %v5808_v12  ;;  %v5907_v34 = vadd.f32 %v4428_v13, %v2256_v23 }
 0x1ba   : > { %v4388_v32 = vpop.f32.mrf.mxu1  ;;  %v2421_v22 = vpop.f32.mrf.mxu0 }
 0x1bb   : > { %v2260_v29 = vadd.f32 %v4388_v32, %v5811_v19  ;;  %v5910_v1 = vadd.f32 %v2421_v22, %v2254_v0 }
 0x1bc   : > { %v2177_v26 = vpop.f32.mrf.mxu1  ;;  %v4431_v11 = vpop.f32.mrf.mxu0 }
 0x1bd   : > { %v2258_v9 = vadd.f32 %v2177_v26, %v5814_v14  ;;  %v5913_v39 = vadd.f32 %v4431_v11, %v2259_v30 }
 0x1be   : > { %v4391_v2 = vpop.f32.mrf.mxu1  ;;  %v2434_v50 = vpop.f32.mrf.mxu0 }
 0x1bf   : > { %v2263_v6 = vadd.f32 %v4391_v2, %v5817_v57  ;;  %v5916_v44 = vadd.f32 %v2434_v50, %v2257_v49 }
 0x1c0   : > { %v2190_v12 = vpop.f32.mrf.mxu1  ;;  %v4432_v18 = vpop.f32.mrf.mxu0 }
 0x1c1   : > { %v2261_v42 = vadd.f32 %v2190_v12, %v5820_v31  ;;  %v5919_v63 = vadd.f32 %v4432_v18, %v2260_v29 }
 0x1c2   : > { %v4392_v19 = vpop.f32.mrf.mxu1  ;;  %v2437_v4 = vpop.f32.mrf.mxu0 }
 0x1c3   : > { %v2264_v55 = vadd.f32 %v4392_v19, %v5823_v7  ;;  %v5922_v25 = vadd.f32 %v2437_v4, %v2258_v9 }
 0x1c4   : > { %v2193_v14 = vpop.f32.mrf.mxu1  ;;  %v4435_v27 = vpop.f32.mrf.mxu0 }
 0x1c5   : > { %v2262_v24 = vadd.f32 %v2193_v14, %v5826_v60  ;;  %v5925_v23 = vadd.f32 %v4435_v27, %v2263_v6 }
 0x1c6   : > { %v4395_v57 = vpop.f32.mrf.mxu1  ;;  %v2450_v59 = vpop.f32.mrf.mxu0 }
 0x1c7   : > { %v2267_v52 = vadd.f32 %v4395_v57, %v5829_v43  ;;  %v5928_v0 = vadd.f32 %v2450_v59, %v2261_v42 }
 0x1c8   : > { %v2206_v31 = vpop.f32.mrf.mxu1  ;;  %v4436_v47 = vpop.f32.mrf.mxu0 }
 0x1c9   : > { %v2265_v45 = vadd.f32 %v2206_v31, %v5832_v36  ;;  %v5931_v30 = vadd.f32 %v4436_v47, %v2264_v55 }
 0x1ca   : > { %v4396_v7 = vpop.f32.mrf.mxu1  ;;  %v2453_v61 = vpop.f32.mrf.mxu0 }
 0x1cb   : > { %v2268_v13 = vadd.f32 %v4396_v7, %v5835_v37  ;;  %v5934_v49 = vadd.f32 %v2453_v61, %v2262_v24 }
 0x1cc   : > { %v2209_v60 = vpop.f32.mrf.mxu1  ;;  %v4439_v32 = vpop.f32.mrf.mxu0 }
 0x1cd   : > { %v2266_v22 = vadd.f32 %v2209_v60, %v5838_v3  ;;  %v5937_v29 = vadd.f32 %v4439_v32, %v2267_v52 }
 0x1ce   : > { %v4399_v43 = vpop.f32.mrf.mxu1  ;;  %v2466_v26 = vpop.f32.mrf.mxu0 }
 0x1cf   : > { %v2271_v11 = vadd.f32 %v4399_v43, %v5841_v38  ;;  %v5940_v9 = vadd.f32 %v2466_v26, %v2265_v45 }
 0x1d0   : > { %v2222_v36 = vpop.f32.mrf.mxu1  ;;  %v4440_v2 = vpop.f32.mrf.mxu0 }
 0x1d1   : > { %v2269_v50 = vadd.f32 %v2222_v36, %v5844_v51  ;;  %v5943_v6 = vadd.f32 %v4440_v2, %v2268_v13 }
 0x1d2   : > { %v4400_v37 = vpop.f32.mrf.mxu1  ;;  %v2469_v12 = vpop.f32.mrf.mxu0 }
 0x1d3   : > { %v2272_v18 = vadd.f32 %v4400_v37, %v5847_v58  ;;  %v5946_v42 = vadd.f32 %v2469_v12, %v2266_v22 }
 0x1d4   : > { %v2225_v3 = vpop.f32.mrf.mxu1  ;;  %v4443_v19 = vpop.f32.mrf.mxu0 }
 0x1d5   : > { %v2270_v4 = vadd.f32 %v2225_v3, %v5850_v8  ;;  %v5949_v55 = vadd.f32 %v4443_v19, %v2271_v11  ;;  %v5961_v8 = vld [vmem:[%s6117_s2] ss:$0 sm:$0xff] }
 0x1d6   : > { %v4455_v38 = vpop.f32.mrf.mxu1  ;;  %v2482_v14 = vpop.f32.mrf.mxu0 }
 0x1d7   : > { %v5951_v27 = vadd.f32 %v2482_v14, %v2269_v50  ;;  %v2885_v58 = vadd.f32 %v4455_v38, %v5853_v56 }
 0x1d8   : > { %v2740_v51 = vpop.f32.mrf.mxu1  ;;  %v4444_v24 = vpop.f32.mrf.mxu0 }
 0x1d9   : > { %v5953_v57 = vadd.f32 %v4444_v24, %v2272_v18  ;;  %v2883_v7 = vadd.f32 %v2740_v51, %v5856_v33 }
 0x1da   : > { %v4456_v59 = vpop.f32.mrf.mxu1  ;;  %v2485_v52 = vpop.f32.mrf.mxu0 }
 0x1db   : > { %v5956_v31 = vadd.f32 %v2485_v52, %v2270_v4  ;;  %v2886_v32 = vadd.f32 %v4456_v59, %v5859_v41 }
 0x1dc   : > { %v2743_v47 = vpop.f32.mrf.mxu1  ;;  %v4499_v45 = vpop.f32.mrf.mxu0 }
 0x1dd   : > { %v3223_v61 = vadd.f32 %v4499_v45, %v2885_v58  ;;  %v2884_v50 = vadd.f32 %v2743_v47, %v5862_v15 }
 0x1de   : > { %v4459_v13 = vpop.f32.mrf.mxu1  ;;  %v3078_v60 = vpop.f32.mrf.mxu0 }
 0x1df   : > { %v3266_v22 = vadd.f32 %v5961_v8, %v3223_v61  ;;  %v3221_v56 = vadd.f32 %v3078_v60, %v2883_v7  ;;  %v2889_v37 = vadd.f32 %v4459_v13, %v5865_v40 }
 0x1e0   : > { %v2756_v43 = vpop.f32.mrf.mxu1  ;;  %v4500_v26 = vpop.f32.mrf.mxu0 }
 0x1e1   : > { %v3302_v11 = vmax.f32 %v3266_v22, 0.0  ;;  %v3264_v36 = vadd.f32 %v5961_v8, %v3221_v56  ;;  %v3224_v2 = vadd.f32 %v4500_v26, %v2886_v32  ;;  %v2887_v15 = vadd.f32 %v2756_v43, %v5868_v48 }
 0x1e2   : > { %v4460_v33 = vpop.f32.mrf.mxu1  ;;  %v3081_v41 = vpop.f32.mrf.mxu0 }
 0x1e3   : > { %v3905_v12 = vpack.c.bf16 %v3302_v11, %v3302_v11  ;;  %v3300_v18 = vmax.f32 %v3264_v36, 0.0  ;;  %v3267_v3 = vadd.f32 %v5961_v8, %v3224_v2  ;;  %v3222_v4 = vadd.f32 %v3081_v41, %v2884_v50 }
 0x1e4   : > { %v2759_v19 = vpop.f32.mrf.mxu1  ;;  %v4503_v38 = vpop.f32.mrf.mxu0  ;;  %v2890_v40 = vadd.f32 %v4460_v33, %v5871_v21 }
 0x1e5   : > { %3483 = vst.msk [vmem:[%s5972_s21 + $0x8] sm:$0xf] %vm3480_vm7, %v3905_v12  ;;  %v3903_v14 = vpack.c.bf16 %v3300_v18, %v3300_v18  ;;  %v3303_v51 = vmax.f32 %v3267_v3, 0.0  ;;  %v3227_v24 = vadd.f32 %v4503_v38, %v2889_v37  ;;  %v3265_v59 = vadd.f32 %v5961_v8, %v3222_v4 }
 0x1e6   : > { %v4463_v52 = vpop.f32.mrf.mxu1  ;;  %v3094_v58 = vpop.f32.mrf.mxu0  ;;  %v2888_v56 = vadd.f32 %v2759_v19, %v5874_v16 }
 0x1e7   : > { %3481 = vst.msk [vmem:[%s5972_s21] sm:$0xf] %vm3480_vm7, %v3903_v14  ;;  %v3906_v47 = vpack.c.bf16 %v3303_v51, %v3303_v51  ;;  %v3270_v45 = vadd.f32 %v5961_v8, %v3227_v24  ;;  %v3225_v7 = vadd.f32 %v3094_v58, %v2887_v15  ;;  %v3301_v61 = vmax.f32 %v3265_v59, 0.0 }
 0x1e8   : > { %v2772_v13 = vpop.f32.mrf.mxu1  ;;  %v4504_v60 = vpop.f32.mrf.mxu0  ;;  %v2893_v11 = vadd.f32 %v4463_v52, %v5877_v17 }
 0x1e9   : > { %3484 = vst.msk [vmem:[%s5972_s21 + $0xc] sm:$0xf] %vm3480_vm7, %v3906_v47  ;;  %v3306_v48 = vmax.f32 %v3270_v45, 0.0  ;;  %v3268_v32 = vadd.f32 %v5961_v8, %v3225_v7  ;;  %v3228_v22 = vadd.f32 %v4504_v60, %v2890_v40  ;;  %v3904_v43 = vpack.c.bf16 %v3301_v61, %v3301_v61 }
 0x1ea   : > { %v4464_v26 = vpop.f32.mrf.mxu1  ;;  %v3097_v21 = vpop.f32.mrf.mxu0  ;;  %v2891_v16 = vadd.f32 %v2772_v13, %v5880_v53 }
 0x1eb   : > { %v3909_v36 = vpack.c.bf16 %v3306_v48, %v3306_v48  ;;  %v3304_v2 = vmax.f32 %v3268_v32, 0.0  ;;  %v3271_v50 = vadd.f32 %v5961_v8, %v3228_v22  ;;  %3482 = vst.msk [vmem:[%s5972_s21 + $0x4] sm:$0xf] %vm3480_vm7, %v3904_v43  ;;  %v3226_v41 = vadd.f32 %v3097_v21, %v2888_v56 }
 0x1ec   : > { %v2775_v33 = vpop.f32.mrf.mxu1  ;;  %v4507_v37 = vpop.f32.mrf.mxu0  ;;  %v2894_v38 = vadd.f32 %v4464_v26, %v5883_v28 }
 0x1ed   : > { %3487 = vst.msk [vmem:[%s5972_s21 + $0x18] sm:$0xf] %vm3480_vm7, %v3909_v36  ;;  %v3907_v12 = vpack.c.bf16 %v3304_v2, %v3304_v2  ;;  %v3307_v18 = vmax.f32 %v3271_v50, 0.0  ;;  %v3231_v3 = vadd.f32 %v4507_v37, %v2893_v11  ;;  %v3269_v17 = vadd.f32 %v5961_v8, %v3226_v41 }
 0x1ee   : > { %v4467_v19 = vpop.f32.mrf.mxu1  ;;  %v3110_v4 = vpop.f32.mrf.mxu0  ;;  %v2892_v47 = vadd.f32 %v2775_v33, %v5886_v5 }
 0x1ef   : > { %3485 = vst.msk [vmem:[%s5972_s21 + $0x10] sm:$0xf] %vm3480_vm7, %v3907_v12  ;;  %v3910_v15 = vpack.c.bf16 %v3307_v18, %v3307_v18  ;;  %v3274_v14 = vadd.f32 %v5961_v8, %v3231_v3  ;;  %v3229_v51 = vadd.f32 %v3110_v4, %v2891_v16  ;;  %v3305_v24 = vmax.f32 %v3269_v17, 0.0 }
 0x1f0   : > { %v2788_v59 = vpop.f32.mrf.mxu1  ;;  %v4508_v52 = vpop.f32.mrf.mxu0  ;;  %v2897_v61 = vadd.f32 %v4467_v19, %v5889_v54 }
 0x1f1   : > { %3488 = vst.msk [vmem:[%s5972_s21 + $0x1c] sm:$0xf] %vm3480_vm7, %v3910_v15  ;;  %v3310_v53 = vmax.f32 %v3274_v14, 0.0  ;;  %v3272_v58 = vadd.f32 %v5961_v8, %v3229_v51  ;;  %v3232_v40 = vadd.f32 %v4508_v52, %v2894_v38  ;;  %v3908_v45 = vpack.c.bf16 %v3305_v24, %v3305_v24 }
 0x1f2   : > { %v4468_v7 = vpop.f32.mrf.mxu1  ;;  %v3113_v28 = vpop.f32.mrf.mxu0  ;;  %v2895_v5 = vadd.f32 %v2788_v59, %v5892_v35 }
 0x1f3   : > { %v3913_v13 = vpack.c.bf16 %v3310_v53, %v3310_v53  ;;  %v3308_v60 = vmax.f32 %v3272_v58, 0.0  ;;  %v3275_v48 = vadd.f32 %v5961_v8, %v3232_v40  ;;  %3486 = vst.msk [vmem:[%s5972_s21 + $0x14] sm:$0xf] %vm3480_vm7, %v3908_v45  ;;  %v3230_v22 = vadd.f32 %v3113_v28, %v2892_v47 }
 0x1f4   : > { %v2791_v32 = vpop.f32.mrf.mxu1  ;;  %v4511_v56 = vpop.f32.mrf.mxu0  ;;  %v2898_v2 = vadd.f32 %v4468_v7, %v5895_v46 }
 0x1f5   : > { %3491 = vst.msk [vmem:[%s5972_s21 + $0x28] sm:$0xf] %vm3480_vm7, %v3913_v13  ;;  %v3911_v43 = vpack.c.bf16 %v3308_v60, %v3308_v60  ;;  %v3311_v26 = vmax.f32 %v3275_v48, 0.0  ;;  %v3235_v21 = vadd.f32 %v4511_v56, %v2897_v61  ;;  %v3273_v54 = vadd.f32 %v5961_v8, %v3230_v22 }
 0x1f6   : > { %v4471_v11 = vpop.f32.mrf.mxu1  ;;  %v3126_v36 = vpop.f32.mrf.mxu0  ;;  %v2896_v17 = vadd.f32 %v2791_v32, %v5898_v20 }
 0x1f7   : > { %3489 = vst.msk [vmem:[%s5972_s21 + $0x20] sm:$0xf] %vm3480_vm7, %v3911_v43  ;;  %v3914_v50 = vpack.c.bf16 %v3311_v26, %v3311_v26  ;;  %v3278_v33 = vadd.f32 %v5961_v8, %v3235_v21  ;;  %v3233_v41 = vadd.f32 %v3126_v36, %v2895_v5  ;;  %v3309_v37 = vmax.f32 %v3273_v54, 0.0 }
 0x1f8   : > { %v2804_v16 = vpop.f32.mrf.mxu1  ;;  %v4512_v12 = vpop.f32.mrf.mxu0  ;;  %v2901_v38 = vadd.f32 %v4471_v11, %v5901_v10 }
 0x1f9   : > { %3492 = vst.msk [vmem:[%s5972_s21 + $0x2c] sm:$0xf] %vm3480_vm7, %v3914_v50  ;;  %v3314_v35 = vmax.f32 %v3278_v33, 0.0  ;;  %v3276_v18 = vadd.f32 %v5961_v8, %v3233_v41  ;;  %v3236_v3 = vadd.f32 %v4512_v12, %v2898_v2  ;;  %v3912_v19 = vpack.c.bf16 %v3309_v37, %v3309_v37 }
 0x1fa   : > { %v4472_v4 = vpop.f32.mrf.mxu1  ;;  %v3129_v46 = vpop.f32.mrf.mxu0  ;;  %v2899_v20 = vadd.f32 %v2804_v16, %v5904_v62 }
 0x1fb   : > { %v3917_v15 = vpack.c.bf16 %v3314_v35, %v3314_v35  ;;  %v3312_v14 = vmax.f32 %v3276_v18, 0.0  ;;  %v3279_v51 = vadd.f32 %v5961_v8, %v3236_v3  ;;  %3490 = vst.msk [vmem:[%s5972_s21 + $0x24] sm:$0xf] %vm3480_vm7, %v3912_v19  ;;  %v3234_v59 = vadd.f32 %v3129_v46, %v2896_v17 }
 0x1fc   : > { %v2807_v24 = vpop.f32.mrf.mxu1  ;;  %v4515_v52 = vpop.f32.mrf.mxu0  ;;  %v2902_v7 = vadd.f32 %v4472_v4, %v5907_v34 }
 0x1fd   : > { %3495 = vst.msk [vmem:[%s5972_s21 + $0x38] sm:$0xf] %vm3480_vm7, %v3917_v15  ;;  %v3915_v53 = vpack.c.bf16 %v3312_v14, %v3312_v14  ;;  %v3315_v58 = vmax.f32 %v3279_v51, 0.0  ;;  %v3239_v40 = vadd.f32 %v4515_v52, %v2901_v38  ;;  %v3277_v10 = vadd.f32 %v5961_v8, %v3234_v59 }
 0x1fe   : > { %v4475_v47 = vpop.f32.mrf.mxu1  ;;  %v3142_v45 = vpop.f32.mrf.mxu0  ;;  %v2900_v5 = vadd.f32 %v2807_v24, %v5910_v1 }
 0x1ff   : > { %3493 = vst.msk [vmem:[%s5972_s21 + $0x30] sm:$0xf] %vm3480_vm7, %v3915_v53  ;;  %v3918_v28 = vpack.c.bf16 %v3315_v58, %v3315_v58  ;;  %v3282_v61 = vadd.f32 %v5961_v8, %v3239_v40  ;;  %v3237_v13 = vadd.f32 %v3142_v45, %v2899_v20  ;;  %v3313_v60 = vmax.f32 %v3277_v10, 0.0 }
 0x200   : > { %v2820_v48 = vpop.f32.mrf.mxu1  ;;  %v4516_v32 = vpop.f32.mrf.mxu0  ;;  %v2905_v21 = vadd.f32 %v4475_v47, %v5913_v39 }
 0x201   : > { %3496 = vst.msk [vmem:[%s5972_s21 + $0x3c] sm:$0xf] %vm3480_vm7, %v3918_v28  ;;  %v3318_v62 = vmax.f32 %v3282_v61, 0.0  ;;  %v3280_v22 = vadd.f32 %v5961_v8, %v3237_v13  ;;  %v3240_v56 = vadd.f32 %v4516_v32, %v2902_v7  ;;  %v3916_v43 = vpack.c.bf16 %v3313_v60, %v3313_v60 }
 0x202   : > { %v4476_v26 = vpop.f32.mrf.mxu1  ;;  %v3145_v34 = vpop.f32.mrf.mxu0  ;;  %v2903_v1 = vadd.f32 %v2820_v48, %v5916_v44 }
 0x203   : > { %v3921_v54 = vpack.c.bf16 %v3318_v62, %v3318_v62  ;;  %v3316_v11 = vmax.f32 %v3280_v22, 0.0  ;;  %v3283_v36 = vadd.f32 %v5961_v8, %v3240_v56  ;;  %3494 = vst.msk [vmem:[%s5972_s21 + $0x34] sm:$0xf] %vm3480_vm7, %v3916_v43  ;;  %v3238_v50 = vadd.f32 %v3145_v34, %v2900_v5 }
 0x204   : > { %v2823_v2 = vpop.f32.mrf.mxu1  ;;  %v4519_v33 = vpop.f32.mrf.mxu0  ;;  %v2906_v18 = vadd.f32 %v4476_v26, %v5919_v63 }
 0x205   : > { %3499 = vst.msk [vmem:[%s5972_s21 + $0x48] sm:$0xf] %vm3480_vm7, %v3921_v54  ;;  %v3919_v41 = vpack.c.bf16 %v3316_v11, %v3316_v11  ;;  %v3319_v37 = vmax.f32 %v3283_v36, 0.0  ;;  %v3243_v16 = vadd.f32 %v4519_v33, %v2905_v21  ;;  %v3281_v39 = vadd.f32 %v5961_v8, %v3238_v50 }
 0x206   : > { %v4479_v12 = vpop.f32.mrf.mxu1  ;;  %v3158_v35 = vpop.f32.mrf.mxu0  ;;  %v2904_v51 = vadd.f32 %v2823_v2, %v5922_v25 }
 0x207   : > { %3497 = vst.msk [vmem:[%s5972_s21 + $0x40] sm:$0xf] %vm3480_vm7, %v3919_v41  ;;  %v3922_v3 = vpack.c.bf16 %v3319_v37, %v3319_v37  ;;  %v3286_v17 = vadd.f32 %v5961_v8, %v3243_v16  ;;  %v3241_v19 = vadd.f32 %v3158_v35, %v2903_v1  ;;  %v3317_v4 = vmax.f32 %v3281_v39, 0.0 }
 0x208   : > { %v2836_v46 = vpop.f32.mrf.mxu1  ;;  %v4520_v38 = vpop.f32.mrf.mxu0  ;;  %v2909_v52 = vadd.f32 %v4479_v12, %v5925_v23 }
 0x209   : > { %3500 = vst.msk [vmem:[%s5972_s21 + $0x4c] sm:$0xf] %vm3480_vm7, %v3922_v3  ;;  %v3322_v44 = vmax.f32 %v3286_v17, 0.0  ;;  %v3284_v15 = vadd.f32 %v5961_v8, %v3241_v19  ;;  %v3244_v14 = vadd.f32 %v4520_v38, %v2906_v18  ;;  %v3920_v24 = vpack.c.bf16 %v3317_v4, %v3317_v4 }
 0x20a   : > { %v4480_v59 = vpop.f32.mrf.mxu1  ;;  %v3161_v63 = vpop.f32.mrf.mxu0  ;;  %v2907_v25 = vadd.f32 %v2836_v46, %v5928_v0 }
 0x20b   : > { %v3925_v20 = vpack.c.bf16 %v3322_v44, %v3322_v44  ;;  %v3320_v53 = vmax.f32 %v3284_v15, 0.0  ;;  %v3287_v58 = vadd.f32 %v5961_v8, %v3244_v14  ;;  %3498 = vst.msk [vmem:[%s5972_s21 + $0x44] sm:$0xf] %vm3480_vm7, %v3920_v24  ;;  %v3242_v10 = vadd.f32 %v3161_v63, %v2904_v51 }
 0x20c   : > { %v2839_v40 = vpop.f32.mrf.mxu1  ;;  %v4523_v47 = vpop.f32.mrf.mxu0  ;;  %v2910_v60 = vadd.f32 %v4480_v59, %v5931_v30 }
 0x20d   : > { %3503 = vst.msk [vmem:[%s5972_s21 + $0x58] sm:$0xf] %vm3480_vm7, %v3925_v20  ;;  %v3923_v45 = vpack.c.bf16 %v3320_v53, %v3320_v53  ;;  %v3323_v7 = vmax.f32 %v3287_v58, 0.0  ;;  %v3247_v28 = vadd.f32 %v4523_v47, %v2909_v52  ;;  %v3285_v23 = vadd.f32 %v5961_v8, %v3242_v10 }
 0x20e   : > { %v4483_v61 = vpop.f32.mrf.mxu1  ;;  %v3174_v13 = vpop.f32.mrf.mxu0  ;;  %v2908_v34 = vadd.f32 %v2839_v40, %v5934_v49 }
 0x20f   : > { %3501 = vst.msk [vmem:[%s5972_s21 + $0x50] sm:$0xf] %vm3480_vm7, %v3923_v45  ;;  %v3926_v48 = vpack.c.bf16 %v3323_v7, %v3323_v7  ;;  %v3290_v32 = vadd.f32 %v5961_v8, %v3247_v28  ;;  %v3245_v62 = vadd.f32 %v3174_v13, %v2907_v25  ;;  %v3321_v22 = vmax.f32 %v3285_v23, 0.0 }
 0x210   : > { %v2852_v56 = vpop.f32.mrf.mxu1  ;;  %v4524_v5 = vpop.f32.mrf.mxu0  ;;  %v2913_v11 = vadd.f32 %v4483_v61, %v5937_v29 }
 0x211   : > { %3504 = vst.msk [vmem:[%s5972_s21 + $0x5c] sm:$0xf] %vm3480_vm7, %v3926_v48  ;;  %v3326_v0 = vmax.f32 %v3290_v32, 0.0  ;;  %v3288_v43 = vadd.f32 %v5961_v8, %v3245_v62  ;;  %v3248_v26 = vadd.f32 %v4524_v5, %v2910_v60  ;;  %v3924_v21 = vpack.c.bf16 %v3321_v22, %v3321_v22 }
 0x212   : > { %v4484_v54 = vpop.f32.mrf.mxu1  ;;  %v3177_v30 = vpop.f32.mrf.mxu0  ;;  %v2911_v49 = vadd.f32 %v2852_v56, %v5940_v9 }
 0x213   : > { %v3929_v36 = vpack.c.bf16 %v3326_v0, %v3326_v0  ;;  %v3324_v2 = vmax.f32 %v3288_v43, 0.0  ;;  %v3291_v50 = vadd.f32 %v5961_v8, %v3248_v26  ;;  %3502 = vst.msk [vmem:[%s5972_s21 + $0x54] sm:$0xf] %vm3480_vm7, %v3924_v21  ;;  %v3246_v1 = vadd.f32 %v3177_v30, %v2908_v34 }
 0x214   : > { %v2855_v33 = vpop.f32.mrf.mxu1  ;;  %v4527_v41 = vpop.f32.mrf.mxu0  ;;  %v2914_v18 = vadd.f32 %v4484_v54, %v5943_v6 }
 0x215   : > { %3507 = vst.msk [vmem:[%s5972_s21 + $0x68] sm:$0xf] %vm3480_vm7, %v3929_v36  ;;  %v3927_v37 = vpack.c.bf16 %v3324_v2, %v3324_v2  ;;  %v3327_v16 = vmax.f32 %v3291_v50, 0.0  ;;  %v3251_v39 = vadd.f32 %v4527_v41, %v2913_v11  ;;  %v3289_v29 = vadd.f32 %v5961_v8, %v3246_v1 }
 0x216   : > { %v4487_v12 = vpop.f32.mrf.mxu1  ;;  %v3190_v35 = vpop.f32.mrf.mxu0  ;;  %v2912_v14 = vadd.f32 %v2855_v33, %v5946_v42 }
 0x217   : > { %3505 = vst.msk [vmem:[%s5972_s21 + $0x60] sm:$0xf] %vm3480_vm7, %v3927_v37  ;;  %v3930_v3 = vpack.c.bf16 %v3327_v16, %v3327_v16  ;;  %v3294_v17 = vadd.f32 %v5961_v8, %v3251_v39  ;;  %v3249_v19 = vadd.f32 %v3190_v35, %v2911_v49  ;;  %v3325_v4 = vmax.f32 %v3289_v29, 0.0 }
 0x218   : > { %v2868_v46 = vpop.f32.mrf.mxu1  ;;  %v4528_v38 = vpop.f32.mrf.mxu0  ;;  %v2917_v59 = vadd.f32 %v4487_v12, %v5949_v55 }
 0x219   : > { %3508 = vst.msk [vmem:[%s5972_s21 + $0x6c] sm:$0xf] %vm3480_vm7, %v3930_v3  ;;  %v3330_v9 = vmax.f32 %v3294_v17, 0.0  ;;  %v3292_v44 = vadd.f32 %v5961_v8, %v3249_v19  ;;  %v3252_v15 = vadd.f32 %v4528_v38, %v2914_v18  ;;  %v3928_v51 = vpack.c.bf16 %v3325_v4, %v3325_v4 }
 0x21a   : > { %v4488_v24 = vpop.f32.mrf.mxu1  ;;  %v3193_v6 = vpop.f32.mrf.mxu0  ;;  %v2915_v40 = vadd.f32 %v2868_v46, %v5951_v27 }
 0x21b   : > { %v3933_v63 = vpack.c.bf16 %v3330_v9, %v3330_v9  ;;  %v3328_v52 = vmax.f32 %v3292_v44, 0.0  ;;  %v3295_v20 = vadd.f32 %v5961_v8, %v3252_v15  ;;  %3506 = vst.msk [vmem:[%s5972_s21 + $0x64] sm:$0xf] %vm3480_vm7, %v3928_v51  ;;  %v3250_v53 = vadd.f32 %v3193_v6, %v2912_v14 }
 0x21c   : > { %v4531_v58 = vpop.f32.mrf.mxu0  ;;  %v2871_v25 = vpop.f32.mrf.mxu1  ;;  %v2918_v7 = vadd.f32 %v4488_v24, %v5953_v57 }
 0x21d   : > { %3511 = vst.msk [vmem:[%s5972_s21 + $0x78] sm:$0xf] %vm3480_vm7, %v3933_v63  ;;  %v3931_v42 = vpack.c.bf16 %v3328_v52, %v3328_v52  ;;  %v3331_v10 = vmax.f32 %v3295_v20, 0.0  ;;  %v3255_v47 = vadd.f32 %v4531_v58, %v2917_v59  ;;  %v3293_v45 = vadd.f32 %v5961_v8, %v3250_v53 }
 0x21e   : > { %v3206_v55 = vpop.f32.mrf.mxu0  ;;  %v2916_v27 = vadd.f32 %v2871_v25, %v5956_v31 }
 0x21f   : > { %3509 = vst.msk [vmem:[%s5972_s21 + $0x70] sm:$0xf] %vm3480_vm7, %v3931_v42  ;;  %v3934_v28 = vpack.c.bf16 %v3331_v10, %v3331_v10  ;;  %v3298_v23 = vadd.f32 %v5961_v8, %v3255_v47  ;;  %v3253_v61 = vadd.f32 %v3206_v55, %v2915_v40  ;;  %v3329_v13 = vmax.f32 %v3293_v45, 0.0 }
 0x220   : > { %v4532_v60 = vpop.f32.mrf.mxu0 }
 0x221   : > { %3512 = vst.msk [vmem:[%s5972_s21 + $0x7c] sm:$0xf] %vm3480_vm7, %v3934_v28  ;;  %v3334_v48 = vmax.f32 %v3298_v23, 0.0  ;;  %v3296_v32 = vadd.f32 %v5961_v8, %v3253_v61  ;;  %v3256_v62 = vadd.f32 %v4532_v60, %v2918_v7  ;;  %v3932_v22 = vpack.c.bf16 %v3329_v13, %v3329_v13 }
 0x222   : > { %v3209_v57 = vpop.f32.mrf.mxu0 }
 0x223   : > { %v3937_v56 = vpack.c.bf16 %v3334_v48, %v3334_v48  ;;  %v3332_v5 = vmax.f32 %v3296_v32, 0.0  ;;  %v3299_v0 = vadd.f32 %v5961_v8, %v3256_v62  ;;  %v3254_v43 = vadd.f32 %v3209_v57, %v2916_v27  ;;  %3510 = vst.msk [vmem:[%s5972_s21 + $0x74] sm:$0xf] %vm3480_vm7, %v3932_v22 }
 0x225   : > { %3515 = vst.msk [vmem:[%s5972_s21 + $0x88] sm:$0xf] %vm3480_vm7, %v3937_v56  ;;  %v3935_v26 = vpack.c.bf16 %v3332_v5, %v3332_v5  ;;  %v3335_v34 = vmax.f32 %v3299_v0, 0.0  ;;  %v3297_v31 = vadd.f32 %v5961_v8, %v3254_v43 }
 0x227   : > { %3513 = vst.msk [vmem:[%s5972_s21 + $0x80] sm:$0xf] %vm3480_vm7, %v3935_v26  ;;  %v3938_v21 = vpack.c.bf16 %v3335_v34, %v3335_v34  ;;  %v3333_v54 = vmax.f32 %v3297_v31, 0.0 }
 0x229   : > { %3516 = vst.msk [vmem:[%s5972_s21 + $0x8c] sm:$0xf] %vm3480_vm7, %v3938_v21  ;;  %v3936_v30 = vpack.c.bf16 %v3333_v54, %v3333_v54 }
 0x22b   : > { %3514 = vst.msk [vmem:[%s5972_s21 + $0x84] sm:$0xf] %vm3480_vm7, %v3936_v30 }
 0x22c PF: > { %s13_s12 = sadd.s32 1, %s4632_s12  }
 0x22d   : > { %p10_p4 = scmp.ge.s32.totalorder %s13_s12, 10  }
 0x22f   :  { %12 = sbr.rel (!%p10_p4) target bundleno = 1 (0x1), region = 70 }

// kernel: vgg_loss.12
= control target key start
LH: loop header
LB: loop body
LE: loop exit
PB: predicated region body
PF: predicated region fallthrough
CT: control target
= control target key end

     0   :  { %s2354_s12 = smov 0   ;;  %s3038_s0 = inlined_call_operand.vmem [shape: bf16[8,110,64], index: 0, kind: input, shape index: {}]   ;;  %s3039_s1 = inlined_call_operand.vmem [shape: bf16[9,64,128], index: 1, kind: input, shape index: {}]   ;;  %s3040_s2 = inlined_call_operand.vmem [shape: f32[1,128], index: 2, kind: input, shape index: {}]   ;;  %s3041_s3 = inlined_call_operand.vmem [shape: bf16[8,80,128], index: 3, kind: output, shape index: {}]  }
   0x1 LB: > { %s1703_s13 = sadd.s32 4294967295, %s2330_s12   ;;  %p1707_p0 = scmp.ge.s32.totalorder %s2330_s12, 1  ;;  %s2330_s12 = sphi %s2354_s12, %s13_s12  }
   0x2   : > { %p137_p1 = scmp.lt.s32.totalorder %s2330_s12, 9 }
   0x4   : > { %p138_p2 = pnand %p1707_p0, %p137_p1 }
   0x5   : > { %p161_p3 = scmp.lt.s32.totalorder (!%p138_p2), %s1703_s13, 7 }
   0x6   : > { %141 = sbr.rel (%p138_p2) target bundleno = 412 (0x19c), region = 32 }
   0xb   : > { %v2274_v0 = vld [vmem:[%s3039_s1 + $0x38] sm:$0xff]   ;;  %v2332_v1 = vmov 0.0   ;;  %v2275_v2 = vld [vmem:[%s3039_s1 + $0x30] sm:$0xff]   ;;  %vm2333_vm0 = vmmov 0   ;;  %s3043_s13 = smov (!%p161_p3, %s1703_s13), 7  ;;  %v2276_v3 = vld [vmem:[%s3039_s1 + $0x28] sm:$0xff]  }
   0xc   : > { %2254 = vmatprep.subr.bf16.mxu1 %v2332_v1  ;;  %2002 = vmatprep.subr.bf16.mxu0 %v2332_v1  ;;  %s2262_s20 = smul.u32 56, %s3043_s13  ;;  %v2277_v4 = vld [vmem:[%s3039_s1 + $0x20] sm:$0xff]   ;;  %vm290_vm1 = vcmask 523264   ;;  %vm221_vm2 = vsmask.f32 7424  ;;  %v2280_v31 = vld [vmem:[%s3039_s1 + $0x18] sm:$0xff]  }
   0xd   : > { %2258 = vmatpush3.bf16.msra.mxu1 %v2274_v0  ;;  %2003 = vmatpush3.bf16.msra.mxu0 %v2274_v0  ;;  %v2284_v36 = vld [vmem:[%s3039_s1 + $0x58] sm:$0xff]   ;;  %v2285_v42 = vld [vmem:[%s3039_s1 + $0x10] sm:$0xff]   ;;  %v2288_v48 = vld [vmem:[%s3039_s1 + $0x8] sm:$0xff]   ;;  %vm501_vm3 = vcmask 1046528   ;;  %vm798_vm4 = vsmask.f32 6400 }
   0xe   : > { %2255 = vmatprep.subr.bf16.mxu1 %v2332_v1  ;;  %2004 = vmatprep.subr.bf16.mxu0 %v2332_v1  ;;  %s2390_s25 = scalar_lea.vmem %s3038_s0, %s2262_s20  ;;  %v2287_v45 = vld [vmem:[%s3039_s1 + $0x50] sm:$0xff]   ;;  %v2289_v51 = vld [vmem:[%s3039_s1 + $0x48] sm:$0xff]   ;;  %v2294_v62 = vld [vmem:[%s3039_s1 + $0x40] sm:$0xff]   ;;  %vm983_vm5 = vcmask 1045504   ;;  %vm1437_vm6 = vcmask 1044480   ;;  %s2263_s17 = smul.u32 40, %s3043_s13 }
   0xf   : > { %2018 = vmatprep.mubr.msk.bf16.mxu1 %vm2333_vm0, %v2332_v1  ;;  %2010 = vmatprep.mubr.msk.bf16.mxu0 %vm2333_vm0, %v2332_v1  ;;  %v2393_v5 = vld [vmem:[%s2390_s25 + $0x10] sm:$0xf]  ;;  %v2396_v6 = vld [vmem:[%s2390_s25 + $0x14] sm:$0xf]  ;;  %v2399_v7 = vld [vmem:[%s2390_s25 + $0x18] sm:$0xf] }
  0x10   : > { %v2402_v8 = vld [vmem:[%s2390_s25 + $0x1c] sm:$0xf]  ;;  %v2406_v9 = vcombine.low %v2393_v5, %v2396_v6  ;;  %v172_v10 = vld [vmem:[%s2390_s25] sm:$0xf]  ;;  %v2410_v11 = vld [vmem:[%s2390_s25 + $0x4] sm:$0xf]  ;;  %v2504_v58 = vcombine.low %v2396_v6, %v2399_v7  ;;  %s3005_s20 = scalar_lea.vmem %s3041_s3, %s2263_s17 }
  0x11   : > { %2259 = vmatpush3.bf16.msra.mxu1 %v2275_v2  ;;  %2005 = vmatpush3.bf16.msra.mxu0 %v2275_v2  ;;  %v2415_v12 = vcombine.low %v2399_v7, %v2402_v8  ;;  %v2419_v13 = vld [vmem:[%s2390_s25 + $0x8] sm:$0xf]  ;;  %v2422_v14 = vld [vmem:[%s2390_s25 + $0xc] sm:$0xf]  ;;  %v2425_v15 = vcombine.low %v172_v10, %v2410_v11  ;;  %v2428_v16 = vld [vmem:[%s2390_s25 + $0x20] sm:$0xf] }
  0x12   : > { %2256 = vmatprep.subr.bf16.mxu1 %v2332_v1  ;;  %2006 = vmatprep.subr.bf16.mxu0 %v2332_v1  ;;  %v238_v17 = vshll.u32 %v2406_v9, 16  ;;  %v242_v18 = vshrl.u32 %v2406_v9, 16  ;;  %v2434_v19 = vcombine.low %v2419_v13, %v2422_v14  ;;  %v2437_v20 = vld [vmem:[%s2390_s25 + $0x24] sm:$0xf]  ;;  %v182_v29 = vld [vmem:[%s2390_s25 + $0x28] sm:$0xf]  ;;  %v2511_v61 = vcombine.low %v2402_v8, %v2428_v16 }
  0x13   : > { %v246_v21 = vshll.u32 %v2415_v12, 16  ;;  %v223_v22 = vshrl.u32 %v2425_v15, 16  ;;  %v225_v23 = vshll.u32 %v2425_v15, 16  ;;  %v2444_v24 = vcombine.low %v2428_v16, %v2437_v20  ;;  %v183_v41 = vld [vmem:[%s2390_s25 + $0x2c] sm:$0xf]  ;;  %v2295_v63 = vld [vmem:[%s3039_s1] sm:$0xff]  }
  0x14   : > { %v240_v25 = vrot.slane %v238_v17, 1  ;;  %v230_v26 = vshll.u32 %v2434_v19, 16  ;;  %v250_v33 = vshrl.u32 %v2415_v12, 16  ;;  %v234_v37 = vshrl.u32 %v2434_v19, 16  ;;  %v2297_v16 = vld [vmem:[%s3039_s1 + $0x98] sm:$0xff]  }
  0x15   : > { %2260 = vmatpush3.bf16.msra.mxu1 %v2276_v3  ;;  %2007 = vmatpush3.bf16.msra.mxu0 %v2276_v3  ;;  %v248_v27 = vrot.slane %v246_v21, 1  ;;  %v227_v28 = vrot.slane %v225_v23, 1  ;;  %v254_v34 = vshll.u32 %v2444_v24, 16  ;;  %v2462_v39 = vcombine.low %v182_v29, %v182_v29 }
  0x16   : > { %2257 = vmatprep.subr.bf16.mxu1 %v2332_v1  ;;  %2008 = vmatprep.subr.bf16.mxu0 %v2332_v1  ;;  %v244_v30 = vor.u32 %v242_v18, %v240_v25  ;;  %v232_v32 = vrot.slane %v230_v26, 1  ;;  %v2479_v47 = vcombine.low %v182_v29, %v183_v41  ;;  %v258_v49 = vshrl.u32 %v2444_v24, 16 }
  0x17   : > { %v228_v35 = vor.u32 %v227_v28, %v223_v22  ;;  %v252_v43 = vor.u32 %v250_v33, %v248_v27  ;;  %v256_v44 = vrot.slane %v254_v34, 1  ;;  %v262_v50 = vshll.u32 %v2462_v39, 16 }
  0x18   : > { %v249_v38 = vsel %vm221_vm2, %v244_v30, %v248_v27  ;;  %v236_v46 = vor.u32 %v234_v37, %v232_v32  ;;  %v2494_v52 = vrot.slane %v230_v26, 3  ;;  %v2497_v54 = vrot.slane %v234_v37, 2 }
  0x19   : > { %2261 = vmatpush3.bf16.msra.mxu1 %v2277_v4  ;;  %2009 = vmatpush3.bf16.msra.mxu0 %v2277_v4  ;;  %v233_v40 = vsel %vm221_vm2, %v228_v35, %v232_v32  ;;  %v257_v53 = vsel %vm221_vm2, %v252_v43, %v256_v44  ;;  %v1276_v55 = vrot.slane %v242_v18, 2  ;;  %v1277_v56 = vrot.slane %v238_v17, 3 }
  0x1a   : > { %2030 = vmatprep.subr.bf16.mxu1 %v2332_v1  ;;  %2058 = vmatprep.subr.bf16.mxu0 %v2332_v1  ;;  %v241_v57 = vsel %vm221_vm2, %v236_v46, %v240_v25  ;;  %v260_v59 = vor.u32 %v258_v49, %v256_v44  ;;  %v264_v60 = vrot.slane %v262_v50, 1  ;;  %v1275_v0 = vor.u32 %v2494_v52, %v2497_v54 }
  0x1b   : > { %v502_v2 = vrot.slane %v2425_v15, 1  ;;  %v503_v3 = vrot.slane %v2434_v19, 1  ;;  %v2526_v4 = vor.u32 %v1277_v56, %v1276_v55  ;;  %v2529_v6 = vcombine.low %v2437_v20, %v182_v29 }
  0x1c   : > { %2019 = vmatmul.mubr.msk.bf16.vlgmr.msra.gmra.mxu1 %vm290_vm1, %v249_v38  ;;  %2011 = vmatmul.mubr.msk.bf16.vlgmr.msra.gmra.mxu0 %vm290_vm1, %v233_v40  ;;  %v817_v7 = vshrl.u32 %v2504_v58, 16  ;;  %v820_v8 = vshll.u32 %v2504_v58, 16  ;;  %v265_v10 = vsel %vm221_vm2, %v260_v59, %v264_v60  ;;  %v826_v17 = vshrl.u32 %v2511_v61, 16  ;;  %v2296_v59 = vld [vmem:[%s3039_s1 + $0x78] sm:$0xff]  }
  0x1d   : > { %2031 = vmatpush3.bf16.msra.mxu1 %v2280_v31  ;;  %2059 = vmatpush3.bf16.msra.mxu0 %v2284_v36  ;;  %v659_v22 = vrot.slane %v2504_v58, 1  ;;  %v829_v23 = vshll.u32 %v2511_v61, 16  ;;  %v2544_v25 = vcombine.low %v183_v41, %v183_v41  ;;  %v504_v26 = vsel %vm501_vm3, %v502_v2, %v503_v3 }
  0x1e   : > { %2032 = vmatprep.subr.bf16.mxu1 %v2332_v1  ;;  %2022 = vmatprep.mubr.msk.bf16.mxu1 %vm2333_vm0, %v2332_v1  ;;  %v819_v18 = vrot.slane %v817_v7, 1  ;;  %v822_v20 = vrot.slane %v820_v8, 2  ;;  %v828_v27 = vrot.slane %v826_v17, 1  ;;  %v661_v28 = vrot.slane %v2511_v61, 1  ;;  %v2301_v8 = vld [vmem:[%s3039_s1 + $0x88] sm:$0xff]  }
  0x1f   : > { %2060 = vmatprep.subr.bf16.mxu0 %v2332_v1  ;;  %2014 = vmatprep.mubr.msk.bf16.mxu0 %vm2333_vm0, %v2332_v1  ;;  %v831_v29 = vrot.slane %v829_v23, 2  ;;  %v835_v30 = vshrl.u32 %v2529_v6, 16  ;;  %v838_v31 = vshll.u32 %v2529_v6, 16  ;;  %v505_v32 = vrot.slane %v2406_v9, 1 }
  0x20   : > { %v2557_v35 = vsel %vm501_vm3, %v659_v22, %v661_v28  ;;  %v663_v36 = vrot.slane %v2529_v6, 1  ;;  %v2563_v37 = vor.u32 %v822_v20, %v819_v18  ;;  %v844_v44 = vshrl.u32 %v2544_v25, 16 }
  0x21   : > { %2033 = vmatpush3.bf16.msra.mxu1 %v2285_v42  ;;  %2061 = vmatpush3.bf16.msra.mxu0 %v2287_v45  ;;  %v832_v38 = vor.u32 %v831_v29, %v828_v27  ;;  %v837_v40 = vrot.slane %v835_v30, 1  ;;  %v840_v41 = vrot.slane %v838_v31, 2  ;;  %v2299_v42 = vld [vmem:[%s3039_s1 + $0x90] sm:$0xff]   ;;  %v847_v45 = vshll.u32 %v2544_v25, 16 }
  0x22   : > { %2034 = vmatprep.subr.bf16.mxu1 %v2332_v1  ;;  %2062 = vmatprep.subr.bf16.mxu0 %v2332_v1  ;;  %v2571_v43 = vsel %vm501_vm3, %v661_v28, %v663_v36  ;;  %v665_v46 = vrot.slane %v2544_v25, 1  ;;  %v846_v55 = vrot.slane %v844_v44, 1  ;;  %v506_v2 = vsel %vm501_vm3, %v503_v3, %v505_v32  ;;  %v2643_v31 = vld [vmem:[%s2390_s25 + $0x30] ss:$0 sps:$4 sm:$0xff]  }
  0x23   : > { %v841_v50 = vor.u32 %v840_v41, %v837_v40  ;;  %v849_v56 = vrot.slane %v847_v45, 2  ;;  %v507_v7 = vrot.slane %v2415_v12, 1  ;;  %v987_v17 = vrot.slane %v2504_v58, 2  ;;  %v2322_v58 = vld [vmem:[%s3039_s1 + $0xe0] sm:$0xff]  }
  0x24   : > { %2023 = vmatmul.mubr.msk.bf16.gmra.mxu1 %vm290_vm1, %v257_v53  ;;  %2015 = vmatmul.mubr.msk.bf16.gmra.mxu0 %vm290_vm1, %v241_v57  ;;  %v1131_v53 = vrot.slane %v2406_v9, 2  ;;  %v2584_v57 = vsel %vm501_vm3, %v663_v36, %v665_v46  ;;  %v1135_v18 = vrot.slane %v2444_v24, 2  ;;  %v989_v20 = vrot.slane %v2511_v61, 2  ;;  %v2303_v61 = vld [vmem:[%s3039_s1 + $0x80] sm:$0xff]  }
  0x25   : > { %2035 = vmatpush3.bf16.msra.mxu1 %v2288_v48  ;;  %2063 = vmatpush3.bf16.msra.mxu0 %v2289_v51  ;;  %v2579_v48 = vsel %vm798_vm4, %v2563_v37, %v832_v38  ;;  %v1130_v51 = vrot.slane %v2434_v19, 2  ;;  %v2590_v60 = vsel %vm798_vm4, %v832_v38, %v841_v50  ;;  %v1137_v23 = vrot.slane %v2479_v47, 2 }
  0x26   : > { %2026 = vmatprep.mubr.msk.bf16.mxu1 %vm2333_vm0, %v2332_v1  ;;  %2064 = vmatprep.subr.bf16.mxu0 %v2332_v1  ;;  %v2631_v28 = vsel %vm983_vm5, %v987_v17, %v989_v20  ;;  %v993_v30 = vrot.slane %v2544_v25, 2  ;;  %v508_v36 = vsel %vm501_vm3, %v505_v32, %v507_v7  ;;  %v1139_v25 = vrot.slane %v2643_v31, 2  ;;  %v2300_v32 = vld [vmem:[%s3039_s1 + $0x68] sm:$0xff]  }
  0x27   : > { %2036 = vmatprep.subr.bf16.mxu1 %v2332_v1  ;;  %2066 = vmatprep.mubr.msk.bf16.mxu0 %vm2333_vm0, %v2332_v1  ;;  %v2634_v29 = vsel %vm983_vm5, %v1135_v18, %v1137_v23  ;;  %v1438_v40 = vrot.slane %v2434_v19, 3  ;;  %v1439_v41 = vrot.slane %v2406_v9, 3  ;;  %vm1272_vm7 = vsmask.f32 5376 }
  0x28   : > { %v1441_v44 = vrot.slane %v2415_v12, 3  ;;  %v1280_v45 = vrot.slane %v250_v33, 2  ;;  %v1281_v46 = vrot.slane %v246_v21, 3  ;;  %v1443_v52 = vrot.slane %v2444_v24, 3 }
  0x29   : > { %2037 = vmatpush3.bf16.msra.mxu1 %v2295_v63  ;;  %2065 = vmatpush3.bf16.msra.mxu0 %v2294_v62  ;;  %v2593_v62 = vsel %vm983_vm5, %v1130_v51, %v1131_v53  ;;  %v1133_v63 = vrot.slane %v2415_v12, 2  ;;  %v2675_v51 = vsel %vm1437_vm6, %v1438_v40, %v1439_v41  ;;  %v1284_v54 = vrot.slane %v258_v49, 2 }
  0x2a   : > { %2086 = vmatprep.subr.bf16.mxu1 %v2332_v1  ;;  %2114 = vmatprep.subr.bf16.mxu0 %v2332_v1  ;;  %v2684_v33 = vsel %vm1437_vm6, %v1439_v41, %v1441_v44  ;;  %v1282_v21 = vor.u32 %v1281_v46, %v1280_v45  ;;  %v2693_v49 = vsel %vm1437_vm6, %v1441_v44, %v1443_v52 }
  0x2b   : > { %v2619_v27 = vsel %vm983_vm5, %v1133_v63, %v1135_v18  ;;  %v2716_v18 = vcombine.low %v2410_v11, %v2419_v13  ;;  %v1447_v11 = vrot.slane %v2643_v31, 3  ;;  %v511_v13 = vrot.slane %v2462_v39, 1 }
  0x2c   : > { %2027 = vmatmul.mubr.msk.bf16.gmra.mxu1 %vm290_vm1, %v265_v10  ;;  %2067 = vmatmul.mubr.msk.bf16.vlgmr.msra.gmra.mxu0 %vm290_vm1, %v504_v26  ;;  %v850_v10 = vor.u32 %v849_v56, %v846_v55  ;;  %v2298_v26 = vld [vmem:[%s3039_s1 + $0x70] sm:$0xff]   ;;  %v1292_v55 = vshll.u32 %v2479_v47, 16  ;;  %v509_v56 = vrot.slane %v2444_v24, 1 }
  0x2d   : > { %2038 = vmatprep.mubr.msk.bf16.mxu1 %vm2333_vm0, %v2332_v1  ;;  %2115 = vmatpush3.bf16.msra.mxu0 %v2297_v16  ;;  %v2603_v16 = vsel %vm983_vm5, %v1131_v53, %v1133_v63  ;;  %v1445_v53 = vrot.slane %v2479_v47, 3 }
  0x2e   : > { %2070 = vmatprep.mubr.msk.bf16.mxu0 %vm2333_vm0, %v2332_v1  ;;  %2116 = vmatprep.subr.bf16.mxu0 %v2332_v1  ;;  %v2610_v3 = vsel %vm798_vm4, %v841_v50, %v850_v10  ;;  %v2672_v50 = vsel %vm983_vm5, %v1137_v23, %v1139_v25  ;;  %v2723_v23 = vcombine.low %v2422_v14, %v2393_v5  ;;  %v800_v5 = vshrl.u32 %v2716_v18, 16 }
  0x2f   : > { %v1298_v14 = vshrl.u32 %v2643_v31, 16  ;;  %v512_v25 = vsel %vm501_vm3, %v509_v56, %v511_v13 }
  0x30   : > { %v802_v41 = vrot.slane %v800_v5, 1 }
  0x31   : > { %2117 = vmatpush3.bf16.msra.mxu0 %v2299_v42  ;;  %v2664_v42 = vsel %vm1272_vm7, %v1275_v0, %v2526_v4  ;;  %v1285_v0 = vrot.slane %v254_v34, 3  ;;  %v2302_v34 = vld [vmem:[%s3039_s1 + $0x60] sm:$0xff]  }
  0x32   : > { %2118 = vmatprep.subr.bf16.mxu0 %v2332_v1 }
  0x33   : > { %v1286_v63 = vor.u32 %v1285_v0, %v1284_v54  ;;  %v657_v0 = vrot.slane %v2723_v23, 1 }
  0x34   : > { %2039 = vmatmul.mubr.msk.bf16.vlgmr.msra.gmra.mxu1 %vm290_vm1, %v2425_v15  ;;  %2071 = vmatmul.mubr.msk.bf16.gmra.mxu0 %vm290_vm1, %v506_v2  ;;  %v991_v15 = vrot.slane %v2529_v6, 2  ;;  %v2708_v2 = vsel %vm1437_vm6, %v1443_v52, %v1445_v53 }
  0x35   : > { %2087 = vmatpush3.bf16.msra.mxu1 %v2296_v59  ;;  %2042 = vmatprep.mubr.msk.bf16.mxu1 %vm2333_vm0, %v2332_v1  ;;  %v2705_v59 = vsel %vm1272_vm7, %v2526_v4, %v1282_v21  ;;  %v2712_v10 = vsel %vm1272_vm7, %v1282_v21, %v1286_v63  ;;  %v510_v4 = vsel %vm501_vm3, %v507_v7, %v509_v56  ;;  %v1301_v7 = vshll.u32 %v2643_v31, 16  ;;  %v2306_v21 = vld [vmem:[%s3039_s1 + $0xd8] sm:$0xff]   ;;  %v2312_v56 = vld [vmem:[%s3039_s1 + $0xc8] sm:$0xff]  }
  0x36   : > { %2088 = vmatprep.subr.bf16.mxu1 %v2332_v1  ;;  %2074 = vmatprep.mubr.msk.bf16.mxu0 %vm2333_vm0, %v2332_v1  ;;  %v2640_v6 = vsel %vm983_vm5, %v989_v20, %v991_v15  ;;  %v2650_v38 = vsel %vm983_vm5, %v991_v15, %v993_v30  ;;  %v808_v15 = vshrl.u32 %v2723_v23, 16  ;;  %v2745_v30 = vsel %vm1437_vm6, %v1445_v53, %v1447_v11  ;;  %v2310_v53 = vld [vmem:[%s3039_s1 + $0xd0] sm:$0xff]  }
  0x37   : > { %2119 = vmatpush3.bf16.msra.mxu0 %v2301_v8  ;;  %v1294_v8 = vrot.slane %v1292_v55, 3  ;;  %v1303_v39 = vrot.slane %v1301_v7, 3 }
  0x38   : > { %2120 = vmatprep.subr.bf16.mxu0 %v2332_v1  ;;  %v810_v31 = vrot.slane %v808_v15, 1 }
  0x39   : > { %2089 = vmatpush3.bf16.msra.mxu1 %v2298_v26 }
  0x3a   : > { %2090 = vmatprep.subr.bf16.mxu1 %v2332_v1 }
  0x3b   : > { %2121 = vmatpush3.bf16.msra.mxu0 %v2303_v61  ;;  %v811_v61 = vshll.u32 %v2723_v23, 16 }
  0x3c   : > { %2043 = vmatmul.mubr.msk.bf16.gmra.mxu1 %vm290_vm1, %v2434_v19  ;;  %2170 = vmatprep.subr.bf16.mxu0 %v2332_v1  ;;  %v1289_v19 = vshrl.u32 %v2479_v47, 16 }
  0x3d   : > { %2075 = vmatmul.mubr.msk.bf16.gmra.mxu0 %vm290_vm1, %v508_v36  ;;  %2046 = vmatprep.mubr.msk.bf16.mxu1 %vm2333_vm0, %v2332_v1  ;;  %v1300_v36 = vrot.slane %v1298_v14, 2  ;;  %v813_v44 = vrot.slane %v811_v61, 2 }
  0x3e   : > { %2078 = vmatprep.mubr.msk.bf16.mxu0 %vm2333_vm0, %v2332_v1  ;;  %2091 = vmatpush3.bf16.msra.mxu1 %v2300_v32  ;;  %v1291_v47 = vrot.slane %v1289_v19, 2  ;;  %v2305_v19 = vld [vmem:[%s3039_s1 + $0xb8] sm:$0xff]  }
  0x3f   : > { %2092 = vmatprep.subr.bf16.mxu1 %v2332_v1  ;;  %v1304_v40 = vor.u32 %v1303_v39, %v1300_v36  ;;  %v814_v52 = vor.u32 %v813_v44, %v810_v31 }
  0x40   : > { %v1295_v20 = vor.u32 %v1294_v8, %v1291_v47  ;;  %v2311_v47 = vld [vmem:[%s3039_s1 + $0xa8] sm:$0xff]   ;;  %v2317_v8 = vld [vmem:[%s3039_s1 + $0xf0] sm:$0xff]  }
  0x41   : > { %v824_v55 = vsel %vm798_vm4, %v814_v52, %v2563_v37  ;;  %v2314_v37 = vld [vmem:[%s3039_s1 + $0xc0] sm:$0xff]  }
  0x42   : > { %2093 = vmatpush3.bf16.msra.mxu1 %v2302_v34  ;;  %v2727_v26 = vsel %vm1272_vm7, %v1286_v63, %v1295_v20  ;;  %v2749_v45 = vsel %vm1272_vm7, %v1295_v20, %v1304_v40  ;;  %v2308_v34 = vld [vmem:[%s3039_s1 + $0xb0] sm:$0xff]   ;;  %v660_v63 = vsel %vm501_vm3, %v657_v0, %v659_v22  ;;  %v2313_v22 = vld [vmem:[%s3039_s1 + $0xa0] sm:$0xff]   ;;  %v2319_v20 = vld [vmem:[%s3039_s1 + $0xe8] sm:$0xff]  }
  0x43   : > { %2142 = vmatprep.subr.bf16.mxu1 %v2332_v1 }
  0x44   : > { %2047 = vmatmul.mubr.msk.bf16.gmra.mxu1 %vm290_vm1, %v2406_v9  ;;  %v803_v9 = vshll.u32 %v2716_v18, 16 }
  0x45   : > { %2079 = vmatmul.mubr.msk.bf16.gmra.mxu0 %vm290_vm1, %v510_v4  ;;  %2050 = vmatprep.mubr.msk.bf16.mxu1 %vm2333_vm0, %v2332_v1 }
  0x46   : > { %2082 = vmatprep.mubr.msk.bf16.mxu0 %vm2333_vm0, %v2332_v1  ;;  %v805_v32 = vrot.slane %v803_v9, 2 }
  0x48   : > { %v806_v46 = vor.u32 %v805_v32, %v802_v41 }
  0x4a   : > { %v815_v54 = vsel %vm798_vm4, %v806_v46, %v814_v52 }
  0x4c   : > { %2051 = vmatmul.mubr.msk.bf16.gmra.mxu1 %vm290_vm1, %v2415_v12  ;;  %v656_v12 = vrot.slane %v2716_v18, 1 }
  0x4d   : > { %2083 = vmatmul.mubr.msk.bf16.gmra.mxu0 %vm290_vm1, %v512_v25  ;;  %2054 = vmatprep.mubr.msk.bf16.mxu1 %vm2333_vm0, %v2332_v1 }
  0x4e   : > { %2122 = vmatprep.mubr.msk.bf16.mxu0 %vm2333_vm0, %v2332_v1 }
  0x54   : > { %2055 = vmatmul.mubr.msk.bf16.gmra.mxu1 %vm290_vm1, %v2444_v24  ;;  %v658_v24 = vsel %vm501_vm3, %v656_v12, %v657_v0 }
  0x55   : > { %2123 = vmatmul.mubr.msk.bf16.vlgmr.msra.gmra.mxu0 %vm290_vm1, %v815_v54  ;;  %2094 = vmatprep.mubr.msk.bf16.mxu1 %vm2333_vm0, %v2332_v1 }
  0x56   : > { %2171 = vmatpush3.bf16.msra.mxu0 %v2306_v21  ;;  %2126 = vmatprep.mubr.msk.bf16.mxu0 %vm2333_vm0, %v2332_v1 }
  0x57   : > { %2172 = vmatprep.subr.bf16.mxu0 %v2332_v1 }
  0x5a   : > { %2173 = vmatpush3.bf16.msra.mxu0 %v2310_v53 }
  0x5b   : > { %2174 = vmatprep.subr.bf16.mxu0 %v2332_v1 }
  0x5c   : > { %2095 = vmatmul.mubr.msk.bf16.vlgmr.msra.gmra.mxu1 %vm290_vm1, %v658_v24 }
  0x5d   : > { %2143 = vmatpush3.bf16.msra.mxu1 %v2305_v19  ;;  %2127 = vmatmul.mubr.msk.bf16.gmra.mxu0 %vm290_vm1, %v824_v55 }
  0x5e   : > { %2098 = vmatprep.mubr.msk.bf16.mxu1 %vm2333_vm0, %v2332_v1  ;;  %2144 = vmatprep.subr.bf16.mxu1 %v2332_v1 }
  0x5f   : > { %2130 = vmatprep.mubr.msk.bf16.mxu0 %vm2333_vm0, %v2332_v1  ;;  %2175 = vmatpush3.bf16.msra.mxu0 %v2312_v56 }
  0x60   : > { %2176 = vmatprep.subr.bf16.mxu0 %v2332_v1 }
  0x61   : > { %2145 = vmatpush3.bf16.msra.mxu1 %v2308_v34 }
  0x62   : > { %2146 = vmatprep.subr.bf16.mxu1 %v2332_v1 }
  0x63   : > { %2177 = vmatpush3.bf16.msra.mxu0 %v2314_v37 }
  0x64   : > { %2099 = vmatmul.mubr.msk.bf16.gmra.mxu1 %vm290_vm1, %v660_v63  ;;  %2226 = vmatprep.subr.bf16.mxu0 %v2332_v1 }
  0x65   : > { %2131 = vmatmul.mubr.msk.bf16.gmra.mxu0 %vm290_vm1, %v2579_v48  ;;  %2102 = vmatprep.mubr.msk.bf16.mxu1 %vm2333_vm0, %v2332_v1  ;;  %v985_v48 = vrot.slane %v2723_v23, 2 }
  0x66   : > { %2134 = vmatprep.mubr.msk.bf16.mxu0 %vm2333_vm0, %v2332_v1  ;;  %2147 = vmatpush3.bf16.msra.mxu1 %v2311_v47 }
  0x67   : > { %2148 = vmatprep.subr.bf16.mxu1 %v2332_v1 }
  0x6a   : > { %2149 = vmatpush3.bf16.msra.mxu1 %v2313_v22 }
  0x6b   : > { %2198 = vmatprep.subr.bf16.mxu1 %v2332_v1 }
  0x6c   : > { %2103 = vmatmul.mubr.msk.bf16.gmra.mxu1 %vm290_vm1, %v2557_v35  ;;  %v2316_v35 = vld [vmem:[%s3039_s1 + $0x118] sm:$0xff]  }
  0x6d   : > { %2135 = vmatmul.mubr.msk.bf16.gmra.mxu0 %vm290_vm1, %v2590_v60  ;;  %2106 = vmatprep.mubr.msk.bf16.mxu1 %vm2333_vm0, %v2332_v1  ;;  %v2318_v60 = vld [vmem:[%s3039_s1 + $0x110] sm:$0xff]  }
  0x6e   : > { %2138 = vmatprep.mubr.msk.bf16.mxu0 %vm2333_vm0, %v2332_v1 }
  0x74   : > { %2107 = vmatmul.mubr.msk.bf16.gmra.mxu1 %vm290_vm1, %v2571_v43  ;;  %v984_v43 = vrot.slane %v2716_v18, 2  ;;  %v2323_v18 = vld [vmem:[%s3039_s1 + $0x100] sm:$0xff]  }
  0x75   : > { %2139 = vmatmul.mubr.msk.bf16.gmra.mxu0 %vm290_vm1, %v2610_v3  ;;  %2110 = vmatprep.mubr.msk.bf16.mxu1 %vm2333_vm0, %v2332_v1  ;;  %v2320_v3 = vld [vmem:[%s3039_s1 + $0x108] sm:$0xff]  }
  0x76   : > { %2178 = vmatprep.mubr.msk.bf16.mxu0 %vm2333_vm0, %v2332_v1 }
  0x7c   : > { %2111 = vmatmul.mubr.msk.bf16.gmra.mxu1 %vm290_vm1, %v2584_v57  ;;  %v986_v57 = vsel %vm983_vm5, %v984_v43, %v985_v48 }
  0x7d   : > { %2179 = vmatmul.mubr.msk.bf16.vlgmr.msra.gmra.mxu0 %vm290_vm1, %v2593_v62  ;;  %2150 = vmatprep.mubr.msk.bf16.mxu1 %vm2333_vm0, %v2332_v1  ;;  %v2315_v62 = vld [vmem:[%s3039_s1 + $0xf8] sm:$0xff]  }
  0x7e   : > { %2227 = vmatpush3.bf16.msra.mxu0 %v2316_v35  ;;  %2182 = vmatprep.mubr.msk.bf16.mxu0 %vm2333_vm0, %v2332_v1 }
  0x7f   : > { %2228 = vmatprep.subr.bf16.mxu0 %v2332_v1 }
  0x82   : > { %2229 = vmatpush3.bf16.msra.mxu0 %v2318_v60 }
  0x83   : > { %2230 = vmatprep.subr.bf16.mxu0 %v2332_v1 }
  0x84   : > { %2151 = vmatmul.mubr.msk.bf16.vlgmr.msra.gmra.mxu1 %vm290_vm1, %v986_v57 }
  0x85   : > { %2199 = vmatpush3.bf16.msra.mxu1 %v2315_v62  ;;  %2183 = vmatmul.mubr.msk.bf16.gmra.mxu0 %vm290_vm1, %v2603_v16  ;;  %v988_v16 = vsel %vm983_vm5, %v985_v48, %v987_v17 }
  0x86   : > { %2154 = vmatprep.mubr.msk.bf16.mxu1 %vm2333_vm0, %v2332_v1  ;;  %2200 = vmatprep.subr.bf16.mxu1 %v2332_v1 }
  0x87   : > { %2186 = vmatprep.mubr.msk.bf16.mxu0 %vm2333_vm0, %v2332_v1  ;;  %2231 = vmatpush3.bf16.msra.mxu0 %v2320_v3 }
  0x88   : > { %2232 = vmatprep.subr.bf16.mxu0 %v2332_v1 }
  0x89   : > { %2201 = vmatpush3.bf16.msra.mxu1 %v2317_v8 }
  0x8a   : > { %2202 = vmatprep.subr.bf16.mxu1 %v2332_v1 }
  0x8b   : > { %2233 = vmatpush3.bf16.msra.mxu0 %v2323_v18 }
  0x8c   : > { %2155 = vmatmul.mubr.msk.bf16.gmra.mxu1 %vm290_vm1, %v988_v16 }
  0x8d   : > { %2187 = vmatmul.mubr.msk.bf16.gmra.mxu0 %vm290_vm1, %v2619_v27  ;;  %2158 = vmatprep.mubr.msk.bf16.mxu1 %vm2333_vm0, %v2332_v1 }
  0x8e   : > { %2190 = vmatprep.mubr.msk.bf16.mxu0 %vm2333_vm0, %v2332_v1  ;;  %2203 = vmatpush3.bf16.msra.mxu1 %v2319_v20 }
  0x8f   : > { %2204 = vmatprep.subr.bf16.mxu1 %v2332_v1 }
  0x92   : > { %2205 = vmatpush3.bf16.msra.mxu1 %v2322_v58 }
  0x94   : > { %2159 = vmatmul.mubr.msk.bf16.gmra.mxu1 %vm290_vm1, %v2631_v28 }
  0x95   : > { %2191 = vmatmul.mubr.msk.bf16.gmra.mxu0 %vm290_vm1, %v2634_v29  ;;  %2162 = vmatprep.mubr.msk.bf16.mxu1 %vm2333_vm0, %v2332_v1 }
  0x96   : > { %2194 = vmatprep.mubr.msk.bf16.mxu0 %vm2333_vm0, %v2332_v1 }
  0x9c   : > { %2163 = vmatmul.mubr.msk.bf16.gmra.mxu1 %vm290_vm1, %v2640_v6 }
  0x9d   : > { %2195 = vmatmul.mubr.msk.bf16.gmra.mxu0 %vm290_vm1, %v2672_v50  ;;  %2166 = vmatprep.mubr.msk.bf16.mxu1 %vm2333_vm0, %v2332_v1 }
  0x9e   : > { %2234 = vmatprep.mubr.msk.bf16.mxu0 %vm2333_vm0, %v2332_v1 }
  0xa4   : > { %2167 = vmatmul.mubr.msk.bf16.gmra.mxu1 %vm290_vm1, %v2650_v38 }
  0xa5   : > { %2235 = vmatmul.mubr.msk.bf16.vlgmr.msra.gmra.mxu0 %vm290_vm1, %v2675_v51  ;;  %2206 = vmatprep.mubr.msk.bf16.mxu1 %vm2333_vm0, %v2332_v1 }
  0xa6   : > { %2238 = vmatprep.mubr.msk.bf16.mxu0 %vm2333_vm0, %v2332_v1 }
  0xac   : > { %2207 = vmatmul.mubr.msk.bf16.vlgmr.msra.gmra.mxu1 %vm290_vm1, %v2664_v42 }
  0xad   : > { %2239 = vmatmul.mubr.msk.bf16.gmra.mxu0 %vm290_vm1, %v2684_v33  ;;  %2210 = vmatprep.mubr.msk.bf16.mxu1 %vm2333_vm0, %v2332_v1 }
  0xae   : > { %2242 = vmatprep.mubr.msk.bf16.mxu0 %vm2333_vm0, %v2332_v1 }
  0xb4   : > { %2211 = vmatmul.mubr.msk.bf16.gmra.mxu1 %vm290_vm1, %v2705_v59 }
  0xb5   : > { %2243 = vmatmul.mubr.msk.bf16.gmra.mxu0 %vm290_vm1, %v2693_v49  ;;  %2214 = vmatprep.mubr.msk.bf16.mxu1 %vm2333_vm0, %v2332_v1 }
  0xb6   : > { %2246 = vmatprep.mubr.msk.bf16.mxu0 %vm2333_vm0, %v2332_v1 }
  0xbc   : > { %2215 = vmatmul.mubr.msk.bf16.gmra.mxu1 %vm290_vm1, %v2712_v10 }
  0xbd   : > { %2247 = vmatmul.mubr.msk.bf16.gmra.mxu0 %vm290_vm1, %v2708_v2  ;;  %2218 = vmatprep.mubr.msk.bf16.mxu1 %vm2333_vm0, %v2332_v1 }
  0xbe   : > { %2250 = vmatprep.mubr.msk.bf16.mxu0 %vm2333_vm0, %v2332_v1 }
  0xc4   : > { %2219 = vmatmul.mubr.msk.bf16.gmra.mxu1 %vm290_vm1, %v2727_v26 }
  0xc5   : > { %2251 = vmatmul.mubr.msk.bf16.gmra.mxu0 %vm290_vm1, %v2745_v30  ;;  %2222 = vmatprep.mubr.msk.bf16.mxu1 %vm2333_vm0, %v2332_v1 }
  0xcc   : > { %2223 = vmatmul.mubr.msk.bf16.gmra.mxu1 %vm290_vm1, %v2749_v45 }
  0xdc   : > { %v356_v17 = vpop.f32.mrf.mxu1  ;;  %v340_v27 = vpop.f32.mrf.mxu0 }
  0xde   : > { %v2020_v28 = vpop.f32.mrf.mxu1  ;;  %v2012_v29 = vpop.f32.mrf.mxu0 }
  0xe0   : > { %v359_v6 = vpop.f32.mrf.mxu1  ;;  %v343_v38 = vpop.f32.mrf.mxu0 }
  0xe2   : > { %v2021_v42 = vpop.f32.mrf.mxu1  ;;  %v2013_v50 = vpop.f32.mrf.mxu0 }
  0xe4   : > { %v364_v51 = vpop.f32.mrf.mxu1  ;;  %v348_v33 = vpop.f32.mrf.mxu0 }
  0xe6   : > { %v2024_v49 = vpop.f32.mrf.mxu1  ;;  %v2016_v59 = vpop.f32.mrf.mxu0 }
  0xe8   : > { %v367_v2 = vpop.f32.mrf.mxu1  ;;  %v351_v10 = vpop.f32.mrf.mxu0 }
  0xea   : > { %v2025_v4 = vpop.f32.mrf.mxu1  ;;  %v2017_v23 = vpop.f32.mrf.mxu0 }
  0xec   : > { %v372_v1 = vpop.f32.mrf.mxu1  ;;  %v586_v26 = vpop.f32.mrf.mxu0 }
  0xee   : > { %v2028_v11 = vpop.f32.mrf.mxu1  ;;  %v2068_v13 = vpop.f32.mrf.mxu0 }
  0xf0   : > { %v375_v5 = vpop.f32.mrf.mxu1  ;;  %v589_v14 = vpop.f32.mrf.mxu0 }
  0xf2   : > { %v2029_v7 = vpop.f32.mrf.mxu1  ;;  %v2069_v9 = vpop.f32.mrf.mxu0 }
  0xf4   : > { %v447_v15 = vpop.f32.mrf.mxu1  ;;  %v594_v30 = vpop.f32.mrf.mxu0 }
  0xf5   : > { %v448_v61 = vadd.f32 %v447_v15, %v340_v27 }
  0xf6   : > { %v2040_v36 = vpop.f32.mrf.mxu1  ;;  %v2072_v39 = vpop.f32.mrf.mxu0 }
  0xf7   : > { %v625_v25 = vadd.f32 %v586_v26, %v448_v61 }
  0xf8   : > { %v450_v40 = vpop.f32.mrf.mxu1  ;;  %v597_v32 = vpop.f32.mrf.mxu0 }
  0xf9   : > { %v451_v41 = vadd.f32 %v450_v40, %v343_v38 }
  0xfa   : > { %v2041_v31 = vpop.f32.mrf.mxu1  ;;  %v2073_v44 = vpop.f32.mrf.mxu0 }
  0xfb   : > { %v626_v45 = vadd.f32 %v589_v14, %v451_v41 }
  0xfc   : > { %v455_v46 = vpop.f32.mrf.mxu1 }
  0xfd   : > { %v456_v52 = vadd.f32 %v455_v46, %v348_v33  ;;  %v602_v54 = vpop.f32.mrf.mxu0 }
  0xfe   : > { %v2044_v21 = vpop.f32.mrf.mxu1 }
  0xff   : > { %v2076_v12 = vpop.f32.mrf.mxu0  ;;  %v627_v0 = vadd.f32 %v594_v30, %v456_v52 }
 0x100   : > { %v458_v53 = vpop.f32.mrf.mxu1 }
 0x101   : > { %v459_v24 = vadd.f32 %v458_v53, %v351_v10  ;;  %v605_v19 = vpop.f32.mrf.mxu0 }
 0x102   : > { %v2045_v55 = vpop.f32.mrf.mxu1 }
 0x103   : > { %v2077_v56 = vpop.f32.mrf.mxu0  ;;  %v628_v34 = vadd.f32 %v597_v32, %v459_v24 }
 0x104   : > { %v463_v37 = vpop.f32.mrf.mxu1 }
 0x105   : > { %v464_v63 = vadd.f32 %v463_v37, %v356_v17  ;;  %v610_v47 = vpop.f32.mrf.mxu0 }
 0x106   : > { %v2048_v22 = vpop.f32.mrf.mxu1 }
 0x107   : > { %v2080_v35 = vpop.f32.mrf.mxu0  ;;  %v629_v43 = vadd.f32 %v602_v54, %v464_v63 }
 0x108   : > { %v466_v48 = vpop.f32.mrf.mxu1 }
 0x109   : > { %v467_v60 = vadd.f32 %v466_v48, %v359_v6  ;;  %v613_v57 = vpop.f32.mrf.mxu0 }
 0x10a   : > { %v2049_v62 = vpop.f32.mrf.mxu1 }
 0x10b   : > { %v2081_v3 = vpop.f32.mrf.mxu0  ;;  %v630_v8 = vadd.f32 %v605_v19, %v467_v60 }
 0x10c   : > { %v471_v18 = vpop.f32.mrf.mxu1 }
 0x10d   : > { %v472_v16 = vadd.f32 %v471_v18, %v364_v51  ;;  %v618_v20 = vpop.f32.mrf.mxu0 }
 0x10e   : > { %v2052_v58 = vpop.f32.mrf.mxu1 }
 0x10f   : > { %v2084_v27 = vpop.f32.mrf.mxu0  ;;  %v631_v28 = vadd.f32 %v610_v47, %v472_v16 }
 0x110   : > { %v474_v29 = vpop.f32.mrf.mxu1 }
 0x111   : > { %v475_v38 = vadd.f32 %v474_v29, %v367_v2  ;;  %v621_v42 = vpop.f32.mrf.mxu0 }
 0x112   : > { %v2053_v17 = vpop.f32.mrf.mxu1 }
 0x113   : > { %v2085_v50 = vpop.f32.mrf.mxu0  ;;  %v632_v33 = vadd.f32 %v613_v57, %v475_v38 }
 0x114   : > { %v479_v49 = vpop.f32.mrf.mxu1 }
 0x115   : > { %v480_v59 = vadd.f32 %v479_v49, %v372_v1  ;;  %v925_v10 = vpop.f32.mrf.mxu0 }
 0x116   : > { %v2056_v6 = vpop.f32.mrf.mxu1 }
 0x117   : > { %v2124_v4 = vpop.f32.mrf.mxu0  ;;  %v633_v23 = vadd.f32 %v618_v20, %v480_v59 }
 0x118   : > { %v482_v26 = vpop.f32.mrf.mxu1 }
 0x119   : > { %v483_v11 = vadd.f32 %v482_v26, %v375_v5  ;;  %v928_v13 = vpop.f32.mrf.mxu0 }
 0x11a   : > { %v2057_v51 = vpop.f32.mrf.mxu1 }
 0x11b   : > { %v2125_v14 = vpop.f32.mrf.mxu0  ;;  %v634_v7 = vadd.f32 %v621_v42, %v483_v11 }
 0x11c   : > { %v740_v9 = vpop.f32.mrf.mxu1 }
 0x11d   : > { %v779_v15 = vadd.f32 %v740_v9, %v625_v25  ;;  %v933_v61 = vpop.f32.mrf.mxu0 }
 0x11e   : > { %v2096_v2 = vpop.f32.mrf.mxu1 }
 0x11f   : > { %v2128_v30 = vpop.f32.mrf.mxu0  ;;  %v2949_v36 = vadd.f32 %v925_v10, %v779_v15 }
 0x120   : > { %v743_v39 = vpop.f32.mrf.mxu1 }
 0x121   : > { %v780_v40 = vadd.f32 %v743_v39, %v626_v45  ;;  %v936_v1 = vpop.f32.mrf.mxu0 }
 0x122   : > { %v2097_v41 = vpop.f32.mrf.mxu1 }
 0x123   : > { %v2129_v32 = vpop.f32.mrf.mxu0  ;;  %v2951_v31 = vadd.f32 %v928_v13, %v780_v40 }
 0x124   : > { %v748_v44 = vpop.f32.mrf.mxu1 }
 0x125   : > { %v781_v5 = vadd.f32 %v748_v44, %v627_v0  ;;  %v941_v46 = vpop.f32.mrf.mxu0 }
 0x126   : > { %v2100_v52 = vpop.f32.mrf.mxu1 }
 0x127   : > { %v2132_v54 = vpop.f32.mrf.mxu0  ;;  %v2953_v21 = vadd.f32 %v933_v61, %v781_v5 }
 0x128   : > { %v751_v25 = vpop.f32.mrf.mxu1 }
 0x129   : > { %v782_v12 = vadd.f32 %v751_v25, %v628_v34  ;;  %v944_v53 = vpop.f32.mrf.mxu0 }
 0x12a   : > { %v2101_v24 = vpop.f32.mrf.mxu1 }
 0x12b   : > { %v2133_v19 = vpop.f32.mrf.mxu0  ;;  %v2955_v55 = vadd.f32 %v936_v1, %v782_v12 }
 0x12c   : > { %v756_v45 = vpop.f32.mrf.mxu1 }
 0x12d   : > { %v783_v56 = vadd.f32 %v756_v45, %v629_v43  ;;  %v949_v37 = vpop.f32.mrf.mxu0 }
 0x12e   : > { %v2104_v63 = vpop.f32.mrf.mxu1 }
 0x12f   : > { %v2136_v47 = vpop.f32.mrf.mxu0  ;;  %v2957_v22 = vadd.f32 %v941_v46, %v783_v56 }
 0x130   : > { %v759_v0 = vpop.f32.mrf.mxu1 }
 0x131   : > { %v784_v35 = vadd.f32 %v759_v0, %v630_v8  ;;  %v952_v48 = vpop.f32.mrf.mxu0 }
 0x132   : > { %v2105_v60 = vpop.f32.mrf.mxu1 }
 0x133   : > { %v2137_v57 = vpop.f32.mrf.mxu0  ;;  %v2959_v62 = vadd.f32 %v944_v53, %v784_v35 }
 0x134   : > { %v764_v34 = vpop.f32.mrf.mxu1 }
 0x135   : > { %v785_v3 = vadd.f32 %v764_v34, %v631_v28  ;;  %v957_v18 = vpop.f32.mrf.mxu0 }
 0x136   : > { %v2108_v16 = vpop.f32.mrf.mxu1 }
 0x137   : > { %v2140_v20 = vpop.f32.mrf.mxu0  ;;  %v2961_v58 = vadd.f32 %v949_v37, %v785_v3 }
 0x138   : > { %v767_v43 = vpop.f32.mrf.mxu1 }
 0x139   : > { %v786_v27 = vadd.f32 %v767_v43, %v632_v33  ;;  %v960_v29 = vpop.f32.mrf.mxu0 }
 0x13a   : > { %v2109_v38 = vpop.f32.mrf.mxu1 }
 0x13b   : > { %v2141_v42 = vpop.f32.mrf.mxu0  ;;  %v2963_v17 = vadd.f32 %v952_v48, %v786_v27 }
 0x13c   : > { %v772_v8 = vpop.f32.mrf.mxu1 }
 0x13d   : > { %v787_v50 = vadd.f32 %v772_v8, %v633_v23  ;;  %v1214_v49 = vpop.f32.mrf.mxu0 }
 0x13e   : > { %v2112_v59 = vpop.f32.mrf.mxu1 }
 0x13f   : > { %v2180_v10 = vpop.f32.mrf.mxu0  ;;  %v2965_v6 = vadd.f32 %v957_v18, %v787_v50 }
 0x140   : > { %v775_v28 = vpop.f32.mrf.mxu1 }
 0x141   : > { %v788_v4 = vadd.f32 %v775_v28, %v634_v7  ;;  %v1217_v26 = vpop.f32.mrf.mxu0 }
 0x142   : > { %v2113_v11 = vpop.f32.mrf.mxu1 }
 0x143   : > { %v2181_v13 = vpop.f32.mrf.mxu0  ;;  %v2967_v51 = vadd.f32 %v960_v29, %v788_v4 }
 0x144   : > { %v1068_v33 = vpop.f32.mrf.mxu1 }
 0x145   : > { %v1222_v14 = vpop.f32.mrf.mxu0  ;;  %v1107_v3 = vadd.f32 %v1068_v33, %v2949_v36  ;;  %v2995_v36 = vld [vmem:[%s3040_s2] ss:$0 sm:$0xff] }
 0x146   : > { %v2152_v9 = vpop.f32.mrf.mxu1 }
 0x147   : > { %v2184_v15 = vpop.f32.mrf.mxu0  ;;  %v1253_v29 = vadd.f32 %v1214_v49, %v1107_v3 }
 0x148   : > { %v1071_v61 = vpop.f32.mrf.mxu1 }
 0x149   : > { %v1225_v2 = vpop.f32.mrf.mxu0  ;;  %v1108_v27 = vadd.f32 %v1071_v61, %v2951_v31 }
 0x14a   : > { %v2153_v30 = vpop.f32.mrf.mxu1 }
 0x14b   : > { %v2185_v23 = vpop.f32.mrf.mxu0  ;;  %v1254_v4 = vadd.f32 %v1217_v26, %v1108_v27 }
 0x14c   : > { %v1076_v39 = vpop.f32.mrf.mxu1 }
 0x14d   : > { %v2969_v40 = vpop.f32.mrf.mxu0  ;;  %v1109_v10 = vadd.f32 %v1076_v39, %v2953_v21 }
 0x14e   : > { %v2156_v1 = vpop.f32.mrf.mxu1 }
 0x14f   : > { %v2188_v41 = vpop.f32.mrf.mxu0  ;;  %v1255_v30 = vadd.f32 %v1222_v14, %v1109_v10 }
 0x150   : > { %v1079_v32 = vpop.f32.mrf.mxu1 }
 0x151   : > { %v2971_v7 = vpop.f32.mrf.mxu0  ;;  %v1110_v49 = vadd.f32 %v1079_v32, %v2955_v55 }
 0x152   : > { %v2157_v44 = vpop.f32.mrf.mxu1 }
 0x153   : > { %v2189_v5 = vpop.f32.mrf.mxu0  ;;  %v1256_v44 = vadd.f32 %v1225_v2, %v1110_v49 }
 0x154   : > { %v1084_v46 = vpop.f32.mrf.mxu1 }
 0x155   : > { %v2973_v52 = vpop.f32.mrf.mxu0  ;;  %v1111_v5 = vadd.f32 %v1084_v46, %v2957_v22 }
 0x156   : > { %v2160_v54 = vpop.f32.mrf.mxu1 }
 0x157   : > { %v2192_v25 = vpop.f32.mrf.mxu0  ;;  %v1257_v46 = vadd.f32 %v2969_v40, %v1111_v5 }
 0x158   : > { %v1087_v12 = vpop.f32.mrf.mxu1 }
 0x159   : > { %v2975_v53 = vpop.f32.mrf.mxu0 }
 0x15a   : > { %v2161_v24 = vpop.f32.mrf.mxu1 }
 0x15b   : > { %v2193_v19 = vpop.f32.mrf.mxu0 }
 0x15c   : > { %v2977_v45 = vpop.f32.mrf.mxu1 }
 0x15d   : > { %v2979_v56 = vpop.f32.mrf.mxu0 }
 0x15e   : > { %v2164_v37 = vpop.f32.mrf.mxu1 }
 0x15f   : > { %v2196_v63 = vpop.f32.mrf.mxu0 }
 0x160   : > { %v2981_v47 = vpop.f32.mrf.mxu1  ;;  %v1112_v63 = vadd.f32 %v1087_v12, %v2959_v62  ;;  %v1113_v62 = vadd.f32 %v2977_v45, %v2961_v58 }
 0x161   : > { %v2983_v0 = vpop.f32.mrf.mxu0 }
 0x162   : > { %v2165_v35 = vpop.f32.mrf.mxu1 }
 0x163   : > { %v2197_v48 = vpop.f32.mrf.mxu0 }
 0x164   : > { %v2985_v60 = vpop.f32.mrf.mxu1 }
 0x165   : > { %v1522_v57 = vpop.f32.mrf.mxu0 }
 0x166   : > { %v2168_v34 = vpop.f32.mrf.mxu1 }
 0x167   : > { %v2236_v18 = vpop.f32.mrf.mxu0 }
 0x168   : > { %v2988_v16 = vpop.f32.mrf.mxu1 }
 0x169   : > { %v1525_v20 = vpop.f32.mrf.mxu0 }
 0x16a   : > { %v2169_v43 = vpop.f32.mrf.mxu1 }
 0x16b   : > { %v2237_v38 = vpop.f32.mrf.mxu0  ;;  %v1258_v43 = vadd.f32 %v2971_v7, %v1112_v63  ;;  %v1259_v7 = vadd.f32 %v2973_v52, %v1113_v62 }
 0x16c   : > { %v1379_v42 = vpop.f32.mrf.mxu1 }
 0x16d   : > { %v1418_v8 = vadd.f32 %v1379_v42, %v1253_v29  ;;  %v1530_v50 = vpop.f32.mrf.mxu0 }
 0x16e   : > { %v2208_v59 = vpop.f32.mrf.mxu1 }
 0x16f   : > { %v1561_v28 = vadd.f32 %v1522_v57, %v1418_v8  ;;  %v2240_v11 = vpop.f32.mrf.mxu0  ;;  %v1114_v59 = vadd.f32 %v2981_v47, %v2963_v17  ;;  %v1115_v17 = vadd.f32 %v2985_v60, %v2965_v6 }
 0x170   : > { %v1382_v13 = vpop.f32.mrf.mxu1 }
 0x171   : > { %v1419_v33 = vadd.f32 %v1382_v13, %v1254_v4  ;;  %v1533_v31 = vpop.f32.mrf.mxu0  ;;  %v1578_v15 = vadd.f32 %v2995_v36, %v1561_v28  ;;  %v1260_v49 = vadd.f32 %v2975_v53, %v1114_v59 }
 0x172   : > { %v2209_v9 = vpop.f32.mrf.mxu1 }
 0x173   : > { %v1562_v61 = vadd.f32 %v1525_v20, %v1419_v33  ;;  %v2241_v23 = vpop.f32.mrf.mxu0  ;;  %v1588_v54 = vmax.f32 %v1578_v15, 0.0 }
 0x174   : > { %v1387_v21 = vpop.f32.mrf.mxu1 }
 0x175   : > { %v1579_v26 = vadd.f32 %v2995_v36, %v1562_v61  ;;  %v1420_v39 = vadd.f32 %v1387_v21, %v1255_v30  ;;  %v1538_v1 = vpop.f32.mrf.mxu0 }
 0x176   : > { %v2212_v41 = vpop.f32.mrf.mxu1 }
 0x177   : > { %v1589_v25 = vmax.f32 %v1579_v26, 0.0  ;;  %v1563_v24 = vadd.f32 %v1530_v50, %v1420_v39  ;;  %v2244_v55 = vpop.f32.mrf.mxu0  ;;  %v1116_v39 = vadd.f32 %v2988_v16, %v2967_v51  ;;  %v1261_v41 = vadd.f32 %v2979_v56, %v1115_v17 }
 0x178   : > { %v1390_v14 = vpop.f32.mrf.mxu1 }
 0x179   : > { %v1895_v32 = vpack.c.bf16 %v1589_v25, %v1588_v54  ;;  %v1421_v19 = vadd.f32 %v1390_v14, %v1256_v44  ;;  %v1541_v37 = vpop.f32.mrf.mxu0  ;;  %v1580_v22 = vadd.f32 %v2995_v36, %v1563_v24  ;;  %v1262_v14 = vadd.f32 %v2983_v0, %v1116_v39 }
 0x17a   : > { %v2213_v35 = vpop.f32.mrf.mxu1 }
 0x17b   : > { %1896 = vst [vmem:[%s3005_s20] sm:$0xff] %v1895_v32   ;;  %v1564_v2 = vadd.f32 %v1533_v31, %v1421_v19  ;;  %v2245_v48 = vpop.f32.mrf.mxu0  ;;  %v1590_v12 = vmax.f32 %v1580_v22, 0.0 }
 0x17c   : > { %v1395_v57 = vpop.f32.mrf.mxu1 }
 0x17d   : > { %v1581_v34 = vadd.f32 %v2995_v36, %v1564_v2  ;;  %v1422_v3 = vadd.f32 %v1395_v57, %v1257_v46  ;;  %v1546_v18 = vpop.f32.mrf.mxu0 }
 0x17e   : > { %v2216_v20 = vpop.f32.mrf.mxu1 }
 0x17f   : > { %v1591_v27 = vmax.f32 %v1581_v34, 0.0  ;;  %v1565_v29 = vadd.f32 %v1538_v1, %v1422_v3  ;;  %v2248_v38 = vpop.f32.mrf.mxu0 }
 0x180   : > { %v1398_v42 = vpop.f32.mrf.mxu1 }
 0x181   : > { %v1900_v8 = vpack.c.bf16 %v1591_v27, %v1590_v12  ;;  %v1423_v40 = vadd.f32 %v1398_v42, %v1258_v43  ;;  %v1549_v50 = vpop.f32.mrf.mxu0  ;;  %v1582_v28 = vadd.f32 %v2995_v36, %v1565_v29 }
 0x182   : > { %v2217_v10 = vpop.f32.mrf.mxu1 }
 0x183   : > { %1917 = vst [vmem:[%s3005_s20 + $0x8] sm:$0xff] %v1900_v8   ;;  %v1566_v4 = vadd.f32 %v1541_v37, %v1423_v40  ;;  %v2249_v11 = vpop.f32.mrf.mxu0  ;;  %v1592_v47 = vmax.f32 %v1582_v28, 0.0 }
 0x184   : > { %v1403_v58 = vpop.f32.mrf.mxu1 }
 0x185   : > { %v1583_v45 = vadd.f32 %v2995_v36, %v1566_v4  ;;  %v1424_v13 = vadd.f32 %v1403_v58, %v1259_v7  ;;  %v1554_v33 = vpop.f32.mrf.mxu0 }
 0x186   : > { %v2220_v31 = vpop.f32.mrf.mxu1 }
 0x187   : > { %v1593_v9 = vmax.f32 %v1583_v45, 0.0  ;;  %v1567_v15 = vadd.f32 %v1546_v18, %v1424_v13  ;;  %v2252_v61 = vpop.f32.mrf.mxu0 }
 0x188   : > { %v1406_v30 = vpop.f32.mrf.mxu1 }
 0x189   : > { %v1905_v23 = vpack.c.bf16 %v1593_v9, %v1592_v47  ;;  %v1425_v52 = vadd.f32 %v1406_v30, %v1260_v49  ;;  %v1557_v21 = vpop.f32.mrf.mxu0  ;;  %v1584_v1 = vadd.f32 %v2995_v36, %v1567_v15 }
 0x18a   : > { %v2221_v26 = vpop.f32.mrf.mxu1 }
 0x18b   : > { %1918 = vst [vmem:[%s3005_s20 + $0x10] sm:$0xff] %v1905_v23   ;;  %v1568_v53 = vadd.f32 %v1549_v50, %v1425_v52  ;;  %v2253_v6 = vpop.f32.mrf.mxu0  ;;  %v1594_v25 = vmax.f32 %v1584_v1, 0.0 }
 0x18c   : > { %v1411_v60 = vpop.f32.mrf.mxu1 }
 0x18d   : > { %v1585_v44 = vadd.f32 %v2995_v36, %v1568_v53  ;;  %v1426_v5 = vadd.f32 %v1411_v60, %v1261_v41 }
 0x18e   : > { %v2224_v54 = vpop.f32.mrf.mxu1 }
 0x18f   : > { %v1595_v24 = vmax.f32 %v1585_v44, 0.0  ;;  %v1569_v55 = vadd.f32 %v1554_v33, %v1426_v5 }
 0x190   : > { %v1414_v51 = vpop.f32.mrf.mxu1 }
 0x191   : > { %v1910_v16 = vpack.c.bf16 %v1595_v24, %v1594_v25  ;;  %v1427_v32 = vadd.f32 %v1414_v51, %v1262_v14  ;;  %v1586_v37 = vadd.f32 %v2995_v36, %v1569_v55 }
 0x192   : > { %v2225_v19 = vpop.f32.mrf.mxu1 }
 0x193   : > { %1919 = vst [vmem:[%s3005_s20 + $0x18] sm:$0xff] %v1910_v16   ;;  %v1570_v56 = vadd.f32 %v1557_v21, %v1427_v32  ;;  %v1596_v35 = vmax.f32 %v1586_v37, 0.0 }
 0x195   : > { %v1587_v63 = vadd.f32 %v2995_v36, %v1570_v56 }
 0x197   : > { %v1597_v22 = vmax.f32 %v1587_v63, 0.0 }
 0x199   : > { %v1915_v2 = vpack.c.bf16 %v1597_v22, %v1596_v35 }
 0x19b   : > { %1920 = vst [vmem:[%s3005_s20 + $0x20] sm:$0xff] %v1915_v2  }
 0x19c PF: > { %s13_s12 = sadd.s32 1, %s2330_s12  }
 0x19d   : > { %p10_p4 = scmp.ge.s32.totalorder %s13_s12, 10  }
 0x19f   :  { %12 = sbr.rel (!%p10_p4) target bundleno = 1 (0x1), region = 70 }

// kernel: vgg_loss.14
= control target key start
LH: loop header
LB: loop body
LE: loop exit
PB: predicated region body
PF: predicated region fallthrough
CT: control target
= control target key end

     0   :  { %s352_s6 = smov 0   ;;  %s354_s7 = smov 0   ;;  %s385_s0 = inlined_call_operand.vmem [shape: bf16[8,4,2,4,256], index: 0, kind: input, shape index: {}]   ;;  %s386_s1 = inlined_call_operand.vmem [shape: bf16[8,4,4,128], index: 1, kind: output, shape index: {}]  }
   0x1   :  { %s356_s8 = smov 0  }
   0x2 LB: > { %s23_s9 = sadd.s32 1, %s336_s7  ;;  %p285_p0 = scmp.ge.s32.totalorder %s340_s8, 1  ;;  %s340_s8 = sphi %s356_s8, %s11_s8   ;;  %s336_s7 = sphi %s354_s7, %s388_s7   ;;  %s332_s6 = sphi %s352_s6, %s387_s6  }
   0x3   : > { %p25_p1 = scmp.ge.s32.totalorder %s23_s9, 8  ;;  %p109_p2 = scmp.lt.s32.totalorder %s340_s8, 9 }
   0x5   : > { %s390_s9 = smov (%p25_p1, %s23_s9), 0  ;;  %p110_p3 = pnand %p285_p0, %p109_p2 }
   0x6   : > { %p139_p4 = scmp.lt.s32.totalorder (!%p110_p3), %s332_s6, 7 }
   0x7   : > { %113 = sbr.rel (%p110_p3) target bundleno = 25 (0x19), region = 24 }
   0xc   : > { %s392_s6 = smov (!%p139_p4, %s332_s6), 7 }
   0xd   : > { %s292_s10 = sshll.u32 %s392_s6, 5  ;;  %s293_s14 = sshll.u32 %s392_s6, 3 }
   0xe   : > { %s147_s13 = scalar_lea.vmem %s385_s0, %s292_s10  ;;  %s157_s17 = scalar_lea.vmem %s386_s1, %s293_s14 }
   0xf   : > { %v159_v0 = vld [vmem:[%s147_s13] sm:$0xf]  ;;  %v160_v1 = vld [vmem:[%s147_s13 + $0x4] sm:$0xf]  ;;  %v161_v2 = vld [vmem:[%s147_s13 + $0x8] sm:$0xf] }
  0x10   : > { %v167_v3 = vmax.bf16 %v160_v1, %v159_v0  ;;  %v162_v4 = vld [vmem:[%s147_s13 + $0xc] sm:$0xf]  ;;  %v163_v5 = vld [vmem:[%s147_s13 + $0x10] sm:$0xf]  ;;  %v164_v6 = vld [vmem:[%s147_s13 + $0x14] sm:$0xf] }
  0x11   : > { %v168_v7 = vmax.bf16 %v162_v4, %v161_v2  ;;  %v169_v8 = vmax.bf16 %v164_v6, %v163_v5  ;;  %v165_v9 = vld [vmem:[%s147_s13 + $0x18] sm:$0xf]  ;;  %v166_v10 = vld [vmem:[%s147_s13 + $0x1c] sm:$0xf] }
  0x12   : > { %v175_v11 = vrot.slane %v167_v3, 2  ;;  %v170_v12 = vmax.bf16 %v166_v10, %v165_v9 }
  0x13   : > { %v176_v13 = vrot.slane %v168_v7, 2  ;;  %v177_v14 = vrot.slane %v169_v8, 2 }
  0x14   : > { %v183_v15 = vmax.bf16 %v175_v11, %v167_v3  ;;  %v178_v16 = vrot.slane %v170_v12, 2 }
  0x15   : > { %v184_v17 = vmax.bf16 %v176_v13, %v168_v7  ;;  %v185_v18 = vmax.bf16 %v177_v14, %v169_v8 }
  0x16   : > { %187 = vst [vmem:[%s157_s17] sm:$0x3] %v183_v15  ;;  %v186_v19 = vmax.bf16 %v178_v16, %v170_v12 }
  0x17   : > { %188 = vst [vmem:[%s157_s17 + $0x2] sm:$0x3] %v184_v17  ;;  %189 = vst [vmem:[%s157_s17 + $0x4] sm:$0x3] %v185_v18 }
  0x18   : > { %190 = vst [vmem:[%s157_s17 + $0x6] sm:$0x3] %v186_v19 }
  0x19 PF: > { %s11_s8 = sadd.s32 1, %s340_s8   ;;  %s387_s6 = smov %s336_s7 }
  0x1a   : > { %p8_p5 = scmp.ge.s32.totalorder %s11_s8, 10   ;;  %s388_s7 = smov %s390_s9 }
  0x1c   :  { %10 = sbr.rel (!%p8_p5) target bundleno = 2 (0x2), region = 54 }

// kernel: vgg_loss.13
= control target key start
LH: loop header
LB: loop body
LE: loop exit
PB: predicated region body
PF: predicated region fallthrough
CT: control target
= control target key end

     0   :  { %s2758_s12 = smov 0   ;;  %s3510_s0 = inlined_call_operand.vmem [shape: bf16[8,110,128], index: 0, kind: input, shape index: {}]   ;;  %s3511_s1 = inlined_call_operand.vmem [shape: bf16[9,128,128], index: 1, kind: input, shape index: {}]   ;;  %s3512_s2 = inlined_call_operand.vmem [shape: f32[1,128], index: 2, kind: input, shape index: {}]   ;;  %s3513_s3 = inlined_call_operand.vmem [shape: bf16[8,80,128], index: 3, kind: output, shape index: {}]  }
   0x1 LB: > { %s1900_s13 = sadd.s32 4294967295, %s2734_s12   ;;  %p1904_p0 = scmp.ge.s32.totalorder %s2734_s12, 1  ;;  %s2734_s12 = sphi %s2758_s12, %s13_s12  }
   0x2   : > { %p137_p1 = scmp.lt.s32.totalorder %s2734_s12, 9 }
   0x4   : > { %p138_p2 = pnand %p1904_p0, %p137_p1 }
   0x5   : > { %p161_p3 = scmp.lt.s32.totalorder (!%p138_p2), %s1900_s13, 7 }
   0x6   : > { %141 = sbr.rel (%p138_p2) target bundleno = 426 (0x1aa), region = 32 }
   0xb   : > { %v2642_v0 = vld [vmem:[%s3511_s1 + $0x78] sm:$0xff]   ;;  %v2736_v1 = vmov 0.0   ;;  %v2644_v3 = vld [vmem:[%s3511_s1 + $0x70] sm:$0xff]   ;;  %vm2737_vm0 = vmmov 0   ;;  %s3515_s13 = smov (!%p161_p3, %s1900_s13), 7  ;;  %v2646_v5 = vld [vmem:[%s3511_s1 + $0x68] sm:$0xff]  }
   0xc   : > { %2290 = vmatprep.subr.bf16.mxu0 %v2736_v1  ;;  %2326 = vmatprep.subr.bf16.mxu1 %v2736_v1  ;;  %v2643_v2 = vld [vmem:[%s3511_s1 + $0x38] sm:$0xff]   ;;  %v2645_v4 = vld [vmem:[%s3511_s1 + $0x30] sm:$0xff]   ;;  %v2647_v6 = vld [vmem:[%s3511_s1 + $0x28] sm:$0xff]   ;;  %s2630_s26 = smul.u32 56, %s3515_s13  ;;  %vm237_vm1 = vsmask.f32 7424 }
   0xd   : > { %2291 = vmatpush3.bf16.msra.mxu0 %v2642_v0  ;;  %2306 = vmatprep.mubr.msk.bf16.mxu0 %vm2737_vm0, %v2736_v1  ;;  %v2648_v7 = vld [vmem:[%s3511_s1 + $0x60] sm:$0xff]   ;;  %v2650_v9 = vld [vmem:[%s3511_s1 + $0x58] sm:$0xff]   ;;  %v2652_v16 = vld [vmem:[%s3511_s1 + $0x50] sm:$0xff]   ;;  %vm552_vm2 = vcmask 1046528   ;;  %vm1100_vm3 = vcmask 1045504   ;;  %vm1620_vm5 = vcmask 1044480  }
   0xe   : > { %2327 = vmatpush3.bf16.msra.mxu1 %v2643_v2  ;;  %2292 = vmatprep.subr.bf16.mxu0 %v2736_v1  ;;  %v2649_v8 = vld [vmem:[%s3511_s1 + $0x20] sm:$0xff]   ;;  %s2808_s6 = scalar_lea.vmem %s3510_s0, %s2630_s26  ;;  %v2651_v10 = vld [vmem:[%s3511_s1 + $0x18] sm:$0xff]   ;;  %v2653_v18 = vld [vmem:[%s3511_s1 + $0x10] sm:$0xff]   ;;  %vm1433_vm4 = vsmask.f32 5376  ;;  %s2631_s16 = smul.u32 40, %s3515_s13 }
   0xf   : > { %2328 = vmatprep.subr.bf16.mxu1 %v2736_v1  ;;  %2342 = vmatprep.mubr.msk.bf16.mxu1 %vm2737_vm0, %v2736_v1  ;;  %v172_v11 = vld [vmem:[%s2808_s6] sm:$0xf]  ;;  %v2820_v12 = vld [vmem:[%s2808_s6 + $0x4] sm:$0xf]  ;;  %v2823_v13 = vld [vmem:[%s2808_s6 + $0x8] sm:$0xf] }
  0x10   : > { %v2826_v14 = vld [vmem:[%s2808_s6 + $0xc] sm:$0xf]  ;;  %v2829_v15 = vcombine.low %v172_v11, %v2820_v12  ;;  %v2846_v21 = vld [vmem:[%s2808_s6 + $0x10] sm:$0xf]  ;;  %v2849_v22 = vld [vmem:[%s2808_s6 + $0x14] sm:$0xf]  ;;  %s3487_s18 = scalar_lea.vmem %s3513_s3, %s2631_s16 }
  0x11   : > { %2293 = vmatpush3.bf16.msra.mxu0 %v2644_v3  ;;  %v2836_v17 = vcombine.low %v2823_v13, %v2826_v14  ;;  %v2654_v24 = vld [vmem:[%s3511_s1 + $0x48] sm:$0xff]   ;;  %v2857_v25 = vcombine.low %v2846_v21, %v2849_v22  ;;  %v2656_v32 = vld [vmem:[%s3511_s1 + $0x40] sm:$0xff]   ;;  %v2660_v41 = vld [vmem:[%s3511_s1 + $0xb8] sm:$0xff]   ;;  %vm893_vm6 = vsmask.f32 6400 }
  0x12   : > { %2329 = vmatpush3.bf16.msra.mxu1 %v2645_v4  ;;  %2294 = vmatprep.subr.bf16.mxu0 %v2736_v1  ;;  %v241_v19 = vshll.u32 %v2829_v15, 16  ;;  %v239_v26 = vshrl.u32 %v2829_v15, 16  ;;  %v2655_v30 = vld [vmem:[%s3511_s1 + $0x8] sm:$0xff]   ;;  %v2657_v35 = vld [vmem:[%s3511_s1] sm:$0xff]   ;;  %v2887_v42 = vld [vmem:[%s2808_s6 + $0x18] sm:$0xf] }
  0x13   : > { %2330 = vmatprep.subr.bf16.mxu1 %v2736_v1  ;;  %v246_v20 = vshll.u32 %v2836_v17, 16  ;;  %v250_v23 = vshrl.u32 %v2836_v17, 16  ;;  %v254_v31 = vshll.u32 %v2857_v25, 16  ;;  %v258_v33 = vshrl.u32 %v2857_v25, 16  ;;  %v2891_v44 = vld [vmem:[%s2808_s6 + $0x1c] sm:$0xf] }
  0x14   : > { %v243_v27 = vrot.slane %v241_v19, 1  ;;  %v2663_v45 = vld [vmem:[%s3511_s1 + $0xf8] sm:$0xff]   ;;  %v2900_v46 = vcombine.low %v2887_v42, %v2891_v44  ;;  %v2661_v47 = vld [vmem:[%s3511_s1 + $0xb0] sm:$0xff]   ;;  %v2907_v50 = vld [vmem:[%s2808_s6 + $0x28] sm:$0xf] }
  0x15   : > { %2295 = vmatpush3.bf16.msra.mxu0 %v2646_v5  ;;  %v2860_v28 = vrot.slane %v246_v20, 3  ;;  %v2862_v29 = vrot.slane %v250_v23, 2  ;;  %v1438_v36 = vrot.slane %v254_v31, 3  ;;  %v248_v38 = vrot.slane %v246_v20, 1  ;;  %v2910_v51 = vld [vmem:[%s2808_s6 + $0x2c] sm:$0xf] }
  0x16   : > { %2331 = vmatpush3.bf16.msra.mxu1 %v2647_v6  ;;  %2296 = vmatprep.subr.bf16.mxu0 %v2736_v1  ;;  %v244_v37 = vor.u32 %v243_v27, %v239_v26  ;;  %v1437_v39 = vrot.slane %v258_v33, 2  ;;  %v256_v49 = vrot.slane %v254_v31, 1  ;;  %v2917_v52 = vcombine.low %v2907_v50, %v2910_v51  ;;  %v2665_v53 = vld [vmem:[%s3511_s1 + $0xf0] sm:$0xff]   ;;  %v2664_v54 = vld [vmem:[%s3511_s1 + $0xa8] sm:$0xff]   ;;  %v2932_v57 = vld [vmem:[%s2808_s6 + $0x20] sm:$0xf] }
  0x17   : > { %2332 = vmatprep.subr.bf16.mxu1 %v2736_v1  ;;  %v1436_v34 = vor.u32 %v2860_v28, %v2862_v29  ;;  %v252_v48 = vor.u32 %v250_v23, %v248_v38  ;;  %v262_v55 = vshll.u32 %v2900_v46, 16  ;;  %v2935_v58 = vld [vmem:[%s2808_s6 + $0x24] sm:$0xf]  ;;  %v2668_v59 = vld [vmem:[%s3511_s1 + $0xe8] sm:$0xff]   ;;  %v2669_v2 = vld [vmem:[%s3511_s1 + $0x98] sm:$0xff]   ;;  %v266_v4 = vshrl.u32 %v2900_v46, 16 }
  0x18   : > { %v2881_v40 = vor.u32 %v1438_v36, %v1437_v39  ;;  %v249_v43 = vsel %vm237_vm1, %v244_v37, %v248_v38  ;;  %v260_v60 = vor.u32 %v258_v33, %v256_v49  ;;  %v2667_v62 = vld [vmem:[%s3511_s1 + $0xa0] sm:$0xff]   ;;  %v2949_v63 = vcombine.low %v2932_v57, %v2935_v58  ;;  %v2672_v6 = vld [vmem:[%s3511_s1 + $0xd8] sm:$0xff]   ;;  %v2674_v11 = vld [vmem:[%s3511_s1 + $0xd0] sm:$0xff]  }
  0x19   : > { %2297 = vmatpush3.bf16.msra.mxu0 %v2648_v7  ;;  %v257_v56 = vsel %vm237_vm1, %v252_v48, %v256_v49  ;;  %v264_v61 = vrot.slane %v262_v55, 1  ;;  %v2670_v0 = vld [vmem:[%s3511_s1 + $0xe0] sm:$0xff]   ;;  %v2675_v20 = vld [vmem:[%s3511_s1 + $0x88] sm:$0xff]   ;;  %v3023_v33 = vcombine.low %v2826_v14, %v2846_v21  ;;  %v554_v36 = vrot.slane %v2836_v17, 1  ;;  %v2684_v21 = vld [vmem:[%s3511_s1 + $0x138] sm:$0xff]  }
  0x1a   : > { %2333 = vmatpush3.bf16.msra.mxu1 %v2649_v8  ;;  %2298 = vmatprep.subr.bf16.mxu0 %v2736_v1  ;;  %v270_v5 = vshll.u32 %v2949_v63, 16  ;;  %v2679_v23 = vld [vmem:[%s3511_s1 + $0xc8] sm:$0xff]   ;;  %v2680_v27 = vld [vmem:[%s3511_s1 + $0x80] sm:$0xff]   ;;  %v3038_v14 = vcombine.low %v2849_v22, %v2887_v42  ;;  %v556_v37 = vrot.slane %v2857_v25, 1  ;;  %v1269_v39 = vrot.slane %v2836_v17, 2  ;;  %v2685_v22 = vld [vmem:[%s3511_s1 + $0x130] sm:$0xff]  }
  0x1b   : > { %2334 = vmatprep.subr.bf16.mxu1 %v2736_v1  ;;  %v265_v3 = vsel %vm237_vm1, %v260_v60, %v264_v61  ;;  %v268_v7 = vor.u32 %v266_v4, %v264_v61  ;;  %v2687_v42 = vld [vmem:[%s3511_s1 + $0x178] sm:$0xff]   ;;  %v1441_v49 = vrot.slane %v266_v4, 2  ;;  %v3071_v28 = vcombine.low %v2891_v44, %v2932_v57  ;;  %v2688_v57 = vld [vmem:[%s3511_s1 + $0x128] sm:$0xff]  }
  0x1c   : > { %v272_v8 = vrot.slane %v270_v5, 1  ;;  %v1446_v44 = vrot.slane %v270_v5, 3  ;;  %v1453_v5 = vshll.u32 %v2917_v52, 16 }
  0x1d   : > { %2299 = vmatpush3.bf16.msra.mxu0 %v2650_v9  ;;  %v2673_v9 = vld [vmem:[%s3511_s1 + $0x90] sm:$0xff]  }
  0x1e   : > { %2335 = vmatpush3.bf16.msra.mxu1 %v2651_v10  ;;  %2300 = vmatprep.subr.bf16.mxu0 %v2736_v1  ;;  %v2981_v10 = vcombine.low %v2907_v50, %v2907_v50 }
  0x1f   : > { %2336 = vmatprep.subr.bf16.mxu1 %v2736_v1 }
  0x20   : > { %v278_v19 = vshll.u32 %v2981_v10, 16 }
  0x21   : > { %2301 = vmatpush3.bf16.msra.mxu0 %v2652_v16  ;;  %v273_v16 = vsel %vm237_vm1, %v268_v7, %v272_v8  ;;  %v2692_v7 = vld [vmem:[%s3511_s1 + $0x168] sm:$0xff]  }
  0x22   : > { %2337 = vmatpush3.bf16.msra.mxu1 %v2653_v18  ;;  %2302 = vmatprep.subr.bf16.mxu0 %v2736_v1  ;;  %v274_v18 = vshrl.u32 %v2949_v63, 16  ;;  %v280_v26 = vrot.slane %v278_v19, 1  ;;  %v1622_v19 = vrot.slane %v2857_v25, 3 }
  0x23   : > { %2338 = vmatprep.subr.bf16.mxu1 %v2736_v1 }
  0x25   : > { %2303 = vmatpush3.bf16.msra.mxu0 %v2654_v24  ;;  %v276_v24 = vor.u32 %v274_v18, %v272_v8 }
  0x26   : > { %2339 = vmatpush3.bf16.msra.mxu1 %v2655_v30  ;;  %2304 = vmatprep.subr.bf16.mxu0 %v2736_v1  ;;  %v2681_v30 = vld [vmem:[%s3511_s1 + $0xc0] sm:$0xff]  }
  0x27   : > { %2340 = vmatprep.subr.bf16.mxu1 %v2736_v1  ;;  %v281_v31 = vsel %vm237_vm1, %v276_v24, %v280_v26  ;;  %v2691_v24 = vld [vmem:[%s3511_s1 + $0x120] sm:$0xff]  }
  0x29   : > { %2305 = vmatpush3.bf16.msra.mxu0 %v2656_v32  ;;  %v3019_v32 = vcombine.low %v2820_v12, %v2823_v13  ;;  %v730_v13 = vrot.slane %v3023_v33, 1 }
  0x2a   : > { %2341 = vmatpush3.bf16.msra.mxu1 %v2657_v35  ;;  %2362 = vmatprep.subr.bf16.mxu0 %v2736_v1  ;;  %v553_v35 = vrot.slane %v2829_v15, 1 }
  0x2b   : > { %2398 = vmatprep.subr.bf16.mxu1 %v2736_v1  ;;  %v729_v12 = vrot.slane %v3019_v32, 1 }
  0x2c   : > { %2307 = vmatmul.mubr.bf16.vlgmr.msra.gmra.mxu0 %v249_v43  ;;  %v3059_v43 = vsel %vm1433_vm4, %v1436_v34, %v2881_v40  ;;  %v1442_v34 = vrot.slane %v262_v55, 3 }
  0x2d   : > { %2343 = vmatmul.mubr.bf16.vlgmr.msra.gmra.mxu1 %v2829_v15  ;;  %2363 = vmatpush3.bf16.msra.mxu0 %v2660_v41  ;;  %v555_v15 = vsel %vm552_vm2, %v553_v35, %v554_v36  ;;  %v731_v38 = vsel %vm552_vm2, %v729_v12, %v730_v13  ;;  %v1270_v41 = vrot.slane %v2857_v25, 2  ;;  %v1624_v35 = vrot.slane %v2900_v46, 3  ;;  %v2694_v12 = vld [vmem:[%s3511_s1 + $0x160] sm:$0xff]  }
  0x2e   : > { %2364 = vmatprep.subr.bf16.mxu0 %v2736_v1  ;;  %2310 = vmatprep.mubr.msk.bf16.mxu0 %vm2737_vm0, %v2736_v1  ;;  %v1443_v55 = vor.u32 %v1442_v34, %v1441_v49  ;;  %v3170_v34 = vcombine.low %v2935_v58, %v2907_v50  ;;  %v560_v50 = vrot.slane %v2949_v63, 1  ;;  %v2696_v58 = vld [vmem:[%s3511_s1 + $0x110] sm:$0xff]  }
  0x2f   : > { %2346 = vmatprep.mubr.msk.bf16.mxu1 %vm2737_vm0, %v2736_v1  ;;  %2399 = vmatpush3.bf16.msra.mxu1 %v2663_v45  ;;  %v1272_v45 = vrot.slane %v2900_v46, 2  ;;  %v3064_v48 = vsel %vm1100_vm3, %v1269_v39, %v1270_v41  ;;  %v3152_v39 = vsel %vm1620_vm5, %v1622_v19, %v1624_v35 }
  0x30   : > { %2400 = vmatprep.subr.bf16.mxu1 %v2736_v1  ;;  %v3104_v4 = vsel %vm1433_vm4, %v2881_v40, %v1443_v55 }
  0x31   : > { %2365 = vmatpush3.bf16.msra.mxu0 %v2661_v47  ;;  %v732_v47 = vrot.slane %v3038_v14, 1  ;;  %v3074_v29 = vsel %vm1100_vm3, %v1270_v41, %v1272_v45 }
  0x32   : > { %2366 = vmatprep.subr.bf16.mxu0 %v2736_v1 }
  0x33   : > { %2401 = vmatpush3.bf16.msra.mxu1 %v2665_v53  ;;  %v558_v53 = vrot.slane %v2900_v46, 1 }
  0x34   : > { %2311 = vmatmul.mubr.bf16.gmra.mxu0 %v257_v56  ;;  %2402 = vmatprep.subr.bf16.mxu1 %v2736_v1  ;;  %v1274_v56 = vrot.slane %v2949_v63, 2 }
  0x35   : > { %2347 = vmatmul.mubr.bf16.gmra.mxu1 %v2836_v17  ;;  %2367 = vmatpush3.bf16.msra.mxu0 %v2664_v54  ;;  %v2689_v54 = vld [vmem:[%s3511_s1 + $0x170] sm:$0xff]  }
  0x36   : > { %2314 = vmatprep.mubr.msk.bf16.mxu0 %vm2737_vm0, %v2736_v1  ;;  %2350 = vmatprep.mubr.msk.bf16.mxu1 %vm2737_vm0, %v2736_v1  ;;  %v3094_v60 = vsel %vm1100_vm3, %v1272_v45, %v1274_v56  ;;  %v2693_v45 = vld [vmem:[%s3511_s1 + $0x118] sm:$0xff]  }
  0x37   : > { %2368 = vmatprep.subr.bf16.mxu0 %v2736_v1  ;;  %2403 = vmatpush3.bf16.msra.mxu1 %v2668_v59  ;;  %v1445_v59 = vrot.slane %v274_v18, 2  ;;  %v1621_v18 = vrot.slane %v2836_v17, 3 }
  0x38   : > { %2404 = vmatprep.subr.bf16.mxu1 %v2736_v1 }
  0x39   : > { %2369 = vmatpush3.bf16.msra.mxu0 %v2667_v62  ;;  %v1447_v61 = vor.u32 %v1446_v44, %v1445_v59  ;;  %v1276_v62 = vrot.slane %v2917_v52, 2  ;;  %v3134_v17 = vsel %vm1620_vm5, %v1621_v18, %v1622_v19  ;;  %v2698_v44 = vld [vmem:[%s3511_s1 + $0x108] sm:$0xff]   ;;  %v912_v19 = vshrl.u32 %v3038_v14, 16 }
  0x3a   : > { %2370 = vmatprep.subr.bf16.mxu0 %v2736_v1 }
  0x3b   : > { %2405 = vmatpush3.bf16.msra.mxu1 %v2670_v0  ;;  %v1450_v0 = vshrl.u32 %v2917_v52, 16  ;;  %v3115_v8 = vsel %vm1433_vm4, %v1443_v55, %v1447_v61  ;;  %v3211_v55 = vcombine.low %v2910_v51, %v2910_v51  ;;  %v903_v51 = vshrl.u32 %v3023_v33, 16 }
  0x3c   : > { %2315 = vmatmul.mubr.bf16.gmra.mxu0 %v265_v3  ;;  %2406 = vmatprep.subr.bf16.mxu1 %v2736_v1  ;;  %v734_v3 = vrot.slane %v3071_v28, 1 }
  0x3d   : > { %2351 = vmatmul.mubr.bf16.gmra.mxu1 %v2857_v25  ;;  %2371 = vmatpush3.bf16.msra.mxu0 %v2669_v2  ;;  %v557_v2 = vsel %vm552_vm2, %v554_v36, %v556_v37  ;;  %v1452_v40 = vrot.slane %v1450_v0, 2  ;;  %v2695_v25 = vld [vmem:[%s3511_s1 + $0x158] sm:$0xff]   ;;  %v2701_v0 = vld [vmem:[%s3511_s1 + $0x100] sm:$0xff]  }
  0x3e   : > { %2318 = vmatprep.mubr.msk.bf16.mxu0 %vm2737_vm0, %v2736_v1  ;;  %2354 = vmatprep.mubr.msk.bf16.mxu1 %vm2737_vm0, %v2736_v1 }
  0x3f   : > { %2372 = vmatprep.subr.bf16.mxu0 %v2736_v1  ;;  %2407 = vmatpush3.bf16.msra.mxu1 %v2672_v6  ;;  %v733_v6 = vsel %vm552_vm2, %v730_v13, %v732_v47 }
  0x40   : > { %2408 = vmatprep.subr.bf16.mxu1 %v2736_v1 }
  0x41   : > { %2373 = vmatpush3.bf16.msra.mxu0 %v2673_v9  ;;  %v3118_v9 = vsel %vm1100_vm3, %v1274_v56, %v1276_v62  ;;  %v2697_v56 = vld [vmem:[%s3511_s1 + $0x150] sm:$0xff]  }
  0x42   : > { %2374 = vmatprep.subr.bf16.mxu0 %v2736_v1 }
  0x43   : > { %2409 = vmatpush3.bf16.msra.mxu1 %v2674_v11  ;;  %v1455_v11 = vrot.slane %v1453_v5, 3 }
  0x44   : > { %2319 = vmatmul.mubr.bf16.gmra.mxu0 %v273_v16  ;;  %2410 = vmatprep.subr.bf16.mxu1 %v2736_v1  ;;  %v2726_v16 = vld [vmem:[%s2808_s6 + $0x30] ss:$0 sps:$4 sm:$0xff]  }
  0x45   : > { %2355 = vmatmul.mubr.bf16.gmra.mxu1 %v2900_v46  ;;  %2322 = vmatprep.mubr.msk.bf16.mxu0 %vm2737_vm0, %v2736_v1  ;;  %v1456_v26 = vor.u32 %v1455_v11, %v1452_v40  ;;  %v1630_v36 = vrot.slane %v2726_v16, 3  ;;  %v2700_v46 = vld [vmem:[%s3511_s1 + $0x148] sm:$0xff]  }
  0x46   : > { %2358 = vmatprep.mubr.msk.bf16.mxu1 %vm2737_vm0, %v2736_v1  ;;  %2375 = vmatpush3.bf16.msra.mxu0 %v2675_v20  ;;  %v1626_v20 = vrot.slane %v2949_v63, 3 }
  0x47   : > { %2411 = vmatpush3.bf16.msra.mxu1 %v2679_v23  ;;  %2376 = vmatprep.subr.bf16.mxu0 %v2736_v1  ;;  %v1628_v23 = vrot.slane %v2917_v52, 3  ;;  %v3145_v13 = vsel %vm1433_vm4, %v1447_v61, %v1456_v26  ;;  %v898_v61 = vshll.u32 %v3019_v32, 16 }
  0x48   : > { %2412 = vmatprep.subr.bf16.mxu1 %v2736_v1 }
  0x49   : > { %v3137_v52 = vsel %vm1620_vm5, %v1626_v20, %v1628_v23  ;;  %v3155_v41 = vsel %vm1620_vm5, %v1628_v23, %v1630_v36  ;;  %v1101_v23 = vrot.slane %v3019_v32, 2  ;;  %v2705_v36 = vld [vmem:[%s3511_s1 + $0x1f8] sm:$0xff]  }
  0x4a   : > { %2377 = vmatpush3.bf16.msra.mxu0 %v2680_v27  ;;  %v1278_v27 = vrot.slane %v2726_v16, 2 }
  0x4b   : > { %2413 = vmatpush3.bf16.msra.mxu1 %v2681_v30  ;;  %2434 = vmatprep.subr.bf16.mxu0 %v2736_v1  ;;  %v1459_v30 = vshrl.u32 %v2726_v16, 16 }
  0x4c   : > { %2323 = vmatmul.mubr.bf16.gmra.mxu0 %v281_v31  ;;  %2470 = vmatprep.subr.bf16.mxu1 %v2736_v1  ;;  %v1462_v31 = vshll.u32 %v2726_v16, 16 }
  0x4d   : > { %2359 = vmatmul.mubr.bf16.gmra.mxu1 %v2949_v63  ;;  %2378 = vmatprep.mubr.msk.bf16.mxu0 %vm2737_vm0, %v2736_v1  ;;  %v561_v63 = vsel %vm552_vm2, %v558_v53, %v560_v50 }
  0x4e   : > { %2414 = vmatprep.mubr.msk.bf16.mxu1 %vm2737_vm0, %v2736_v1 }
  0x54   : > { %2379 = vmatmul.mubr.bf16.vlgmr.msra.gmra.mxu0 %v555_v15  ;;  %v3148_v15 = vsel %vm1100_vm3, %v1276_v62, %v1278_v27  ;;  %v906_v62 = vshll.u32 %v3023_v33, 16  ;;  %v2703_v27 = vld [vmem:[%s3511_s1 + $0x1b8] sm:$0xff]  }
  0x55   : > { %2415 = vmatmul.mubr.bf16.vlgmr.msra.gmra.mxu1 %v731_v38  ;;  %2435 = vmatpush3.bf16.msra.mxu0 %v2684_v21  ;;  %v1461_v21 = vrot.slane %v1459_v30, 2  ;;  %v1464_v38 = vrot.slane %v1462_v31, 3  ;;  %v914_v30 = vrot.slane %v912_v19, 1  ;;  %v1110_v19 = vrot.slane %v3211_v55, 2 }
  0x56   : > { %2436 = vmatprep.subr.bf16.mxu0 %v2736_v1  ;;  %2382 = vmatprep.mubr.msk.bf16.mxu0 %vm2737_vm0, %v2736_v1  ;;  %v908_v40 = vrot.slane %v906_v62, 2 }
  0x57   : > { %2418 = vmatprep.mubr.msk.bf16.mxu1 %vm2737_vm0, %v2736_v1  ;;  %2471 = vmatpush3.bf16.msra.mxu1 %v2687_v42  ;;  %v559_v42 = vsel %vm552_vm2, %v556_v37, %v558_v53  ;;  %v1465_v49 = vor.u32 %v1464_v38, %v1461_v21  ;;  %v562_v53 = vrot.slane %v2981_v10, 1  ;;  %v738_v10 = vrot.slane %v3211_v55, 1 }
  0x58   : > { %2472 = vmatprep.subr.bf16.mxu1 %v2736_v1  ;;  %v924_v21 = vshll.u32 %v3071_v28, 16  ;;  %v1104_v38 = vrot.slane %v3038_v14, 2 }
  0x59   : > { %2437 = vmatpush3.bf16.msra.mxu0 %v2685_v22  ;;  %v3158_v22 = vsel %vm1620_vm5, %v1624_v35, %v1626_v20  ;;  %v3182_v37 = vsel %vm1433_vm4, %v1456_v26, %v1465_v49  ;;  %v915_v20 = vshll.u32 %v3038_v14, 16  ;;  %v2706_v49 = vld [vmem:[%s3511_s1 + $0x1a8] sm:$0xff]  }
  0x5a   : > { %2438 = vmatprep.subr.bf16.mxu0 %v2736_v1 }
  0x5b   : > { %2473 = vmatpush3.bf16.msra.mxu1 %v2689_v54  ;;  %v735_v54 = vsel %vm552_vm2, %v732_v47, %v734_v3  ;;  %v736_v47 = vrot.slane %v3170_v34, 1  ;;  %v917_v31 = vrot.slane %v915_v20, 2  ;;  %v2717_v20 = vld [vmem:[%s3511_s1 + $0x180] sm:$0xff]  }
  0x5c   : > { %2383 = vmatmul.mubr.bf16.gmra.mxu0 %v557_v2  ;;  %2474 = vmatprep.subr.bf16.mxu1 %v2736_v1  ;;  %v2702_v2 = vld [vmem:[%s3511_s1 + $0x140] sm:$0xff]  }
  0x5d   : > { %2419 = vmatmul.mubr.bf16.gmra.mxu1 %v733_v6  ;;  %2439 = vmatpush3.bf16.msra.mxu0 %v2688_v57  ;;  %v737_v59 = vsel %vm552_vm2, %v734_v3, %v736_v47  ;;  %v895_v57 = vshrl.u32 %v3019_v32, 16  ;;  %v563_v3 = vsel %vm552_vm2, %v560_v50, %v562_v53  ;;  %v900_v6 = vrot.slane %v898_v61, 2  ;;  %v2704_v32 = vld [vmem:[%s3511_s1 + $0x1b0] sm:$0xff]   ;;  %v2709_v50 = vld [vmem:[%s3511_s1 + $0x1e8] sm:$0xff]   ;;  %v2710_v53 = vld [vmem:[%s3511_s1 + $0x198] sm:$0xff]  }
  0x5e   : > { %2386 = vmatprep.mubr.msk.bf16.mxu0 %vm2737_vm0, %v2736_v1  ;;  %2422 = vmatprep.mubr.msk.bf16.mxu1 %vm2737_vm0, %v2736_v1  ;;  %v739_v11 = vsel %vm552_vm2, %v736_v47, %v738_v10  ;;  %v2708_v47 = vld [vmem:[%s3511_s1 + $0x1a0] sm:$0xff]   ;;  %v2713_v10 = vld [vmem:[%s3511_s1 + $0x190] sm:$0xff]  }
  0x5f   : > { %2440 = vmatprep.subr.bf16.mxu0 %v2736_v1  ;;  %2475 = vmatpush3.bf16.msra.mxu1 %v2692_v7  ;;  %v897_v5 = vrot.slane %v895_v57, 1  ;;  %v905_v7 = vrot.slane %v903_v51, 1  ;;  %v2712_v51 = vld [vmem:[%s3511_s1 + $0x1d8] sm:$0xff]  }
  0x60   : > { %2476 = vmatprep.subr.bf16.mxu1 %v2736_v1 }
  0x61   : > { %2441 = vmatpush3.bf16.msra.mxu0 %v2691_v24  ;;  %v901_v16 = vor.u32 %v900_v6, %v897_v5  ;;  %v909_v18 = vor.u32 %v908_v40, %v905_v7  ;;  %v1102_v24 = vrot.slane %v3023_v33, 2  ;;  %v918_v33 = vor.u32 %v917_v31, %v914_v30  ;;  %v2714_v5 = vld [vmem:[%s3511_s1 + $0x1d0] sm:$0xff]  }
  0x62   : > { %2442 = vmatprep.subr.bf16.mxu0 %v2736_v1 }
  0x63   : > { %2477 = vmatpush3.bf16.msra.mxu1 %v2694_v12  ;;  %v910_v26 = vsel %vm893_vm6, %v901_v16, %v909_v18  ;;  %v1103_v35 = vsel %vm1100_vm3, %v1101_v23, %v1102_v24  ;;  %v921_v12 = vshrl.u32 %v3071_v28, 16  ;;  %v1105_v14 = vsel %vm1100_vm3, %v1102_v24, %v1104_v38  ;;  %v2716_v16 = vld [vmem:[%s3511_s1 + $0x1c8] sm:$0xff]   ;;  %v2718_v23 = vld [vmem:[%s3511_s1 + $0x1c0] sm:$0xff]  }
  0x64   : > { %2387 = vmatmul.mubr.bf16.gmra.mxu0 %v559_v42  ;;  %2478 = vmatprep.subr.bf16.mxu1 %v2736_v1  ;;  %v2707_v42 = vld [vmem:[%s3511_s1 + $0x1f0] sm:$0xff]  }
  0x65   : > { %2423 = vmatmul.mubr.bf16.gmra.mxu1 %v735_v54  ;;  %2443 = vmatpush3.bf16.msra.mxu0 %v2693_v45  ;;  %v919_v45 = vsel %vm893_vm6, %v909_v18, %v918_v33  ;;  %v923_v54 = vrot.slane %v921_v12, 1 }
  0x66   : > { %2390 = vmatprep.mubr.msk.bf16.mxu0 %vm2737_vm0, %v2736_v1  ;;  %2426 = vmatprep.mubr.msk.bf16.mxu1 %vm2737_vm0, %v2736_v1 }
  0x67   : > { %2444 = vmatprep.subr.bf16.mxu0 %v2736_v1  ;;  %2479 = vmatpush3.bf16.msra.mxu1 %v2695_v25  ;;  %v926_v25 = vrot.slane %v924_v21, 2 }
  0x68   : > { %2480 = vmatprep.subr.bf16.mxu1 %v2736_v1 }
  0x69   : > { %2445 = vmatpush3.bf16.msra.mxu0 %v2696_v58  ;;  %v927_v58 = vor.u32 %v926_v25, %v923_v54 }
  0x6a   : > { %2446 = vmatprep.subr.bf16.mxu0 %v2736_v1 }
  0x6b   : > { %2481 = vmatpush3.bf16.msra.mxu1 %v2697_v56  ;;  %v930_v56 = vshrl.u32 %v3170_v34, 16 }
  0x6c   : > { %2391 = vmatmul.mubr.bf16.gmra.mxu0 %v561_v63  ;;  %2482 = vmatprep.subr.bf16.mxu1 %v2736_v1  ;;  %v933_v63 = vshll.u32 %v3170_v34, 16 }
  0x6d   : > { %2427 = vmatmul.mubr.bf16.gmra.mxu1 %v737_v59  ;;  %2394 = vmatprep.mubr.msk.bf16.mxu0 %vm2737_vm0, %v2736_v1  ;;  %v1106_v59 = vrot.slane %v3071_v28, 2  ;;  %v932_v57 = vrot.slane %v930_v56, 1 }
  0x6e   : > { %2430 = vmatprep.mubr.msk.bf16.mxu1 %vm2737_vm0, %v2736_v1  ;;  %2447 = vmatpush3.bf16.msra.mxu0 %v2698_v44  ;;  %v2711_v44 = vld [vmem:[%s3511_s1 + $0x1e0] sm:$0xff]   ;;  %v935_v61 = vrot.slane %v933_v63, 2 }
  0x6f   : > { %2483 = vmatpush3.bf16.msra.mxu1 %v2700_v46  ;;  %2448 = vmatprep.subr.bf16.mxu0 %v2736_v1  ;;  %v928_v46 = vsel %vm893_vm6, %v918_v33, %v927_v58  ;;  %v1107_v28 = vsel %vm1100_vm3, %v1104_v38, %v1106_v59 }
  0x70   : > { %2484 = vmatprep.subr.bf16.mxu1 %v2736_v1  ;;  %v936_v62 = vor.u32 %v935_v61, %v932_v57 }
  0x72   : > { %2449 = vmatpush3.bf16.msra.mxu0 %v2701_v0  ;;  %v939_v0 = vshrl.u32 %v3211_v55, 16  ;;  %v937_v6 = vsel %vm893_vm6, %v927_v58, %v936_v62 }
  0x73   : > { %2485 = vmatpush3.bf16.msra.mxu1 %v2702_v2  ;;  %2506 = vmatprep.subr.bf16.mxu0 %v2736_v1  ;;  %v942_v2 = vshll.u32 %v3211_v55, 16  ;;  %v2719_v55 = vld [vmem:[%s3511_s1 + $0x238] sm:$0xff]  }
  0x74   : > { %2395 = vmatmul.mubr.bf16.gmra.mxu0 %v563_v3  ;;  %2542 = vmatprep.subr.bf16.mxu1 %v2736_v1  ;;  %v1108_v3 = vrot.slane %v3170_v34, 2  ;;  %v941_v7 = vrot.slane %v939_v0, 1  ;;  %v2715_v34 = vld [vmem:[%s3511_s1 + $0x188] sm:$0xff]  }
  0x75   : > { %2431 = vmatmul.mubr.bf16.gmra.mxu1 %v739_v11  ;;  %2450 = vmatprep.mubr.msk.bf16.mxu0 %vm2737_vm0, %v2736_v1  ;;  %v944_v40 = vrot.slane %v942_v2, 2 }
  0x76   : > { %2486 = vmatprep.mubr.msk.bf16.mxu1 %vm2737_vm0, %v2736_v1  ;;  %v1109_v11 = vsel %vm1100_vm3, %v1106_v59, %v1108_v3 }
  0x77   : > { %v945_v18 = vor.u32 %v944_v40, %v941_v7 }
  0x79   : > { %v946_v24 = vsel %vm893_vm6, %v936_v62, %v945_v18 }
  0x7c   : > { %2451 = vmatmul.mubr.bf16.vlgmr.msra.gmra.mxu0 %v910_v26  ;;  %v1111_v26 = vsel %vm1100_vm3, %v1108_v3, %v1110_v19 }
  0x7d   : > { %2487 = vmatmul.mubr.bf16.vlgmr.msra.gmra.mxu1 %v1103_v35  ;;  %2507 = vmatpush3.bf16.msra.mxu0 %v2703_v27  ;;  %v2720_v27 = vld [vmem:[%s3511_s1 + $0x230] sm:$0xff]  }
  0x7e   : > { %2508 = vmatprep.subr.bf16.mxu0 %v2736_v1  ;;  %2454 = vmatprep.mubr.msk.bf16.mxu0 %vm2737_vm0, %v2736_v1 }
  0x7f   : > { %2490 = vmatprep.mubr.msk.bf16.mxu1 %vm2737_vm0, %v2736_v1  ;;  %2543 = vmatpush3.bf16.msra.mxu1 %v2705_v36 }
  0x80   : > { %2544 = vmatprep.subr.bf16.mxu1 %v2736_v1 }
  0x81   : > { %2509 = vmatpush3.bf16.msra.mxu0 %v2704_v32 }
  0x82   : > { %2510 = vmatprep.subr.bf16.mxu0 %v2736_v1 }
  0x83   : > { %2545 = vmatpush3.bf16.msra.mxu1 %v2707_v42 }
  0x84   : > { %2455 = vmatmul.mubr.bf16.gmra.mxu0 %v919_v45  ;;  %2546 = vmatprep.subr.bf16.mxu1 %v2736_v1 }
  0x85   : > { %2491 = vmatmul.mubr.bf16.gmra.mxu1 %v1105_v14  ;;  %2511 = vmatpush3.bf16.msra.mxu0 %v2706_v49 }
  0x86   : > { %2458 = vmatprep.mubr.msk.bf16.mxu0 %vm2737_vm0, %v2736_v1  ;;  %2494 = vmatprep.mubr.msk.bf16.mxu1 %vm2737_vm0, %v2736_v1 }
  0x87   : > { %2512 = vmatprep.subr.bf16.mxu0 %v2736_v1  ;;  %2547 = vmatpush3.bf16.msra.mxu1 %v2709_v50 }
  0x88   : > { %2548 = vmatprep.subr.bf16.mxu1 %v2736_v1 }
  0x89   : > { %2513 = vmatpush3.bf16.msra.mxu0 %v2708_v47 }
  0x8a   : > { %2514 = vmatprep.subr.bf16.mxu0 %v2736_v1 }
  0x8b   : > { %2549 = vmatpush3.bf16.msra.mxu1 %v2711_v44 }
  0x8c   : > { %2459 = vmatmul.mubr.bf16.gmra.mxu0 %v928_v46  ;;  %2550 = vmatprep.subr.bf16.mxu1 %v2736_v1 }
  0x8d   : > { %2495 = vmatmul.mubr.bf16.gmra.mxu1 %v1107_v28  ;;  %2515 = vmatpush3.bf16.msra.mxu0 %v2710_v53 }
  0x8e   : > { %2462 = vmatprep.mubr.msk.bf16.mxu0 %vm2737_vm0, %v2736_v1  ;;  %2498 = vmatprep.mubr.msk.bf16.mxu1 %vm2737_vm0, %v2736_v1 }
  0x8f   : > { %2516 = vmatprep.subr.bf16.mxu0 %v2736_v1  ;;  %2551 = vmatpush3.bf16.msra.mxu1 %v2712_v51 }
  0x90   : > { %2552 = vmatprep.subr.bf16.mxu1 %v2736_v1 }
  0x91   : > { %2517 = vmatpush3.bf16.msra.mxu0 %v2713_v10 }
  0x92   : > { %2518 = vmatprep.subr.bf16.mxu0 %v2736_v1 }
  0x93   : > { %2553 = vmatpush3.bf16.msra.mxu1 %v2714_v5 }
  0x94   : > { %2463 = vmatmul.mubr.bf16.gmra.mxu0 %v937_v6  ;;  %2554 = vmatprep.subr.bf16.mxu1 %v2736_v1 }
  0x95   : > { %2499 = vmatmul.mubr.bf16.gmra.mxu1 %v1109_v11  ;;  %2466 = vmatprep.mubr.msk.bf16.mxu0 %vm2737_vm0, %v2736_v1 }
  0x96   : > { %2502 = vmatprep.mubr.msk.bf16.mxu1 %vm2737_vm0, %v2736_v1  ;;  %2519 = vmatpush3.bf16.msra.mxu0 %v2715_v34 }
  0x97   : > { %2555 = vmatpush3.bf16.msra.mxu1 %v2716_v16  ;;  %2520 = vmatprep.subr.bf16.mxu0 %v2736_v1 }
  0x98   : > { %2556 = vmatprep.subr.bf16.mxu1 %v2736_v1 }
  0x9a   : > { %2521 = vmatpush3.bf16.msra.mxu0 %v2717_v20 }
  0x9b   : > { %2557 = vmatpush3.bf16.msra.mxu1 %v2718_v23  ;;  %2578 = vmatprep.subr.bf16.mxu0 %v2736_v1 }
  0x9c   : > { %2467 = vmatmul.mubr.bf16.gmra.mxu0 %v946_v24  ;;  %2614 = vmatprep.subr.bf16.mxu1 %v2736_v1 }
  0x9d   : > { %2503 = vmatmul.mubr.bf16.gmra.mxu1 %v1111_v26  ;;  %2522 = vmatprep.mubr.msk.bf16.mxu0 %vm2737_vm0, %v2736_v1 }
  0x9e   : > { %2558 = vmatprep.mubr.msk.bf16.mxu1 %vm2737_vm0, %v2736_v1 }
  0xa4   : > { %2523 = vmatmul.mubr.bf16.vlgmr.msra.gmra.mxu0 %v3064_v48  ;;  %v2722_v48 = vld [vmem:[%s3511_s1 + $0x220] sm:$0xff]  }
  0xa5   : > { %2559 = vmatmul.mubr.bf16.vlgmr.msra.gmra.mxu1 %v3059_v43  ;;  %2579 = vmatpush3.bf16.msra.mxu0 %v2719_v55  ;;  %v2721_v43 = vld [vmem:[%s3511_s1 + $0x228] sm:$0xff]  }
  0xa6   : > { %2580 = vmatprep.subr.bf16.mxu0 %v2736_v1  ;;  %2526 = vmatprep.mubr.msk.bf16.mxu0 %vm2737_vm0, %v2736_v1 }
  0xa7   : > { %2562 = vmatprep.mubr.msk.bf16.mxu1 %vm2737_vm0, %v2736_v1  ;;  %2622 = vmatpush3.bf16.msra.mxu1 %v2719_v55 }
  0xa8   : > { %2615 = vmatprep.subr.bf16.mxu1 %v2736_v1 }
  0xa9   : > { %2581 = vmatpush3.bf16.msra.mxu0 %v2720_v27 }
  0xaa   : > { %2582 = vmatprep.subr.bf16.mxu0 %v2736_v1 }
  0xab   : > { %2623 = vmatpush3.bf16.msra.mxu1 %v2720_v27 }
  0xac   : > { %2527 = vmatmul.mubr.bf16.gmra.mxu0 %v3074_v29  ;;  %2616 = vmatprep.subr.bf16.mxu1 %v2736_v1  ;;  %v2723_v29 = vld [vmem:[%s3511_s1 + $0x218] sm:$0xff]  }
  0xad   : > { %2563 = vmatmul.mubr.bf16.gmra.mxu1 %v3104_v4  ;;  %2583 = vmatpush3.bf16.msra.mxu0 %v2721_v43  ;;  %v2724_v4 = vld [vmem:[%s3511_s1 + $0x210] sm:$0xff]  }
  0xae   : > { %2530 = vmatprep.mubr.msk.bf16.mxu0 %vm2737_vm0, %v2736_v1  ;;  %2566 = vmatprep.mubr.msk.bf16.mxu1 %vm2737_vm0, %v2736_v1 }
  0xaf   : > { %2584 = vmatprep.subr.bf16.mxu0 %v2736_v1  ;;  %2624 = vmatpush3.bf16.msra.mxu1 %v2721_v43 }
  0xb0   : > { %2617 = vmatprep.subr.bf16.mxu1 %v2736_v1 }
  0xb1   : > { %2585 = vmatpush3.bf16.msra.mxu0 %v2722_v48 }
  0xb2   : > { %2586 = vmatprep.subr.bf16.mxu0 %v2736_v1 }
  0xb3   : > { %2625 = vmatpush3.bf16.msra.mxu1 %v2722_v48 }
  0xb4   : > { %2531 = vmatmul.mubr.bf16.gmra.mxu0 %v3094_v60  ;;  %2618 = vmatprep.subr.bf16.mxu1 %v2736_v1  ;;  %v2725_v60 = vld [vmem:[%s3511_s1 + $0x208] sm:$0xff]  }
  0xb5   : > { %2567 = vmatmul.mubr.bf16.gmra.mxu1 %v3115_v8  ;;  %2587 = vmatpush3.bf16.msra.mxu0 %v2723_v29  ;;  %v2727_v8 = vld [vmem:[%s3511_s1 + $0x200] sm:$0xff]  }
  0xb6   : > { %2534 = vmatprep.mubr.msk.bf16.mxu0 %vm2737_vm0, %v2736_v1  ;;  %2570 = vmatprep.mubr.msk.bf16.mxu1 %vm2737_vm0, %v2736_v1 }
  0xb7   : > { %2626 = vmatpush3.bf16.msra.mxu1 %v2723_v29  ;;  %2588 = vmatprep.subr.bf16.mxu0 %v2736_v1 }
  0xb8   : > { %2619 = vmatprep.subr.bf16.mxu1 %v2736_v1 }
  0xb9   : > { %2589 = vmatpush3.bf16.msra.mxu0 %v2724_v4 }
  0xba   : > { %2590 = vmatprep.subr.bf16.mxu0 %v2736_v1 }
  0xbb   : > { %2627 = vmatpush3.bf16.msra.mxu1 %v2724_v4 }
  0xbc   : > { %2535 = vmatmul.mubr.bf16.gmra.mxu0 %v3118_v9  ;;  %2620 = vmatprep.subr.bf16.mxu1 %v2736_v1 }
  0xbd   : > { %2571 = vmatmul.mubr.bf16.gmra.mxu1 %v3145_v13  ;;  %2538 = vmatprep.mubr.msk.bf16.mxu0 %vm2737_vm0, %v2736_v1 }
  0xbe   : > { %2574 = vmatprep.mubr.msk.bf16.mxu1 %vm2737_vm0, %v2736_v1  ;;  %2591 = vmatpush3.bf16.msra.mxu0 %v2725_v60 }
  0xbf   : > { %2628 = vmatpush3.bf16.msra.mxu1 %v2725_v60  ;;  %2592 = vmatprep.subr.bf16.mxu0 %v2736_v1 }
  0xc0   : > { %2621 = vmatprep.subr.bf16.mxu1 %v2736_v1 }
  0xc2   : > { %2593 = vmatpush3.bf16.msra.mxu0 %v2727_v8 }
  0xc3   : > { %2629 = vmatpush3.bf16.msra.mxu1 %v2727_v8 }
  0xc4   : > { %2539 = vmatmul.mubr.bf16.gmra.mxu0 %v3148_v15 }
  0xc5   : > { %2575 = vmatmul.mubr.bf16.gmra.mxu1 %v3182_v37  ;;  %2594 = vmatprep.mubr.msk.bf16.mxu0 %vm2737_vm0, %v2736_v1 }
  0xc6   : > { %2606 = vmatprep.mubr.msk.bf16.mxu1 %vm2737_vm0, %v2736_v1 }
  0xcc   : > { %2595 = vmatmul.mubr.bf16.vlgmr.msra.gmra.mxu0 %v3134_v17 }
  0xcd   : > { %2607 = vmatmul.mubr.bf16.vlgmr.msra.gmra.mxu1 %v3137_v52  ;;  %2598 = vmatprep.mubr.msk.bf16.mxu0 %vm2737_vm0, %v2736_v1 }
  0xce   : > { %2610 = vmatprep.mubr.msk.bf16.mxu1 %vm2737_vm0, %v2736_v1 }
  0xd4   : > { %2599 = vmatmul.mubr.bf16.gmra.mxu0 %v3152_v39 }
  0xd5   : > { %2611 = vmatmul.mubr.bf16.gmra.mxu1 %v3155_v41  ;;  %2602 = vmatprep.mubr.msk.bf16.mxu0 %vm2737_vm0, %v2736_v1 }
  0xdc   : > { %2603 = vmatmul.mubr.bf16.gmra.mxu0 %v3158_v22 }
  0xec   : > { %v369_v9 = vpop.f32.mrf.mxu0 }
  0xed   : > { %v490_v13 = vpop.f32.mrf.mxu1 }
  0xee   : > { %v491_v17 = vadd.f32 %v490_v13, %v369_v9  ;;  %v2308_v15 = vpop.f32.mrf.mxu0 }
  0xef   : > { %v2344_v52 = vpop.f32.mrf.mxu1 }
  0xf0   : > { %v372_v37 = vpop.f32.mrf.mxu0 }
  0xf1   : > { %v493_v30 = vpop.f32.mrf.mxu1 }
  0xf2   : > { %v494_v31 = vadd.f32 %v493_v30, %v372_v37  ;;  %v2309_v35 = vpop.f32.mrf.mxu0 }
  0xf3   : > { %v2345_v36 = vpop.f32.mrf.mxu1 }
  0xf4   : > { %v377_v32 = vpop.f32.mrf.mxu0 }
  0xf5   : > { %v498_v33 = vpop.f32.mrf.mxu1 }
  0xf6   : > { %v499_v39 = vadd.f32 %v498_v33, %v377_v32  ;;  %v2312_v12 = vpop.f32.mrf.mxu0 }
  0xf7   : > { %v2348_v41 = vpop.f32.mrf.mxu1 }
  0xf8   : > { %v380_v21 = vpop.f32.mrf.mxu0 }
  0xf9   : > { %v501_v38 = vpop.f32.mrf.mxu1 }
  0xfa   : > { %v502_v1 = vadd.f32 %v501_v38, %v380_v21  ;;  %v2313_v42 = vpop.f32.mrf.mxu0 }
  0xfb   : > { %v2349_v22 = vpop.f32.mrf.mxu1 }
  0xfc   : > { %v385_v45 = vpop.f32.mrf.mxu0 }
  0xfd   : > { %v506_v49 = vpop.f32.mrf.mxu1 }
  0xfe   : > { %v507_v54 = vadd.f32 %v506_v49, %v385_v45  ;;  %v2316_v25 = vpop.f32.mrf.mxu0 }
  0xff   : > { %v2352_v14 = vpop.f32.mrf.mxu1 }
 0x100   : > { %v388_v50 = vpop.f32.mrf.mxu0 }
 0x101   : > { %v509_v58 = vpop.f32.mrf.mxu1 }
 0x102   : > { %v510_v47 = vadd.f32 %v509_v58, %v388_v50  ;;  %v2317_v56 = vpop.f32.mrf.mxu0 }
 0x103   : > { %v2353_v63 = vpop.f32.mrf.mxu1 }
 0x104   : > { %v393_v59 = vpop.f32.mrf.mxu0 }
 0x105   : > { %v514_v44 = vpop.f32.mrf.mxu1 }
 0x106   : > { %v515_v46 = vadd.f32 %v514_v44, %v393_v59  ;;  %v2320_v53 = vpop.f32.mrf.mxu0 }
 0x107   : > { %v2356_v57 = vpop.f32.mrf.mxu1 }
 0x108   : > { %v396_v61 = vpop.f32.mrf.mxu0 }
 0x109   : > { %v517_v28 = vpop.f32.mrf.mxu1 }
 0x10a   : > { %v518_v51 = vadd.f32 %v517_v28, %v396_v61  ;;  %v2321_v62 = vpop.f32.mrf.mxu0 }
 0x10b   : > { %v2357_v10 = vpop.f32.mrf.mxu1 }
 0x10c   : > { %v401_v0 = vpop.f32.mrf.mxu0 }
 0x10d   : > { %v522_v2 = vpop.f32.mrf.mxu1 }
 0x10e   : > { %v523_v3 = vadd.f32 %v522_v2, %v401_v0  ;;  %v2324_v5 = vpop.f32.mrf.mxu0 }
 0x10f   : > { %v2360_v6 = vpop.f32.mrf.mxu1 }
 0x110   : > { %v404_v7 = vpop.f32.mrf.mxu0 }
 0x111   : > { %v525_v40 = vpop.f32.mrf.mxu1 }
 0x112   : > { %v526_v11 = vadd.f32 %v525_v40, %v404_v7  ;;  %v2325_v34 = vpop.f32.mrf.mxu0 }
 0x113   : > { %v2361_v16 = vpop.f32.mrf.mxu1 }
 0x114   : > { %v651_v18 = vpop.f32.mrf.mxu0 }
 0x115   : > { %v690_v19 = vadd.f32 %v651_v18, %v491_v17  ;;  %v827_v20 = vpop.f32.mrf.mxu1 }
 0x116   : > { %v2380_v23 = vpop.f32.mrf.mxu0 }
 0x117   : > { %v866_v24 = vadd.f32 %v827_v20, %v690_v19  ;;  %v2416_v26 = vpop.f32.mrf.mxu1 }
 0x118   : > { %v654_v55 = vpop.f32.mrf.mxu0 }
 0x119   : > { %v691_v27 = vadd.f32 %v654_v55, %v494_v31  ;;  %v830_v43 = vpop.f32.mrf.mxu1 }
 0x11a   : > { %v2381_v48 = vpop.f32.mrf.mxu0 }
 0x11b   : > { %v867_v29 = vadd.f32 %v830_v43, %v691_v27  ;;  %v2417_v4 = vpop.f32.mrf.mxu1 }
 0x11c   : > { %v659_v60 = vpop.f32.mrf.mxu0 }
 0x11d   : > { %v692_v8 = vadd.f32 %v659_v60, %v499_v39  ;;  %v835_v9 = vpop.f32.mrf.mxu1 }
 0x11e   : > { %v2384_v13 = vpop.f32.mrf.mxu0 }
 0x11f   : > { %v868_v15 = vadd.f32 %v835_v9, %v692_v8  ;;  %v2420_v52 = vpop.f32.mrf.mxu1 }
 0x120   : > { %v662_v37 = vpop.f32.mrf.mxu0 }
 0x121   : > { %v693_v30 = vadd.f32 %v662_v37, %v502_v1  ;;  %v838_v35 = vpop.f32.mrf.mxu1 }
 0x122   : > { %v2385_v17 = vpop.f32.mrf.mxu0 }
 0x123   : > { %v869_v36 = vadd.f32 %v838_v35, %v693_v30  ;;  %v2421_v32 = vpop.f32.mrf.mxu1 }
 0x124   : > { %v667_v33 = vpop.f32.mrf.mxu0 }
 0x125   : > { %v694_v12 = vadd.f32 %v667_v33, %v507_v54  ;;  %v843_v41 = vpop.f32.mrf.mxu1 }
 0x126   : > { %v2388_v31 = vpop.f32.mrf.mxu0 }
 0x127   : > { %v870_v21 = vadd.f32 %v843_v41, %v694_v12  ;;  %v2424_v38 = vpop.f32.mrf.mxu1 }
 0x128   : > { %v670_v42 = vpop.f32.mrf.mxu0 }
 0x129   : > { %v695_v22 = vadd.f32 %v670_v42, %v510_v47  ;;  %v846_v45 = vpop.f32.mrf.mxu1 }
 0x12a   : > { %v2389_v39 = vpop.f32.mrf.mxu0 }
 0x12b   : > { %v871_v49 = vadd.f32 %v846_v45, %v695_v22  ;;  %v2425_v25 = vpop.f32.mrf.mxu1 }
 0x12c   : > { %v675_v14 = vpop.f32.mrf.mxu0 }
 0x12d   : > { %v696_v50 = vadd.f32 %v675_v14, %v515_v46  ;;  %v851_v58 = vpop.f32.mrf.mxu1 }
 0x12e   : > { %v2392_v1 = vpop.f32.mrf.mxu0 }
 0x12f   : > { %v3430_v56 = vadd.f32 %v851_v58, %v696_v50  ;;  %v2428_v63 = vpop.f32.mrf.mxu1 }
 0x130   : > { %v678_v59 = vpop.f32.mrf.mxu0 }
 0x131   : > { %v697_v44 = vadd.f32 %v678_v59, %v518_v51  ;;  %v854_v54 = vpop.f32.mrf.mxu1 }
 0x132   : > { %v2393_v53 = vpop.f32.mrf.mxu0 }
 0x133   : > { %v3432_v57 = vadd.f32 %v854_v54, %v697_v44  ;;  %v2429_v61 = vpop.f32.mrf.mxu1 }
 0x134   : > { %v683_v28 = vpop.f32.mrf.mxu0 }
 0x135   : > { %v698_v47 = vadd.f32 %v683_v28, %v523_v3  ;;  %v859_v62 = vpop.f32.mrf.mxu1 }
 0x136   : > { %v2396_v10 = vpop.f32.mrf.mxu0 }
 0x137   : > { %v3434_v0 = vadd.f32 %v859_v62, %v698_v47  ;;  %v2432_v2 = vpop.f32.mrf.mxu1 }
 0x138   : > { %v686_v46 = vpop.f32.mrf.mxu0 }
 0x139   : > { %v699_v5 = vadd.f32 %v686_v46, %v526_v11  ;;  %v862_v6 = vpop.f32.mrf.mxu1 }
 0x13a   : > { %v2397_v7 = vpop.f32.mrf.mxu0 }
 0x13b   : > { %v3436_v40 = vadd.f32 %v862_v6, %v699_v5  ;;  %v2433_v34 = vpop.f32.mrf.mxu1 }
 0x13c   : > { %v1034_v51 = vpop.f32.mrf.mxu0 }
 0x13d   : > { %v1073_v16 = vadd.f32 %v1034_v51, %v866_v24  ;;  %v1199_v18 = vpop.f32.mrf.mxu1 }
 0x13e   : > { %v2452_v19 = vpop.f32.mrf.mxu0 }
 0x13f   : > { %v3438_v20 = vadd.f32 %v1199_v18, %v1073_v16  ;;  %v2488_v23 = vpop.f32.mrf.mxu1 }
 0x140   : > { %v1037_v3 = vpop.f32.mrf.mxu0 }
 0x141   : > { %v1074_v26 = vadd.f32 %v1037_v3, %v867_v29  ;;  %v1202_v55 = vpop.f32.mrf.mxu1 }
 0x142   : > { %v2453_v27 = vpop.f32.mrf.mxu0 }
 0x143   : > { %v3440_v43 = vadd.f32 %v1202_v55, %v1074_v26  ;;  %v2489_v48 = vpop.f32.mrf.mxu1 }
 0x144   : > { %v1042_v11 = vpop.f32.mrf.mxu0 }
 0x145   : > { %v1075_v4 = vadd.f32 %v1042_v11, %v868_v15  ;;  %v1207_v60 = vpop.f32.mrf.mxu1 }
 0x146   : > { %v2456_v8 = vpop.f32.mrf.mxu0 }
 0x147   : > { %v3442_v9 = vadd.f32 %v1207_v60, %v1075_v4  ;;  %v2492_v13 = vpop.f32.mrf.mxu1 }
 0x148   : > { %v1045_v24 = vpop.f32.mrf.mxu0 }
 0x149   : > { %v1076_v52 = vadd.f32 %v1045_v24, %v869_v36  ;;  %v1210_v37 = vpop.f32.mrf.mxu1 }
 0x14a   : > { %v2457_v30 = vpop.f32.mrf.mxu0 }
 0x14b   : > { %v3444_v35 = vadd.f32 %v1210_v37, %v1076_v52  ;;  %v2493_v17 = vpop.f32.mrf.mxu1 }
 0x14c   : > { %v1050_v29 = vpop.f32.mrf.mxu0 }
 0x14d   : > { %v1077_v32 = vadd.f32 %v1050_v29, %v870_v21  ;;  %v1215_v33 = vpop.f32.mrf.mxu1 }
 0x14e   : > { %v2460_v12 = vpop.f32.mrf.mxu0 }
 0x14f   : > { %v3446_v41 = vadd.f32 %v1215_v33, %v1077_v32  ;;  %v2496_v31 = vpop.f32.mrf.mxu1 }
 0x150   : > { %v1053_v15 = vpop.f32.mrf.mxu0 }
 0x151   : > { %v1078_v38 = vadd.f32 %v1053_v15, %v871_v49  ;;  %v1218_v42 = vpop.f32.mrf.mxu1 }
 0x152   : > { %v2461_v22 = vpop.f32.mrf.mxu0 }
 0x153   : > { %v3448_v45 = vadd.f32 %v1218_v42, %v1078_v38  ;;  %v2497_v39 = vpop.f32.mrf.mxu1 }
 0x154   : > { %v1058_v36 = vpop.f32.mrf.mxu0 }
 0x155   : > { %v1223_v25 = vpop.f32.mrf.mxu1  ;;  %v1079_v33 = vadd.f32 %v1058_v36, %v3430_v56 }
 0x156   : > { %v2464_v14 = vpop.f32.mrf.mxu0 }
 0x157   : > { %v2500_v50 = vpop.f32.mrf.mxu1  ;;  %v1244_v42 = vadd.f32 %v1223_v25, %v1079_v33 }
 0x158   : > { %v1061_v58 = vpop.f32.mrf.mxu0 }
 0x159   : > { %v1226_v1 = vpop.f32.mrf.mxu1  ;;  %v1080_v22 = vadd.f32 %v1061_v58, %v3432_v57 }
 0x15a   : > { %v2465_v63 = vpop.f32.mrf.mxu0 }
 0x15b   : > { %v2501_v21 = vpop.f32.mrf.mxu1 }
 0x15c   : > { %v1066_v59 = vpop.f32.mrf.mxu0 }
 0x15d   : > { %v1231_v44 = vpop.f32.mrf.mxu1 }
 0x15e   : > { %v2468_v54 = vpop.f32.mrf.mxu0 }
 0x15f   : > { %v2504_v53 = vpop.f32.mrf.mxu1 }
 0x160   : > { %v1069_v61 = vpop.f32.mrf.mxu0  ;;  %v1245_v53 = vadd.f32 %v1226_v1, %v1080_v22  ;;  %v3473_v1 = vld [vmem:[%s3512_s2] ss:$0 sm:$0xff] }
 0x161   : > { %v3450_v28 = vpop.f32.mrf.mxu1 }
 0x162   : > { %v2469_v49 = vpop.f32.mrf.mxu0 }
 0x163   : > { %v2505_v47 = vpop.f32.mrf.mxu1  ;;  %v1081_v49 = vadd.f32 %v1066_v59, %v3434_v0 }
 0x164   : > { %v1367_v62 = vpop.f32.mrf.mxu0 }
 0x165   : > { %v1554_v10 = vpop.f32.mrf.mxu1  ;;  %v1406_v14 = vadd.f32 %v1367_v62, %v3438_v20  ;;  %v1246_v58 = vadd.f32 %v1231_v44, %v1081_v49  ;;  %v1082_v20 = vadd.f32 %v1069_v61, %v3436_v40 }
 0x166   : > { %v2524_v2 = vpop.f32.mrf.mxu0 }
 0x167   : > { %v2560_v46 = vpop.f32.mrf.mxu1  ;;  %v1593_v2 = vadd.f32 %v1554_v10, %v1406_v14  ;;  %v1247_v40 = vadd.f32 %v3450_v28, %v1082_v20 }
 0x168   : > { %v1370_v5 = vpop.f32.mrf.mxu0 }
 0x169   : > { %v1557_v6 = vpop.f32.mrf.mxu1  ;;  %v1407_v56 = vadd.f32 %v1370_v5, %v3440_v43 }
 0x16a   : > { %v2525_v7 = vpop.f32.mrf.mxu0 }
 0x16b   : > { %v2561_v34 = vpop.f32.mrf.mxu1  ;;  %v1594_v62 = vadd.f32 %v1557_v6, %v1407_v56 }
 0x16c   : > { %v1375_v51 = vpop.f32.mrf.mxu0 }
 0x16d   : > { %v3452_v16 = vpop.f32.mrf.mxu1  ;;  %v1408_v43 = vadd.f32 %v1375_v51, %v3442_v9 }
 0x16e   : > { %v2528_v18 = vpop.f32.mrf.mxu0 }
 0x16f   : > { %v2564_v19 = vpop.f32.mrf.mxu1 }
 0x170   : > { %v1378_v23 = vpop.f32.mrf.mxu0 }
 0x171   : > { %v3454_v3 = vpop.f32.mrf.mxu1  ;;  %v1409_v6 = vadd.f32 %v1378_v23, %v3444_v35 }
 0x172   : > { %v2529_v26 = vpop.f32.mrf.mxu0 }
 0x173   : > { %v2565_v55 = vpop.f32.mrf.mxu1 }
 0x174   : > { %v3456_v27 = vpop.f32.mrf.mxu0 }
 0x175   : > { %v3458_v48 = vpop.f32.mrf.mxu1 }
 0x176   : > { %v2532_v11 = vpop.f32.mrf.mxu0 }
 0x177   : > { %v2568_v4 = vpop.f32.mrf.mxu1 }
 0x178   : > { %v3460_v60 = vpop.f32.mrf.mxu0 }
 0x179   : > { %v3462_v8 = vpop.f32.mrf.mxu1 }
 0x17a   : > { %v2533_v13 = vpop.f32.mrf.mxu0 }
 0x17b   : > { %v2569_v24 = vpop.f32.mrf.mxu1  ;;  %v1595_v13 = vadd.f32 %v3452_v16, %v1408_v43 }
 0x17c   : > { %v1391_v52 = vpop.f32.mrf.mxu0 }
 0x17d   : > { %v1578_v37 = vpop.f32.mrf.mxu1  ;;  %v1412_v63 = vadd.f32 %v1391_v52, %v1244_v42 }
 0x17e   : > { %v2536_v30 = vpop.f32.mrf.mxu0 }
 0x17f   : > { %v2572_v17 = vpop.f32.mrf.mxu1  ;;  %v1599_v46 = vadd.f32 %v1578_v37, %v1412_v63 }
 0x180   : > { %v1394_v29 = vpop.f32.mrf.mxu0 }
 0x181   : > { %v1581_v32 = vpop.f32.mrf.mxu1  ;;  %v1413_v7 = vadd.f32 %v1394_v29, %v1245_v53 }
 0x182   : > { %v2537_v12 = vpop.f32.mrf.mxu0 }
 0x183   : > { %v2573_v31 = vpop.f32.mrf.mxu1  ;;  %v1600_v5 = vadd.f32 %v1581_v32, %v1413_v7  ;;  %v1596_v12 = vadd.f32 %v3454_v3, %v1409_v6 }
 0x184   : > { %v1399_v15 = vpop.f32.mrf.mxu0  ;;  %v1410_v31 = vadd.f32 %v3456_v27, %v3446_v41  ;;  %v1411_v41 = vadd.f32 %v3460_v60, %v3448_v45 }
 0x185   : > { %v1586_v38 = vpop.f32.mrf.mxu1  ;;  %v1414_v18 = vadd.f32 %v1399_v15, %v1246_v58 }
 0x186   : > { %v2540_v39 = vpop.f32.mrf.mxu0  ;;  %v1597_v3 = vadd.f32 %v3458_v48, %v1410_v31  ;;  %v1598_v48 = vadd.f32 %v3462_v8, %v1411_v41 }
 0x187   : > { %v2576_v50 = vpop.f32.mrf.mxu1  ;;  %v1601_v24 = vadd.f32 %v1586_v38, %v1414_v18 }
 0x188   : > { %v1402_v21 = vpop.f32.mrf.mxu0 }
 0x189   : > { %v1589_v54 = vpop.f32.mrf.mxu1  ;;  %v1415_v52 = vadd.f32 %v1402_v21, %v1247_v40 }
 0x18a   : > { %v2541_v47 = vpop.f32.mrf.mxu0 }
 0x18b   : > { %v2577_v36 = vpop.f32.mrf.mxu1  ;;  %v1602_v42 = vadd.f32 %v1589_v54, %v1415_v52 }
 0x18c   : > { %v1719_v25 = vpop.f32.mrf.mxu0 }
 0x18d   : > { %v1758_v34 = vadd.f32 %v1719_v25, %v1593_v2  ;;  %v1743_v57 = vpop.f32.mrf.mxu1 }
 0x18e   : > { %v1764_v0 = vadd.f32 %v1743_v57, %v1599_v46  ;;  %v2596_v59 = vpop.f32.mrf.mxu0 }
 0x18f   : > { %v2608_v10 = vpop.f32.mrf.mxu1  ;;  %v1775_v26 = vadd.f32 %v3473_v1, %v1758_v34 }
 0x190   : > { %v1722_v19 = vpop.f32.mrf.mxu0  ;;  %v1781_v61 = vadd.f32 %v3473_v1, %v1764_v0 }
 0x191   : > { %v1759_v44 = vadd.f32 %v1722_v19, %v1594_v62  ;;  %v1746_v55 = vpop.f32.mrf.mxu1  ;;  %v1785_v17 = vmax.f32 %v1775_v26, 0.0 }
 0x192   : > { %v1765_v11 = vadd.f32 %v1746_v55, %v1600_v5  ;;  %v2597_v4 = vpop.f32.mrf.mxu0  ;;  %v1791_v33 = vmax.f32 %v1781_v61, 0.0 }
 0x193   : > { %v1776_v9 = vadd.f32 %v3473_v1, %v1759_v44  ;;  %v2609_v51 = vpop.f32.mrf.mxu1 }
 0x194   : > { %v1782_v37 = vadd.f32 %v3473_v1, %v1765_v11  ;;  %v1727_v30 = vpop.f32.mrf.mxu0 }
 0x195   : > { %v1786_v29 = vmax.f32 %v1776_v9, 0.0  ;;  %v1760_v28 = vadd.f32 %v1727_v30, %v1595_v13  ;;  %v1751_v32 = vpop.f32.mrf.mxu1 }
 0x196   : > { %v1792_v35 = vmax.f32 %v1782_v37, 0.0  ;;  %v1766_v16 = vadd.f32 %v1751_v32, %v1601_v24  ;;  %v2600_v23 = vpop.f32.mrf.mxu0 }
 0x197   : > { %v2147_v15 = vpack.c.bf16 %v1786_v29, %v1785_v17  ;;  %v2612_v38 = vpop.f32.mrf.mxu1  ;;  %v1777_v14 = vadd.f32 %v3473_v1, %v1760_v28 }
 0x198   : > { %v2162_v22 = vpack.c.bf16 %v1792_v35, %v1791_v33  ;;  %v1730_v39 = vpop.f32.mrf.mxu0  ;;  %v1783_v21 = vadd.f32 %v3473_v1, %v1766_v16 }
 0x199   : > { %2148 = vst [vmem:[%s3487_s18] sm:$0xff] %v2147_v15   ;;  %v1761_v50 = vadd.f32 %v1730_v39, %v1596_v12  ;;  %v1754_v63 = vpop.f32.mrf.mxu1  ;;  %v1787_v56 = vmax.f32 %v1777_v14, 0.0 }
 0x19a   : > { %2171 = vst [vmem:[%s3487_s18 + $0x18] sm:$0xff] %v2162_v22   ;;  %v1767_v53 = vadd.f32 %v1754_v63, %v1602_v42  ;;  %v2601_v49 = vpop.f32.mrf.mxu0  ;;  %v1793_v7 = vmax.f32 %v1783_v21, 0.0 }
 0x19b   : > { %v1778_v27 = vadd.f32 %v3473_v1, %v1761_v50  ;;  %v2613_v54 = vpop.f32.mrf.mxu1 }
 0x19c   : > { %v1784_v47 = vadd.f32 %v3473_v1, %v1767_v53  ;;  %v1735_v2 = vpop.f32.mrf.mxu0 }
 0x19d   : > { %v1788_v36 = vmax.f32 %v1778_v27, 0.0  ;;  %v1762_v46 = vadd.f32 %v1735_v2, %v1597_v3 }
 0x19e   : > { %v1794_v25 = vmax.f32 %v1784_v47, 0.0  ;;  %v2604_v34 = vpop.f32.mrf.mxu0 }
 0x19f   : > { %v2152_v57 = vpack.c.bf16 %v1788_v36, %v1787_v56  ;;  %v1779_v45 = vadd.f32 %v3473_v1, %v1762_v46 }
 0x1a0   : > { %v2167_v58 = vpack.c.bf16 %v1794_v25, %v1793_v7  ;;  %v1738_v20 = vpop.f32.mrf.mxu0 }
 0x1a1   : > { %2169 = vst [vmem:[%s3487_s18 + $0x8] sm:$0xff] %v2152_v57   ;;  %v1763_v60 = vadd.f32 %v1738_v20, %v1598_v48  ;;  %v1789_v62 = vmax.f32 %v1779_v45, 0.0 }
 0x1a2   : > { %2172 = vst [vmem:[%s3487_s18 + $0x20] sm:$0xff] %v2167_v58   ;;  %v2605_v0 = vpop.f32.mrf.mxu0 }
 0x1a3   : > { %v1780_v59 = vadd.f32 %v3473_v1, %v1763_v60 }
 0x1a5   : > { %v1790_v43 = vmax.f32 %v1780_v59, 0.0 }
 0x1a7   : > { %v2157_v10 = vpack.c.bf16 %v1790_v43, %v1789_v62 }
 0x1a9   : > { %2170 = vst [vmem:[%s3487_s18 + $0x10] sm:$0xff] %v2157_v10  }
 0x1aa PF: > { %s13_s12 = sadd.s32 1, %s2734_s12  }
 0x1ab   : > { %p10_p4 = scmp.ge.s32.totalorder %s13_s12, 10  }
 0x1ad   :  { %12 = sbr.rel (!%p10_p4) target bundleno = 1 (0x1), region = 70 }

// kernel: vgg_loss.15
= control target key start
LH: loop header
LB: loop body
LE: loop exit
PB: predicated region body
PF: predicated region fallthrough
CT: control target
= control target key end

     0   :  { %s2308_s12 = smov 0   ;;  %s2854_s0 = inlined_call_operand.vmem [shape: bf16[8,42,128], index: 0, kind: input, shape index: {}]   ;;  %s2855_s1 = inlined_call_operand.vmem [shape: bf16[9,128,256], index: 1, kind: input, shape index: {}]   ;;  %s2856_s2 = inlined_call_operand.vmem [shape: f32[1,256], index: 2, kind: input, shape index: {}]   ;;  %s2857_s3 = inlined_call_operand.vmem [shape: bf16[8,24,256], index: 3, kind: output, shape index: {}]  }
   0x1 LB: > { %s1738_s13 = sadd.s32 4294967295, %s2285_s12   ;;  %p1742_p0 = scmp.ge.s32.totalorder %s2285_s12, 1  ;;  %s2285_s12 = sphi %s2308_s12, %s13_s12  }
   0x2   : > { %p137_p1 = scmp.lt.s32.totalorder %s2285_s12, 9 }
   0x4   : > { %p138_p2 = pnand %p1742_p0, %p137_p1 }
   0x5   : > { %p161_p3 = scmp.lt.s32.totalorder (!%p138_p2), %s1738_s13, 7 }
   0x6   : > { %141 = sbr.rel (%p138_p2) target bundleno = 381 (0x17d), region = 32 }
   0xb   : > { %v2057_v0 = vld [vmem:[%s2855_s1 + $0xf4] ss:$8 sps:$4 sm:$0xff]   ;;  %v2287_v2 = vmov 0   ;;  %v2061_v3 = vld [vmem:[%s2855_s1 + $0xf0] ss:$8 sps:$4 sm:$0xff]   ;;  %s2859_s13 = smov (!%p161_p3, %s1738_s13), 7 }
   0xc   : > { %v2059_v1 = vld [vmem:[%s2855_s1 + $0x74] ss:$8 sps:$4 sm:$0xff]   ;;  %348 = vmatprep.mubr.bf16.mxu0 %v2287_v2  ;;  %479 = vmatprep.mubr.bf16.mxu1 %v2287_v2  ;;  %v2062_v4 = vld [vmem:[%s2855_s1 + $0x70] ss:$8 sps:$4 sm:$0xff]   ;;  %v2063_v5 = vld [vmem:[%s2855_s1 + $0xe4] ss:$8 sps:$4 sm:$0xff]  }
   0xd   : > { %316 = vmatprep.subr.bf16.mxu0 %v2057_v0  ;;  %447 = vmatprep.subr.bf16.mxu1 %v2059_v1  ;;  %v2065_v6 = vld [vmem:[%s2855_s1 + $0x64] ss:$8 sps:$4 sm:$0xff]   ;;  %v2067_v7 = vld [vmem:[%s2855_s1 + $0xe0] ss:$8 sps:$4 sm:$0xff]   ;;  %v2069_v9 = vld [vmem:[%s2855_s1 + $0xd4] ss:$8 sps:$4 sm:$0xff]  }
   0xe   : > { %317 = vmatpush1.bf16.msra.mxu0 %v2061_v3  ;;  %448 = vmatpush1.bf16.msra.mxu1 %v2062_v4  ;;  %v2068_v8 = vld [vmem:[%s2855_s1 + $0x60] ss:$8 sps:$4 sm:$0xff]   ;;  %v2071_v10 = vld [vmem:[%s2855_s1 + $0x54] ss:$8 sps:$4 sm:$0xff]   ;;  %v2073_v11 = vld [vmem:[%s2855_s1 + $0xd0] ss:$8 sps:$4 sm:$0xff]  }
   0xf   : > { %318 = vmatprep.subr.bf16.mxu0 %v2063_v5  ;;  %449 = vmatprep.subr.bf16.mxu1 %v2065_v6  ;;  %v2074_v12 = vld [vmem:[%s2855_s1 + $0x50] ss:$8 sps:$4 sm:$0xff]   ;;  %v2075_v13 = vld [vmem:[%s2855_s1 + $0xc4] ss:$8 sps:$4 sm:$0xff]   ;;  %v2079_v15 = vld [vmem:[%s2855_s1 + $0xc0] ss:$8 sps:$4 sm:$0xff]  }
  0x10   : > { %v2077_v14 = vld [vmem:[%s2855_s1 + $0x44] ss:$8 sps:$4 sm:$0xff]   ;;  %v2080_v16 = vld [vmem:[%s2855_s1 + $0x40] ss:$8 sps:$4 sm:$0xff]   ;;  %v2081_v17 = vld [vmem:[%s2855_s1 + $0xb4] ss:$8 sps:$4 sm:$0xff]  }
  0x11   : > { %v2083_v18 = vld [vmem:[%s2855_s1 + $0x34] ss:$8 sps:$4 sm:$0xff]   ;;  %s2047_s25 = smul.u32 24, %s2859_s13  ;;  %v2085_v19 = vld [vmem:[%s2855_s1 + $0xb0] ss:$8 sps:$4 sm:$0xff]   ;;  %vm517_vm1 = vcmask 1046528  }
  0x12   : > { %319 = vmatpush1.bf16.msra.mxu0 %v2067_v7  ;;  %450 = vmatpush1.bf16.msra.mxu1 %v2068_v8  ;;  %v2086_v20 = vld [vmem:[%s2855_s1 + $0x30] ss:$8 sps:$4 sm:$0xff]   ;;  %v2087_v21 = vld [vmem:[%s2855_s1 + $0xa4] ss:$8 sps:$4 sm:$0xff]   ;;  %v2091_v23 = vld [vmem:[%s2855_s1 + $0xa0] ss:$8 sps:$4 sm:$0xff]  }
  0x13   : > { %320 = vmatprep.subr.bf16.mxu0 %v2069_v9  ;;  %451 = vmatprep.subr.bf16.mxu1 %v2071_v10  ;;  %v2089_v22 = vld [vmem:[%s2855_s1 + $0x24] ss:$8 sps:$4 sm:$0xff]   ;;  %s2396_s9 = scalar_lea.vmem %s2854_s0, %s2047_s25  ;;  %v2092_v24 = vld [vmem:[%s2855_s1 + $0x20] ss:$8 sps:$4 sm:$0xff]   ;;  %v2093_v25 = vld [vmem:[%s2855_s1 + $0x94] ss:$8 sps:$4 sm:$0xff]   ;;  %s170_s26 = scalar_lea.vmem %s2857_s3, %s2047_s25 }
  0x14   : > { %v2095_v26 = vld [vmem:[%s2855_s1 + $0x14] ss:$8 sps:$4 sm:$0xff]   ;;  %v172_v27 = vld [vmem:[%s2396_s9] sm:$0xf]  ;;  %v173_v28 = vld [vmem:[%s2396_s9 + $0x4] sm:$0xf] }
  0x15   : > { %v174_v29 = vld [vmem:[%s2396_s9 + $0x8] sm:$0xf]  ;;  %v2414_v30 = vld [vmem:[%s2396_s9 + $0xc] sm:$0xf]  ;;  %v2416_v31 = vcombine.low %v172_v27, %v173_v28  ;;  %v2097_v32 = vld [vmem:[%s2855_s1 + $0x90] ss:$8 sps:$4 sm:$0xff]  }
  0x16   : > { %321 = vmatpush1.bf16.msra.mxu0 %v2073_v11  ;;  %452 = vmatpush1.bf16.msra.mxu1 %v2074_v12  ;;  %v2098_v33 = vld [vmem:[%s2855_s1 + $0x10] ss:$8 sps:$4 sm:$0xff]   ;;  %v2425_v34 = vcombine.low %v174_v29, %v2414_v30  ;;  %v2427_v35 = vcombine.low %v173_v28, %v174_v29  ;;  %v2099_v36 = vld [vmem:[%s2855_s1 + $0x84] ss:$8 sps:$4 sm:$0xff]   ;;  %v2103_v42 = vld [vmem:[%s2855_s1 + $0x80] ss:$8 sps:$4 sm:$0xff]   ;;  %v1746_v60 = vcombine.low %v174_v29, %v174_v29 }
  0x17   : > { %322 = vmatprep.subr.bf16.mxu0 %v2075_v13  ;;  %453 = vmatprep.subr.bf16.mxu1 %v2077_v14  ;;  %v220_v37 = vshrl.u32 %v2416_v31, 16  ;;  %v222_v38 = vshll.u32 %v2416_v31, 16  ;;  %v2101_v39 = vld [vmem:[%s2855_s1 + $0x4] ss:$8 sps:$4 sm:$0xff]   ;;  %vm218_vm0 = vsmask.f32 7424 }
  0x18   : > { %v227_v40 = vshll.u32 %v2425_v34, 16  ;;  %v2104_v43 = vld [vmem:[%s2855_s1] ss:$8 sps:$4 sm:$0xff]   ;;  %v2109_v46 = vld [vmem:[%s2855_s1 + $0x174] ss:$8 sps:$4 sm:$0xff]   ;;  %v231_v54 = vshrl.u32 %v2425_v34, 16 }
  0x19   : > { %v224_v41 = vrot.slane %v222_v38, 1  ;;  %v2112_v47 = vld [vmem:[%s2855_s1 + $0x1f4] ss:$8 sps:$4 sm:$0xff]   ;;  %v2107_v48 = vld [vmem:[%s2855_s1 + $0x170] ss:$8 sps:$4 sm:$0xff]   ;;  %vm677_vm2 = vcmask 1044480  }
  0x1a   : > { %323 = vmatpush1.bf16.msra.mxu0 %v2079_v15  ;;  %454 = vmatpush1.bf16.msra.mxu1 %v2080_v16  ;;  %v229_v45 = vrot.slane %v227_v40, 1  ;;  %v2110_v50 = vld [vmem:[%s2855_s1 + $0x1f0] ss:$8 sps:$4 sm:$0xff]   ;;  %v2115_v51 = vld [vmem:[%s2855_s1 + $0x164] ss:$8 sps:$4 sm:$0xff]   ;;  %vm1160_vm4 = vcmask 1045504  }
  0x1b   : > { %324 = vmatprep.subr.bf16.mxu0 %v2081_v17  ;;  %455 = vmatprep.subr.bf16.mxu1 %v2083_v18  ;;  %v225_v44 = vor.u32 %v224_v41, %v220_v37  ;;  %v2118_v52 = vld [vmem:[%s2855_s1 + $0x1e4] ss:$8 sps:$4 sm:$0xff]   ;;  %v2113_v53 = vld [vmem:[%s2855_s1 + $0x160] ss:$8 sps:$4 sm:$0xff]   ;;  %v2121_v56 = vld [vmem:[%s2855_s1 + $0x154] ss:$8 sps:$4 sm:$0xff]  }
  0x1c   : > { %v2116_v55 = vld [vmem:[%s2855_s1 + $0x1e0] ss:$8 sps:$4 sm:$0xff]   ;;  %v2124_v57 = vld [vmem:[%s2855_s1 + $0x1d4] ss:$8 sps:$4 sm:$0xff]   ;;  %v2119_v58 = vld [vmem:[%s2855_s1 + $0x150] ss:$8 sps:$4 sm:$0xff]   ;;  %v233_v59 = vor.u32 %v231_v54, %v229_v45 }
  0x1d   : > { %v230_v49 = vsel %vm218_vm0, %v225_v44, %v229_v45  ;;  %v2122_v61 = vld [vmem:[%s2855_s1 + $0x1d0] ss:$8 sps:$4 sm:$0xff]   ;;  %v2127_v62 = vld [vmem:[%s2855_s1 + $0x144] ss:$8 sps:$4 sm:$0xff]   ;;  %v2125_v0 = vld [vmem:[%s2855_s1 + $0x140] ss:$8 sps:$4 sm:$0xff]  }
  0x1e   : > { %325 = vmatpush1.bf16.msra.mxu0 %v2085_v19  ;;  %456 = vmatpush1.bf16.msra.mxu1 %v2086_v20  ;;  %v2130_v63 = vld [vmem:[%s2855_s1 + $0x1c4] ss:$8 sps:$4 sm:$0xff]   ;;  %v2128_v1 = vld [vmem:[%s2855_s1 + $0x1c0] ss:$8 sps:$4 sm:$0xff]   ;;  %v2133_v3 = vld [vmem:[%s2855_s1 + $0x134] ss:$8 sps:$4 sm:$0xff]  }
  0x1f   : > { %326 = vmatprep.subr.bf16.mxu0 %v2087_v21  ;;  %457 = vmatprep.subr.bf16.mxu1 %v2089_v22  ;;  %v2136_v4 = vld [vmem:[%s2855_s1 + $0x1b4] ss:$8 sps:$4 sm:$0xff]   ;;  %v2131_v5 = vld [vmem:[%s2855_s1 + $0x130] ss:$8 sps:$4 sm:$0xff]   ;;  %v2139_v7 = vld [vmem:[%s2855_s1 + $0x124] ss:$8 sps:$4 sm:$0xff]  }
  0x20   : > { %v2134_v6 = vld [vmem:[%s2855_s1 + $0x1b0] ss:$8 sps:$4 sm:$0xff]   ;;  %v2142_v8 = vld [vmem:[%s2855_s1 + $0x1a4] ss:$8 sps:$4 sm:$0xff]   ;;  %v2137_v9 = vld [vmem:[%s2855_s1 + $0x120] ss:$8 sps:$4 sm:$0xff]  }
  0x21   : > { %v2140_v10 = vld [vmem:[%s2855_s1 + $0x1a0] ss:$8 sps:$4 sm:$0xff]   ;;  %v2146_v11 = vld [vmem:[%s2855_s1 + $0x114] ss:$8 sps:$4 sm:$0xff]   ;;  %v2144_v13 = vld [vmem:[%s2855_s1 + $0x110] ss:$8 sps:$4 sm:$0xff]  }
  0x22   : > { %327 = vmatpush1.bf16.msra.mxu0 %v2091_v23  ;;  %458 = vmatpush1.bf16.msra.mxu1 %v2092_v24  ;;  %v2149_v12 = vld [vmem:[%s2855_s1 + $0x194] ss:$8 sps:$4 sm:$0xff]   ;;  %v2147_v14 = vld [vmem:[%s2855_s1 + $0x190] ss:$8 sps:$4 sm:$0xff]   ;;  %v2152_v15 = vld [vmem:[%s2855_s1 + $0x104] ss:$8 sps:$4 sm:$0xff]  }
  0x23   : > { %328 = vmatprep.subr.bf16.mxu0 %v2093_v25  ;;  %459 = vmatprep.subr.bf16.mxu1 %v2095_v26  ;;  %v2155_v16 = vld [vmem:[%s2855_s1 + $0x184] ss:$8 sps:$4 sm:$0xff]   ;;  %v2150_v17 = vld [vmem:[%s2855_s1 + $0x100] ss:$8 sps:$4 sm:$0xff]   ;;  %v518_v18 = vrot.slane %v2416_v31, 1  ;;  %v519_v19 = vrot.slane %v2425_v34, 1 }
  0x24   : > { %v2153_v20 = vld [vmem:[%s2855_s1 + $0x180] ss:$8 sps:$4 sm:$0xff]   ;;  %v678_v21 = vrot.slane %v2416_v31, 3  ;;  %v679_v22 = vrot.slane %v2425_v34, 3  ;;  %v2158_v23 = vld [vmem:[%s2855_s1 + $0x274] ss:$8 sps:$4 sm:$0xff]  }
  0x25   : > { %v2161_v24 = vld [vmem:[%s2855_s1 + $0x2f4] ss:$8 sps:$4 sm:$0xff]   ;;  %v2156_v25 = vld [vmem:[%s2855_s1 + $0x270] ss:$8 sps:$4 sm:$0xff]   ;;  %v520_v26 = vsel %vm517_vm1, %v518_v18, %v519_v19  ;;  %v2164_v29 = vld [vmem:[%s2855_s1 + $0x264] ss:$8 sps:$4 sm:$0xff]   ;;  %v1893_v18 = vcombine.low %v2414_v30, %v2414_v30 }
  0x26   : > { %329 = vmatpush1.bf16.msra.mxu0 %v2097_v32  ;;  %460 = vmatpush1.bf16.msra.mxu1 %v2098_v33  ;;  %v680_v27 = vsel %vm677_vm2, %v678_v21, %v679_v22  ;;  %v2159_v28 = vld [vmem:[%s2855_s1 + $0x2f0] ss:$8 sps:$4 sm:$0xff]   ;;  %v2167_v32 = vld [vmem:[%s2855_s1 + $0x2e4] ss:$8 sps:$4 sm:$0xff]   ;;  %v2162_v33 = vld [vmem:[%s2855_s1 + $0x260] ss:$8 sps:$4 sm:$0xff]  }
  0x27   : > { %330 = vmatprep.subr.bf16.mxu0 %v2099_v36  ;;  %461 = vmatprep.subr.bf16.mxu1 %v2101_v39  ;;  %v2165_v36 = vld [vmem:[%s2855_s1 + $0x2e0] ss:$8 sps:$4 sm:$0xff]   ;;  %v2170_v39 = vld [vmem:[%s2855_s1 + $0x254] ss:$8 sps:$4 sm:$0xff]   ;;  %v2176_v44 = vld [vmem:[%s2855_s1 + $0x244] ss:$8 sps:$4 sm:$0xff]  }
  0x28   : > { %v2173_v41 = vld [vmem:[%s2855_s1 + $0x2d4] ss:$8 sps:$4 sm:$0xff]   ;;  %v2179_v45 = vld [vmem:[%s2855_s1 + $0x2c4] ss:$8 sps:$4 sm:$0xff]   ;;  %vm837_vm3 = vsmask.f32 4352 }
  0x29   : > { %v2200_v34 = vld [vmem:[%s2855_s1 + $0x204] ss:$8 sps:$4 sm:$0xff]   ;;  %vm1320_vm5 = vsmask.f32 5376 }
  0x2a   : > { %331 = vmatpush1.bf16.msra.mxu0 %v2103_v42  ;;  %462 = vmatpush1.bf16.msra.mxu1 %v2104_v43  ;;  %v2168_v42 = vld [vmem:[%s2855_s1 + $0x250] ss:$8 sps:$4 sm:$0xff]   ;;  %v2226_v21 = vld [vmem:[%s2855_s1 + $0x344] ss:$8 sps:$4 sm:$0xff]  }
  0x2b   : > { %603 = vmatprep.subr.bf16.mxu0 %v2109_v46  ;;  %763 = vmatprep.subr.bf16.mxu1 %v2112_v47  ;;  %v2171_v43 = vld [vmem:[%s2855_s1 + $0x2d0] ss:$8 sps:$4 sm:$0xff]   ;;  %v2174_v46 = vld [vmem:[%s2855_s1 + $0x240] ss:$8 sps:$4 sm:$0xff]  }
  0x2c   : > { %v2177_v47 = vld [vmem:[%s2855_s1 + $0x2c0] ss:$8 sps:$4 sm:$0xff]  }
  0x2d   : > { %349 = vmatmul.mubr.bf16.vlgmr.msra.gmra.mxu0 %v230_v49  ;;  %480 = vmatmul.mubr.bf16.vlgmr.msra.gmra.mxu1 %v2416_v31  ;;  %v2185_v49 = vld [vmem:[%s2855_s1 + $0x2b4] ss:$8 sps:$4 sm:$0xff]   ;;  %v2198_v31 = vld [vmem:[%s2855_s1 + $0x200] ss:$8 sps:$4 sm:$0xff]  }
  0x2e   : > { %604 = vmatpush1.bf16.msra.mxu0 %v2107_v48  ;;  %764 = vmatpush1.bf16.msra.mxu1 %v2110_v50  ;;  %v2182_v48 = vld [vmem:[%s2855_s1 + $0x234] ss:$8 sps:$4 sm:$0xff]   ;;  %v2180_v50 = vld [vmem:[%s2855_s1 + $0x230] ss:$8 sps:$4 sm:$0xff]  }
  0x2f   : > { %605 = vmatprep.subr.bf16.mxu0 %v2115_v51  ;;  %765 = vmatprep.subr.bf16.mxu1 %v2118_v52  ;;  %v2183_v51 = vld [vmem:[%s2855_s1 + $0x2b0] ss:$8 sps:$4 sm:$0xff]   ;;  %v2188_v52 = vld [vmem:[%s2855_s1 + $0x224] ss:$8 sps:$4 sm:$0xff]  }
  0x30   : > { %358 = vmatprep.mubr.bf16.mxu0 %v2287_v2  ;;  %489 = vmatprep.mubr.bf16.mxu1 %v2287_v2 }
  0x32   : > { %606 = vmatpush1.bf16.msra.mxu0 %v2113_v53  ;;  %766 = vmatpush1.bf16.msra.mxu1 %v2116_v55  ;;  %v2191_v53 = vld [vmem:[%s2855_s1 + $0x2a4] ss:$8 sps:$4 sm:$0xff]   ;;  %v2186_v55 = vld [vmem:[%s2855_s1 + $0x220] ss:$8 sps:$4 sm:$0xff]  }
  0x33   : > { %607 = vmatprep.subr.bf16.mxu0 %v2121_v56  ;;  %767 = vmatprep.subr.bf16.mxu1 %v2124_v57  ;;  %v2189_v56 = vld [vmem:[%s2855_s1 + $0x2a0] ss:$8 sps:$4 sm:$0xff]   ;;  %v2194_v57 = vld [vmem:[%s2855_s1 + $0x214] ss:$8 sps:$4 sm:$0xff]  }
  0x35   : > { %359 = vmatmul.mubr.bf16.gmra.mxu0 %v233_v59  ;;  %490 = vmatmul.mubr.bf16.gmra.mxu1 %v1746_v60  ;;  %v838_v59 = vrot.slane %v220_v37, 3  ;;  %v842_v60 = vrot.slane %v227_v40, 4  ;;  %v839_v37 = vrot.slane %v222_v38, 4  ;;  %v2203_v40 = vld [vmem:[%s2855_s1 + $0x284] ss:$8 sps:$4 sm:$0xff]  }
  0x36   : > { %608 = vmatpush1.bf16.msra.mxu0 %v2119_v58  ;;  %768 = vmatpush1.bf16.msra.mxu1 %v2122_v61  ;;  %v2197_v58 = vld [vmem:[%s2855_s1 + $0x294] ss:$8 sps:$4 sm:$0xff]   ;;  %v841_v61 = vrot.slane %v231_v54, 3  ;;  %v2201_v38 = vld [vmem:[%s2855_s1 + $0x280] ss:$8 sps:$4 sm:$0xff]  }
  0x37   : > { %609 = vmatprep.subr.bf16.mxu0 %v2127_v62  ;;  %769 = vmatprep.subr.bf16.mxu1 %v2130_v63  ;;  %v176_v62 = vld [vmem:[%s2396_s9 + $0x10] sm:$0xf] }
  0x38   : > { %635 = vmatprep.mubr.bf16.mxu0 %v2287_v2  ;;  %795 = vmatprep.mubr.bf16.mxu1 %v2287_v2  ;;  %v2192_v63 = vld [vmem:[%s2855_s1 + $0x210] ss:$8 sps:$4 sm:$0xff]   ;;  %v2664_v54 = vcombine.low %v2414_v30, %v176_v62  ;;  %v2229_v30 = vld [vmem:[%s2855_s1 + $0x3c4] ss:$8 sps:$4 sm:$0xff]  }
  0x3a   : > { %610 = vmatpush1.bf16.msra.mxu0 %v2125_v0  ;;  %770 = vmatpush1.bf16.msra.mxu1 %v2128_v1  ;;  %v2195_v0 = vld [vmem:[%s2855_s1 + $0x290] ss:$8 sps:$4 sm:$0xff]   ;;  %v1494_v1 = vrot.slane %v2427_v35, 3 }
  0x3b   : > { %611 = vmatprep.subr.bf16.mxu0 %v2133_v3  ;;  %771 = vmatprep.subr.bf16.mxu1 %v2136_v4  ;;  %v1495_v3 = vrot.slane %v2664_v54, 3  ;;  %v843_v4 = vor.u32 %v842_v60, %v841_v61  ;;  %v2257_v60 = vld [vmem:[%s2855_s1 + $0x474] ss:$8 sps:$4 sm:$0xff]  }
  0x3e   : > { %612 = vmatpush1.bf16.msra.mxu0 %v2131_v5  ;;  %772 = vmatpush1.bf16.msra.mxu1 %v2134_v6  ;;  %v840_v5 = vor.u32 %v839_v37, %v838_v59  ;;  %v2207_v6 = vld [vmem:[%s2855_s1 + $0x374] ss:$8 sps:$4 sm:$0xff]  }
  0x3f   : > { %613 = vmatprep.subr.bf16.mxu0 %v2139_v7  ;;  %773 = vmatprep.subr.bf16.mxu1 %v2142_v8  ;;  %v2210_v7 = vld [vmem:[%s2855_s1 + $0x3f4] ss:$8 sps:$4 sm:$0xff]   ;;  %v2683_v8 = vsel %vm677_vm2, %v1494_v1, %v1495_v3  ;;  %v2264_v1 = vld [vmem:[%s2855_s1 + $0x440] ss:$8 sps:$4 sm:$0xff]  }
  0x40   : > { %v2263_v37 = vld [vmem:[%s2855_s1 + $0x454] ss:$8 sps:$4 sm:$0xff]  }
  0x42   : > { %614 = vmatpush1.bf16.msra.mxu0 %v2137_v9  ;;  %774 = vmatpush1.bf16.msra.mxu1 %v2140_v10  ;;  %v2205_v9 = vld [vmem:[%s2855_s1 + $0x370] ss:$8 sps:$4 sm:$0xff]   ;;  %v844_v10 = vsel %vm837_vm3, %v840_v5, %v843_v4  ;;  %v2270_v5 = vld [vmem:[%s2855_s1 + $0x420] ss:$8 sps:$4 sm:$0xff]  }
  0x43   : > { %615 = vmatprep.subr.bf16.mxu0 %v2146_v11  ;;  %775 = vmatprep.subr.bf16.mxu1 %v2149_v12  ;;  %v2208_v11 = vld [vmem:[%s2855_s1 + $0x3f0] ss:$8 sps:$4 sm:$0xff]   ;;  %v2213_v12 = vld [vmem:[%s2855_s1 + $0x364] ss:$8 sps:$4 sm:$0xff]  }
  0x46   : > { %616 = vmatpush1.bf16.msra.mxu0 %v2144_v13  ;;  %776 = vmatpush1.bf16.msra.mxu1 %v2147_v14  ;;  %v2216_v13 = vld [vmem:[%s2855_s1 + $0x3e4] ss:$8 sps:$4 sm:$0xff]   ;;  %v2211_v14 = vld [vmem:[%s2855_s1 + $0x360] ss:$8 sps:$4 sm:$0xff]  }
  0x47   : > { %617 = vmatprep.subr.bf16.mxu0 %v2152_v15  ;;  %777 = vmatprep.subr.bf16.mxu1 %v2155_v16  ;;  %v2214_v15 = vld [vmem:[%s2855_s1 + $0x3e0] ss:$8 sps:$4 sm:$0xff]   ;;  %v2219_v16 = vld [vmem:[%s2855_s1 + $0x354] ss:$8 sps:$4 sm:$0xff]  }
  0x4a   : > { %618 = vmatpush1.bf16.msra.mxu0 %v2150_v17  ;;  %778 = vmatpush1.bf16.msra.mxu1 %v2153_v20  ;;  %v2222_v17 = vld [vmem:[%s2855_s1 + $0x3d4] ss:$8 sps:$4 sm:$0xff]   ;;  %v2220_v20 = vld [vmem:[%s2855_s1 + $0x3d0] ss:$8 sps:$4 sm:$0xff]  }
  0x4b   : > { %927 = vmatprep.subr.bf16.mxu0 %v2158_v23  ;;  %1083 = vmatprep.subr.bf16.mxu1 %v2161_v24  ;;  %v2227_v23 = vld [vmem:[%s2855_s1 + $0x3c0] ss:$8 sps:$4 sm:$0xff]   ;;  %v2232_v24 = vld [vmem:[%s2855_s1 + $0x334] ss:$8 sps:$4 sm:$0xff]  }
  0x4d   : > { %636 = vmatmul.mubr.bf16.vlgmr.msra.gmra.mxu0 %v520_v26  ;;  %796 = vmatmul.mubr.bf16.vlgmr.msra.gmra.mxu1 %v680_v27  ;;  %v2230_v26 = vld [vmem:[%s2855_s1 + $0x330] ss:$8 sps:$4 sm:$0xff]  }
  0x4e   : > { %928 = vmatpush1.bf16.msra.mxu0 %v2156_v25  ;;  %1084 = vmatpush1.bf16.msra.mxu1 %v2159_v28  ;;  %v2235_v25 = vld [vmem:[%s2855_s1 + $0x3b4] ss:$8 sps:$4 sm:$0xff]   ;;  %v2233_v27 = vld [vmem:[%s2855_s1 + $0x3b0] ss:$8 sps:$4 sm:$0xff]   ;;  %v2238_v28 = vld [vmem:[%s2855_s1 + $0x324] ss:$8 sps:$4 sm:$0xff]  }
  0x4f   : > { %929 = vmatprep.subr.bf16.mxu0 %v2164_v29  ;;  %1085 = vmatprep.subr.bf16.mxu1 %v2167_v32  ;;  %v2241_v29 = vld [vmem:[%s2855_s1 + $0x3a4] ss:$8 sps:$4 sm:$0xff]   ;;  %v1322_v32 = vshrl.u32 %v2427_v35, 16 }
  0x50   : > { %645 = vmatprep.mubr.bf16.mxu0 %v2287_v2  ;;  %805 = vmatprep.mubr.bf16.mxu1 %v2287_v2 }
  0x52   : > { %930 = vmatpush1.bf16.msra.mxu0 %v2162_v33  ;;  %1086 = vmatpush1.bf16.msra.mxu1 %v2165_v36  ;;  %v1325_v33 = vshll.u32 %v2427_v35, 16  ;;  %v2236_v36 = vld [vmem:[%s2855_s1 + $0x320] ss:$8 sps:$4 sm:$0xff]  }
  0x53   : > { %931 = vmatprep.subr.bf16.mxu0 %v2170_v39  ;;  %1087 = vmatprep.subr.bf16.mxu1 %v2173_v41  ;;  %v2239_v39 = vld [vmem:[%s2855_s1 + $0x3a0] ss:$8 sps:$4 sm:$0xff]   ;;  %v1330_v41 = vshrl.u32 %v2664_v54, 16 }
  0x55   : > { %646 = vmatmul.mubr.bf16.gmra.mxu0 %v519_v19  ;;  %806 = vmatmul.mubr.bf16.gmra.mxu1 %v679_v22  ;;  %v2217_v19 = vld [vmem:[%s2855_s1 + $0x350] ss:$8 sps:$4 sm:$0xff]   ;;  %v2224_v22 = vld [vmem:[%s2855_s1 + $0x340] ss:$8 sps:$4 sm:$0xff]  }
  0x56   : > { %932 = vmatpush1.bf16.msra.mxu0 %v2168_v42  ;;  %1088 = vmatpush1.bf16.msra.mxu1 %v2171_v43  ;;  %v1333_v42 = vshll.u32 %v2664_v54, 16  ;;  %v2244_v43 = vld [vmem:[%s2855_s1 + $0x314] ss:$8 sps:$4 sm:$0xff]  }
  0x57   : > { %933 = vmatprep.subr.bf16.mxu0 %v2176_v44  ;;  %1089 = vmatprep.subr.bf16.mxu1 %v2179_v45  ;;  %v2247_v44 = vld [vmem:[%s2855_s1 + $0x394] ss:$8 sps:$4 sm:$0xff]   ;;  %v1324_v45 = vrot.slane %v1322_v32, 2 }
  0x58   : > { %959 = vmatprep.mubr.bf16.mxu0 %v2287_v2  ;;  %1115 = vmatprep.mubr.bf16.mxu1 %v2287_v2 }
  0x5a   : > { %934 = vmatpush1.bf16.msra.mxu0 %v2174_v46  ;;  %1090 = vmatpush1.bf16.msra.mxu1 %v2177_v47  ;;  %v1327_v46 = vrot.slane %v1325_v33, 3  ;;  %v2242_v47 = vld [vmem:[%s2855_s1 + $0x310] ss:$8 sps:$4 sm:$0xff]  }
  0x5b   : > { %935 = vmatprep.subr.bf16.mxu0 %v2182_v48  ;;  %1091 = vmatprep.subr.bf16.mxu1 %v2185_v49  ;;  %v2245_v48 = vld [vmem:[%s2855_s1 + $0x390] ss:$8 sps:$4 sm:$0xff]   ;;  %v1332_v49 = vrot.slane %v1330_v41, 2 }
  0x5e   : > { %936 = vmatpush1.bf16.msra.mxu0 %v2180_v50  ;;  %1092 = vmatpush1.bf16.msra.mxu1 %v2183_v51  ;;  %v1335_v50 = vrot.slane %v1333_v42, 3  ;;  %v2250_v51 = vld [vmem:[%s2855_s1 + $0x304] ss:$8 sps:$4 sm:$0xff]  }
  0x5f   : > { %937 = vmatprep.subr.bf16.mxu0 %v2188_v52  ;;  %1093 = vmatprep.subr.bf16.mxu1 %v2191_v53  ;;  %v2253_v52 = vld [vmem:[%s2855_s1 + $0x384] ss:$8 sps:$4 sm:$0xff]   ;;  %v2248_v53 = vld [vmem:[%s2855_s1 + $0x300] ss:$8 sps:$4 sm:$0xff]  }
  0x60   : > { %v1336_v59 = vor.u32 %v1335_v50, %v1332_v49 }
  0x62   : > { %938 = vmatpush1.bf16.msra.mxu0 %v2186_v55  ;;  %1094 = vmatpush1.bf16.msra.mxu1 %v2189_v56  ;;  %v2251_v55 = vld [vmem:[%s2855_s1 + $0x380] ss:$8 sps:$4 sm:$0xff]   ;;  %v1161_v56 = vrot.slane %v2427_v35, 2 }
  0x63   : > { %939 = vmatprep.subr.bf16.mxu0 %v2194_v57  ;;  %1095 = vmatprep.subr.bf16.mxu1 %v2197_v58  ;;  %v1162_v57 = vrot.slane %v2664_v54, 2  ;;  %v1328_v58 = vor.u32 %v1327_v46, %v1324_v45 }
  0x65   : > { %v1163_v61 = vsel %vm1160_vm4, %v1161_v56, %v1162_v57  ;;  %v1337_v62 = vsel %vm1320_vm5, %v1328_v58, %v1336_v59 }
  0x66   : > { %940 = vmatpush1.bf16.msra.mxu0 %v2192_v63  ;;  %1096 = vmatpush1.bf16.msra.mxu1 %v2195_v0  ;;  %v2260_v63 = vld [vmem:[%s2855_s1 + $0x464] ss:$8 sps:$4 sm:$0xff]   ;;  %v2258_v0 = vld [vmem:[%s2855_s1 + $0x460] ss:$8 sps:$4 sm:$0xff]  }
  0x67   : > { %941 = vmatprep.subr.bf16.mxu0 %v2200_v34  ;;  %1097 = vmatprep.subr.bf16.mxu1 %v2203_v40  ;;  %v2261_v34 = vld [vmem:[%s2855_s1 + $0x450] ss:$8 sps:$4 sm:$0xff]   ;;  %v2266_v40 = vld [vmem:[%s2855_s1 + $0x444] ss:$8 sps:$4 sm:$0xff]  }
  0x6a   : > { %942 = vmatpush1.bf16.msra.mxu0 %v2198_v31  ;;  %1098 = vmatpush1.bf16.msra.mxu1 %v2201_v38  ;;  %v2267_v31 = vld [vmem:[%s2855_s1 + $0x430] ss:$8 sps:$4 sm:$0xff]   ;;  %v2272_v38 = vld [vmem:[%s2855_s1 + $0x424] ss:$8 sps:$4 sm:$0xff]  }
  0x6b   : > { %1246 = vmatprep.subr.bf16.mxu0 %v2207_v6  ;;  %1420 = vmatprep.subr.bf16.mxu1 %v2210_v7  ;;  %v2273_v6 = vld [vmem:[%s2855_s1 + $0x410] ss:$8 sps:$4 sm:$0xff]   ;;  %v2278_v7 = vld [vmem:[%s2855_s1 + $0x404] ss:$8 sps:$4 sm:$0xff]  }
  0x6d   : > { %960 = vmatmul.mubr.bf16.vlgmr.msra.gmra.mxu0 %v844_v10  ;;  %1116 = vmatmul.mubr.bf16.vlgmr.msra.gmra.mxu1 %v2427_v35  ;;  %v2255_v35 = vld [vmem:[%s2855_s1 + $0x470] ss:$8 sps:$4 sm:$0xff]  }
  0x6e   : > { %1247 = vmatpush1.bf16.msra.mxu0 %v2205_v9  ;;  %1421 = vmatpush1.bf16.msra.mxu1 %v2208_v11  ;;  %v2276_v9 = vld [vmem:[%s2855_s1 + $0x400] ss:$8 sps:$4 sm:$0xff]  }
  0x6f   : > { %1248 = vmatprep.subr.bf16.mxu0 %v2213_v12  ;;  %1422 = vmatprep.subr.bf16.mxu1 %v2216_v13 }
  0x70   : > { %969 = vmatprep.mubr.bf16.mxu0 %v2287_v2  ;;  %1125 = vmatprep.mubr.bf16.mxu1 %v2287_v2 }
  0x72   : > { %1249 = vmatpush1.bf16.msra.mxu0 %v2211_v14  ;;  %1423 = vmatpush1.bf16.msra.mxu1 %v2214_v15 }
  0x73   : > { %1250 = vmatprep.subr.bf16.mxu0 %v2219_v16  ;;  %1424 = vmatprep.subr.bf16.mxu1 %v2222_v17 }
  0x75   : > { %970 = vmatmul.mubr.bf16.gmra.mxu0 %v843_v4  ;;  %1126 = vmatmul.mubr.bf16.gmra.mxu1 %v1893_v18  ;;  %v2269_v4 = vld [vmem:[%s2855_s1 + $0x434] ss:$8 sps:$4 sm:$0xff]  }
  0x76   : > { %1251 = vmatpush1.bf16.msra.mxu0 %v2217_v19  ;;  %1425 = vmatpush1.bf16.msra.mxu1 %v2220_v20 }
  0x77   : > { %1252 = vmatprep.subr.bf16.mxu0 %v2226_v21  ;;  %1426 = vmatprep.subr.bf16.mxu1 %v2229_v30 }
  0x78   : > { %1278 = vmatprep.mubr.bf16.mxu0 %v2287_v2  ;;  %1452 = vmatprep.mubr.bf16.mxu1 %v2287_v2 }
  0x7a   : > { %1253 = vmatpush1.bf16.msra.mxu0 %v2224_v22  ;;  %1427 = vmatpush1.bf16.msra.mxu1 %v2227_v23 }
  0x7b   : > { %1254 = vmatprep.subr.bf16.mxu0 %v2232_v24  ;;  %1428 = vmatprep.subr.bf16.mxu1 %v2235_v25 }
  0x7e   : > { %1255 = vmatpush1.bf16.msra.mxu0 %v2230_v26  ;;  %1429 = vmatpush1.bf16.msra.mxu1 %v2233_v27 }
  0x7f   : > { %1256 = vmatprep.subr.bf16.mxu0 %v2238_v28  ;;  %1430 = vmatprep.subr.bf16.mxu1 %v2241_v29 }
  0x82   : > { %1257 = vmatpush1.bf16.msra.mxu0 %v2236_v36  ;;  %1431 = vmatpush1.bf16.msra.mxu1 %v2239_v39 }
  0x83   : > { %1258 = vmatprep.subr.bf16.mxu0 %v2244_v43  ;;  %1432 = vmatprep.subr.bf16.mxu1 %v2247_v44 }
  0x86   : > { %1259 = vmatpush1.bf16.msra.mxu0 %v2242_v47  ;;  %1433 = vmatpush1.bf16.msra.mxu1 %v2245_v48 }
  0x87   : > { %1260 = vmatprep.subr.bf16.mxu0 %v2250_v51  ;;  %1434 = vmatprep.subr.bf16.mxu1 %v2253_v52 }
  0x8a   : > { %1261 = vmatpush1.bf16.msra.mxu0 %v2248_v53  ;;  %1435 = vmatpush1.bf16.msra.mxu1 %v2251_v55 }
  0x8b   : > { %1579 = vmatprep.subr.bf16.mxu0 %v2257_v60  ;;  %2031 = vmatprep.subr.bf16.mxu1 %v2257_v60 }
  0x8d   : > { %1279 = vmatmul.mubr.bf16.vlgmr.msra.gmra.mxu0 %v1163_v61  ;;  %1453 = vmatmul.mubr.bf16.vlgmr.msra.gmra.mxu1 %v1337_v62 }
  0x8e   : > { %1580 = vmatpush1.bf16.msra.mxu0 %v2255_v35  ;;  %2039 = vmatpush1.bf16.msra.mxu1 %v2255_v35 }
  0x8f   : > { %1581 = vmatprep.subr.bf16.mxu0 %v2260_v63  ;;  %2032 = vmatprep.subr.bf16.mxu1 %v2260_v63 }
  0x90   : > { %1288 = vmatprep.mubr.bf16.mxu0 %v2287_v2  ;;  %1462 = vmatprep.mubr.bf16.mxu1 %v2287_v2 }
  0x92   : > { %1582 = vmatpush1.bf16.msra.mxu0 %v2258_v0  ;;  %2040 = vmatpush1.bf16.msra.mxu1 %v2258_v0 }
  0x93   : > { %1583 = vmatprep.subr.bf16.mxu0 %v2263_v37  ;;  %2033 = vmatprep.subr.bf16.mxu1 %v2263_v37 }
  0x95   : > { %1289 = vmatmul.mubr.bf16.gmra.mxu0 %v1162_v57  ;;  %1463 = vmatmul.mubr.bf16.gmra.mxu1 %v1336_v59 }
  0x96   : > { %1584 = vmatpush1.bf16.msra.mxu0 %v2261_v34  ;;  %2041 = vmatpush1.bf16.msra.mxu1 %v2261_v34 }
  0x97   : > { %1585 = vmatprep.subr.bf16.mxu0 %v2266_v40  ;;  %2034 = vmatprep.subr.bf16.mxu1 %v2266_v40 }
  0x98   : > { %1611 = vmatprep.mubr.bf16.mxu0 %v2287_v2  ;;  %1621 = vmatprep.mubr.bf16.mxu1 %v2287_v2  ;;  %v2275_v2 = vld [vmem:[%s2855_s1 + $0x414] ss:$8 sps:$4 sm:$0xff]  }
  0x9a   : > { %1586 = vmatpush1.bf16.msra.mxu0 %v2264_v1  ;;  %2042 = vmatpush1.bf16.msra.mxu1 %v2264_v1 }
  0x9b   : > { %1587 = vmatprep.subr.bf16.mxu0 %v2269_v4  ;;  %2035 = vmatprep.subr.bf16.mxu1 %v2269_v4 }
  0x9e   : > { %1588 = vmatpush1.bf16.msra.mxu0 %v2267_v31  ;;  %2043 = vmatpush1.bf16.msra.mxu1 %v2267_v31 }
  0x9f   : > { %1589 = vmatprep.subr.bf16.mxu0 %v2272_v38  ;;  %2036 = vmatprep.subr.bf16.mxu1 %v2272_v38 }
  0xa2   : > { %1590 = vmatpush1.bf16.msra.mxu0 %v2270_v5  ;;  %2044 = vmatpush1.bf16.msra.mxu1 %v2270_v5 }
  0xa3   : > { %1591 = vmatprep.subr.bf16.mxu0 %v2275_v2  ;;  %2037 = vmatprep.subr.bf16.mxu1 %v2275_v2 }
  0xa6   : > { %1592 = vmatpush1.bf16.msra.mxu0 %v2273_v6  ;;  %2045 = vmatpush1.bf16.msra.mxu1 %v2273_v6 }
  0xa7   : > { %1593 = vmatprep.subr.bf16.mxu0 %v2278_v7  ;;  %2038 = vmatprep.subr.bf16.mxu1 %v2278_v7 }
  0xaa   : > { %1594 = vmatpush1.bf16.msra.mxu0 %v2276_v9  ;;  %2046 = vmatpush1.bf16.msra.mxu1 %v2276_v9 }
  0xad   : > { %1612 = vmatmul.mubr.bf16.vlgmr.msra.gmra.mxu0 %v2683_v8  ;;  %1622 = vmatmul.mubr.bf16.vlgmr.msra.gmra.mxu1 %v1495_v3 }
  0xed   : > { %v350_v10 = vpop.f32.mrf.mxu0  ;;  %v481_v11 = vpop.f32.mrf.mxu1 }
  0xee   : > { %v482_v12 = vadd.f32 %v481_v11, %v350_v10 }
  0xef   : > { %v352_v13 = vpop.f32.mrf.mxu0  ;;  %v483_v14 = vpop.f32.mrf.mxu1 }
  0xf0   : > { %v484_v15 = vadd.f32 %v483_v14, %v352_v13 }
  0xf1   : > { %v354_v16 = vpop.f32.mrf.mxu0  ;;  %v485_v17 = vpop.f32.mrf.mxu1 }
  0xf2   : > { %v486_v18 = vadd.f32 %v485_v17, %v354_v16 }
  0xf3   : > { %v356_v19 = vpop.f32.mrf.mxu0  ;;  %v487_v20 = vpop.f32.mrf.mxu1 }
  0xf4   : > { %v488_v21 = vadd.f32 %v487_v20, %v356_v19 }
  0xf5   : > { %v360_v30 = vpop.f32.mrf.mxu0  ;;  %v491_v22 = vpop.f32.mrf.mxu1 }
  0xf6   : > { %v492_v23 = vadd.f32 %v491_v22, %v360_v30 }
  0xf7   : > { %v362_v24 = vpop.f32.mrf.mxu0  ;;  %v493_v8 = vpop.f32.mrf.mxu1 }
  0xf8   : > { %v494_v25 = vadd.f32 %v493_v8, %v362_v24 }
  0xf9   : > { %v364_v54 = vpop.f32.mrf.mxu0  ;;  %v495_v3 = vpop.f32.mrf.mxu1 }
  0xfa   : > { %v1638_v54 = vlaneseq }
  0xfb   : > { %v365_v26 = vpop.f32.mrf.mxu0  ;;  %v496_v27 = vpop.f32.mrf.mxu1 }
 0x10d   : > { %v637_v28 = vpop.f32.mrf.mxu0  ;;  %v797_v29 = vpop.f32.mrf.mxu1 }
 0x10e   : > { %v654_v32 = vadd.f32 %v637_v28, %v482_v12  ;;  %v1639_v28 = vshrl.u32 %v1638_v54, 7 }
 0x10f   : > { %v639_v33 = vpop.f32.mrf.mxu0  ;;  %v799_v36 = vpop.f32.mrf.mxu1 }
 0x110   : > { %v814_v39 = vadd.f32 %v797_v29, %v654_v32  ;;  %v655_v41 = vadd.f32 %v639_v33, %v484_v15 }
 0x111   : > { %v641_v42 = vpop.f32.mrf.mxu0  ;;  %v801_v43 = vpop.f32.mrf.mxu1 }
 0x112   : > { %v815_v44 = vadd.f32 %v799_v36, %v655_v41  ;;  %v656_v45 = vadd.f32 %v641_v42, %v486_v18  ;;  %v1640_v42 = vsub.s32 0, %v1639_v28 }
 0x113   : > { %v643_v46 = vpop.f32.mrf.mxu0  ;;  %v803_v47 = vpop.f32.mrf.mxu1 }
 0x114   : > { %v816_v48 = vadd.f32 %v801_v43, %v656_v45  ;;  %v657_v49 = vadd.f32 %v643_v46, %v488_v21 }
 0x115   : > { %v647_v50 = vpop.f32.mrf.mxu0  ;;  %v807_v51 = vpop.f32.mrf.mxu1 }
 0x116   : > { %v817_v52 = vadd.f32 %v803_v47, %v657_v49  ;;  %v658_v53 = vadd.f32 %v647_v50, %v492_v23  ;;  %v1636_v50 = vld [vmem:[%s2856_s2] sm:$0x3] }
 0x117   : > { %v649_v55 = vpop.f32.mrf.mxu0  ;;  %v809_v56 = vpop.f32.mrf.mxu1 }
 0x118   : > { %v659_v57 = vadd.f32 %v649_v55, %v494_v25  ;;  %v818_v58 = vadd.f32 %v807_v51, %v658_v53  ;;  %v1644_v51 = vsub.s32 1, %v1639_v28 }
 0x119   : > { %v651_v59 = vpop.f32.mrf.mxu0  ;;  %v811_v60 = vpop.f32.mrf.mxu1 }
 0x11a   : > { %v819_v61 = vadd.f32 %v809_v56, %v659_v57  ;;  %v1641_v57 = vrot.slane %v1636_v50, %v1640_v42 }
 0x11b   : > { %v652_v62 = vpop.f32.mrf.mxu0  ;;  %v812_v35 = vpop.f32.mrf.mxu1 }
 0x12d   : > { %v961_v63 = vpop.f32.mrf.mxu0  ;;  %v1117_v0 = vpop.f32.mrf.mxu1 }
 0x12e   : > { %v978_v3 = vadd.f32 %v961_v63, %v814_v39 }
 0x12f   : > { %v963_v37 = vpop.f32.mrf.mxu0  ;;  %v1119_v34 = vpop.f32.mrf.mxu1 }
 0x130   : > { %v979_v27 = vadd.f32 %v963_v37, %v815_v44  ;;  %v1134_v32 = vadd.f32 %v1117_v0, %v978_v3 }
 0x131   : > { %v965_v40 = vpop.f32.mrf.mxu0  ;;  %v1121_v1 = vpop.f32.mrf.mxu1 }
 0x132   : > { %v1135_v36 = vadd.f32 %v1119_v34, %v979_v27  ;;  %v980_v41 = vadd.f32 %v965_v40, %v816_v48 }
 0x133   : > { %v967_v4 = vpop.f32.mrf.mxu0  ;;  %v1123_v31 = vpop.f32.mrf.mxu1 }
 0x134   : > { %v981_v43 = vadd.f32 %v967_v4, %v817_v52  ;;  %v1136_v53 = vadd.f32 %v1121_v1, %v980_v41  ;;  %v1645_v52 = vrot.slane %v1636_v50, %v1644_v51 }
 0x135   : > { %v971_v38 = vpop.f32.mrf.mxu0  ;;  %v1127_v5 = vpop.f32.mrf.mxu1 }
 0x136   : > { %v982_v26 = vadd.f32 %v971_v38, %v818_v58  ;;  %v1137_v44 = vadd.f32 %v1123_v31, %v981_v43 }
 0x137   : > { %v973_v2 = vpop.f32.mrf.mxu0  ;;  %v1129_v6 = vpop.f32.mrf.mxu1 }
 0x138   : > { %v983_v29 = vadd.f32 %v973_v2, %v819_v61  ;;  %v1138_v33 = vadd.f32 %v1127_v5, %v982_v26 }
 0x139   : > { %v975_v7 = vpop.f32.mrf.mxu0  ;;  %v1131_v9 = vpop.f32.mrf.mxu1 }
 0x13a   : > { %v1139_v45 = vadd.f32 %v1129_v6, %v983_v29 }
 0x13b   : > { %v976_v10 = vpop.f32.mrf.mxu0  ;;  %v1132_v11 = vpop.f32.mrf.mxu1 }
 0x14d   : > { %v1280_v12 = vpop.f32.mrf.mxu0  ;;  %v1454_v13 = vpop.f32.mrf.mxu1 }
 0x14e   : > { %v1297_v46 = vadd.f32 %v1280_v12, %v1134_v32 }
 0x14f   : > { %v1282_v14 = vpop.f32.mrf.mxu0  ;;  %v1456_v15 = vpop.f32.mrf.mxu1 }
 0x150   : > { %v1298_v49 = vadd.f32 %v1282_v14, %v1135_v36  ;;  %v1471_v55 = vadd.f32 %v1454_v13, %v1297_v46 }
 0x151   : > { %v1284_v16 = vpop.f32.mrf.mxu0  ;;  %v1458_v17 = vpop.f32.mrf.mxu1 }
 0x152   : > { %v1472_v58 = vadd.f32 %v1456_v15, %v1298_v49  ;;  %v1299_v59 = vadd.f32 %v1284_v16, %v1136_v53 }
 0x153   : > { %v1286_v18 = vpop.f32.mrf.mxu0  ;;  %v1460_v19 = vpop.f32.mrf.mxu1 }
 0x154   : > { %v1300_v61 = vadd.f32 %v1286_v18, %v1137_v44  ;;  %v1473_v31 = vadd.f32 %v1458_v17, %v1299_v59 }
 0x155   : > { %v1290_v20 = vpop.f32.mrf.mxu0  ;;  %v1464_v21 = vpop.f32.mrf.mxu1 }
 0x156   : > { %v1301_v47 = vadd.f32 %v1290_v20, %v1138_v33  ;;  %v1474_v2 = vadd.f32 %v1460_v19, %v1300_v61 }
 0x157   : > { %v1292_v30 = vpop.f32.mrf.mxu0  ;;  %v1466_v22 = vpop.f32.mrf.mxu1 }
 0x158   : > { %v1302_v39 = vadd.f32 %v1292_v30, %v1139_v45  ;;  %v1475_v56 = vadd.f32 %v1464_v21, %v1301_v47 }
 0x159   : > { %v1294_v23 = vpop.f32.mrf.mxu0  ;;  %v1468_v24 = vpop.f32.mrf.mxu1 }
 0x15a   : > { %v1476_v62 = vadd.f32 %v1466_v22, %v1302_v39 }
 0x15b   : > { %v1295_v8 = vpop.f32.mrf.mxu0  ;;  %v1469_v25 = vpop.f32.mrf.mxu1 }
 0x16d   : > { %v1613_v48 = vpop.f32.mrf.mxu0  ;;  %v1623_v60 = vpop.f32.mrf.mxu1 }
 0x16e   : > { %v1630_v35 = vadd.f32 %v1613_v48, %v1471_v55  ;;  %v1634_v63 = vadd.f32 %v1623_v60, %v1475_v56 }
 0x16f   : > { %v1615_v0 = vpop.f32.mrf.mxu0  ;;  %v1625_v37 = vpop.f32.mrf.mxu1 }
 0x170   : > { %v1648_v34 = vadd.f32 %v1641_v57, %v1630_v35  ;;  %v1652_v40 = vadd.f32 %v1641_v57, %v1634_v63  ;;  %v1631_v4 = vadd.f32 %v1615_v0, %v1472_v58  ;;  %v1635_v1 = vadd.f32 %v1625_v37, %v1476_v62 }
 0x171   : > { %v1617_v38 = vpop.f32.mrf.mxu0  ;;  %v1627_v5 = vpop.f32.mrf.mxu1 }
 0x172   : > { %v1649_v6 = vadd.f32 %v1645_v52, %v1631_v4  ;;  %v1653_v7 = vadd.f32 %v1645_v52, %v1635_v1  ;;  %v1654_v9 = vmax.f32 %v1648_v34, 0.0  ;;  %v1632_v10 = vadd.f32 %v1617_v38, %v1473_v31 }
 0x173   : > { %v1619_v11 = vpop.f32.mrf.mxu0  ;;  %v1628_v12 = vpop.f32.mrf.mxu1  ;;  %v1658_v13 = vmax.f32 %v1652_v40, 0.0 }
 0x174   : > { %v1655_v14 = vmax.f32 %v1649_v6, 0.0  ;;  %v1659_v15 = vmax.f32 %v1653_v7, 0.0  ;;  %v1633_v16 = vadd.f32 %v1619_v11, %v1474_v2  ;;  %v1650_v18 = vadd.f32 %v1641_v57, %v1632_v10 }
 0x176   : > { %v2028_v17 = vpack.c.bf16 %v1655_v14, %v1654_v9  ;;  %v2030_v20 = vpack.c.bf16 %v1659_v15, %v1658_v13  ;;  %v1651_v21 = vadd.f32 %v1645_v52, %v1633_v16  ;;  %v1656_v19 = vmax.f32 %v1650_v18, 0.0 }
 0x178   : > { %1680 = vst [vmem:[%s170_s26] sm:$0xff] %v2028_v17  ;;  %1682 = vst [vmem:[%s170_s26 + $0x10] sm:$0xff] %v2030_v20  ;;  %v1657_v30 = vmax.f32 %v1651_v21, 0.0 }
 0x17a   : > { %v2029_v22 = vpack.c.bf16 %v1657_v30, %v1656_v19 }
 0x17c   : > { %1681 = vst [vmem:[%s170_s26 + $0x8] sm:$0xff] %v2029_v22 }
 0x17d PF: > { %s13_s12 = sadd.s32 1, %s2285_s12  }
 0x17e   : > { %p10_p4 = scmp.ge.s32.totalorder %s13_s12, 10  }
 0x180   :  { %12 = sbr.rel (!%p10_p4) target bundleno = 1 (0x1), region = 70 }

// kernel: vgg_loss.17
= control target key start
LH: loop header
LB: loop body
LE: loop exit
PB: predicated region body
PF: predicated region fallthrough
CT: control target
= control target key end

     0   :  { %s226_s0 = inlined_call_operand.vmem [shape: bf16[64,256], index: 0, kind: input, shape index: {}]   ;;  %s227_s1 = inlined_call_operand.vmem [shape: bf16[64,256], index: 1, kind: input, shape index: {}]   ;;  %s228_s2 = inlined_call_operand.hbm [shape: f32[1,1], index: 2, kind: output, shape index: {}]  }
   0x1   :  { %v18_v0 = vld [vmem:[%s226_s0] sm:$0xff]  ;;  %v19_v2 = vld [vmem:[%s226_s0 + $0x8] sm:$0xff] }
   0x2   :  { %v42_v1 = vld [vmem:[%s227_s1] sm:$0xff]  ;;  %v43_v3 = vld [vmem:[%s227_s1 + $0x8] sm:$0xff]  ;;  %v26_v4 = vunpack.c.l.bf16 %v18_v0  ;;  %v27_v5 = vunpack.c.h.bf16 %v18_v0 }
   0x3   :  { %v50_v6 = vunpack.c.l.bf16 %v42_v1  ;;  %v51_v7 = vunpack.c.h.bf16 %v42_v1 }
   0x4   :  { %7 = vsyncpa [#allocation4], 0  ;;  %v28_v8 = vunpack.c.l.bf16 %v19_v2  ;;  %v52_v9 = vunpack.c.l.bf16 %v43_v3  ;;  %v20_v10 = vld [vmem:[%s226_s0 + $0x10] sm:$0xff]  ;;  %v29_v12 = vunpack.c.h.bf16 %v19_v2  ;;  %v53_v13 = vunpack.c.h.bf16 %v43_v3  ;;  %v21_v19 = vld [vmem:[%s226_s0 + $0x18] sm:$0xff]  ;;  %s159_s13 = smov [#allocation3]  }
   0x5   :  { %v44_v11 = vld [vmem:[%s227_s1 + $0x10] sm:$0xff]  ;;  %v66_v14 = vsub.f32 %v26_v4, %v50_v6  ;;  %v67_v15 = vsub.f32 %v27_v5, %v51_v7  ;;  %v30_v16 = vunpack.c.l.bf16 %v20_v10  ;;  %v31_v20 = vunpack.c.h.bf16 %v20_v10  ;;  %v45_v21 = vld [vmem:[%s227_s1 + $0x18] sm:$0xff]  ;;  %v22_v26 = vld [vmem:[%s226_s0 + $0x20] sm:$0xff] }
   0x6   :  { %v54_v17 = vunpack.c.l.bf16 %v44_v11  ;;  %v68_v18 = vsub.f32 %v28_v8, %v52_v9  ;;  %v55_v22 = vunpack.c.h.bf16 %v44_v11  ;;  %v69_v23 = vsub.f32 %v29_v12, %v53_v13  ;;  %v46_v32 = vld [vmem:[%s227_s1 + $0x20] sm:$0xff]  ;;  %v23_v38 = vld [vmem:[%s226_s0 + $0x28] sm:$0xff]  ;;  %v24_v50 = vld [vmem:[%s226_s0 + $0x30] sm:$0xff] }
   0x7   :  { %v83_v24 = vmul.f32 %v66_v14, %v66_v14  ;;  %v84_v25 = vmul.f32 %v67_v15, %v67_v15  ;;  %v32_v27 = vunpack.c.l.bf16 %v21_v19  ;;  %v56_v28 = vunpack.c.l.bf16 %v45_v21  ;;  %v47_v44 = vld [vmem:[%s227_s1 + $0x28] sm:$0xff]  ;;  %v48_v56 = vld [vmem:[%s227_s1 + $0x30] sm:$0xff]  ;;  %v25_v62 = vld [vmem:[%s226_s0 + $0x38] sm:$0xff] }
   0x8   :  { %v70_v29 = vsub.f32 %v30_v16, %v54_v17  ;;  %v85_v30 = vmul.f32 %v68_v18, %v68_v18  ;;  %v33_v31 = vunpack.c.h.bf16 %v21_v19  ;;  %v57_v33 = vunpack.c.h.bf16 %v45_v21  ;;  %v49_v4 = vld [vmem:[%s227_s1 + $0x38] sm:$0xff] }
   0x9   :  { %v71_v34 = vsub.f32 %v31_v20, %v55_v22  ;;  %v86_v35 = vmul.f32 %v69_v23, %v69_v23  ;;  %v99_v36 = vadd.f32 %v84_v25, %v83_v24  ;;  %v34_v37 = vunpack.c.l.bf16 %v22_v26 }
   0xa   :  { %v58_v39 = vunpack.c.l.bf16 %v46_v32  ;;  %v72_v40 = vsub.f32 %v32_v27, %v56_v28  ;;  %v87_v41 = vmul.f32 %v70_v29, %v70_v29  ;;  %v35_v43 = vunpack.c.h.bf16 %v22_v26 }
   0xb   :  { %v100_v42 = vadd.f32 %v99_v36, %v85_v30  ;;  %v59_v45 = vunpack.c.h.bf16 %v46_v32  ;;  %v73_v46 = vsub.f32 %v33_v31, %v57_v33  ;;  %v88_v47 = vmul.f32 %v71_v34, %v71_v34 }
   0xc   :  { %v36_v49 = vunpack.c.l.bf16 %v23_v38  ;;  %v60_v51 = vunpack.c.l.bf16 %v47_v44  ;;  %v74_v52 = vsub.f32 %v34_v37, %v58_v39  ;;  %v89_v53 = vmul.f32 %v72_v40, %v72_v40 }
   0xd   :  { %v101_v48 = vadd.f32 %v100_v42, %v86_v35  ;;  %v37_v55 = vunpack.c.h.bf16 %v23_v38  ;;  %v61_v57 = vunpack.c.h.bf16 %v47_v44  ;;  %v75_v58 = vsub.f32 %v35_v43, %v59_v45 }
   0xe   :  { %v90_v59 = vmul.f32 %v73_v46, %v73_v46  ;;  %v38_v61 = vunpack.c.l.bf16 %v24_v50  ;;  %v62_v63 = vunpack.c.l.bf16 %v48_v56  ;;  %v76_v0 = vsub.f32 %v36_v49, %v60_v51 }
   0xf   :  { %v102_v54 = vadd.f32 %v101_v48, %v87_v41  ;;  %v91_v1 = vmul.f32 %v74_v52, %v74_v52  ;;  %v39_v3 = vunpack.c.h.bf16 %v24_v50  ;;  %v63_v5 = vunpack.c.h.bf16 %v48_v56 }
  0x10   :  { %v77_v6 = vsub.f32 %v37_v55, %v61_v57  ;;  %v92_v7 = vmul.f32 %v75_v58, %v75_v58  ;;  %v40_v9 = vunpack.c.l.bf16 %v25_v62  ;;  %v64_v10 = vunpack.c.l.bf16 %v49_v4 }
  0x11   :  { %v103_v60 = vadd.f32 %v102_v54, %v88_v47  ;;  %v78_v11 = vsub.f32 %v38_v61, %v62_v63  ;;  %v93_v12 = vmul.f32 %v76_v0, %v76_v0  ;;  %v41_v14 = vunpack.c.h.bf16 %v25_v62 }
  0x12   :  { %v65_v15 = vunpack.c.h.bf16 %v49_v4  ;;  %v79_v16 = vsub.f32 %v39_v3, %v63_v5  ;;  %v94_v17 = vmul.f32 %v77_v6, %v77_v6  ;;  %v80_v19 = vsub.f32 %v40_v9, %v64_v10 }
  0x13   :  { %v104_v2 = vadd.f32 %v103_v60, %v89_v53  ;;  %v95_v20 = vmul.f32 %v78_v11, %v78_v11 }
  0x14   :  { %v81_v22 = vsub.f32 %v41_v14, %v65_v15  ;;  %v96_v23 = vmul.f32 %v79_v16, %v79_v16  ;;  %v97_v25 = vmul.f32 %v80_v19, %v80_v19 }
  0x15   :  { %v105_v8 = vadd.f32 %v104_v2, %v90_v59 }
  0x16   :  { %v98_v27 = vmul.f32 %v81_v22, %v81_v22 }
  0x17   :  { %v106_v13 = vadd.f32 %v105_v8, %v91_v1 }
  0x19   :  { %v107_v18 = vadd.f32 %v106_v13, %v92_v7 }
  0x1b   :  { %v108_v21 = vadd.f32 %v107_v18, %v93_v12 }
  0x1d   :  { %v109_v24 = vadd.f32 %v108_v21, %v94_v17 }
  0x1f   :  { %v110_v26 = vadd.f32 %v109_v24, %v95_v20 }
  0x21   :  { %v111_v28 = vadd.f32 %v110_v26, %v96_v23 }
  0x23   :  { %v112_v29 = vadd.f32 %v111_v28, %v97_v25 }
  0x25   :  { %v113_v30 = vadd.f32 %v112_v29, %v98_v27 }
  0x27   :  { %114 = vadd.xlane.f32.xlu0 %v113_v30 }
  0xb0   :  { %v115_v31 = vpop.xlane.xlu0 %114 }
  0xb1   :  { %v116_v32 = vrot.slane %v115_v31, 4 }
  0xb3   :  { %v117_v33 = vadd.f32 %v116_v32, %v115_v31 }
  0xb5   :  { %v118_v34 = vrot.slane %v117_v33, 2 }
  0xb7   :  { %v119_v35 = vadd.f32 %v118_v34, %v117_v33 }
  0xb9   :  { %v120_v36 = vrot.slane %v119_v35, 1 }
  0xbb   :  { %v121_v37 = vadd.f32 %v120_v36, %v119_v35 }
  0xbd   :  { %146 = vpush %v121_v37 }
  0xee   :  { %s147_s0 = spop %146 }
  0xef   :  { %s130_s1 = smul.f32 6.1035156e-05, %s147_s0 }
  0xf1   :  { %132 = sst [smem:[#allocation3]] %s130_s1 }
  0xf2   :  { %140 = dma.smem_to_hbm %s159_s13, 16, %s228_s2, [#allocation4]  }
  0xf3   :  { %157 = dma.done.wait [#allocation4], 16  }
  0xf4   :  { %158 = vsyncadd [#allocation4], 4294967280 }
  0xf5   :  { %144 = sfence }
  0xf6   :  { %145 = vsyncpa [#allocation4], 1 }

// kernel: vgg_loss.16
= control target key start
LH: loop header
LB: loop body
LE: loop exit
PB: predicated region body
PF: predicated region fallthrough
CT: control target
= control target key end

     0   :  { %s3761_s12 = smov 0   ;;  %s4835_s0 = inlined_call_operand.vmem [shape: bf16[8,42,256], index: 0, kind: input, shape index: {}]   ;;  %s4836_s1 = inlined_call_operand.vmem [shape: bf16[9,256,256], index: 1, kind: input, shape index: {}]   ;;  %s4837_s2 = inlined_call_operand.vmem [shape: f32[1,256], index: 2, kind: input, shape index: {}]   ;;  %s4838_s3 = inlined_call_operand.vmem [shape: bf16[8,24,256], index: 3, kind: output, shape index: {}]  }
   0x1 LB: > { %s2675_s13 = sadd.s32 4294967295, %s3739_s12   ;;  %p2679_p0 = scmp.ge.s32.totalorder %s3739_s12, 1  ;;  %s3739_s12 = sphi %s3761_s12, %s13_s12  }
   0x2   : > { %p137_p1 = scmp.lt.s32.totalorder %s3739_s12, 9 }
   0x4   : > { %p138_p2 = pnand %p2679_p0, %p137_p1 }
   0x5   : > { %p161_p3 = scmp.lt.s32.totalorder (!%p138_p2), %s2675_s13, 7 }
   0x6   : > { %141 = sbr.rel (%p138_p2) target bundleno = 538 (0x21a), region = 32 }
   0xb   : > { %v3288_v0 = vld [vmem:[%s4836_s1 + $0x174] ss:$8 sps:$4 sm:$0xff]   ;;  %v3292_v2 = vld [vmem:[%s4836_s1 + $0x170] ss:$8 sps:$4 sm:$0xff]   ;;  %v3294_v4 = vld [vmem:[%s4836_s1 + $0x164] ss:$8 sps:$4 sm:$0xff]  }
   0xc   : > { %v3290_v1 = vld [vmem:[%s4836_s1 + $0x74] ss:$8 sps:$4 sm:$0xff]   ;;  %452 = vmatprep.subr.bf16.mxu0 %v3288_v0  ;;  %v3293_v3 = vld [vmem:[%s4836_s1 + $0x70] ss:$8 sps:$4 sm:$0xff]   ;;  %v3296_v5 = vld [vmem:[%s4836_s1 + $0x64] ss:$8 sps:$4 sm:$0xff]  }
   0xd   : > { %663 = vmatprep.subr.bf16.mxu1 %v3290_v1  ;;  %453 = vmatpush1.bf16.msra.mxu0 %v3292_v2  ;;  %v3298_v6 = vld [vmem:[%s4836_s1 + $0x160] ss:$8 sps:$4 sm:$0xff]   ;;  %v3300_v8 = vld [vmem:[%s4836_s1 + $0x154] ss:$8 sps:$4 sm:$0xff]   ;;  %v3304_v10 = vld [vmem:[%s4836_s1 + $0x150] ss:$8 sps:$4 sm:$0xff]  }
   0xe   : > { %664 = vmatpush1.bf16.msra.mxu1 %v3293_v3  ;;  %454 = vmatprep.subr.bf16.mxu0 %v3294_v4  ;;  %v3299_v7 = vld [vmem:[%s4836_s1 + $0x60] ss:$8 sps:$4 sm:$0xff]   ;;  %v3302_v9 = vld [vmem:[%s4836_s1 + $0x54] ss:$8 sps:$4 sm:$0xff]   ;;  %v3305_v11 = vld [vmem:[%s4836_s1 + $0x50] ss:$8 sps:$4 sm:$0xff]  }
   0xf   : > { %665 = vmatprep.subr.bf16.mxu1 %v3296_v5  ;;  %v3306_v12 = vld [vmem:[%s4836_s1 + $0x144] ss:$8 sps:$4 sm:$0xff]   ;;  %v3310_v14 = vld [vmem:[%s4836_s1 + $0x140] ss:$8 sps:$4 sm:$0xff]   ;;  %v3312_v16 = vld [vmem:[%s4836_s1 + $0x134] ss:$8 sps:$4 sm:$0xff]  }
  0x10   : > { %v3308_v13 = vld [vmem:[%s4836_s1 + $0x44] ss:$8 sps:$4 sm:$0xff]   ;;  %v3311_v15 = vld [vmem:[%s4836_s1 + $0x40] ss:$8 sps:$4 sm:$0xff]   ;;  %v3314_v17 = vld [vmem:[%s4836_s1 + $0x34] ss:$8 sps:$4 sm:$0xff]  }
  0x11   : > { %455 = vmatpush1.bf16.msra.mxu0 %v3298_v6  ;;  %v3316_v18 = vld [vmem:[%s4836_s1 + $0x130] ss:$8 sps:$4 sm:$0xff]   ;;  %v3318_v20 = vld [vmem:[%s4836_s1 + $0x124] ss:$8 sps:$4 sm:$0xff]   ;;  %v3322_v22 = vld [vmem:[%s4836_s1 + $0x120] ss:$8 sps:$4 sm:$0xff]  }
  0x12   : > { %666 = vmatpush1.bf16.msra.mxu1 %v3299_v7  ;;  %456 = vmatprep.subr.bf16.mxu0 %v3300_v8  ;;  %v3317_v19 = vld [vmem:[%s4836_s1 + $0x30] ss:$8 sps:$4 sm:$0xff]   ;;  %v3320_v21 = vld [vmem:[%s4836_s1 + $0x24] ss:$8 sps:$4 sm:$0xff]   ;;  %v3323_v23 = vld [vmem:[%s4836_s1 + $0x20] ss:$8 sps:$4 sm:$0xff]  }
  0x13   : > { %667 = vmatprep.subr.bf16.mxu1 %v3302_v9  ;;  %v3324_v24 = vld [vmem:[%s4836_s1 + $0x114] ss:$8 sps:$4 sm:$0xff]   ;;  %v3328_v26 = vld [vmem:[%s4836_s1 + $0x110] ss:$8 sps:$4 sm:$0xff]   ;;  %v3330_v28 = vld [vmem:[%s4836_s1 + $0x104] ss:$8 sps:$4 sm:$0xff]  }
  0x14   : > { %v3326_v25 = vld [vmem:[%s4836_s1 + $0x14] ss:$8 sps:$4 sm:$0xff]   ;;  %v3329_v27 = vld [vmem:[%s4836_s1 + $0x10] ss:$8 sps:$4 sm:$0xff]   ;;  %v3332_v29 = vld [vmem:[%s4836_s1 + $0x4] ss:$8 sps:$4 sm:$0xff]  }
  0x15   : > { %457 = vmatpush1.bf16.msra.mxu0 %v3304_v10  ;;  %v3334_v30 = vld [vmem:[%s4836_s1 + $0x100] ss:$8 sps:$4 sm:$0xff]   ;;  %v3336_v32 = vld [vmem:[%s4836_s1 + $0x1f4] ss:$8 sps:$4 sm:$0xff]   ;;  %v3340_v34 = vld [vmem:[%s4836_s1 + $0x1f0] ss:$8 sps:$4 sm:$0xff]  }
  0x16   : > { %668 = vmatpush1.bf16.msra.mxu1 %v3305_v11  ;;  %458 = vmatprep.subr.bf16.mxu0 %v3306_v12  ;;  %v3335_v31 = vld [vmem:[%s4836_s1] ss:$8 sps:$4 sm:$0xff]   ;;  %v3338_v33 = vld [vmem:[%s4836_s1 + $0xf4] ss:$8 sps:$4 sm:$0xff]   ;;  %v3341_v35 = vld [vmem:[%s4836_s1 + $0xf0] ss:$8 sps:$4 sm:$0xff]  }
  0x17   : > { %669 = vmatprep.subr.bf16.mxu1 %v3308_v13  ;;  %s4840_s13 = smov (!%p161_p3, %s2675_s13), 7  ;;  %v3342_v36 = vld [vmem:[%s4836_s1 + $0x1e4] ss:$8 sps:$4 sm:$0xff]   ;;  %v3346_v38 = vld [vmem:[%s4836_s1 + $0x1e0] ss:$8 sps:$4 sm:$0xff]   ;;  %vm751_vm1 = vcmask 1046528  }
  0x18   : > { %v3344_v37 = vld [vmem:[%s4836_s1 + $0xe4] ss:$8 sps:$4 sm:$0xff]   ;;  %s3278_s17 = smul.u32 48, %s4840_s13  ;;  %v3347_v39 = vld [vmem:[%s4836_s1 + $0xe0] ss:$8 sps:$4 sm:$0xff]   ;;  %vm1012_vm2 = vcmask 1044480  }
  0x19   : > { %459 = vmatpush1.bf16.msra.mxu0 %v3310_v14  ;;  %v3348_v40 = vld [vmem:[%s4836_s1 + $0x1d4] ss:$8 sps:$4 sm:$0xff]   ;;  %v3352_v42 = vld [vmem:[%s4836_s1 + $0x1d0] ss:$8 sps:$4 sm:$0xff]   ;;  %v3354_v44 = vld [vmem:[%s4836_s1 + $0x1c4] ss:$8 sps:$4 sm:$0xff]  }
  0x1a   : > { %670 = vmatpush1.bf16.msra.mxu1 %v3311_v15  ;;  %460 = vmatprep.subr.bf16.mxu0 %v3312_v16  ;;  %v3350_v41 = vld [vmem:[%s4836_s1 + $0xd4] ss:$8 sps:$4 sm:$0xff]   ;;  %v3353_v43 = vld [vmem:[%s4836_s1 + $0xd0] ss:$8 sps:$4 sm:$0xff]   ;;  %s3911_s30 = scalar_lea.vmem %s4835_s0, %s3278_s17  ;;  %v3356_v45 = vld [vmem:[%s4836_s1 + $0xc4] ss:$8 sps:$4 sm:$0xff]  }
  0x1b   : > { %671 = vmatprep.subr.bf16.mxu1 %v3314_v17  ;;  %v3358_v46 = vld [vmem:[%s4836_s1 + $0x1c0] ss:$8 sps:$4 sm:$0xff]   ;;  %v3930_v50 = vld [vmem:[%s3911_s30 + $0x10] sm:$0xff]  ;;  %v174_v51 = vld [vmem:[%s3911_s30 + $0x18] sm:$0xff]  ;;  %vm257_vm0 = vsmask.f32 7424 }
  0x1c   : > { %v3359_v47 = vld [vmem:[%s4836_s1 + $0xc0] ss:$8 sps:$4 sm:$0xff]   ;;  %v3360_v52 = vld [vmem:[%s4836_s1 + $0x1b4] ss:$8 sps:$4 sm:$0xff]   ;;  %v3940_v54 = vcombine.high %v3930_v50, %v174_v51  ;;  %v3946_v56 = vcombine.low %v3930_v50, %v174_v51  ;;  %v3364_v60 = vld [vmem:[%s4836_s1 + $0x1b0] ss:$8 sps:$4 sm:$0xff]  }
  0x1d   : > { %461 = vmatpush1.bf16.msra.mxu0 %v3316_v18  ;;  %v171_v48 = vld [vmem:[%s3911_s30] sm:$0xff]  ;;  %v3927_v49 = vld [vmem:[%s3911_s30 + $0x8] sm:$0xff]  ;;  %v3362_v55 = vld [vmem:[%s4836_s1 + $0xb4] ss:$8 sps:$4 sm:$0xff]   ;;  %vm1273_vm3 = vsmask.f32 4352 }
  0x1e   : > { %672 = vmatpush1.bf16.msra.mxu1 %v3317_v19  ;;  %462 = vmatprep.subr.bf16.mxu0 %v3318_v20  ;;  %v3937_v53 = vcombine.high %v171_v48, %v3927_v49  ;;  %v278_v59 = vshll.u32 %v3940_v54, 16  ;;  %v3365_v61 = vld [vmem:[%s4836_s1 + $0xb0] ss:$8 sps:$4 sm:$0xff]   ;;  %v3965_v0 = vcombine.low %v171_v48, %v3927_v49  ;;  %v3366_v1 = vld [vmem:[%s4836_s1 + $0x1a4] ss:$8 sps:$4 sm:$0xff]   ;;  %v266_v3 = vshll.u32 %v3946_v56, 16 }
  0x1f   : > { %673 = vmatprep.subr.bf16.mxu1 %v3320_v21  ;;  %v3368_v2 = vld [vmem:[%s4836_s1 + $0xa4] ss:$8 sps:$4 sm:$0xff]   ;;  %v3370_v4 = vld [vmem:[%s4836_s1 + $0x1a0] ss:$8 sps:$4 sm:$0xff]   ;;  %v282_v8 = vshrl.u32 %v3946_v56, 16  ;;  %v753_v21 = vrot.slane %v3946_v56, 1  ;;  %v4063_v51 = vcombine.low %v3927_v49, %v3930_v50 }
  0x20   : > { %v271_v57 = vshrl.u32 %v3937_v53, 16  ;;  %v273_v58 = vshll.u32 %v3937_v53, 16  ;;  %695 = vmatprep.mubr.bf16.mxu1 %v3937_v53  ;;  %v3962_v63 = vrot.slane %v278_v59, 1  ;;  %v3371_v6 = vld [vmem:[%s4836_s1 + $0xa0] ss:$8 sps:$4 sm:$0xff]   ;;  %v1278_v7 = vrot.slane %v266_v3, 4 }
  0x21   : > { %463 = vmatpush1.bf16.msra.mxu0 %v3322_v22  ;;  %v3372_v9 = vld [vmem:[%s4836_s1 + $0x194] ss:$8 sps:$4 sm:$0xff]   ;;  %v261_v11 = vshll.u32 %v3965_v0, 16  ;;  %v1277_v13 = vrot.slane %v282_v8, 3  ;;  %v3376_v14 = vld [vmem:[%s4836_s1 + $0x190] ss:$8 sps:$4 sm:$0xff]  }
  0x22   : > { %674 = vmatpush1.bf16.msra.mxu1 %v3323_v23  ;;  %464 = vmatprep.subr.bf16.mxu0 %v3324_v24  ;;  %v275_v62 = vrot.slane %v273_v58, 1  ;;  %v3374_v12 = vld [vmem:[%s4836_s1 + $0x94] ss:$8 sps:$4 sm:$0xff]   ;;  %v3377_v15 = vld [vmem:[%s4836_s1 + $0x90] ss:$8 sps:$4 sm:$0xff]   ;;  %v259_v18 = vshrl.u32 %v3965_v0, 16 }
  0x23   : > { %675 = vmatprep.subr.bf16.mxu1 %v3326_v25  ;;  %v3378_v16 = vld [vmem:[%s4836_s1 + $0x184] ss:$8 sps:$4 sm:$0xff]   ;;  %v4003_v17 = vor.u32 %v1278_v7, %v1277_v13  ;;  %v263_v19 = vrot.slane %v261_v11, 1  ;;  %v752_v20 = vrot.slane %v3965_v0, 1  ;;  %v1013_v23 = vrot.slane %v3965_v0, 3  ;;  %s3279_s6 = smul.u32 24, %s4840_s13 }
  0x24   : > { %v276_v5 = vor.u32 %v275_v62, %v271_v57  ;;  %v3380_v22 = vld [vmem:[%s4836_s1 + $0x84] ss:$8 sps:$4 sm:$0xff]   ;;  %v1014_v24 = vrot.slane %v3946_v56, 3  ;;  %v3382_v25 = vld [vmem:[%s4836_s1 + $0x180] ss:$8 sps:$4 sm:$0xff]   ;;  %vm1802_vm4 = vcmask 1045504  }
  0x25   : > { %465 = vmatpush1.bf16.msra.mxu0 %v3328_v26  ;;  %v285_v26 = vshrl.u32 %v3940_v54, 16  ;;  %v3400_v62 = vld [vmem:[%s4836_s1 + $0x250] ss:$8 sps:$4 sm:$0xff]   ;;  %v3406_v7 = vld [vmem:[%s4836_s1 + $0x240] ss:$8 sps:$4 sm:$0xff]   ;;  %s170_s9 = scalar_lea.vmem %s4838_s3, %s3279_s6 }
  0x26   : > { %676 = vmatpush1.bf16.msra.mxu1 %v3329_v27  ;;  %466 = vmatprep.subr.bf16.mxu0 %v3330_v28  ;;  %v281_v10 = vsel %vm257_vm0, %v276_v5, %v3962_v63  ;;  %v4020_v27 = vsel %vm751_vm1, %v752_v20, %v753_v21  ;;  %v3383_v28 = vld [vmem:[%s4836_s1 + $0x80] ss:$8 sps:$4 sm:$0xff]   ;;  %v1017_v5 = vrot.slane %v3940_v54, 3  ;;  %v3415_v13 = vld [vmem:[%s4836_s1 + $0x330] ss:$8 sps:$4 sm:$0xff]  }
  0x27   : > { %677 = vmatprep.subr.bf16.mxu1 %v3332_v29  ;;  %484 = vmatprep.mubr.bf16.mxu0 %v281_v10  ;;  %v3390_v29 = vld [vmem:[%s4836_s1 + $0x274] ss:$8 sps:$4 sm:$0xff]   ;;  %vm2063_vm5 = vsmask.f32 5376 }
  0x28   : > { %v3414_v10 = vld [vmem:[%s4836_s1 + $0x234] ss:$8 sps:$4 sm:$0xff]  }
  0x29   : > { %467 = vmatpush1.bf16.msra.mxu0 %v3334_v30  ;;  %v4031_v30 = vsel %vm1012_vm2, %v1013_v23, %v1014_v24  ;;  %v3429_v20 = vld [vmem:[%s4836_s1 + $0x314] ss:$8 sps:$4 sm:$0xff]   ;;  %v3427_v23 = vld [vmem:[%s4836_s1 + $0x310] ss:$8 sps:$4 sm:$0xff]  }
  0x2a   : > { %678 = vmatpush1.bf16.msra.mxu1 %v3335_v31  ;;  %468 = vmatprep.subr.bf16.mxu0 %v3336_v32  ;;  %v264_v31 = vor.u32 %v263_v19, %v259_v18  ;;  %v268_v32 = vrot.slane %v266_v3, 1  ;;  %v756_v3 = vrot.slane %v3940_v54, 1  ;;  %v3426_v19 = vld [vmem:[%s4836_s1 + $0x214] ss:$8 sps:$4 sm:$0xff]   ;;  %v3509_v54 = vld [vmem:[%s4836_s1 + $0x544] ss:$8 sps:$4 sm:$0xff]  }
  0x2b   : > { %679 = vmatprep.subr.bf16.mxu1 %v3338_v33  ;;  %v3393_v33 = vld [vmem:[%s4836_s1 + $0x374] ss:$8 sps:$4 sm:$0xff]  }
  0x2c   : > { %v3515_v56 = vld [vmem:[%s4836_s1 + $0x534] ss:$8 sps:$4 sm:$0xff]  }
  0x2d   : > { %469 = vmatpush2.bf16.msra.mxu0 %v3340_v34  ;;  %v1284_v34 = vrot.slane %v285_v26, 3 }
  0x2e   : > { %680 = vmatpush2.bf16.msra.mxu1 %v3341_v35  ;;  %470 = vmatprep.subr.bf16.mxu0 %v3342_v36  ;;  %v1274_v35 = vrot.slane %v259_v18, 3  ;;  %v1281_v36 = vrot.slane %v271_v57, 3  ;;  %v3421_v18 = vld [vmem:[%s4836_s1 + $0x320] ss:$8 sps:$4 sm:$0xff]  }
  0x2f   : > { %681 = vmatprep.subr.bf16.mxu1 %v3344_v37  ;;  %v1282_v37 = vrot.slane %v273_v58, 4  ;;  %v3394_v58 = vld [vmem:[%s4836_s1 + $0x260] ss:$8 sps:$4 sm:$0xff]  }
  0x31   : > { %471 = vmatpush2.bf16.msra.mxu0 %v3346_v38  ;;  %v1285_v38 = vrot.slane %v278_v59, 4 }
  0x32   : > { %682 = vmatpush2.bf16.msra.mxu1 %v3347_v39  ;;  %472 = vmatprep.subr.bf16.mxu0 %v3348_v40  ;;  %v3388_v39 = vld [vmem:[%s4836_s1 + $0x270] ss:$8 sps:$4 sm:$0xff]  }
  0x33   : > { %683 = vmatprep.subr.bf16.mxu1 %v3350_v41  ;;  %v3391_v40 = vld [vmem:[%s4836_s1 + $0x370] ss:$8 sps:$4 sm:$0xff]   ;;  %v1283_v41 = vor.u32 %v1282_v37, %v1281_v36  ;;  %v3447_v36 = vld [vmem:[%s4836_s1 + $0x3e4] ss:$8 sps:$4 sm:$0xff]   ;;  %v3442_v37 = vld [vmem:[%s4836_s1 + $0x2e0] ss:$8 sps:$4 sm:$0xff]  }
  0x35   : > { %473 = vmatpush2.bf16.msra.mxu0 %v3352_v42  ;;  %v1275_v42 = vrot.slane %v261_v11, 4  ;;  %v3417_v11 = vld [vmem:[%s4836_s1 + $0x334] ss:$8 sps:$4 sm:$0xff]  }
  0x36   : > { %684 = vmatpush2.bf16.msra.mxu1 %v3353_v43  ;;  %474 = vmatprep.subr.bf16.mxu0 %v3354_v44  ;;  %v269_v43 = vsel %vm257_vm0, %v264_v31, %v268_v32  ;;  %v3396_v44 = vld [vmem:[%s4836_s1 + $0x264] ss:$8 sps:$4 sm:$0xff]   ;;  %v3438_v31 = vld [vmem:[%s4836_s1 + $0x2f4] ss:$8 sps:$4 sm:$0xff]  }
  0x37   : > { %685 = vmatprep.subr.bf16.mxu1 %v3356_v45  ;;  %v4052_v45 = vor.u32 %v1285_v38, %v1284_v34  ;;  %v1276_v48 = vor.u32 %v1275_v42, %v1274_v35  ;;  %v3439_v34 = vld [vmem:[%s4836_s1 + $0x3f0] ss:$8 sps:$4 sm:$0xff]   ;;  %v3444_v35 = vld [vmem:[%s4836_s1 + $0x2e4] ss:$8 sps:$4 sm:$0xff]   ;;  %v3445_v38 = vld [vmem:[%s4836_s1 + $0x3e0] ss:$8 sps:$4 sm:$0xff]  }
  0x38   : > { %v3451_v42 = vld [vmem:[%s4836_s1 + $0x3d0] ss:$8 sps:$4 sm:$0xff]  }
  0x39   : > { %475 = vmatpush2.bf16.msra.mxu0 %v3358_v46  ;;  %v4056_v46 = vcombine.high %v3927_v49, %v3930_v50  ;;  %v4069_v57 = vsel %vm1273_vm3, %v1283_v41, %v4052_v45  ;;  %v3397_v49 = vld [vmem:[%s4836_s1 + $0x360] ss:$8 sps:$4 sm:$0xff]   ;;  %v4079_v59 = vsel %vm1273_vm3, %v1276_v48, %v4003_v17  ;;  %v3448_v41 = vld [vmem:[%s4836_s1 + $0x2d0] ss:$8 sps:$4 sm:$0xff]  }
  0x3a   : > { %686 = vmatpush2.bf16.msra.mxu1 %v3359_v47  ;;  %476 = vmatprep.subr.bf16.mxu0 %v3360_v52  ;;  %v3399_v47 = vld [vmem:[%s4836_s1 + $0x364] ss:$8 sps:$4 sm:$0xff]   ;;  %v287_v52 = vor.u32 %v285_v26, %v3962_v63  ;;  %v2684_v63 = vcombine.low %v3930_v50, %v3930_v50  ;;  %v3457_v48 = vld [vmem:[%s4836_s1 + $0x3c0] ss:$8 sps:$4 sm:$0xff]  }
  0x3b   : > { %687 = vmatprep.subr.bf16.mxu1 %v3362_v55  ;;  %v2685_v55 = vcombine.high %v3930_v50, %v3930_v50  ;;  %v3408_v50 = vld [vmem:[%s4836_s1 + $0x244] ss:$8 sps:$4 sm:$0xff]  }
  0x3c   : > { %v3435_v26 = vld [vmem:[%s4836_s1 + $0x304] ss:$8 sps:$4 sm:$0xff]  }
  0x3d   : > { %477 = vmatpush2.bf16.msra.mxu0 %v3364_v60  ;;  %v3402_v60 = vld [vmem:[%s4836_s1 + $0x254] ss:$8 sps:$4 sm:$0xff]  }
  0x3e   : > { %688 = vmatpush2.bf16.msra.mxu1 %v3365_v61  ;;  %478 = vmatprep.subr.bf16.mxu0 %v3366_v1  ;;  %v3405_v61 = vld [vmem:[%s4836_s1 + $0x354] ss:$8 sps:$4 sm:$0xff]   ;;  %v3403_v1 = vld [vmem:[%s4836_s1 + $0x350] ss:$8 sps:$4 sm:$0xff]  }
  0x3f   : > { %689 = vmatprep.subr.bf16.mxu1 %v3368_v2  ;;  %v284_v2 = vor.u32 %v282_v8, %v268_v32  ;;  %v3441_v32 = vld [vmem:[%s4836_s1 + $0x3f4] ss:$8 sps:$4 sm:$0xff]  }
  0x41   : > { %479 = vmatpush2.bf16.msra.mxu0 %v3370_v4  ;;  %v1016_v4 = vrot.slane %v3937_v53, 3 }
  0x42   : > { %690 = vmatpush2.bf16.msra.mxu1 %v3371_v6  ;;  %480 = vmatprep.subr.bf16.mxu0 %v3372_v9  ;;  %v3411_v6 = vld [vmem:[%s4836_s1 + $0x344] ss:$8 sps:$4 sm:$0xff]  }
  0x43   : > { %691 = vmatprep.subr.bf16.mxu1 %v3374_v12  ;;  %v1018_v9 = vsel %vm1012_vm2, %v1016_v4, %v1017_v5  ;;  %v3412_v12 = vld [vmem:[%s4836_s1 + $0x230] ss:$8 sps:$4 sm:$0xff]  }
  0x44   : > { %v3477_v4 = vld [vmem:[%s4836_s1 + $0x390] ss:$8 sps:$4 sm:$0xff]  }
  0x45   : > { %481 = vmatpush2.bf16.msra.mxu0 %v3376_v14  ;;  %v3420_v14 = vld [vmem:[%s4836_s1 + $0x224] ss:$8 sps:$4 sm:$0xff]  }
  0x46   : > { %692 = vmatpush2.bf16.msra.mxu1 %v3377_v15  ;;  %482 = vmatprep.subr.bf16.mxu0 %v3378_v16  ;;  %v3423_v15 = vld [vmem:[%s4836_s1 + $0x324] ss:$8 sps:$4 sm:$0xff]   ;;  %v3418_v16 = vld [vmem:[%s4836_s1 + $0x220] ss:$8 sps:$4 sm:$0xff]  }
  0x47   : > { %693 = vmatprep.subr.bf16.mxu1 %v3380_v22  ;;  %v3424_v22 = vld [vmem:[%s4836_s1 + $0x210] ss:$8 sps:$4 sm:$0xff]  }
  0x49   : > { %483 = vmatpush2.bf16.msra.mxu0 %v3382_v25  ;;  %v3432_v25 = vld [vmem:[%s4836_s1 + $0x204] ss:$8 sps:$4 sm:$0xff]  }
  0x4a   : > { %694 = vmatpush2.bf16.msra.mxu1 %v3383_v28  ;;  %922 = vmatprep.subr.bf16.mxu0 %v3390_v29  ;;  %v3430_v28 = vld [vmem:[%s4836_s1 + $0x200] ss:$8 sps:$4 sm:$0xff]  }
  0x4b   : > { %1183 = vmatprep.subr.bf16.mxu1 %v3393_v33  ;;  %v3433_v29 = vld [vmem:[%s4836_s1 + $0x300] ss:$8 sps:$4 sm:$0xff]   ;;  %v3436_v33 = vld [vmem:[%s4836_s1 + $0x2f0] ss:$8 sps:$4 sm:$0xff]  }
  0x4c   : > { %485 = vmatmul.mubr.bf16.vlgmr.msra.gmra.mxu0 %v269_v43  ;;  %v3456_v43 = vld [vmem:[%s4836_s1 + $0x2c4] ss:$8 sps:$4 sm:$0xff]  }
  0x4d   : > { %696 = vmatmul.mubr.bf16.vlgmr.msra.gmra.mxu1 %v3965_v0  ;;  %923 = vmatpush1.bf16.msra.mxu0 %v3388_v39  ;;  %v755_v0 = vrot.slane %v3937_v53, 1  ;;  %v3409_v53 = vld [vmem:[%s4836_s1 + $0x340] ss:$8 sps:$4 sm:$0xff]   ;;  %v3450_v39 = vld [vmem:[%s4836_s1 + $0x2d4] ss:$8 sps:$4 sm:$0xff]  }
  0x4e   : > { %1184 = vmatpush1.bf16.msra.mxu1 %v3391_v40  ;;  %924 = vmatprep.subr.bf16.mxu0 %v3396_v44  ;;  %v3453_v40 = vld [vmem:[%s4836_s1 + $0x3d4] ss:$8 sps:$4 sm:$0xff]   ;;  %v3459_v44 = vld [vmem:[%s4836_s1 + $0x3c4] ss:$8 sps:$4 sm:$0xff]  }
  0x4f   : > { %1185 = vmatprep.subr.bf16.mxu1 %v3399_v47  ;;  %494 = vmatprep.mubr.bf16.mxu0 %v287_v52  ;;  %v757_v8 = vsel %vm751_vm1, %v755_v0, %v756_v3  ;;  %v3454_v47 = vld [vmem:[%s4836_s1 + $0x2c0] ss:$8 sps:$4 sm:$0xff]   ;;  %v3462_v52 = vld [vmem:[%s4836_s1 + $0x2b4] ss:$8 sps:$4 sm:$0xff]  }
  0x50   : > { %705 = vmatprep.mubr.bf16.mxu1 %v2685_v55  ;;  %v3465_v55 = vld [vmem:[%s4836_s1 + $0x3b4] ss:$8 sps:$4 sm:$0xff]  }
  0x51   : > { %925 = vmatpush1.bf16.msra.mxu0 %v3394_v58  ;;  %v3460_v58 = vld [vmem:[%s4836_s1 + $0x2b0] ss:$8 sps:$4 sm:$0xff]   ;;  %v3476_v0 = vld [vmem:[%s4836_s1 + $0x294] ss:$8 sps:$4 sm:$0xff]  }
  0x52   : > { %1186 = vmatpush1.bf16.msra.mxu1 %v3397_v49  ;;  %926 = vmatprep.subr.bf16.mxu0 %v3402_v60  ;;  %v3463_v49 = vld [vmem:[%s4836_s1 + $0x3b0] ss:$8 sps:$4 sm:$0xff]   ;;  %v3468_v60 = vld [vmem:[%s4836_s1 + $0x2a4] ss:$8 sps:$4 sm:$0xff]  }
  0x53   : > { %1187 = vmatprep.subr.bf16.mxu1 %v3405_v61  ;;  %v3471_v61 = vld [vmem:[%s4836_s1 + $0x3a4] ss:$8 sps:$4 sm:$0xff]  }
  0x54   : > { %495 = vmatmul.mubr.bf16.gmra.mxu0 %v284_v2  ;;  %v3474_v2 = vld [vmem:[%s4836_s1 + $0x290] ss:$8 sps:$4 sm:$0xff]  }
  0x55   : > { %706 = vmatmul.mubr.bf16.gmra.mxu1 %v2684_v63  ;;  %927 = vmatpush1.bf16.msra.mxu0 %v3400_v62  ;;  %v3466_v62 = vld [vmem:[%s4836_s1 + $0x2a0] ss:$8 sps:$4 sm:$0xff]  }
  0x56   : > { %1188 = vmatpush1.bf16.msra.mxu1 %v3403_v1  ;;  %928 = vmatprep.subr.bf16.mxu0 %v3408_v50  ;;  %v3469_v63 = vld [vmem:[%s4836_s1 + $0x3a0] ss:$8 sps:$4 sm:$0xff]   ;;  %v3479_v1 = vld [vmem:[%s4836_s1 + $0x394] ss:$8 sps:$4 sm:$0xff]   ;;  %v3482_v50 = vld [vmem:[%s4836_s1 + $0x284] ss:$8 sps:$4 sm:$0xff]  }
  0x57   : > { %1189 = vmatprep.subr.bf16.mxu1 %v3411_v6  ;;  %954 = vmatprep.mubr.bf16.mxu0 %v757_v8  ;;  %v3485_v6 = vld [vmem:[%s4836_s1 + $0x384] ss:$8 sps:$4 sm:$0xff]   ;;  %v3488_v8 = vld [vmem:[%s4836_s1 + $0x474] ss:$8 sps:$4 sm:$0xff]  }
  0x58   : > { %1215 = vmatprep.mubr.bf16.mxu1 %v1018_v9  ;;  %v3491_v9 = vld [vmem:[%s4836_s1 + $0x574] ss:$8 sps:$4 sm:$0xff]  }
  0x59   : > { %929 = vmatpush1.bf16.msra.mxu0 %v3406_v7  ;;  %v3480_v7 = vld [vmem:[%s4836_s1 + $0x280] ss:$8 sps:$4 sm:$0xff]  }
  0x5a   : > { %1190 = vmatpush1.bf16.msra.mxu1 %v3409_v53  ;;  %930 = vmatprep.subr.bf16.mxu0 %v3414_v10  ;;  %v3483_v53 = vld [vmem:[%s4836_s1 + $0x380] ss:$8 sps:$4 sm:$0xff]   ;;  %v3486_v10 = vld [vmem:[%s4836_s1 + $0x470] ss:$8 sps:$4 sm:$0xff]  }
  0x5b   : > { %1191 = vmatprep.subr.bf16.mxu1 %v3417_v11  ;;  %v3489_v11 = vld [vmem:[%s4836_s1 + $0x570] ss:$8 sps:$4 sm:$0xff]  }
  0x5d   : > { %931 = vmatpush1.bf16.msra.mxu0 %v3412_v12  ;;  %v3494_v12 = vld [vmem:[%s4836_s1 + $0x464] ss:$8 sps:$4 sm:$0xff]  }
  0x5e   : > { %1192 = vmatpush1.bf16.msra.mxu1 %v3415_v13  ;;  %932 = vmatprep.subr.bf16.mxu0 %v3420_v14  ;;  %v3497_v13 = vld [vmem:[%s4836_s1 + $0x564] ss:$8 sps:$4 sm:$0xff]   ;;  %v3492_v14 = vld [vmem:[%s4836_s1 + $0x460] ss:$8 sps:$4 sm:$0xff]  }
  0x5f   : > { %1193 = vmatprep.subr.bf16.mxu1 %v3423_v15  ;;  %v3495_v15 = vld [vmem:[%s4836_s1 + $0x560] ss:$8 sps:$4 sm:$0xff]  }
  0x61   : > { %933 = vmatpush1.bf16.msra.mxu0 %v3418_v16  ;;  %v3500_v16 = vld [vmem:[%s4836_s1 + $0x454] ss:$8 sps:$4 sm:$0xff]  }
  0x62   : > { %1194 = vmatpush1.bf16.msra.mxu1 %v3421_v18  ;;  %934 = vmatprep.subr.bf16.mxu0 %v3426_v19  ;;  %v3501_v18 = vld [vmem:[%s4836_s1 + $0x550] ss:$8 sps:$4 sm:$0xff]   ;;  %v3506_v19 = vld [vmem:[%s4836_s1 + $0x444] ss:$8 sps:$4 sm:$0xff]  }
  0x63   : > { %1195 = vmatprep.subr.bf16.mxu1 %v3429_v20  ;;  %v3512_v20 = vld [vmem:[%s4836_s1 + $0x434] ss:$8 sps:$4 sm:$0xff]  }
  0x65   : > { %935 = vmatpush1.bf16.msra.mxu0 %v3424_v22  ;;  %v3518_v22 = vld [vmem:[%s4836_s1 + $0x424] ss:$8 sps:$4 sm:$0xff]  }
  0x66   : > { %1196 = vmatpush1.bf16.msra.mxu1 %v3427_v23  ;;  %936 = vmatprep.subr.bf16.mxu0 %v3432_v25  ;;  %v3516_v23 = vld [vmem:[%s4836_s1 + $0x420] ss:$8 sps:$4 sm:$0xff]  }
  0x67   : > { %1197 = vmatprep.subr.bf16.mxu1 %v3435_v26  ;;  %v3519_v25 = vld [vmem:[%s4836_s1 + $0x520] ss:$8 sps:$4 sm:$0xff]   ;;  %v3524_v26 = vld [vmem:[%s4836_s1 + $0x414] ss:$8 sps:$4 sm:$0xff]  }
  0x69   : > { %937 = vmatpush1.bf16.msra.mxu0 %v3430_v28  ;;  %v3527_v28 = vld [vmem:[%s4836_s1 + $0x514] ss:$8 sps:$4 sm:$0xff]  }
  0x6a   : > { %1198 = vmatpush1.bf16.msra.mxu1 %v3433_v29  ;;  %938 = vmatprep.subr.bf16.mxu0 %v3438_v31  ;;  %v3522_v29 = vld [vmem:[%s4836_s1 + $0x410] ss:$8 sps:$4 sm:$0xff]  }
  0x6b   : > { %1199 = vmatprep.subr.bf16.mxu1 %v3441_v32  ;;  %v3525_v31 = vld [vmem:[%s4836_s1 + $0x510] ss:$8 sps:$4 sm:$0xff]   ;;  %v3530_v32 = vld [vmem:[%s4836_s1 + $0x404] ss:$8 sps:$4 sm:$0xff]  }
  0x6d   : > { %939 = vmatpush2.bf16.msra.mxu0 %v3436_v33  ;;  %v3533_v33 = vld [vmem:[%s4836_s1 + $0x504] ss:$8 sps:$4 sm:$0xff]  }
  0x6e   : > { %1200 = vmatpush2.bf16.msra.mxu1 %v3439_v34  ;;  %940 = vmatprep.subr.bf16.mxu0 %v3444_v35  ;;  %v3528_v34 = vld [vmem:[%s4836_s1 + $0x400] ss:$8 sps:$4 sm:$0xff]  }
  0x6f   : > { %1201 = vmatprep.subr.bf16.mxu1 %v3447_v36  ;;  %v3531_v35 = vld [vmem:[%s4836_s1 + $0x500] ss:$8 sps:$4 sm:$0xff]   ;;  %v3536_v36 = vld [vmem:[%s4836_s1 + $0x4f4] ss:$8 sps:$4 sm:$0xff]  }
  0x71   : > { %941 = vmatpush2.bf16.msra.mxu0 %v3442_v37  ;;  %v3539_v37 = vld [vmem:[%s4836_s1 + $0x5f4] ss:$8 sps:$4 sm:$0xff]  }
  0x72   : > { %1202 = vmatpush2.bf16.msra.mxu1 %v3445_v38  ;;  %942 = vmatprep.subr.bf16.mxu0 %v3450_v39  ;;  %v3534_v38 = vld [vmem:[%s4836_s1 + $0x4f0] ss:$8 sps:$4 sm:$0xff]  }
  0x73   : > { %1203 = vmatprep.subr.bf16.mxu1 %v3453_v40  ;;  %v3537_v39 = vld [vmem:[%s4836_s1 + $0x5f0] ss:$8 sps:$4 sm:$0xff]   ;;  %v3542_v40 = vld [vmem:[%s4836_s1 + $0x4e4] ss:$8 sps:$4 sm:$0xff]  }
  0x75   : > { %943 = vmatpush2.bf16.msra.mxu0 %v3448_v41  ;;  %v3545_v41 = vld [vmem:[%s4836_s1 + $0x5e4] ss:$8 sps:$4 sm:$0xff]  }
  0x76   : > { %1204 = vmatpush2.bf16.msra.mxu1 %v3451_v42  ;;  %944 = vmatprep.subr.bf16.mxu0 %v3456_v43  ;;  %v3540_v42 = vld [vmem:[%s4836_s1 + $0x4e0] ss:$8 sps:$4 sm:$0xff]  }
  0x77   : > { %1205 = vmatprep.subr.bf16.mxu1 %v3459_v44  ;;  %v3543_v43 = vld [vmem:[%s4836_s1 + $0x5e0] ss:$8 sps:$4 sm:$0xff]   ;;  %v3548_v44 = vld [vmem:[%s4836_s1 + $0x4d4] ss:$8 sps:$4 sm:$0xff]  }
  0x79   : > { %945 = vmatpush2.bf16.msra.mxu0 %v3454_v47  ;;  %v3551_v47 = vld [vmem:[%s4836_s1 + $0x5d4] ss:$8 sps:$4 sm:$0xff]  }
  0x7a   : > { %1206 = vmatpush2.bf16.msra.mxu1 %v3457_v48  ;;  %946 = vmatprep.subr.bf16.mxu0 %v3462_v52  ;;  %v3546_v48 = vld [vmem:[%s4836_s1 + $0x4d0] ss:$8 sps:$4 sm:$0xff]  }
  0x7b   : > { %1207 = vmatprep.subr.bf16.mxu1 %v3465_v55  ;;  %v3549_v52 = vld [vmem:[%s4836_s1 + $0x5d0] ss:$8 sps:$4 sm:$0xff]   ;;  %v3554_v55 = vld [vmem:[%s4836_s1 + $0x4c4] ss:$8 sps:$4 sm:$0xff]  }
  0x7d   : > { %947 = vmatpush2.bf16.msra.mxu0 %v3460_v58  ;;  %v3557_v58 = vld [vmem:[%s4836_s1 + $0x5c4] ss:$8 sps:$4 sm:$0xff]  }
  0x7e   : > { %1208 = vmatpush2.bf16.msra.mxu1 %v3463_v49  ;;  %948 = vmatprep.subr.bf16.mxu0 %v3468_v60  ;;  %v3552_v49 = vld [vmem:[%s4836_s1 + $0x4c0] ss:$8 sps:$4 sm:$0xff]  }
  0x7f   : > { %1209 = vmatprep.subr.bf16.mxu1 %v3471_v61  ;;  %v3555_v60 = vld [vmem:[%s4836_s1 + $0x5c0] ss:$8 sps:$4 sm:$0xff]   ;;  %v3560_v61 = vld [vmem:[%s4836_s1 + $0x4b4] ss:$8 sps:$4 sm:$0xff]  }
  0x81   : > { %949 = vmatpush2.bf16.msra.mxu0 %v3466_v62  ;;  %v3563_v62 = vld [vmem:[%s4836_s1 + $0x5b4] ss:$8 sps:$4 sm:$0xff]  }
  0x82   : > { %1210 = vmatpush2.bf16.msra.mxu1 %v3469_v63  ;;  %950 = vmatprep.subr.bf16.mxu0 %v3476_v0  ;;  %v3558_v63 = vld [vmem:[%s4836_s1 + $0x4b0] ss:$8 sps:$4 sm:$0xff]  }
  0x83   : > { %1211 = vmatprep.subr.bf16.mxu1 %v3479_v1  ;;  %v3561_v0 = vld [vmem:[%s4836_s1 + $0x5b0] ss:$8 sps:$4 sm:$0xff]   ;;  %v3566_v1 = vld [vmem:[%s4836_s1 + $0x4a4] ss:$8 sps:$4 sm:$0xff]  }
  0x85   : > { %951 = vmatpush2.bf16.msra.mxu0 %v3474_v2  ;;  %v3569_v2 = vld [vmem:[%s4836_s1 + $0x5a4] ss:$8 sps:$4 sm:$0xff]  }
  0x86   : > { %1212 = vmatpush2.bf16.msra.mxu1 %v3477_v4  ;;  %952 = vmatprep.subr.bf16.mxu0 %v3482_v50  ;;  %v3564_v4 = vld [vmem:[%s4836_s1 + $0x4a0] ss:$8 sps:$4 sm:$0xff]  }
  0x87   : > { %1213 = vmatprep.subr.bf16.mxu1 %v3485_v6  ;;  %v3567_v50 = vld [vmem:[%s4836_s1 + $0x5a0] ss:$8 sps:$4 sm:$0xff]   ;;  %v3572_v6 = vld [vmem:[%s4836_s1 + $0x494] ss:$8 sps:$4 sm:$0xff]  }
  0x89   : > { %953 = vmatpush2.bf16.msra.mxu0 %v3480_v7  ;;  %v3575_v7 = vld [vmem:[%s4836_s1 + $0x594] ss:$8 sps:$4 sm:$0xff]  }
  0x8a   : > { %1214 = vmatpush2.bf16.msra.mxu1 %v3483_v53  ;;  %1452 = vmatprep.subr.bf16.mxu0 %v3488_v8  ;;  %v3570_v53 = vld [vmem:[%s4836_s1 + $0x490] ss:$8 sps:$4 sm:$0xff]  }
  0x8b   : > { %1706 = vmatprep.subr.bf16.mxu1 %v3491_v9  ;;  %v3573_v8 = vld [vmem:[%s4836_s1 + $0x590] ss:$8 sps:$4 sm:$0xff]   ;;  %v3578_v9 = vld [vmem:[%s4836_s1 + $0x484] ss:$8 sps:$4 sm:$0xff]  }
  0x8c   : > { %955 = vmatmul.mubr.bf16.vlgmr.msra.gmra.mxu0 %v4020_v27  ;;  %v3503_v27 = vld [vmem:[%s4836_s1 + $0x554] ss:$8 sps:$4 sm:$0xff]  }
  0x8d   : > { %1216 = vmatmul.mubr.bf16.vlgmr.msra.gmra.mxu1 %v4031_v30  ;;  %1453 = vmatpush1.bf16.msra.mxu0 %v3486_v10  ;;  %v3498_v30 = vld [vmem:[%s4836_s1 + $0x450] ss:$8 sps:$4 sm:$0xff]   ;;  %v4459_v10 = vld [vmem:[%s3911_s30 + $0x20] sm:$0xff] }
  0x8e   : > { %1707 = vmatpush1.bf16.msra.mxu1 %v3489_v11  ;;  %1454 = vmatprep.subr.bf16.mxu0 %v3494_v12  ;;  %v3581_v11 = vld [vmem:[%s4836_s1 + $0x584] ss:$8 sps:$4 sm:$0xff]   ;;  %v3576_v12 = vld [vmem:[%s4836_s1 + $0x480] ss:$8 sps:$4 sm:$0xff]  }
  0x8f   : > { %1708 = vmatprep.subr.bf16.mxu1 %v3497_v13  ;;  %964 = vmatprep.mubr.bf16.mxu0 %v756_v3  ;;  %v3504_v3 = vld [vmem:[%s4836_s1 + $0x440] ss:$8 sps:$4 sm:$0xff]  }
  0x90   : > { %1225 = vmatprep.mubr.bf16.mxu1 %v1017_v5  ;;  %v3507_v5 = vld [vmem:[%s4836_s1 + $0x540] ss:$8 sps:$4 sm:$0xff]  }
  0x91   : > { %1455 = vmatpush1.bf16.msra.mxu0 %v3492_v14  ;;  %v3579_v13 = vld [vmem:[%s4836_s1 + $0x580] ss:$8 sps:$4 sm:$0xff]   ;;  %v4471_v14 = vld [vmem:[%s3911_s30 + $0x18] sm:$0xff] }
  0x92   : > { %1709 = vmatpush1.bf16.msra.mxu1 %v3495_v15  ;;  %1456 = vmatprep.subr.bf16.mxu0 %v3500_v16  ;;  %v4475_v15 = vcombine.high %v4471_v14, %v4459_v10  ;;  %v3586_v16 = vld [vmem:[%s4836_s1 + $0x674] ss:$8 sps:$4 sm:$0xff]  }
  0x93   : > { %1710 = vmatprep.subr.bf16.mxu1 %v3503_v27  ;;  %v3589_v27 = vld [vmem:[%s4836_s1 + $0x774] ss:$8 sps:$4 sm:$0xff]  }
  0x94   : > { %965 = vmatmul.mubr.bf16.gmra.mxu0 %v753_v21  ;;  %v3510_v21 = vld [vmem:[%s4836_s1 + $0x430] ss:$8 sps:$4 sm:$0xff]  }
  0x95   : > { %1226 = vmatmul.mubr.bf16.gmra.mxu1 %v1014_v24  ;;  %1457 = vmatpush1.bf16.msra.mxu0 %v3498_v30  ;;  %v3513_v24 = vld [vmem:[%s4836_s1 + $0x530] ss:$8 sps:$4 sm:$0xff]  }
  0x96   : > { %1711 = vmatpush1.bf16.msra.mxu1 %v3501_v18  ;;  %1458 = vmatprep.subr.bf16.mxu0 %v3506_v19  ;;  %v3584_v30 = vld [vmem:[%s4836_s1 + $0x670] ss:$8 sps:$4 sm:$0xff]   ;;  %v2082_v18 = vshrl.u32 %v4056_v46, 16 }
  0x97   : > { %1712 = vmatprep.subr.bf16.mxu1 %v3509_v54  ;;  %1484 = vmatprep.mubr.bf16.mxu0 %v4069_v57  ;;  %v3521_v57 = vld [vmem:[%s4836_s1 + $0x524] ss:$8 sps:$4 sm:$0xff]   ;;  %v3587_v19 = vld [vmem:[%s4836_s1 + $0x770] ss:$8 sps:$4 sm:$0xff]   ;;  %v2085_v54 = vshll.u32 %v4056_v46, 16 }
  0x98   : > { %1738 = vmatprep.mubr.bf16.mxu1 %v4056_v46 }
  0x99   : > { %1459 = vmatpush1.bf16.msra.mxu0 %v3504_v3  ;;  %v2090_v3 = vshrl.u32 %v4475_v15, 16 }
  0x9a   : > { %1713 = vmatpush1.bf16.msra.mxu1 %v3507_v5  ;;  %1460 = vmatprep.subr.bf16.mxu0 %v3512_v20  ;;  %v2093_v5 = vshll.u32 %v4475_v15, 16  ;;  %v3592_v20 = vld [vmem:[%s4836_s1 + $0x664] ss:$8 sps:$4 sm:$0xff]  }
  0x9b   : > { %1714 = vmatprep.subr.bf16.mxu1 %v3515_v56  ;;  %v3595_v56 = vld [vmem:[%s4836_s1 + $0x764] ss:$8 sps:$4 sm:$0xff]  }
  0x9d   : > { %1461 = vmatpush1.bf16.msra.mxu0 %v3510_v21  ;;  %v2979_v21 = vcombine.high %v4471_v14, %v4471_v14 }
  0x9e   : > { %1715 = vmatpush1.bf16.msra.mxu1 %v3513_v24  ;;  %1462 = vmatprep.subr.bf16.mxu0 %v3518_v22  ;;  %v2084_v24 = vrot.slane %v2082_v18, 2  ;;  %v2087_v22 = vrot.slane %v2085_v54, 3  ;;  %v3652_v18 = vld [vmem:[%s4836_s1 + $0x6c0] ss:$8 sps:$4 sm:$0xff]   ;;  %v3660_v54 = vld [vmem:[%s4836_s1 + $0x6b4] ss:$8 sps:$4 sm:$0xff]  }
  0x9f   : > { %1716 = vmatprep.subr.bf16.mxu1 %v3521_v57  ;;  %v2092_v57 = vrot.slane %v2090_v3, 2  ;;  %v3663_v3 = vld [vmem:[%s4836_s1 + $0x7b4] ss:$8 sps:$4 sm:$0xff]  }
  0xa1   : > { %1463 = vmatpush1.bf16.msra.mxu0 %v3516_v23  ;;  %v2095_v23 = vrot.slane %v2093_v5, 3  ;;  %v3658_v5 = vld [vmem:[%s4836_s1 + $0x6b0] ss:$8 sps:$4 sm:$0xff]  }
  0xa2   : > { %1717 = vmatpush1.bf16.msra.mxu1 %v3519_v25  ;;  %1464 = vmatprep.subr.bf16.mxu0 %v3524_v26  ;;  %v3590_v25 = vld [vmem:[%s4836_s1 + $0x660] ss:$8 sps:$4 sm:$0xff]  }
  0xa3   : > { %1718 = vmatprep.subr.bf16.mxu1 %v3527_v28  ;;  %v3593_v26 = vld [vmem:[%s4836_s1 + $0x760] ss:$8 sps:$4 sm:$0xff]   ;;  %v3601_v28 = vld [vmem:[%s4836_s1 + $0x754] ss:$8 sps:$4 sm:$0xff]  }
  0xa5   : > { %1465 = vmatpush1.bf16.msra.mxu0 %v3522_v29  ;;  %v2978_v29 = vcombine.low %v4471_v14, %v4471_v14 }
  0xa6   : > { %1719 = vmatpush1.bf16.msra.mxu1 %v3525_v31  ;;  %1466 = vmatprep.subr.bf16.mxu0 %v3530_v32  ;;  %v1806_v31 = vrot.slane %v4056_v46, 2  ;;  %v1807_v32 = vrot.slane %v4475_v15, 2 }
  0xa7   : > { %1720 = vmatprep.subr.bf16.mxu1 %v3533_v33  ;;  %v2088_v33 = vor.u32 %v2087_v22, %v2084_v24  ;;  %v3669_v24 = vld [vmem:[%s4836_s1 + $0x7a4] ss:$8 sps:$4 sm:$0xff]   ;;  %v2065_v22 = vshrl.u32 %v4063_v51, 16 }
  0xa9   : > { %1467 = vmatpush1.bf16.msra.mxu0 %v3528_v34  ;;  %v4520_v34 = vor.u32 %v2095_v23, %v2092_v57  ;;  %v2068_v57 = vshll.u32 %v4063_v51, 16 }
  0xaa   : > { %1721 = vmatpush1.bf16.msra.mxu1 %v3531_v35  ;;  %1468 = vmatprep.subr.bf16.mxu0 %v3536_v36  ;;  %v3596_v35 = vld [vmem:[%s4836_s1 + $0x650] ss:$8 sps:$4 sm:$0xff]   ;;  %v3606_v36 = vld [vmem:[%s4836_s1 + $0x644] ss:$8 sps:$4 sm:$0xff]  }
  0xab   : > { %1722 = vmatprep.subr.bf16.mxu1 %v3539_v37  ;;  %v3609_v37 = vld [vmem:[%s4836_s1 + $0x744] ss:$8 sps:$4 sm:$0xff]  }
  0xad   : > { %1469 = vmatpush2.bf16.msra.mxu0 %v3534_v38  ;;  %v1808_v38 = vsel %vm1802_vm4, %v1806_v31, %v1807_v32  ;;  %v3670_v31 = vld [vmem:[%s4836_s1 + $0x690] ss:$8 sps:$4 sm:$0xff]  }
  0xae   : > { %1723 = vmatpush2.bf16.msra.mxu1 %v3537_v39  ;;  %1470 = vmatprep.subr.bf16.mxu0 %v3542_v40  ;;  %v2097_v39 = vsel %vm2063_vm5, %v2088_v33, %v4520_v34  ;;  %v3604_v40 = vld [vmem:[%s4836_s1 + $0x640] ss:$8 sps:$4 sm:$0xff]   ;;  %v3673_v33 = vld [vmem:[%s4836_s1 + $0x790] ss:$8 sps:$4 sm:$0xff]  }
  0xaf   : > { %1724 = vmatprep.subr.bf16.mxu1 %v3545_v41  ;;  %v3607_v41 = vld [vmem:[%s4836_s1 + $0x740] ss:$8 sps:$4 sm:$0xff]  }
  0xb1   : > { %1471 = vmatpush2.bf16.msra.mxu0 %v3540_v42  ;;  %v3615_v42 = vld [vmem:[%s4836_s1 + $0x734] ss:$8 sps:$4 sm:$0xff]  }
  0xb2   : > { %1725 = vmatpush2.bf16.msra.mxu1 %v3543_v43  ;;  %1472 = vmatprep.subr.bf16.mxu0 %v3548_v44  ;;  %v3610_v43 = vld [vmem:[%s4836_s1 + $0x630] ss:$8 sps:$4 sm:$0xff]  }
  0xb3   : > { %1726 = vmatprep.subr.bf16.mxu1 %v3551_v47  ;;  %v3613_v44 = vld [vmem:[%s4836_s1 + $0x730] ss:$8 sps:$4 sm:$0xff]   ;;  %v3618_v47 = vld [vmem:[%s4836_s1 + $0x624] ss:$8 sps:$4 sm:$0xff]  }
  0xb5   : > { %1473 = vmatpush2.bf16.msra.mxu0 %v3546_v48  ;;  %v3621_v48 = vld [vmem:[%s4836_s1 + $0x724] ss:$8 sps:$4 sm:$0xff]  }
  0xb6   : > { %1727 = vmatpush2.bf16.msra.mxu1 %v3549_v52  ;;  %1474 = vmatprep.subr.bf16.mxu0 %v3554_v55  ;;  %v3616_v52 = vld [vmem:[%s4836_s1 + $0x620] ss:$8 sps:$4 sm:$0xff]  }
  0xb7   : > { %1728 = vmatprep.subr.bf16.mxu1 %v3557_v58  ;;  %v3619_v55 = vld [vmem:[%s4836_s1 + $0x720] ss:$8 sps:$4 sm:$0xff]   ;;  %v3624_v58 = vld [vmem:[%s4836_s1 + $0x614] ss:$8 sps:$4 sm:$0xff]  }
  0xb9   : > { %1475 = vmatpush2.bf16.msra.mxu0 %v3552_v49  ;;  %v3627_v49 = vld [vmem:[%s4836_s1 + $0x714] ss:$8 sps:$4 sm:$0xff]  }
  0xba   : > { %1729 = vmatpush2.bf16.msra.mxu1 %v3555_v60  ;;  %1476 = vmatprep.subr.bf16.mxu0 %v3560_v61  ;;  %v3622_v60 = vld [vmem:[%s4836_s1 + $0x610] ss:$8 sps:$4 sm:$0xff]  }
  0xbb   : > { %1730 = vmatprep.subr.bf16.mxu1 %v3563_v62  ;;  %v3625_v61 = vld [vmem:[%s4836_s1 + $0x710] ss:$8 sps:$4 sm:$0xff]   ;;  %v3630_v62 = vld [vmem:[%s4836_s1 + $0x604] ss:$8 sps:$4 sm:$0xff]  }
  0xbd   : > { %1477 = vmatpush2.bf16.msra.mxu0 %v3558_v63  ;;  %v3633_v63 = vld [vmem:[%s4836_s1 + $0x704] ss:$8 sps:$4 sm:$0xff]  }
  0xbe   : > { %1731 = vmatpush2.bf16.msra.mxu1 %v3561_v0  ;;  %1478 = vmatprep.subr.bf16.mxu0 %v3566_v1  ;;  %v3628_v0 = vld [vmem:[%s4836_s1 + $0x600] ss:$8 sps:$4 sm:$0xff]  }
  0xbf   : > { %1732 = vmatprep.subr.bf16.mxu1 %v3569_v2  ;;  %v3631_v1 = vld [vmem:[%s4836_s1 + $0x700] ss:$8 sps:$4 sm:$0xff]   ;;  %v3636_v2 = vld [vmem:[%s4836_s1 + $0x6f4] ss:$8 sps:$4 sm:$0xff]  }
  0xc1   : > { %1479 = vmatpush2.bf16.msra.mxu0 %v3564_v4  ;;  %v3639_v4 = vld [vmem:[%s4836_s1 + $0x7f4] ss:$8 sps:$4 sm:$0xff]  }
  0xc2   : > { %1733 = vmatpush2.bf16.msra.mxu1 %v3567_v50  ;;  %1480 = vmatprep.subr.bf16.mxu0 %v3572_v6  ;;  %v3634_v50 = vld [vmem:[%s4836_s1 + $0x6f0] ss:$8 sps:$4 sm:$0xff]  }
  0xc3   : > { %1734 = vmatprep.subr.bf16.mxu1 %v3575_v7  ;;  %v3637_v6 = vld [vmem:[%s4836_s1 + $0x7f0] ss:$8 sps:$4 sm:$0xff]   ;;  %v3642_v7 = vld [vmem:[%s4836_s1 + $0x6e4] ss:$8 sps:$4 sm:$0xff]  }
  0xc5   : > { %1481 = vmatpush2.bf16.msra.mxu0 %v3570_v53  ;;  %v3645_v53 = vld [vmem:[%s4836_s1 + $0x7e4] ss:$8 sps:$4 sm:$0xff]  }
  0xc6   : > { %1735 = vmatpush2.bf16.msra.mxu1 %v3573_v8  ;;  %1482 = vmatprep.subr.bf16.mxu0 %v3578_v9  ;;  %v3640_v8 = vld [vmem:[%s4836_s1 + $0x6e0] ss:$8 sps:$4 sm:$0xff]  }
  0xc7   : > { %1736 = vmatprep.subr.bf16.mxu1 %v3581_v11  ;;  %v3643_v9 = vld [vmem:[%s4836_s1 + $0x7e0] ss:$8 sps:$4 sm:$0xff]   ;;  %v3648_v11 = vld [vmem:[%s4836_s1 + $0x6d4] ss:$8 sps:$4 sm:$0xff]  }
  0xc9   : > { %1483 = vmatpush2.bf16.msra.mxu0 %v3576_v12  ;;  %v3651_v12 = vld [vmem:[%s4836_s1 + $0x7d4] ss:$8 sps:$4 sm:$0xff]  }
  0xca   : > { %1737 = vmatpush2.bf16.msra.mxu1 %v3579_v13  ;;  %1973 = vmatprep.subr.bf16.mxu0 %v3586_v16  ;;  %v3646_v13 = vld [vmem:[%s4836_s1 + $0x6d0] ss:$8 sps:$4 sm:$0xff]  }
  0xcb   : > { %2262 = vmatprep.subr.bf16.mxu1 %v3589_v27  ;;  %v3649_v16 = vld [vmem:[%s4836_s1 + $0x7d0] ss:$8 sps:$4 sm:$0xff]   ;;  %v3654_v27 = vld [vmem:[%s4836_s1 + $0x6c4] ss:$8 sps:$4 sm:$0xff]  }
  0xcc   : > { %1485 = vmatmul.mubr.bf16.vlgmr.msra.gmra.mxu0 %v4079_v59  ;;  %v3598_v59 = vld [vmem:[%s4836_s1 + $0x654] ss:$8 sps:$4 sm:$0xff]  }
  0xcd   : > { %1739 = vmatmul.mubr.bf16.vlgmr.msra.gmra.mxu1 %v4063_v51  ;;  %1974 = vmatpush1.bf16.msra.mxu0 %v3584_v30  ;;  %v3657_v30 = vld [vmem:[%s4836_s1 + $0x7c4] ss:$8 sps:$4 sm:$0xff]  }
  0xce   : > { %2263 = vmatpush1.bf16.msra.mxu1 %v3587_v19  ;;  %1975 = vmatprep.subr.bf16.mxu0 %v3592_v20  ;;  %v3655_v19 = vld [vmem:[%s4836_s1 + $0x7c0] ss:$8 sps:$4 sm:$0xff]   ;;  %v3661_v20 = vld [vmem:[%s4836_s1 + $0x7b0] ss:$8 sps:$4 sm:$0xff]  }
  0xcf   : > { %2264 = vmatprep.subr.bf16.mxu1 %v3595_v56  ;;  %1494 = vmatprep.mubr.bf16.mxu0 %v4052_v45  ;;  %v3599_v45 = vld [vmem:[%s4836_s1 + $0x750] ss:$8 sps:$4 sm:$0xff]   ;;  %v4656_v56 = vcombine.low %v4471_v14, %v4459_v10  ;;  %v3664_v10 = vld [vmem:[%s4836_s1 + $0x6a0] ss:$8 sps:$4 sm:$0xff]  }
  0xd0   : > { %1748 = vmatprep.mubr.bf16.mxu1 %v2979_v21  ;;  %v3666_v21 = vld [vmem:[%s4836_s1 + $0x6a4] ss:$8 sps:$4 sm:$0xff]   ;;  %v3667_v14 = vld [vmem:[%s4836_s1 + $0x7a0] ss:$8 sps:$4 sm:$0xff]  }
  0xd1   : > { %1976 = vmatpush1.bf16.msra.mxu0 %v3590_v25  ;;  %v2073_v23 = vshrl.u32 %v4656_v56, 16  ;;  %v2076_v25 = vshll.u32 %v4656_v56, 16 }
  0xd2   : > { %2265 = vmatpush1.bf16.msra.mxu1 %v3593_v26  ;;  %1977 = vmatprep.subr.bf16.mxu0 %v3598_v59  ;;  %v3672_v26 = vld [vmem:[%s4836_s1 + $0x694] ss:$8 sps:$4 sm:$0xff]  }
  0xd3   : > { %2266 = vmatprep.subr.bf16.mxu1 %v3601_v28  ;;  %v3675_v59 = vld [vmem:[%s4836_s1 + $0x794] ss:$8 sps:$4 sm:$0xff]   ;;  %v2067_v28 = vrot.slane %v2065_v22, 2  ;;  %v3702_v22 = vld [vmem:[%s4836_s1 + $0x810] ss:$8 sps:$4 sm:$0xff]  }
  0xd4   : > { %1495 = vmatmul.mubr.bf16.gmra.mxu0 %v4003_v17  ;;  %v3612_v17 = vld [vmem:[%s4836_s1 + $0x634] ss:$8 sps:$4 sm:$0xff]  }
  0xd5   : > { %1749 = vmatmul.mubr.bf16.gmra.mxu1 %v2978_v29  ;;  %1978 = vmatpush1.bf16.msra.mxu0 %v3596_v35  ;;  %v2070_v29 = vrot.slane %v2068_v57, 3  ;;  %v2075_v35 = vrot.slane %v2073_v23, 2  ;;  %v3707_v57 = vld [vmem:[%s4836_s1 + $0x804] ss:$8 sps:$4 sm:$0xff]   ;;  %v3708_v23 = vld [vmem:[%s4836_s1 + $0x8f0] ss:$8 sps:$4 sm:$0xff]  }
  0xd6   : > { %2267 = vmatpush1.bf16.msra.mxu1 %v3599_v45  ;;  %1979 = vmatprep.subr.bf16.mxu0 %v3606_v36  ;;  %v2078_v45 = vrot.slane %v2076_v25, 3  ;;  %v3678_v36 = vld [vmem:[%s4836_s1 + $0x684] ss:$8 sps:$4 sm:$0xff]  }
  0xd7   : > { %2268 = vmatprep.subr.bf16.mxu1 %v3609_v37  ;;  %2005 = vmatprep.mubr.bf16.mxu0 %v1808_v38  ;;  %v3681_v37 = vld [vmem:[%s4836_s1 + $0x784] ss:$8 sps:$4 sm:$0xff]   ;;  %v3676_v38 = vld [vmem:[%s4836_s1 + $0x680] ss:$8 sps:$4 sm:$0xff]  }
  0xd8   : > { %2294 = vmatprep.mubr.bf16.mxu1 %v2097_v39  ;;  %v3679_v39 = vld [vmem:[%s4836_s1 + $0x780] ss:$8 sps:$4 sm:$0xff]   ;;  %v3713_v25 = vld [vmem:[%s4836_s1 + $0x8e4] ss:$8 sps:$4 sm:$0xff]  }
  0xd9   : > { %1980 = vmatpush1.bf16.msra.mxu0 %v3604_v40  ;;  %v1803_v40 = vrot.slane %v4063_v51, 2 }
  0xda   : > { %2269 = vmatpush1.bf16.msra.mxu1 %v3607_v41  ;;  %1981 = vmatprep.subr.bf16.mxu0 %v3612_v17  ;;  %v1804_v41 = vrot.slane %v4656_v56, 2  ;;  %v2071_v17 = vor.u32 %v2070_v29, %v2067_v28  ;;  %v3714_v28 = vld [vmem:[%s4836_s1 + $0x8d0] ss:$8 sps:$4 sm:$0xff]   ;;  %v3719_v29 = vld [vmem:[%s4836_s1 + $0x8c4] ss:$8 sps:$4 sm:$0xff]  }
  0xdb   : > { %2270 = vmatprep.subr.bf16.mxu1 %v3615_v42  ;;  %v2079_v42 = vor.u32 %v2078_v45, %v2075_v35  ;;  %v3720_v35 = vld [vmem:[%s4836_s1 + $0x8b0] ss:$8 sps:$4 sm:$0xff]   ;;  %v3725_v45 = vld [vmem:[%s4836_s1 + $0x8a4] ss:$8 sps:$4 sm:$0xff]  }
  0xdd   : > { %1982 = vmatpush1.bf16.msra.mxu0 %v3610_v43  ;;  %v3686_v43 = vld [vmem:[%s4836_s1 + $0x874] ss:$8 sps:$4 sm:$0xff]  }
  0xde   : > { %2271 = vmatpush1.bf16.msra.mxu1 %v3613_v44  ;;  %1983 = vmatprep.subr.bf16.mxu0 %v3618_v47  ;;  %v1805_v44 = vsel %vm1802_vm4, %v1803_v40, %v1804_v41  ;;  %v2080_v47 = vsel %vm2063_vm5, %v2071_v17, %v2079_v42  ;;  %v3729_v40 = vld [vmem:[%s4836_s1 + $0x880] ss:$8 sps:$4 sm:$0xff]   ;;  %v2353_v17 = vrot.slane %v4656_v56, 3 }
  0xdf   : > { %2272 = vmatprep.subr.bf16.mxu1 %v3621_v48  ;;  %v3684_v48 = vld [vmem:[%s4836_s1 + $0x870] ss:$8 sps:$4 sm:$0xff]  }
  0xe1   : > { %1984 = vmatpush1.bf16.msra.mxu0 %v3616_v52  ;;  %v3689_v52 = vld [vmem:[%s4836_s1 + $0x864] ss:$8 sps:$4 sm:$0xff]  }
  0xe2   : > { %2273 = vmatpush1.bf16.msra.mxu1 %v3619_v55  ;;  %1985 = vmatprep.subr.bf16.mxu0 %v3624_v58 }
  0xe3   : > { %2274 = vmatprep.subr.bf16.mxu1 %v3627_v49 }
  0xe5   : > { %1986 = vmatpush1.bf16.msra.mxu0 %v3622_v60  ;;  %v3687_v60 = vld [vmem:[%s4836_s1 + $0x860] ss:$8 sps:$4 sm:$0xff]  }
  0xe6   : > { %2275 = vmatpush1.bf16.msra.mxu1 %v3625_v61  ;;  %1987 = vmatprep.subr.bf16.mxu0 %v3630_v62 }
  0xe7   : > { %2276 = vmatprep.subr.bf16.mxu1 %v3633_v63  ;;  %v3692_v63 = vld [vmem:[%s4836_s1 + $0x854] ss:$8 sps:$4 sm:$0xff]  }
  0xe9   : > { %1988 = vmatpush1.bf16.msra.mxu0 %v3628_v0 }
  0xea   : > { %2277 = vmatpush1.bf16.msra.mxu1 %v3631_v1  ;;  %1989 = vmatprep.subr.bf16.mxu0 %v3636_v2 }
  0xeb   : > { %2278 = vmatprep.subr.bf16.mxu1 %v3639_v4  ;;  %v2355_v4 = vrot.slane %v4056_v46, 3 }
  0xed   : > { %1990 = vmatpush2.bf16.msra.mxu0 %v3634_v50  ;;  %v2356_v50 = vrot.slane %v4475_v15, 3 }
  0xee   : > { %2279 = vmatpush2.bf16.msra.mxu1 %v3637_v6  ;;  %1991 = vmatprep.subr.bf16.mxu0 %v3642_v7  ;;  %v3690_v7 = vld [vmem:[%s4836_s1 + $0x850] ss:$8 sps:$4 sm:$0xff]  }
  0xef   : > { %2280 = vmatprep.subr.bf16.mxu1 %v3645_v53 }
  0xf1   : > { %1992 = vmatpush2.bf16.msra.mxu0 %v3640_v8 }
  0xf2   : > { %2281 = vmatpush2.bf16.msra.mxu1 %v3643_v9  ;;  %1993 = vmatprep.subr.bf16.mxu0 %v3648_v11  ;;  %v2357_v9 = vsel %vm1012_vm2, %v2355_v4, %v2356_v50  ;;  %v3693_v11 = vld [vmem:[%s4836_s1 + $0x840] ss:$8 sps:$4 sm:$0xff]  }
  0xf3   : > { %2282 = vmatprep.subr.bf16.mxu1 %v3651_v12 }
  0xf5   : > { %1994 = vmatpush2.bf16.msra.mxu0 %v3646_v13  ;;  %v3698_v13 = vld [vmem:[%s4836_s1 + $0x834] ss:$8 sps:$4 sm:$0xff]  }
  0xf6   : > { %2283 = vmatpush2.bf16.msra.mxu1 %v3649_v16  ;;  %1995 = vmatprep.subr.bf16.mxu0 %v3654_v27 }
  0xf7   : > { %2284 = vmatprep.subr.bf16.mxu1 %v3657_v30 }
  0xf9   : > { %1996 = vmatpush2.bf16.msra.mxu0 %v3652_v18 }
  0xfa   : > { %2285 = vmatpush2.bf16.msra.mxu1 %v3655_v19  ;;  %1997 = vmatprep.subr.bf16.mxu0 %v3660_v54  ;;  %v3696_v54 = vld [vmem:[%s4836_s1 + $0x830] ss:$8 sps:$4 sm:$0xff]  }
  0xfb   : > { %2286 = vmatprep.subr.bf16.mxu1 %v3663_v3  ;;  %v3701_v3 = vld [vmem:[%s4836_s1 + $0x824] ss:$8 sps:$4 sm:$0xff]  }
  0xfd   : > { %1998 = vmatpush2.bf16.msra.mxu0 %v3658_v5 }
  0xfe   : > { %2287 = vmatpush2.bf16.msra.mxu1 %v3661_v20  ;;  %1999 = vmatprep.subr.bf16.mxu0 %v3666_v21  ;;  %v3699_v21 = vld [vmem:[%s4836_s1 + $0x820] ss:$8 sps:$4 sm:$0xff]  }
  0xff   : > { %2288 = vmatprep.subr.bf16.mxu1 %v3669_v24  ;;  %v3704_v24 = vld [vmem:[%s4836_s1 + $0x814] ss:$8 sps:$4 sm:$0xff]  }
 0x101   : > { %2000 = vmatpush2.bf16.msra.mxu0 %v3664_v10  ;;  %v3705_v10 = vld [vmem:[%s4836_s1 + $0x800] ss:$8 sps:$4 sm:$0xff]  }
 0x102   : > { %2289 = vmatpush2.bf16.msra.mxu1 %v3667_v14  ;;  %2001 = vmatprep.subr.bf16.mxu0 %v3672_v26  ;;  %v3710_v14 = vld [vmem:[%s4836_s1 + $0x8f4] ss:$8 sps:$4 sm:$0xff]   ;;  %v3711_v26 = vld [vmem:[%s4836_s1 + $0x8e0] ss:$8 sps:$4 sm:$0xff]  }
 0x103   : > { %2290 = vmatprep.subr.bf16.mxu1 %v3675_v59  ;;  %v3716_v59 = vld [vmem:[%s4836_s1 + $0x8d4] ss:$8 sps:$4 sm:$0xff]  }
 0x105   : > { %2002 = vmatpush2.bf16.msra.mxu0 %v3670_v31  ;;  %v3717_v31 = vld [vmem:[%s4836_s1 + $0x8c0] ss:$8 sps:$4 sm:$0xff]  }
 0x106   : > { %2291 = vmatpush2.bf16.msra.mxu1 %v3673_v33  ;;  %2003 = vmatprep.subr.bf16.mxu0 %v3678_v36  ;;  %v3722_v33 = vld [vmem:[%s4836_s1 + $0x8b4] ss:$8 sps:$4 sm:$0xff]   ;;  %v3723_v36 = vld [vmem:[%s4836_s1 + $0x8a0] ss:$8 sps:$4 sm:$0xff]  }
 0x107   : > { %2292 = vmatprep.subr.bf16.mxu1 %v3681_v37  ;;  %v3728_v37 = vld [vmem:[%s4836_s1 + $0x894] ss:$8 sps:$4 sm:$0xff]  }
 0x109   : > { %2004 = vmatpush2.bf16.msra.mxu0 %v3676_v38  ;;  %v3726_v38 = vld [vmem:[%s4836_s1 + $0x890] ss:$8 sps:$4 sm:$0xff]  }
 0x10a   : > { %2293 = vmatpush2.bf16.msra.mxu1 %v3679_v39  ;;  %2522 = vmatprep.subr.bf16.mxu0 %v3686_v43  ;;  %v3731_v39 = vld [vmem:[%s4836_s1 + $0x884] ss:$8 sps:$4 sm:$0xff]  }
 0x10b   : > { %3246 = vmatprep.subr.bf16.mxu1 %v3686_v43 }
 0x10c   : > { %v486_v55 = vpop.f32.mrf.mxu0  ;;  %2006 = vmatmul.mubr.bf16.vlgmr.msra.gmra.mxu0 %v1805_v44 }
 0x10d   : > { %v697_v58 = vpop.f32.mrf.mxu1  ;;  %2295 = vmatmul.mubr.bf16.vlgmr.msra.gmra.mxu1 %v2080_v47  ;;  %2523 = vmatpush1.bf16.msra.mxu0 %v3684_v48 }
 0x10e   : > { %v4711_v49 = vadd.f32 %v697_v58, %v486_v55  ;;  %3262 = vmatpush1.bf16.msra.mxu1 %v3684_v48  ;;  %v488_v61 = vpop.f32.mrf.mxu0  ;;  %2524 = vmatprep.subr.bf16.mxu0 %v3689_v52 }
 0x10f   : > { %v699_v62 = vpop.f32.mrf.mxu1  ;;  %3247 = vmatprep.subr.bf16.mxu1 %v3689_v52  ;;  %2015 = vmatprep.mubr.bf16.mxu0 %v1807_v32  ;;  %v3695_v32 = vld [vmem:[%s4836_s1 + $0x844] ss:$8 sps:$4 sm:$0xff]  }
 0x110   : > { %v4719_v0 = vadd.f32 %v699_v62, %v488_v61  ;;  %2304 = vmatprep.mubr.bf16.mxu1 %v4520_v34  ;;  %v490_v1 = vpop.f32.mrf.mxu0 }
 0x111   : > { %v701_v2 = vpop.f32.mrf.mxu1  ;;  %2525 = vmatpush1.bf16.msra.mxu0 %v3687_v60 }
 0x112   : > { %v4726_v6 = vadd.f32 %v701_v2, %v490_v1  ;;  %3263 = vmatpush1.bf16.msra.mxu1 %v3687_v60  ;;  %v492_v53 = vpop.f32.mrf.mxu0  ;;  %2526 = vmatprep.subr.bf16.mxu0 %v3692_v63 }
 0x113   : > { %v703_v8 = vpop.f32.mrf.mxu1  ;;  %3248 = vmatprep.subr.bf16.mxu1 %v3692_v63 }
 0x114   : > { %v4734_v34 = vadd.f32 %v703_v8, %v492_v53  ;;  %2016 = vmatmul.mubr.bf16.gmra.mxu0 %v1804_v41  ;;  %v496_v46 = vpop.f32.mrf.mxu0  ;;  %v2352_v41 = vrot.slane %v4063_v51, 3 }
 0x115   : > { %2305 = vmatmul.mubr.bf16.gmra.mxu1 %v2079_v42  ;;  %v707_v15 = vpop.f32.mrf.mxu1  ;;  %2527 = vmatpush1.bf16.msra.mxu0 %v3690_v7 }
 0x116   : > { %3264 = vmatpush1.bf16.msra.mxu1 %v3690_v7  ;;  %v4740_v12 = vadd.f32 %v707_v15, %v496_v46  ;;  %2528 = vmatprep.subr.bf16.mxu0 %v3695_v32  ;;  %v498_v16 = vpop.f32.mrf.mxu0  ;;  %v2354_v42 = vsel %vm1012_vm2, %v2352_v41, %v2353_v17 }
 0x117   : > { %3249 = vmatprep.subr.bf16.mxu1 %v3695_v32  ;;  %v709_v27 = vpop.f32.mrf.mxu1  ;;  %2554 = vmatprep.mubr.bf16.mxu0 %v2357_v9 }
 0x118   : > { %v4745_v30 = vadd.f32 %v709_v27, %v498_v16  ;;  %2564 = vmatprep.mubr.bf16.mxu1 %v2356_v50  ;;  %v500_v18 = vpop.f32.mrf.mxu0 }
 0x119   : > { %v711_v19 = vpop.f32.mrf.mxu1  ;;  %2529 = vmatpush1.bf16.msra.mxu0 %v3693_v11 }
 0x11a   : > { %3265 = vmatpush1.bf16.msra.mxu1 %v3693_v11  ;;  %2530 = vmatprep.subr.bf16.mxu0 %v3698_v13  ;;  %v501_v5 = vpop.f32.mrf.mxu0 }
 0x11b   : > { %3250 = vmatprep.subr.bf16.mxu1 %v3698_v13  ;;  %v712_v20 = vpop.f32.mrf.mxu1 }
 0x11d   : > { %2531 = vmatpush1.bf16.msra.mxu0 %v3696_v54 }
 0x11e   : > { %3266 = vmatpush1.bf16.msra.mxu1 %v3696_v54  ;;  %2532 = vmatprep.subr.bf16.mxu0 %v3701_v3 }
 0x11f   : > { %3251 = vmatprep.subr.bf16.mxu1 %v3701_v3 }
 0x121   : > { %2533 = vmatpush1.bf16.msra.mxu0 %v3699_v21 }
 0x122   : > { %3267 = vmatpush1.bf16.msra.mxu1 %v3699_v21  ;;  %2534 = vmatprep.subr.bf16.mxu0 %v3704_v24 }
 0x123   : > { %3252 = vmatprep.subr.bf16.mxu1 %v3704_v24 }
 0x125   : > { %2535 = vmatpush1.bf16.msra.mxu0 %v3702_v22 }
 0x126   : > { %3268 = vmatpush1.bf16.msra.mxu1 %v3702_v22  ;;  %2536 = vmatprep.subr.bf16.mxu0 %v3707_v57 }
 0x127   : > { %3253 = vmatprep.subr.bf16.mxu1 %v3707_v57 }
 0x129   : > { %2537 = vmatpush1.bf16.msra.mxu0 %v3705_v10 }
 0x12a   : > { %3269 = vmatpush1.bf16.msra.mxu1 %v3705_v10  ;;  %2538 = vmatprep.subr.bf16.mxu0 %v3710_v14 }
 0x12b   : > { %3254 = vmatprep.subr.bf16.mxu1 %v3710_v14 }
 0x12d   : > { %2539 = vmatpush2.bf16.msra.mxu0 %v3708_v23 }
 0x12e   : > { %3270 = vmatpush2.bf16.msra.mxu1 %v3708_v23  ;;  %2540 = vmatprep.subr.bf16.mxu0 %v3713_v25 }
 0x12f   : > { %3255 = vmatprep.subr.bf16.mxu1 %v3713_v25 }
 0x131   : > { %2541 = vmatpush2.bf16.msra.mxu0 %v3711_v26 }
 0x132   : > { %3271 = vmatpush2.bf16.msra.mxu1 %v3711_v26  ;;  %2542 = vmatprep.subr.bf16.mxu0 %v3716_v59 }
 0x133   : > { %3256 = vmatprep.subr.bf16.mxu1 %v3716_v59 }
 0x135   : > { %2543 = vmatpush2.bf16.msra.mxu0 %v3714_v28 }
 0x136   : > { %3272 = vmatpush2.bf16.msra.mxu1 %v3714_v28  ;;  %2544 = vmatprep.subr.bf16.mxu0 %v3719_v29 }
 0x137   : > { %3257 = vmatprep.subr.bf16.mxu1 %v3719_v29 }
 0x139   : > { %2545 = vmatpush2.bf16.msra.mxu0 %v3717_v31 }
 0x13a   : > { %3273 = vmatpush2.bf16.msra.mxu1 %v3717_v31  ;;  %2546 = vmatprep.subr.bf16.mxu0 %v3722_v33 }
 0x13b   : > { %3258 = vmatprep.subr.bf16.mxu1 %v3722_v33 }
 0x13d   : > { %2547 = vmatpush2.bf16.msra.mxu0 %v3720_v35 }
 0x13e   : > { %3274 = vmatpush2.bf16.msra.mxu1 %v3720_v35  ;;  %2548 = vmatprep.subr.bf16.mxu0 %v3725_v45 }
 0x13f   : > { %3259 = vmatprep.subr.bf16.mxu1 %v3725_v45 }
 0x141   : > { %2549 = vmatpush2.bf16.msra.mxu0 %v3723_v36 }
 0x142   : > { %3275 = vmatpush2.bf16.msra.mxu1 %v3723_v36  ;;  %2550 = vmatprep.subr.bf16.mxu0 %v3728_v37 }
 0x143   : > { %3260 = vmatprep.subr.bf16.mxu1 %v3728_v37 }
 0x145   : > { %2551 = vmatpush2.bf16.msra.mxu0 %v3726_v38 }
 0x146   : > { %3276 = vmatpush2.bf16.msra.mxu1 %v3726_v38  ;;  %2552 = vmatprep.subr.bf16.mxu0 %v3731_v39 }
 0x147   : > { %3261 = vmatprep.subr.bf16.mxu1 %v3731_v39 }
 0x149   : > { %2553 = vmatpush2.bf16.msra.mxu0 %v3729_v40 }
 0x14a   : > { %3277 = vmatpush2.bf16.msra.mxu1 %v3729_v40 }
 0x14c   : > { %v956_v43 = vpop.f32.mrf.mxu0  ;;  %2555 = vmatmul.mubr.bf16.vlgmr.msra.gmra.mxu0 %v2354_v42 }
 0x14d   : > { %v1217_v44 = vpop.f32.mrf.mxu1  ;;  %2565 = vmatmul.mubr.bf16.vlgmr.msra.gmra.mxu1 %v2353_v17  ;;  %v973_v47 = vadd.f32 %v956_v43, %v4711_v49 }
 0x14e   : > { %v958_v48 = vpop.f32.mrf.mxu0 }
 0x14f   : > { %v1219_v52 = vpop.f32.mrf.mxu1  ;;  %v1234_v55 = vadd.f32 %v1217_v44, %v973_v47  ;;  %v974_v58 = vadd.f32 %v958_v48, %v4719_v0 }
 0x150   : > { %v960_v51 = vpop.f32.mrf.mxu0 }
 0x151   : > { %v1221_v60 = vpop.f32.mrf.mxu1  ;;  %v1235_v56 = vadd.f32 %v1219_v52, %v974_v58  ;;  %v975_v61 = vadd.f32 %v960_v51, %v4726_v6 }
 0x152   : > { %v962_v62 = vpop.f32.mrf.mxu0 }
 0x153   : > { %v1223_v63 = vpop.f32.mrf.mxu1  ;;  %v1236_v1 = vadd.f32 %v1221_v60, %v975_v61  ;;  %v976_v2 = vadd.f32 %v962_v62, %v4734_v34 }
 0x154   : > { %v966_v4 = vpop.f32.mrf.mxu0 }
 0x155   : > { %v1227_v50 = vpop.f32.mrf.mxu1  ;;  %v1237_v7 = vadd.f32 %v1223_v63, %v976_v2  ;;  %v977_v49 = vadd.f32 %v966_v4, %v4740_v12  ;;  %v2581_v63 = vlaneseq }
 0x156   : > { %v968_v53 = vpop.f32.mrf.mxu0 }
 0x157   : > { %v1229_v8 = vpop.f32.mrf.mxu1  ;;  %v978_v32 = vadd.f32 %v968_v53, %v4745_v30  ;;  %v1238_v0 = vadd.f32 %v1227_v50, %v977_v49  ;;  %v2579_v53 = vld [vmem:[%s4837_s2] sm:$0x3] }
 0x158   : > { %v970_v46 = vpop.f32.mrf.mxu0 }
 0x159   : > { %v1231_v15 = vpop.f32.mrf.mxu1  ;;  %v1239_v9 = vadd.f32 %v1229_v8, %v978_v32 }
 0x15a   : > { %v971_v11 = vpop.f32.mrf.mxu0 }
 0x15b   : > { %v1232_v6 = vpop.f32.mrf.mxu1 }
 0x18c   : > { %v1486_v13 = vpop.f32.mrf.mxu0 }
 0x18d   : > { %v1740_v16 = vpop.f32.mrf.mxu1  ;;  %v1503_v27 = vadd.f32 %v1486_v13, %v1234_v55 }
 0x18e   : > { %v1488_v18 = vpop.f32.mrf.mxu0 }
 0x18f   : > { %v1742_v34 = vpop.f32.mrf.mxu1  ;;  %v1757_v19 = vadd.f32 %v1740_v16, %v1503_v27  ;;  %v1504_v54 = vadd.f32 %v1488_v18, %v1235_v56 }
 0x190   : > { %v1490_v3 = vpop.f32.mrf.mxu0 }
 0x191   : > { %v1744_v5 = vpop.f32.mrf.mxu1  ;;  %v1758_v12 = vadd.f32 %v1742_v34, %v1504_v54  ;;  %v1505_v20 = vadd.f32 %v1490_v3, %v1236_v1  ;;  %v2582_v1 = vshrl.u32 %v2581_v63, 7 }
 0x192   : > { %v1492_v21 = vpop.f32.mrf.mxu0 }
 0x193   : > { %v1746_v24 = vpop.f32.mrf.mxu1  ;;  %v1759_v30 = vadd.f32 %v1744_v5, %v1505_v20  ;;  %v1506_v22 = vadd.f32 %v1492_v21, %v1237_v7  ;;  %v2583_v4 = vsub.s32 0, %v2582_v1  ;;  %v2587_v50 = vsub.s32 1, %v2582_v1 }
 0x194   : > { %v1496_v57 = vpop.f32.mrf.mxu0 }
 0x195   : > { %v1750_v10 = vpop.f32.mrf.mxu1  ;;  %v1760_v14 = vadd.f32 %v1746_v24, %v1506_v22  ;;  %v1507_v23 = vadd.f32 %v1496_v57, %v1238_v0  ;;  %v2584_v46 = vrot.slane %v2579_v53, %v2583_v4 }
 0x196   : > { %v1498_v25 = vpop.f32.mrf.mxu0 }
 0x197   : > { %v1752_v26 = vpop.f32.mrf.mxu1  ;;  %v1508_v59 = vadd.f32 %v1498_v25, %v1239_v9  ;;  %v1761_v28 = vadd.f32 %v1750_v10, %v1507_v23  ;;  %v2588_v9 = vrot.slane %v2579_v53, %v2587_v50 }
 0x198   : > { %v1500_v29 = vpop.f32.mrf.mxu0 }
 0x199   : > { %v1754_v31 = vpop.f32.mrf.mxu1  ;;  %v1762_v33 = vadd.f32 %v1752_v26, %v1508_v59 }
 0x19a   : > { %v1501_v35 = vpop.f32.mrf.mxu0 }
 0x19b   : > { %v1755_v45 = vpop.f32.mrf.mxu1 }
 0x1cc   : > { %v2007_v36 = vpop.f32.mrf.mxu0 }
 0x1cd   : > { %v2296_v37 = vpop.f32.mrf.mxu1  ;;  %v2024_v38 = vadd.f32 %v2007_v36, %v1757_v19 }
 0x1ce   : > { %v2009_v39 = vpop.f32.mrf.mxu0 }
 0x1cf   : > { %v2298_v40 = vpop.f32.mrf.mxu1  ;;  %v2313_v41 = vadd.f32 %v2296_v37, %v2024_v38  ;;  %v2025_v7 = vadd.f32 %v2009_v39, %v1758_v12 }
 0x1d0   : > { %v2011_v17 = vpop.f32.mrf.mxu0 }
 0x1d1   : > { %v2300_v42 = vpop.f32.mrf.mxu1  ;;  %v2026_v43 = vadd.f32 %v2011_v17, %v1759_v30  ;;  %v2314_v11 = vadd.f32 %v2298_v40, %v2025_v7 }
 0x1d2   : > { %v2013_v44 = vpop.f32.mrf.mxu0 }
 0x1d3   : > { %v2302_v47 = vpop.f32.mrf.mxu1  ;;  %v2315_v48 = vadd.f32 %v2300_v42, %v2026_v43  ;;  %v2027_v32 = vadd.f32 %v2013_v44, %v1760_v14 }
 0x1d4   : > { %v2017_v52 = vpop.f32.mrf.mxu0 }
 0x1d5   : > { %v2306_v55 = vpop.f32.mrf.mxu1  ;;  %v2028_v2 = vadd.f32 %v2017_v52, %v1761_v28  ;;  %v2316_v54 = vadd.f32 %v2302_v47, %v2027_v32 }
 0x1d6   : > { %v2019_v58 = vpop.f32.mrf.mxu0 }
 0x1d7   : > { %v2308_v51 = vpop.f32.mrf.mxu1  ;;  %v2029_v49 = vadd.f32 %v2019_v58, %v1762_v33  ;;  %v2317_v8 = vadd.f32 %v2306_v55, %v2028_v2 }
 0x1d8   : > { %v2021_v60 = vpop.f32.mrf.mxu0 }
 0x1d9   : > { %v2310_v56 = vpop.f32.mrf.mxu1  ;;  %v2318_v6 = vadd.f32 %v2308_v51, %v2029_v49 }
 0x1da   : > { %v2022_v61 = vpop.f32.mrf.mxu0 }
 0x1db   : > { %v2311_v62 = vpop.f32.mrf.mxu1 }
 0x20c   : > { %v2556_v0 = vpop.f32.mrf.mxu0 }
 0x20d   : > { %v2566_v15 = vpop.f32.mrf.mxu1  ;;  %v2573_v13 = vadd.f32 %v2556_v0, %v2313_v41 }
 0x20e   : > { %v2577_v16 = vadd.f32 %v2566_v15, %v2317_v8  ;;  %v2558_v27 = vpop.f32.mrf.mxu0 }
 0x20f   : > { %v2568_v18 = vpop.f32.mrf.mxu1  ;;  %v2574_v34 = vadd.f32 %v2558_v27, %v2314_v11  ;;  %v2591_v3 = vadd.f32 %v2584_v46, %v2573_v13 }
 0x210   : > { %v2578_v19 = vadd.f32 %v2568_v18, %v2318_v6  ;;  %v2560_v5 = vpop.f32.mrf.mxu0  ;;  %v2595_v20 = vadd.f32 %v2584_v46, %v2577_v16 }
 0x211   : > { %v2570_v12 = vpop.f32.mrf.mxu1  ;;  %v2592_v21 = vadd.f32 %v2588_v9, %v2574_v34  ;;  %v2575_v30 = vadd.f32 %v2560_v5, %v2315_v48 }
 0x212   : > { %v2596_v24 = vadd.f32 %v2588_v9, %v2578_v19  ;;  %v2562_v22 = vpop.f32.mrf.mxu0 }
 0x213   : > { %v2571_v57 = vpop.f32.mrf.mxu1  ;;  %v3243_v10 = vpack.c.bf16 %v2592_v21, %v2591_v3  ;;  %v2576_v23 = vadd.f32 %v2562_v22, %v2316_v54  ;;  %v2593_v25 = vadd.f32 %v2584_v46, %v2575_v30 }
 0x214   : > { %v3245_v14 = vpack.c.bf16 %v2596_v24, %v2595_v20 }
 0x215   : > { %2617 = vst [vmem:[%s170_s9] sm:$0xff] %v3243_v10  ;;  %v2594_v26 = vadd.f32 %v2588_v9, %v2576_v23 }
 0x216   : > { %2619 = vst [vmem:[%s170_s9 + $0x10] sm:$0xff] %v3245_v14 }
 0x217   : > { %v3244_v59 = vpack.c.bf16 %v2594_v26, %v2593_v25 }
 0x219   : > { %2618 = vst [vmem:[%s170_s9 + $0x8] sm:$0xff] %v3244_v59 }
 0x21a PF: > { %s13_s12 = sadd.s32 1, %s3739_s12  }
 0x21b   : > { %p10_p4 = scmp.ge.s32.totalorder %s13_s12, 10  }
 0x21d   :  { %12 = sbr.rel (!%p10_p4) target bundleno = 1 (0x1), region = 70 }

</bundles_post_ra>
